<compile_context>
chip_gen: v6e
topology: v6e:2x2x1
jax: 0.10.0
libtpu: 0.0.40
codegen_flags: <defaults>
</compile_context>

<pallas_src>
import numpy as np
import jax
import jax.numpy as jnp
from jax.experimental import pallas as pl
from jax.experimental.pallas import tpu as pltpu

# ---- Denoiser / STFT configuration (module defaults) ----
FILTER_LENGTH = 1024
N_OVERLAP = 4
HOP_LENGTH = FILTER_LENGTH // N_OVERLAP          # 256
WIN_LENGTH = 1024
CUTOFF = FILTER_LENGTH // 2 + 1                  # 513
CPAD = ((CUTOFF + 127) // 128) * 128             # 640: freq axis padded to lane multiple
STRENGTH = 0.1


# ------------------------------------------------------------------
# Deterministic parameter setup (equivalent of STFT.__init__) -- glue
# ------------------------------------------------------------------
def _build_stft_params():
    n = np.arange(FILTER_LENGTH)
    # periodic ("fftbins=True") Hann window, win_length == filter_length
    window = 0.5 - 0.5 * np.cos(2.0 * np.pi * n / WIN_LENGTH)
    fourier = np.fft.fft(np.eye(FILTER_LENGTH))
    fb = np.vstack([np.real(fourier[:CUTOFF]), np.imag(fourier[:CUTOFF])])   # (2C, FL)
    scale = FILTER_LENGTH / HOP_LENGTH
    forward_basis = (fb * window[None, :]).astype(np.float32)                 # (2C, FL)
    inverse_basis = (np.linalg.pinv(scale * fb).T * window[None, :]).astype(np.float32)
    return window.astype(np.float32), forward_basis, inverse_basis


def _window_sumsquare(win_sq, n_frames):
    """librosa-style window_sumsquare for the hann window (win==fft length)."""
    n = FILTER_LENGTH + HOP_LENGTH * (n_frames - 1)
    x = np.zeros(n, dtype=np.float32)
    for i in range(n_frames):
        s = i * HOP_LENGTH
        x[s:min(n, s + FILTER_LENGTH)] += win_sq[:max(0, min(FILTER_LENGTH, n - s))]
    return x


def _stft_bias_spec(bias_audio, forward_basis):
    """magnitude of frame 0 of the bias audio's STFT -> (C,) (init-time setup)."""
    pad = FILTER_LENGTH // 2
    x = np.pad(bias_audio, ((0, 0), (pad, pad)), mode="reflect")
    frame0 = x[0, :FILTER_LENGTH]
    re = frame0 @ forward_basis[:CUTOFF].T
    im = frame0 @ forward_basis[CUTOFF:].T
    return np.sqrt(re * re + im * im).astype(np.float32)


# ------------------------------------------------------------------
# Pallas kernel: frame -> STFT -> denoise -> inverse STFT -> overlap-add
# ------------------------------------------------------------------
def _denoiser_kernel(seg_ref, fwd_ref, bias_ref, inv_ref, win_ref, out_ref):
    bblk, S, hop = seg_ref.shape
    T = S - (N_OVERLAP - 1)

    # In-VMEM frame construction: frame t = [seg[t], seg[t+1], seg[t+2], seg[t+3]]
    # (lane-axis concat of sublane-shifted views; avoids 4x-expanded HBM gather).
    parts = []
    for bi in range(bblk):
        seg_b = seg_ref[bi]                                                  # (S, hop) f32
        parts.append(jnp.concatenate(
            [seg_b[j:j + T, :] for j in range(N_OVERLAP)], axis=-1))         # (T, FL)
    frames = parts[0] if bblk == 1 else jnp.concatenate(parts, axis=0)       # (bblk*T, FL)

    # Forward STFT: single fused bf16 MXU matmul against [real | imag] basis.
    spec = jnp.dot(frames.astype(jnp.bfloat16), fwd_ref[...],
                   preferred_element_type=jnp.float32)                       # (rows, 2*CPAD)
    cp = spec.shape[-1] // 2
    re = spec[:, :cp]
    im = spec[:, cp:]
    mag = jnp.sqrt(re * re + im * im)

    # Denoise: clamp(mag - bias_spec*strength, 0); rescale (re, im) by mag_d / mag
    # (== mag_d * cos/sin(atan2(im, re))).  EUP approx reciprocal is ~free.
    mag_d = jnp.maximum(mag - bias_ref[...], 0.0)                            # bias pre-scaled
    pos = mag > 0.0
    ratio = jnp.where(pos,
                      mag_d * pl.reciprocal(jnp.where(pos, mag, 1.0), approx=True),
                      0.0)
    ri = spec * jnp.concatenate([ratio, ratio], axis=-1)                     # (rows, 2*CPAD)

    # Inverse STFT: single fused bf16 matmul against stacked [real ; imag] inverse basis.
    fs = jnp.dot(ri.astype(jnp.bfloat16), inv_ref[...],
                 preferred_element_type=jnp.float32)                         # (rows, FL)

    # Overlap-add as sublane-shifted adds into the output block, then
    # window-sumsquare normalization (scale + tiny-guard folded into win_ref).
    win = win_ref[...]                                                       # (S, hop)
    for bi in range(bblk):
        fs_b = fs[bi * T:(bi + 1) * T, :]                                    # (T, FL)
        out_ref[bi] = jnp.zeros((S, hop), jnp.float32)
        for j in range(N_OVERLAP):
            cur = out_ref[bi, j:j + T, :]
            out_ref[bi, j:j + T, :] = cur + fs_b[:, j * hop:(j + 1) * hop]
        out_ref[bi] = out_ref[bi] * win


# ------------------------------------------------------------------
# Wrapper (glue: reflect pad, hop-segmenting, batch blocking, trim)
# ------------------------------------------------------------------
def denoise(audio, forward_basis, inverse_basis, bias_spec, window, strength=STRENGTH):
    B, L = audio.shape
    pad = FILTER_LENGTH // 2
    x = jnp.pad(audio.astype(jnp.float32), ((0, 0), (pad, pad)), mode="reflect")
    T = (L + 2 * pad - FILTER_LENGTH) // HOP_LENGTH + 1
    S = T + N_OVERLAP - 1

    # Hop-sized segments (the frames themselves are rebuilt inside the kernel).
    seg = x[:, :S * HOP_LENGTH].reshape(B, S, HOP_LENGTH)                    # (B, S, HOP)

    # Batch blocking: pack rows toward ~256 for the MXU, but keep grid length >= 2
    # so both v7x TensorCores get work.
    bblk = max(1, min(B, 256 // max(T, 1)))
    if B >= 2:
        bblk = min(bblk, (B + 1) // 2)
    grid_len = -(-B // bblk)
    Bp = grid_len * bblk
    if Bp != B:
        seg = jnp.concatenate(
            [seg, jnp.zeros((Bp - B, S, HOP_LENGTH), jnp.float32)], axis=0)

    # Host-side fused / lane-padded bases (bf16 halves VMEM + DMA for the constants).
    fwd_all = np.zeros((FILTER_LENGTH, 2 * CPAD), np.float32)
    fwd_all[:, :CUTOFF] = forward_basis[:CUTOFF].T
    fwd_all[:, CPAD:CPAD + CUTOFF] = forward_basis[CUTOFF:].T
    inv_all = np.zeros((2 * CPAD, FILTER_LENGTH), np.float32)
    inv_all[:CUTOFF] = inverse_basis[:CUTOFF]
    inv_all[CPAD:CPAD + CUTOFF] = inverse_basis[CUTOFF:]
    bias = np.zeros((1, CPAD), np.float32)                                   # padded lanes stay 0
    bias[0, :CUTOFF] = bias_spec * strength

    ws = _window_sumsquare((window.astype(np.float64) ** 2).astype(np.float32), T)
    tiny = np.finfo(np.float32).tiny
    scale = float(FILTER_LENGTH) / HOP_LENGTH
    inv_win = np.where(ws > tiny, scale / ws, scale).astype(np.float32).reshape(S, HOP_LENGTH)

    fwd_all = jnp.asarray(fwd_all, dtype=jnp.bfloat16)
    inv_all = jnp.asarray(inv_all, dtype=jnp.bfloat16)
    bias = jnp.asarray(bias)
    inv_win = jnp.asarray(inv_win)

    # Computed VMEM budget: single-buffered constants + double-buffered blocks + headroom.
    const_bytes = (FILTER_LENGTH * 2 * CPAD) * 2 + (2 * CPAD * FILTER_LENGTH) * 2 \
                  + CPAD * 4 + S * HOP_LENGTH * 4
    block_bytes = 2 * 2 * bblk * S * HOP_LENGTH * 4
    vmem_limit = int(min(64 * 1024 * 1024, const_bytes + block_bytes + 16 * 1024 * 1024))

    const = dict(pipeline_mode=pl.Buffered(1))   # grid-invariant operands: single buffer

    out_segs = pl.pallas_call(
        _denoiser_kernel,
        out_shape=jax.ShapeDtypeStruct((Bp, S, HOP_LENGTH), jnp.float32),
        grid_spec=pltpu.PrefetchScalarGridSpec(
            num_scalar_prefetch=0,
            grid=(grid_len,),
            in_specs=[
                pl.BlockSpec((bblk, S, HOP_LENGTH), lambda b: (b, 0, 0)),
                pl.BlockSpec((FILTER_LENGTH, 2 * CPAD), lambda b: (0, 0), **const),
                pl.BlockSpec((1, CPAD), lambda b: (0, 0), **const),
                pl.BlockSpec((2 * CPAD, FILTER_LENGTH), lambda b: (0, 0), **const),
                pl.BlockSpec((S, HOP_LENGTH), lambda b: (0, 0), **const),
            ],
            out_specs=pl.BlockSpec((bblk, S, HOP_LENGTH), lambda b: (b, 0, 0)),
        ),
        compiler_params=pltpu.CompilerParams(
            dimension_semantics=("parallel",),
            vmem_limit_bytes=vmem_limit,
        ),
    )(seg, fwd_all, bias, inv_all, inv_win)

    # TODO(synk): for long audio, add a second grid axis over frame tiles with a
    # 3-frame overlap-add halo instead of loading all T frames per batch element.

    flat = out_segs[:B].reshape(B, S * HOP_LENGTH)
    trimmed = flat[:, 2 * HOP_LENGTH: S * HOP_LENGTH - 2 * HOP_LENGTH]       # (B, L)
    return trimmed[:, None, :]                                               # (B, 1, L) like torch


# ------------------------------------------------------------------
# Pure numpy reference (mirrors the PyTorch Denoiser.forward semantics)
# ------------------------------------------------------------------
def _reference_denoise(audio, forward_basis, inverse_basis, bias_spec, window, strength):
    B, L = audio.shape
    pad = FILTER_LENGTH // 2
    x = np.pad(audio.astype(np.float32), ((0, 0), (pad, pad)), mode="reflect")
    T = (L + 2 * pad - FILTER_LENGTH) // HOP_LENGTH + 1
    idx = np.arange(T)[:, None] * HOP_LENGTH + np.arange(FILTER_LENGTH)[None, :]
    frames = x[:, idx]
    re = frames @ forward_basis[:CUTOFF].T
    im = frames @ forward_basis[CUTOFF:].T
    mag = np.sqrt(re * re + im * im)
    phase = np.arctan2(im, re)
    mag_d = np.maximum(mag - bias_spec[None, None, :] * strength, 0.0)
    rr = mag_d * np.cos(phase)
    ii = mag_d * np.sin(phase)
    fs = rr @ inverse_basis[:CUTOFF] + ii @ inverse_basis[CUTOFF:]
    n = FILTER_LENGTH + HOP_LENGTH * (T - 1)
    out = np.zeros((B, n), dtype=np.float32)
    for t in range(T):
        out[:, t * HOP_LENGTH:t * HOP_LENGTH + FILTER_LENGTH] += fs[:, t]
    ws = _window_sumsquare((window.astype(np.float64) ** 2).astype(np.float32), T)
    tiny = np.finfo(np.float32).tiny
    nz = ws > tiny
    out[:, nz] /= ws[nz]
    out *= float(FILTER_LENGTH) / HOP_LENGTH
    out = out[:, FILTER_LENGTH // 2: -(FILTER_LENGTH // 2)]
    return out[:, None, :]


if __name__ == "__main__":
    window, forward_basis, inverse_basis = _build_stft_params()

    key = jax.random.PRNGKey(0)
    k_audio, k_bias = jax.random.split(key)
    B, L = 2, 2048
    audio = 0.1 * jax.random.normal(k_audio, (B, L), dtype=jnp.float32)

    # TODO(synk): the real module runs a pretrained HiFi-GAN vocoder on zero mels to get
    # the bias waveform; here we substitute a deterministic synthetic bias waveform.
    bias_audio = np.asarray(0.01 * jax.random.normal(k_bias, (1, FILTER_LENGTH), dtype=jnp.float32))
    bias_spec = _stft_bias_spec(bias_audio, forward_basis)                   # (513,)

    out = denoise(audio, forward_basis, inverse_basis, bias_spec, window, strength=STRENGTH)
    out = jax.block_until_ready(out)

    ref = _reference_denoise(np.asarray(audio), forward_basis, inverse_basis,
                             bias_spec, window, STRENGTH)
    assert out.shape == (B, 1, L), out.shape
    assert np.all(np.isfinite(np.asarray(out)))
    np.testing.assert_allclose(np.asarray(out), ref, rtol=2e-2, atol=1e-2)
    print("KERNEL_OK")
</pallas_src>

<mosaic_0001>
module attributes {stable_mosaic.version = 11 : i64} {
  func.func @_denoiser_kernel(%arg0: i32, %arg1: memref<1x12x256xf32, #tpu.memory_space<vmem>>, %arg2: memref<1024x1280xbf16, #tpu.memory_space<vmem>>, %arg3: memref<1x640xf32, #tpu.memory_space<vmem>>, %arg4: memref<1280x1024xbf16, #tpu.memory_space<vmem>>, %arg5: memref<12x256xf32, #tpu.memory_space<vmem>>, %arg6: memref<1x12x256xf32, #tpu.memory_space<vmem>>) attributes {dimension_semantics = [#tpu.dimension_semantics<parallel>], iteration_bounds = array<i64: 2>, scalar_prefetch = 0 : i64, scratch_operands = 0 : i64, tpu.core_type = #tpu.core_type<tc>, window_params = [{transform_indices = @transform_0, window_bounds = array<i64: 1, 12, 256>}, {pipeline_mode = #tpu.pipeline_mode<synchronous>, transform_indices = @transform_1, window_bounds = array<i64: 1024, 1280>}, {pipeline_mode = #tpu.pipeline_mode<synchronous>, transform_indices = @transform_2, window_bounds = array<i64: 1, 640>}, {pipeline_mode = #tpu.pipeline_mode<synchronous>, transform_indices = @transform_3, window_bounds = array<i64: 1280, 1024>}, {pipeline_mode = #tpu.pipeline_mode<synchronous>, transform_indices = @transform_4, window_bounds = array<i64: 12, 256>}, {transform_indices = @transform_5, window_bounds = array<i64: 1, 12, 256>}]} {
    %c0 = arith.constant 0 : index
    %c0_0 = arith.constant 0 : index
    %c0_1 = arith.constant 0 : index
    %0 = vector.load %arg1[%c0, %c0_0, %c0_1] : memref<1x12x256xf32, #tpu.memory_space<vmem>>, vector<1x12x256xf32>
    %1 = vector.shape_cast %0 : vector<1x12x256xf32> to vector<12x256xf32>
    %2 = vector.extract_strided_slice %1 {offsets = [0, 0], sizes = [9, 256], strides = [1, 1]} : vector<12x256xf32> to vector<9x256xf32>
    %3 = vector.extract_strided_slice %1 {offsets = [1, 0], sizes = [9, 256], strides = [1, 1]} : vector<12x256xf32> to vector<9x256xf32>
    %4 = vector.extract_strided_slice %1 {offsets = [2, 0], sizes = [9, 256], strides = [1, 1]} : vector<12x256xf32> to vector<9x256xf32>
    %5 = vector.extract_strided_slice %1 {offsets = [3, 0], sizes = [9, 256], strides = [1, 1]} : vector<12x256xf32> to vector<9x256xf32>
    %6 = tpu.concatenate %2, %3, %4, %5 in 1 : vector<9x256xf32>, vector<9x256xf32>, vector<9x256xf32>, vector<9x256xf32> -> vector<9x1024xf32>
    %7 = arith.truncf %6 : vector<9x1024xf32> to vector<9x1024xbf16>
    %c0_2 = arith.constant 0 : index
    %c0_3 = arith.constant 0 : index
    %8 = vector.load %arg2[%c0_2, %c0_3] : memref<1024x1280xbf16, #tpu.memory_space<vmem>>, vector<1024x1280xbf16>
    %cst = arith.constant dense<0.000000e+00> : vector<9x1280xf32>
    %9 = tpu.matmul %7, %8, %cst {dimension_numbers = #tpu.dot_dimension_numbers<[1], [0], [0], [1], [0, 0, 1, 1], [], []>} : vector<9x1024xbf16>, vector<1024x1280xbf16>, vector<9x1280xf32> -> vector<9x1280xf32>
    %10 = vector.extract_strided_slice %9 {offsets = [0, 0], sizes = [9, 640], strides = [1, 1]} : vector<9x1280xf32> to vector<9x640xf32>
    %11 = vector.extract_strided_slice %9 {offsets = [0, 640], sizes = [9, 640], strides = [1, 1]} : vector<9x1280xf32> to vector<9x640xf32>
    %12 = arith.mulf %10, %10 : vector<9x640xf32>
    %13 = arith.mulf %11, %11 : vector<9x640xf32>
    %14 = arith.addf %12, %13 : vector<9x640xf32>
    %15 = math.sqrt %14 : vector<9x640xf32>
    %c0_4 = arith.constant 0 : index
    %c0_5 = arith.constant 0 : index
    %16 = vector.load %arg3[%c0_4, %c0_5] : memref<1x640xf32, #tpu.memory_space<vmem>>, vector<1x640xf32>
    %17 = vector.broadcast %16 : vector<1x640xf32> to vector<9x640xf32>
    %18 = arith.subf %15, %17 : vector<9x640xf32>
    %cst_6 = arith.constant 0.000000e+00 : f32
    %19 = vector.broadcast %cst_6 : f32 to vector<9x640xf32>
    %20 = arith.maximumf %18, %19 : vector<9x640xf32>
    %cst_7 = arith.constant 0.000000e+00 : f32
    %21 = vector.broadcast %cst_7 : f32 to vector<9x640xf32>
    %22 = arith.cmpf ogt, %15, %21 : vector<9x640xf32>
    %cst_8 = arith.constant 1.000000e+00 : f32
    %23 = vector.broadcast %cst_8 : f32 to vector<9x640xf32>
    %24 = arith.select %22, %15, %23 : vector<9x640xi1>, vector<9x640xf32>
    %25 = tpu.reciprocal %24 {approx = true} : vector<9x640xf32> -> vector<9x640xf32>
    %26 = arith.mulf %20, %25 : vector<9x640xf32>
    %cst_9 = arith.constant 0.000000e+00 : f32
    %27 = vector.broadcast %cst_9 : f32 to vector<9x640xf32>
    %28 = arith.select %22, %26, %27 : vector<9x640xi1>, vector<9x640xf32>
    %29 = tpu.concatenate %28, %28 in 1 : vector<9x640xf32>, vector<9x640xf32> -> vector<9x1280xf32>
    %30 = arith.mulf %9, %29 : vector<9x1280xf32>
    %31 = arith.truncf %30 : vector<9x1280xf32> to vector<9x1280xbf16>
    %c0_10 = arith.constant 0 : index
    %c0_11 = arith.constant 0 : index
    %32 = vector.load %arg4[%c0_10, %c0_11] : memref<1280x1024xbf16, #tpu.memory_space<vmem>>, vector<1280x1024xbf16>
    %cst_12 = arith.constant dense<0.000000e+00> : vector<9x1024xf32>
    %33 = tpu.matmul %31, %32, %cst_12 {dimension_numbers = #tpu.dot_dimension_numbers<[1], [0], [0], [1], [0, 0, 1, 1], [], []>} : vector<9x1280xbf16>, vector<1280x1024xbf16>, vector<9x1024xf32> -> vector<9x1024xf32>
    %c0_13 = arith.constant 0 : index
    %c0_14 = arith.constant 0 : index
    %34 = vector.load %arg5[%c0_13, %c0_14] : memref<12x256xf32, #tpu.memory_space<vmem>>, vector<12x256xf32>
    %cst_15 = arith.constant 0.000000e+00 : f32
    %35 = vector.broadcast %cst_15 : f32 to vector<12x256xf32>
    %c0_16 = arith.constant 0 : index
    %c0_17 = arith.constant 0 : index
    %c0_18 = arith.constant 0 : index
    %36 = vector.load %arg6[%c0_16, %c0_17, %c0_18] : memref<1x12x256xf32, #tpu.memory_space<vmem>>, vector<1x12x256xf32>
    %37 = vector.shape_cast %36 : vector<1x12x256xf32> to vector<12x256xf32>
    %38 = vector.shape_cast %35 : vector<12x256xf32> to vector<1x12x256xf32>
    tpu.vector_store %arg6[%c0_16, %c0_17, %c0_18], %38 {strides = array<i32>} : memref<1x12x256xf32, #tpu.memory_space<vmem>>, vector<1x12x256xf32>,
    %c0_19 = arith.constant 0 : index
    %c0_20 = arith.constant 0 : index
    %c0_21 = arith.constant 0 : index
    %39 = vector.load %arg6[%c0_19, %c0_20, %c0_21] : memref<1x12x256xf32, #tpu.memory_space<vmem>>, vector<1x9x256xf32>
    %40 = vector.shape_cast %39 : vector<1x9x256xf32> to vector<9x256xf32>
    %41 = vector.extract_strided_slice %33 {offsets = [0, 0], sizes = [9, 256], strides = [1, 1]} : vector<9x1024xf32> to vector<9x256xf32>
    %42 = arith.addf %40, %41 : vector<9x256xf32>
    %c0_22 = arith.constant 0 : index
    %c0_23 = arith.constant 0 : index
    %c0_24 = arith.constant 0 : index
    %43 = vector.load %arg6[%c0_22, %c0_23, %c0_24] : memref<1x12x256xf32, #tpu.memory_space<vmem>>, vector<1x9x256xf32>
    %44 = vector.shape_cast %43 : vector<1x9x256xf32> to vector<9x256xf32>
    %45 = vector.shape_cast %42 : vector<9x256xf32> to vector<1x9x256xf32>
    tpu.vector_store %arg6[%c0_22, %c0_23, %c0_24], %45 {strides = array<i32>} : memref<1x12x256xf32, #tpu.memory_space<vmem>>, vector<1x9x256xf32>,
    %c0_25 = arith.constant 0 : index
    %c1 = arith.constant 1 : index
    %c0_26 = arith.constant 0 : index
    %46 = vector.load %arg6[%c0_25, %c1, %c0_26] : memref<1x12x256xf32, #tpu.memory_space<vmem>>, vector<1x9x256xf32>
    %47 = vector.shape_cast %46 : vector<1x9x256xf32> to vector<9x256xf32>
    %48 = vector.extract_strided_slice %33 {offsets = [0, 256], sizes = [9, 256], strides = [1, 1]} : vector<9x1024xf32> to vector<9x256xf32>
    %49 = arith.addf %47, %48 : vector<9x256xf32>
    %c0_27 = arith.constant 0 : index
    %c1_28 = arith.constant 1 : index
    %c0_29 = arith.constant 0 : index
    %50 = vector.load %arg6[%c0_27, %c1_28, %c0_29] : memref<1x12x256xf32, #tpu.memory_space<vmem>>, vector<1x9x256xf32>
    %51 = vector.shape_cast %50 : vector<1x9x256xf32> to vector<9x256xf32>
    %52 = vector.shape_cast %49 : vector<9x256xf32> to vector<1x9x256xf32>
    tpu.vector_store %arg6[%c0_27, %c1_28, %c0_29], %52 {strides = array<i32>} : memref<1x12x256xf32, #tpu.memory_space<vmem>>, vector<1x9x256xf32>,
    %c0_30 = arith.constant 0 : index
    %c2 = arith.constant 2 : index
    %c0_31 = arith.constant 0 : index
    %53 = vector.load %arg6[%c0_30, %c2, %c0_31] : memref<1x12x256xf32, #tpu.memory_space<vmem>>, vector<1x9x256xf32>
    %54 = vector.shape_cast %53 : vector<1x9x256xf32> to vector<9x256xf32>
    %55 = vector.extract_strided_slice %33 {offsets = [0, 512], sizes = [9, 256], strides = [1, 1]} : vector<9x1024xf32> to vector<9x256xf32>
    %56 = arith.addf %54, %55 : vector<9x256xf32>
    %c0_32 = arith.constant 0 : index
    %c2_33 = arith.constant 2 : index
    %c0_34 = arith.constant 0 : index
    %57 = vector.load %arg6[%c0_32, %c2_33, %c0_34] : memref<1x12x256xf32, #tpu.memory_space<vmem>>, vector<1x9x256xf32>
    %58 = vector.shape_cast %57 : vector<1x9x256xf32> to vector<9x256xf32>
    %59 = vector.shape_cast %56 : vector<9x256xf32> to vector<1x9x256xf32>
    tpu.vector_store %arg6[%c0_32, %c2_33, %c0_34], %59 {strides = array<i32>} : memref<1x12x256xf32, #tpu.memory_space<vmem>>, vector<1x9x256xf32>,
    %c0_35 = arith.constant 0 : index
    %c3 = arith.constant 3 : index
    %c0_36 = arith.constant 0 : index
    %60 = vector.load %arg6[%c0_35, %c3, %c0_36] : memref<1x12x256xf32, #tpu.memory_space<vmem>>, vector<1x9x256xf32>
    %61 = vector.shape_cast %60 : vector<1x9x256xf32> to vector<9x256xf32>
    %62 = vector.extract_strided_slice %33 {offsets = [0, 768], sizes = [9, 256], strides = [1, 1]} : vector<9x1024xf32> to vector<9x256xf32>
    %63 = arith.addf %61, %62 : vector<9x256xf32>
    %c0_37 = arith.constant 0 : index
    %c3_38 = arith.constant 3 : index
    %c0_39 = arith.constant 0 : index
    %64 = vector.load %arg6[%c0_37, %c3_38, %c0_39] : memref<1x12x256xf32, #tpu.memory_space<vmem>>, vector<1x9x256xf32>
    %65 = vector.shape_cast %64 : vector<1x9x256xf32> to vector<9x256xf32>
    %66 = vector.shape_cast %63 : vector<9x256xf32> to vector<1x9x256xf32>
    tpu.vector_store %arg6[%c0_37, %c3_38, %c0_39], %66 {strides = array<i32>} : memref<1x12x256xf32, #tpu.memory_space<vmem>>, vector<1x9x256xf32>,
    %c0_40 = arith.constant 0 : index
    %c0_41 = arith.constant 0 : index
    %c0_42 = arith.constant 0 : index
    %67 = vector.load %arg6[%c0_40, %c0_41, %c0_42] : memref<1x12x256xf32, #tpu.memory_space<vmem>>, vector<1x12x256xf32>
    %68 = vector.shape_cast %67 : vector<1x12x256xf32> to vector<12x256xf32>
    %69 = arith.mulf %68, %34 : vector<12x256xf32>
    %c0_43 = arith.constant 0 : index
    %c0_44 = arith.constant 0 : index
    %c0_45 = arith.constant 0 : index
    %70 = vector.load %arg6[%c0_43, %c0_44, %c0_45] : memref<1x12x256xf32, #tpu.memory_space<vmem>>, vector<1x12x256xf32>
    %71 = vector.shape_cast %70 : vector<1x12x256xf32> to vector<12x256xf32>
    %72 = vector.shape_cast %69 : vector<12x256xf32> to vector<1x12x256xf32>
    tpu.vector_store %arg6[%c0_43, %c0_44, %c0_45], %72 {strides = array<i32>} : memref<1x12x256xf32, #tpu.memory_space<vmem>>, vector<1x12x256xf32>,
    return
  }
  func.func @transform_0(%arg0: i32) -> (i32, i32, i32) {
    %c0_i32 = arith.constant 0 : i32
    %c0_i32_0 = arith.constant 0 : i32
    %c0_i32_1 = arith.constant 0 : i32
    return %arg0, %c0_i32, %c0_i32_0 : i32, i32, i32
  }
  func.func @transform_1(%arg0: i32) -> (i32, i32) {
    %c0_i32 = arith.constant 0 : i32
    %c0_i32_0 = arith.constant 0 : i32
    %c0_i32_1 = arith.constant 0 : i32
    return %c0_i32, %c0_i32_0 : i32, i32
  }
  func.func @transform_2(%arg0: i32) -> (i32, i32) {
    %c0_i32 = arith.constant 0 : i32
    %c0_i32_0 = arith.constant 0 : i32
    %c0_i32_1 = arith.constant 0 : i32
    return %c0_i32, %c0_i32_0 : i32, i32
  }
  func.func @transform_3(%arg0: i32) -> (i32, i32) {
    %c0_i32 = arith.constant 0 : i32
    %c0_i32_0 = arith.constant 0 : i32
    %c0_i32_1 = arith.constant 0 : i32
    return %c0_i32, %c0_i32_0 : i32, i32
  }
  func.func @transform_4(%arg0: i32) -> (i32, i32) {
    %c0_i32 = arith.constant 0 : i32
    %c0_i32_0 = arith.constant 0 : i32
    %c0_i32_1 = arith.constant 0 : i32
    return %c0_i32, %c0_i32_0 : i32, i32
  }
  func.func @transform_5(%arg0: i32) -> (i32, i32, i32) {
    %c0_i32 = arith.constant 0 : i32
    %c0_i32_0 = arith.constant 0 : i32
    %c0_i32_1 = arith.constant 0 : i32
    return %arg0, %c0_i32, %c0_i32_0 : i32, i32, i32
  }
}

</mosaic_0001>

<bundles_post_ra>
// kernel: tpu_custom_call.1
= control target key start
LH: loop header
LB: loop body
LE: loop exit
PB: predicated region body
PF: predicated region fallthrough
CT: control target
= control target key end

     0   :  { %10 = vsyncpa [#allocation3], 0  ;;  %s13354_s0 = inlined_call_operand.vmem [shape: f32[2,12,256], index: 0, kind: input, shape index: {}]   ;;  %s13355_s1 = inlined_call_operand.hbm [shape: bf16[1024,1280], index: 1, kind: input, shape index: {}]   ;;  %s13356_s2 = inlined_call_operand.hbm [shape: f32[1,640], index: 2, kind: input, shape index: {}]   ;;  %s13357_s3 = inlined_call_operand.hbm [shape: bf16[1280,1024], index: 3, kind: input, shape index: {}]   ;;  %s13358_s4 = inlined_call_operand.hbm [shape: f32[12,256], index: 4, kind: input, shape index: {}]   ;;  %s13359_s5 = inlined_call_operand.vmem [shape: f32[2,12,256], index: 5, kind: output, shape index: {}]  }
   0x1   :  { %11 = vsyncpa [#allocation5], 0 }
   0x2   :  { %12 = vsyncpa [#allocation8], 0  ;;  %s12689_s18 = smov 0  }
   0x3 LB: > { %s12648_s19 = smov [#allocation4]   ;;  %s12695_s21 = sadd.s32 4294967295, %s12646_s18   ;;  %s12646_s18 = sphi %s12689_s18, %s18_s18  }
   0x4   : > { %s185_s20 = sshll.u32 %s12648_s19, 4  ;;  %p10169_p0 = scmp.ge.s32.totalorder %s12646_s18, 1  ;;  %s186_s20 = int_to_ptr.vmem [resolvable:$true] %s185_s20 }
   0x5   : > { %p159_p1 = scmp.lt.s32.totalorder %s12646_s18, 3  ;;  %p11497_p2 = scmp.eq.s32.totalorder %s12695_s21, 0 }
   0x6   : > { %s12649_s23 = smov [#allocation2]   ;;  %s12650_s26 = smov [#allocation6]  }
   0x7   : > { %p12700_p3 = pnand %p10169_p0, %p159_p1  ;;  %s171_s24 = sshll.u32 %s12649_s23, 4  ;;  %s12706_s24 = int_to_ptr.vmem [resolvable:$true] %s171_s24 }
   0x8   : > { %s195_s27 = sshll.u32 %s12650_s26, 4  ;;  %s12535_s28 = scalar_lea.vmem %s186_s20, 80  ;;  %s12714_s27 = int_to_ptr.vmem [resolvable:$true] %s195_s27 }
   0x9   : > { %p11484_p4 = pneg %p12700_p3  ;;  %p12536_p7 = scmp.ne.s32.totalorder %s186_s20, %s12535_s28 }
   0xa   : > { %s12542_s29 = scalar_lea.vmem %s186_s20, 96  ;;  %p12543_p10 = scmp.lt.s32.totalorder %s186_s20, %s186_s20 }
   0xb   : > { %p12710_p5 = pnand %p11497_p2, %p11484_p4  ;;  %p12544_p11 = scmp.lt.s32.totalorder %s12542_s29, %s12535_s28 }
   0xd   : > { %p12526_p6 = pneg %p12710_p5  ;;  %p12545_p12 = por %p12544_p11, %p12543_p10 }
   0xf   : > { %p12538_p8 = pnand %p12536_p7, %p12526_p6 }
  0x11   : > { %p12539_p9 = pneg %p12538_p8 }
  0x13   : > { %p12546_p13 = pnand %p12545_p12, %p12539_p9 }
  0x15   : > { %12549 = shalt.err (!%p12546_p13)
}
  0x16   : > { %11490 = dma.hbm_to_vmem [thread:$0]  (!%p12710_p5), %s13356_s2, 80, %s186_s20, [#allocation5]  }
  0x17   : > { %s12561_s7 = scalar_lea.vmem %s12706_s24, 81920  ;;  %p12569_p7 = scmp.lt.s32.totalorder %s12706_s24, %s12706_s24 }
  0x18   : > { %p12562_p0 = scmp.ne.s32.totalorder %s12706_s24, %s12561_s7  ;;  %p12570_p8 = scmp.lt.s32.totalorder %s12561_s7, %s12561_s7 }
  0x1a   : > { %p12564_p1 = pnand %p12562_p0, %p12526_p6  ;;  %p12571_p9 = por %p12570_p8, %p12569_p7 }
  0x1c   : > { %p12565_p4 = pneg %p12564_p1 }
  0x1e   : > { %p12572_p10 = pnand %p12571_p9, %p12565_p4 }
  0x20   : > { %12575 = shalt.err (!%p12572_p10)
}
  0x21   : > { %s12651_s8 = smov 640   ;;  %s12652_s9 = smov 40  }
  0x22   : > { %11487 = dma.hbm_to_vmem [thread:$0]  (!%p12710_p5), %s13355_s1, 81920, %s12706_s24, [#allocation3], %s12651_s8, %s12651_s8, %s12652_s9  }
  0x23   : > { %s12587_s12 = scalar_lea.vmem %s12714_s27, 81920  ;;  %p12595_p0 = scmp.lt.s32.totalorder %s12714_s27, %s12714_s27 }
  0x24   : > { %p12588_p11 = scmp.ne.s32.totalorder %s12714_s27, %s12587_s12  ;;  %p12596_p1 = scmp.lt.s32.totalorder %s12587_s12, %s12587_s12 }
  0x26   : > { %p12590_p12 = pnand %p12588_p11, %p12526_p6  ;;  %p12597_p4 = por %p12596_p1, %p12595_p0 }
  0x28   : > { %p12591_p13 = pneg %p12590_p12 }
  0x2a   : > { %p12598_p7 = pnand %p12597_p4, %p12591_p13 }
  0x2c   : > { %12601 = shalt.err (!%p12598_p7)
}
  0x2d   : > { %s12653_s13 = smov 512   ;;  %s12654_s14 = smov 32  }
  0x2e   : > { %11493 = dma.hbm_to_vmem [thread:$0]  (!%p12710_p5), %s13357_s3, 81920, %s12714_s27, [#allocation5], %s12653_s13, %s12653_s13, %s12654_s14  }
  0x2f   : > { %s12655_s17 = smov [#allocation7]  }
  0x30   : > { %s208_s19 = sshll.u32 %s12655_s17, 4  ;;  %s209_s19 = int_to_ptr.vmem [resolvable:$true] %s208_s19 }
  0x31   : > { %s12613_s20 = scalar_lea.vmem %s209_s19, 512  ;;  %p12621_p11 = scmp.lt.s32.totalorder %s209_s19, %s209_s19 }
  0x32   : > { %p12614_p8 = scmp.ne.s32.totalorder %s209_s19, %s12613_s20  ;;  %p12622_p12 = scmp.lt.s32.totalorder %s12613_s20, %s12613_s20 }
  0x34   : > { %p12616_p9 = pnand %p12614_p8, %p12526_p6  ;;  %p12623_p13 = por %p12622_p12, %p12621_p11 }
  0x36   : > { %p12617_p10 = pneg %p12616_p9 }
  0x38   : > { %p12624_p0 = pnand %p12623_p13, %p12617_p10 }
  0x3a   : > { %12627 = shalt.err (!%p12624_p0)
}
  0x3b   : > { %s12656_s23 = smov 256   ;;  %s12657_s24 = smov 16  }
  0x3c   : > { %11496 = dma.hbm_to_vmem [thread:$0]  (!%p12710_p5), %s13358_s4, 512, %s209_s19, [#allocation8], %s12656_s23, %s12656_s23, %s12657_s24  }
  0x3d   : > { %232 = sbr.rel (%p12700_p3) target bundleno = 1752 (0x6d8), region = 40 }
  0x42   : > { %12633 = dma.done.wait (%p11497_p2), [#allocation3], 81920  }
  0x43   : > { %12635 = vsyncadd (%p11497_p2), [#allocation3], 4294885376 }
  0x44   : > { %12637 = dma.done.wait (%p11497_p2), [#allocation5], 82000  }
  0x45   : > { %12639 = vsyncadd (%p11497_p2), [#allocation5], 4294885296 }
  0x46   : > { %12641 = dma.done.wait (%p11497_p2), [#allocation8], 512  }
  0x47   : > { %12643 = vsyncadd (%p11497_p2), [#allocation8], 4294966784  ;;  %v11524_v0 = vld [vmem:[#allocation2 + $0x234] ss:$40 sps:$4 sm:$0xff]   ;;  %v11528_v2 = vld [vmem:[#allocation2 + $0x230] ss:$40 sps:$4 sm:$0xff]  }
  0x48   : > { %v11526_v1 = vld [vmem:[#allocation2 + $0x734] ss:$40 sps:$4 sm:$0xff]   ;;  %4171 = vmatprep.subr.bf16.mxu0 %v11524_v0  ;;  %v11529_v3 = vld [vmem:[#allocation2 + $0x730] ss:$40 sps:$4 sm:$0xff]   ;;  %v11530_v4 = vld [vmem:[#allocation2 + $0x1e4] ss:$40 sps:$4 sm:$0xff]  }
  0x49   : > { %4214 = vmatprep.subr.bf16.mxu1 %v11526_v1  ;;  %4172 = vmatpush1.bf16.msra.mxu0 %v11528_v2  ;;  %v11532_v5 = vld [vmem:[#allocation2 + $0x6e4] ss:$40 sps:$4 sm:$0xff]   ;;  %v11534_v6 = vld [vmem:[#allocation2 + $0x1e0] ss:$40 sps:$4 sm:$0xff]   ;;  %v11536_v8 = vld [vmem:[#allocation2 + $0x194] ss:$40 sps:$4 sm:$0xff]  }
  0x4a   : > { %4215 = vmatpush1.bf16.msra.mxu1 %v11529_v3  ;;  %4173 = vmatprep.subr.bf16.mxu0 %v11530_v4  ;;  %v11535_v7 = vld [vmem:[#allocation2 + $0x6e0] ss:$40 sps:$4 sm:$0xff]   ;;  %v11538_v9 = vld [vmem:[#allocation2 + $0x694] ss:$40 sps:$4 sm:$0xff]   ;;  %v11540_v10 = vld [vmem:[#allocation2 + $0x190] ss:$40 sps:$4 sm:$0xff]  }
  0x4b   : > { %4216 = vmatprep.subr.bf16.mxu1 %v11532_v5  ;;  %v11541_v11 = vld [vmem:[#allocation2 + $0x690] ss:$40 sps:$4 sm:$0xff]   ;;  %v11542_v12 = vld [vmem:[#allocation2 + $0x144] ss:$40 sps:$4 sm:$0xff]   ;;  %v11546_v14 = vld [vmem:[#allocation2 + $0x140] ss:$40 sps:$4 sm:$0xff]  }
  0x4c   : > { %v11544_v13 = vld [vmem:[#allocation2 + $0x644] ss:$40 sps:$4 sm:$0xff]   ;;  %v11547_v15 = vld [vmem:[#allocation2 + $0x640] ss:$40 sps:$4 sm:$0xff]   ;;  %v11548_v16 = vld [vmem:[#allocation2 + $0xf4] ss:$40 sps:$4 sm:$0xff]  }
  0x4d   : > { %4174 = vmatpush1.bf16.msra.mxu0 %v11534_v6  ;;  %v11550_v17 = vld [vmem:[#allocation2 + $0x5f4] ss:$40 sps:$4 sm:$0xff]   ;;  %v11552_v18 = vld [vmem:[#allocation2 + $0xf0] ss:$40 sps:$4 sm:$0xff]   ;;  %v11554_v20 = vld [vmem:[#allocation2 + $0xa4] ss:$40 sps:$4 sm:$0xff]  }
  0x4e   : > { %4217 = vmatpush1.bf16.msra.mxu1 %v11535_v7  ;;  %4175 = vmatprep.subr.bf16.mxu0 %v11536_v8  ;;  %v11553_v19 = vld [vmem:[#allocation2 + $0x5f0] ss:$40 sps:$4 sm:$0xff]   ;;  %v11556_v21 = vld [vmem:[#allocation2 + $0x5a4] ss:$40 sps:$4 sm:$0xff]   ;;  %v11558_v22 = vld [vmem:[#allocation2 + $0xa0] ss:$40 sps:$4 sm:$0xff]  }
  0x4f   : > { %4218 = vmatprep.subr.bf16.mxu1 %v11538_v9  ;;  %v11559_v23 = vld [vmem:[#allocation2 + $0x5a0] ss:$40 sps:$4 sm:$0xff]   ;;  %v11560_v24 = vld [vmem:[#allocation2 + $0x54] ss:$40 sps:$4 sm:$0xff]   ;;  %v11564_v26 = vld [vmem:[#allocation2 + $0x50] ss:$40 sps:$4 sm:$0xff]  }
  0x50   : > { %v11562_v25 = vld [vmem:[#allocation2 + $0x554] ss:$40 sps:$4 sm:$0xff]   ;;  %v11565_v27 = vld [vmem:[#allocation2 + $0x550] ss:$40 sps:$4 sm:$0xff]   ;;  %v11566_v28 = vld [vmem:[#allocation2 + $0x4] ss:$40 sps:$4 sm:$0xff]  }
  0x51   : > { %4176 = vmatpush1.bf16.msra.mxu0 %v11540_v10  ;;  %v11568_v29 = vld [vmem:[#allocation2 + $0x504] ss:$40 sps:$4 sm:$0xff]   ;;  %v11570_v30 = vld [vmem:[#allocation2] ss:$40 sps:$4 sm:$0xff]   ;;  %v11572_v32 = vld [vmem:[#allocation2 + $0x4b4] ss:$40 sps:$4 sm:$0xff]  }
  0x52   : > { %4219 = vmatpush1.bf16.msra.mxu1 %v11541_v11  ;;  %4177 = vmatprep.subr.bf16.mxu0 %v11542_v12  ;;  %v11571_v31 = vld [vmem:[#allocation2 + $0x500] ss:$40 sps:$4 sm:$0xff]   ;;  %p272_p2 = scmp.lt.s32.totalorder %s12695_s21, 1  ;;  %v11574_v33 = vld [vmem:[#allocation2 + $0x9b4] ss:$40 sps:$4 sm:$0xff]   ;;  %vm290_vm0 = vcmask 1046528  }
  0x53   : > { %4220 = vmatprep.subr.bf16.mxu1 %v11544_v13  ;;  %v11576_v34 = vld [vmem:[#allocation2 + $0x4b0] ss:$40 sps:$4 sm:$0xff]   ;;  %v11578_v36 = vld [vmem:[#allocation2 + $0x464] ss:$40 sps:$4 sm:$0xff]   ;;  %v11582_v38 = vld [vmem:[#allocation2 + $0x460] ss:$40 sps:$4 sm:$0xff]  }
  0x54   : > { %v11577_v35 = vld [vmem:[#allocation2 + $0x9b0] ss:$40 sps:$4 sm:$0xff]   ;;  %s13363_s21 = smov (!%p272_p2, %s12695_s21), 1  ;;  %v11580_v37 = vld [vmem:[#allocation2 + $0x964] ss:$40 sps:$4 sm:$0xff]   ;;  %vm301_vm1 = vcmask 1045504  }
  0x55   : > { %4178 = vmatpush1.bf16.msra.mxu0 %v11546_v14  ;;  %v11583_v39 = vld [vmem:[#allocation2 + $0x960] ss:$40 sps:$4 sm:$0xff]   ;;  %v11584_v40 = vld [vmem:[#allocation2 + $0x414] ss:$40 sps:$4 sm:$0xff]   ;;  %s11466_s22 = sshll.u32 %s13363_s21, 5  ;;  %vm312_vm2 = vcmask 1044480  }
  0x56   : > { %4221 = vmatpush1.bf16.msra.mxu1 %v11547_v15  ;;  %4179 = vmatprep.subr.bf16.mxu0 %v11548_v16  ;;  %v11586_v41 = vld [vmem:[#allocation2 + $0x914] ss:$40 sps:$4 sm:$0xff]   ;;  %v11588_v42 = vld [vmem:[#allocation2 + $0x410] ss:$40 sps:$4 sm:$0xff]   ;;  %s12784_s29 = scalar_lea.vmem %s13354_s0, %s11466_s22  ;;  %v11590_v44 = vld [vmem:[#allocation2 + $0x3c4] ss:$40 sps:$4 sm:$0xff]   ;;  %s13267_s7 = scalar_lea.vmem %s13359_s5, %s11466_s22 }
  0x57   : > { %4222 = vmatprep.subr.bf16.mxu1 %v11550_v17  ;;  %v11589_v43 = vld [vmem:[#allocation2 + $0x910] ss:$40 sps:$4 sm:$0xff]   ;;  %v11592_v45 = vld [vmem:[#allocation2 + $0x8c4] ss:$40 sps:$4 sm:$0xff]   ;;  %v11594_v46 = vld [vmem:[#allocation2 + $0x3c0] ss:$40 sps:$4 sm:$0xff]  }
  0x58   : > { %v12787_v47 = vld [vmem:[%s12784_s29 + $0x8] sm:$0xff]  ;;  %v12790_v49 = vld [vmem:[%s12784_s29 + $0x18] sm:$0xf]  ;;  %v11596_v51 = vld [vmem:[#allocation2 + $0x374] ss:$40 sps:$4 sm:$0xff]  }
  0x59   : > { %4180 = vmatpush1.bf16.msra.mxu0 %v11552_v18  ;;  %v11595_v48 = vld [vmem:[#allocation2 + $0x8c0] ss:$40 sps:$4 sm:$0xff]   ;;  %v294_v50 = vrot.slane %v12787_v47, 1  ;;  %v12795_v52 = vpack.c.bf16 %v12790_v49, %v12787_v47  ;;  %v295_v53 = vrot.slane %v12790_v49, 1  ;;  %v11598_v54 = vld [vmem:[#allocation2 + $0x874] ss:$40 sps:$4 sm:$0xff]  }
  0x5a   : > { %4223 = vmatpush1.bf16.msra.mxu1 %v11553_v19  ;;  %4181 = vmatprep.subr.bf16.mxu0 %v11554_v20  ;;  %v11600_v55 = vld [vmem:[#allocation2 + $0x370] ss:$40 sps:$4 sm:$0xff]   ;;  %v11602_v58 = vld [vmem:[#allocation2 + $0x324] ss:$40 sps:$4 sm:$0xff]   ;;  %v11606_v3 = vld [vmem:[#allocation2 + $0x320] ss:$40 sps:$4 sm:$0xff]  }
  0x5b   : > { %4224 = vmatprep.subr.bf16.mxu1 %v11556_v21  ;;  %v11601_v56 = vld [vmem:[#allocation2 + $0x870] ss:$40 sps:$4 sm:$0xff]   ;;  %4203 = vmatprep.mubr.bf16.mxu0 %v12795_v52  ;;  %v296_v57 = vsel %vm290_vm0, %v294_v50, %v295_v53  ;;  %v282_v60 = vld [vmem:[%s12784_s29] sm:$0xff]  ;;  %v11608_v6 = vld [vmem:[#allocation2 + $0x2d4] ss:$40 sps:$4 sm:$0xff]   ;;  %v305_v19 = vrot.slane %v12787_v47, 2 }
  0x5c   : > { %v12800_v59 = vpack.c.bf16 %v295_v53, %v296_v57  ;;  %v284_v61 = vld [vmem:[%s12784_s29 + $0x10] sm:$0xf]  ;;  %v302_v62 = vrot.slane %v282_v60, 2  ;;  %v11604_v63 = vld [vmem:[#allocation2 + $0x824] ss:$40 sps:$4 sm:$0xff]   ;;  %v313_v1 = vrot.slane %v282_v60, 3 }
  0x5d   : > { %4182 = vmatpush1.bf16.msra.mxu0 %v11558_v22  ;;  %v303_v0 = vrot.slane %v284_v61, 2  ;;  %v314_v2 = vrot.slane %v284_v61, 3  ;;  %v11607_v4 = vld [vmem:[#allocation2 + $0x820] ss:$40 sps:$4 sm:$0xff]   ;;  %v11610_v9 = vld [vmem:[#allocation2 + $0x7d4] ss:$40 sps:$4 sm:$0xff]  }
  0x5e   : > { %4225 = vmatpush1.bf16.msra.mxu1 %v11559_v23  ;;  %4183 = vmatprep.subr.bf16.mxu0 %v11560_v24  ;;  %v11612_v11 = vld [vmem:[#allocation2 + $0x2d0] ss:$40 sps:$4 sm:$0xff]   ;;  %v11614_v13 = vld [vmem:[#allocation2 + $0x284] ss:$40 sps:$4 sm:$0xff]   ;;  %v291_v14 = vrot.slane %v282_v60, 1  ;;  %v292_v15 = vrot.slane %v284_v61, 1 }
  0x5f   : > { %4226 = vmatprep.subr.bf16.mxu1 %v11562_v25  ;;  %4246 = vmatprep.mubr.bf16.mxu1 %v12800_v59  ;;  %v304_v5 = vsel %vm301_vm1, %v302_v62, %v303_v0  ;;  %v315_v8 = vsel %vm312_vm2, %v313_v1, %v314_v2  ;;  %v11613_v12 = vld [vmem:[#allocation2 + $0x7d0] ss:$40 sps:$4 sm:$0xff]   ;;  %v11616_v16 = vld [vmem:[#allocation2 + $0x784] ss:$40 sps:$4 sm:$0xff]   ;;  %v11618_v17 = vld [vmem:[#allocation2 + $0x280] ss:$40 sps:$4 sm:$0xff]  }
  0x60   : > { %v12806_v7 = vpack.c.bf16 %v303_v0, %v304_v5  ;;  %v12809_v10 = vpack.c.bf16 %v314_v2, %v315_v8  ;;  %v11619_v18 = vld [vmem:[#allocation2 + $0x780] ss:$40 sps:$4 sm:$0xff]   ;;  %v306_v20 = vrot.slane %v12790_v49, 2  ;;  %v316_v21 = vrot.slane %v12787_v47, 3  ;;  %v11622_v24 = vld [vmem:[#allocation2 + $0xc34] ss:$40 sps:$4 sm:$0xff]  }
  0x61   : > { %4184 = vmatpush1.bf16.msra.mxu0 %v11564_v26  ;;  %v317_v22 = vrot.slane %v12790_v49, 3  ;;  %v293_v23 = vsel %vm290_vm0, %v291_v14, %v292_v15  ;;  %v11625_v25 = vld [vmem:[#allocation2 + $0x1134] ss:$40 sps:$4 sm:$0xff]   ;;  %v12816_v26 = vpack.c.bf16 %v284_v61, %v282_v60  ;;  %v11647_v49 = vld [vmem:[#allocation2 + $0xff0] ss:$40 sps:$4 sm:$0xff]  }
  0x62   : > { %4227 = vmatpush1.bf16.msra.mxu1 %v11565_v27  ;;  %4185 = vmatprep.subr.bf16.mxu0 %v11566_v28  ;;  %v12818_v27 = vpack.c.bf16 %v292_v15, %v293_v23  ;;  %v11620_v28 = vld [vmem:[#allocation2 + $0xc30] ss:$40 sps:$4 sm:$0xff]   ;;  %v11649_v47 = vld [vmem:[#allocation2 + $0xff4] ss:$40 sps:$4 sm:$0xff]   ;;  %v11652_v50 = vld [vmem:[#allocation2 + $0xaa4] ss:$40 sps:$4 sm:$0xff]  }
  0x63   : > { %4228 = vmatprep.subr.bf16.mxu1 %v11568_v29  ;;  %v11623_v29 = vld [vmem:[#allocation2 + $0x1130] ss:$40 sps:$4 sm:$0xff]   ;;  %v11650_v53 = vld [vmem:[#allocation2 + $0xaa0] ss:$40 sps:$4 sm:$0xff]   ;;  %v11664_v60 = vld [vmem:[#allocation2 + $0xa04] ss:$40 sps:$4 sm:$0xff]  }
  0x64   : > { %v11656_v57 = vld [vmem:[#allocation2 + $0xa50] ss:$40 sps:$4 sm:$0xff]   ;;  %v11667_v61 = vld [vmem:[#allocation2 + $0xf04] ss:$40 sps:$4 sm:$0xff]   ;;  %v11662_v62 = vld [vmem:[#allocation2 + $0xa00] ss:$40 sps:$4 sm:$0xff]  }
  0x65   : > { %4186 = vmatpush1.bf16.msra.mxu0 %v11570_v30  ;;  %v307_v30 = vsel %vm301_vm1, %v305_v19, %v306_v20  ;;  %v11670_v0 = vld [vmem:[#allocation2 + $0xeb4] ss:$40 sps:$4 sm:$0xff]   ;;  %v11668_v2 = vld [vmem:[#allocation2 + $0xeb0] ss:$40 sps:$4 sm:$0xff]   ;;  %v11679_v5 = vld [vmem:[#allocation2 + $0x1364] ss:$40 sps:$4 sm:$0xff]  }
  0x66   : > { %4229 = vmatpush1.bf16.msra.mxu1 %v11571_v31  ;;  %4187 = vmatprep.subr.bf16.mxu0 %v11572_v32  ;;  %v318_v31 = vsel %vm312_vm2, %v316_v21, %v317_v22  ;;  %v11628_v32 = vld [vmem:[#allocation2 + $0xbe4] ss:$40 sps:$4 sm:$0xff]   ;;  %v11673_v1 = vld [vmem:[#allocation2 + $0x13b4] ss:$40 sps:$4 sm:$0xff]   ;;  %v11677_v8 = vld [vmem:[#allocation2 + $0x1360] ss:$40 sps:$4 sm:$0xff]  }
  0x67   : > { %4230 = vmatprep.subr.bf16.mxu1 %v11574_v33  ;;  %v11631_v33 = vld [vmem:[#allocation2 + $0x10e4] ss:$40 sps:$4 sm:$0xff]   ;;  %v11697_v19 = vld [vmem:[#allocation2 + $0x1274] ss:$40 sps:$4 sm:$0xff]   ;;  %v11695_v21 = vld [vmem:[#allocation2 + $0x1270] ss:$40 sps:$4 sm:$0xff]  }
  0x68   : > { %v11688_v14 = vld [vmem:[#allocation2 + $0xdc4] ss:$40 sps:$4 sm:$0xff]  }
  0x69   : > { %4188 = vmatpush2.bf16.msra.mxu0 %v11576_v34  ;;  %v12822_v34 = vpack.c.bf16 %v306_v20, %v307_v30  ;;  %v11691_v15 = vld [vmem:[#allocation2 + $0x12c4] ss:$40 sps:$4 sm:$0xff]   ;;  %v11692_v20 = vld [vmem:[#allocation2 + $0xd70] ss:$40 sps:$4 sm:$0xff]  }
  0x6a   : > { %4231 = vmatpush2.bf16.msra.mxu1 %v11577_v35  ;;  %4189 = vmatprep.subr.bf16.mxu0 %v11578_v36  ;;  %v12824_v35 = vpack.c.bf16 %v317_v22, %v318_v31  ;;  %v11626_v36 = vld [vmem:[#allocation2 + $0xbe0] ss:$40 sps:$4 sm:$0xff]   ;;  %v11700_v22 = vld [vmem:[#allocation2 + $0xd24] ss:$40 sps:$4 sm:$0xff]   ;;  %v11704_v30 = vld [vmem:[#allocation2 + $0xcd0] ss:$40 sps:$4 sm:$0xff]  }
  0x6b   : > { %4232 = vmatprep.subr.bf16.mxu1 %v11580_v37  ;;  %v11629_v37 = vld [vmem:[#allocation2 + $0x10e0] ss:$40 sps:$4 sm:$0xff]   ;;  %v11703_v23 = vld [vmem:[#allocation2 + $0x1224] ss:$40 sps:$4 sm:$0xff]   ;;  %v11707_v31 = vld [vmem:[#allocation2 + $0x11d0] ss:$40 sps:$4 sm:$0xff]  }
  0x6d   : > { %4190 = vmatpush2.bf16.msra.mxu0 %v11582_v38  ;;  %v11634_v38 = vld [vmem:[#allocation2 + $0xb94] ss:$40 sps:$4 sm:$0xff]  }
  0x6e   : > { %4233 = vmatpush2.bf16.msra.mxu1 %v11583_v39  ;;  %4191 = vmatprep.subr.bf16.mxu0 %v11584_v40  ;;  %v11637_v39 = vld [vmem:[#allocation2 + $0x1094] ss:$40 sps:$4 sm:$0xff]   ;;  %v11632_v40 = vld [vmem:[#allocation2 + $0xb90] ss:$40 sps:$4 sm:$0xff]  }
  0x6f   : > { %4234 = vmatprep.subr.bf16.mxu1 %v11586_v41  ;;  %v11635_v41 = vld [vmem:[#allocation2 + $0x1090] ss:$40 sps:$4 sm:$0xff]  }
  0x71   : > { %4192 = vmatpush2.bf16.msra.mxu0 %v11588_v42  ;;  %v11640_v42 = vld [vmem:[#allocation2 + $0xb44] ss:$40 sps:$4 sm:$0xff]  }
  0x72   : > { %4235 = vmatpush2.bf16.msra.mxu1 %v11589_v43  ;;  %4193 = vmatprep.subr.bf16.mxu0 %v11590_v44  ;;  %v11643_v43 = vld [vmem:[#allocation2 + $0x1044] ss:$40 sps:$4 sm:$0xff]   ;;  %v11638_v44 = vld [vmem:[#allocation2 + $0xb40] ss:$40 sps:$4 sm:$0xff]  }
  0x73   : > { %4236 = vmatprep.subr.bf16.mxu1 %v11592_v45  ;;  %v11641_v45 = vld [vmem:[#allocation2 + $0x1040] ss:$40 sps:$4 sm:$0xff]  }
  0x75   : > { %4194 = vmatpush2.bf16.msra.mxu0 %v11594_v46  ;;  %v11646_v46 = vld [vmem:[#allocation2 + $0xaf4] ss:$40 sps:$4 sm:$0xff]  }
  0x76   : > { %4237 = vmatpush2.bf16.msra.mxu1 %v11595_v48  ;;  %4195 = vmatprep.subr.bf16.mxu0 %v11596_v51  ;;  %v11644_v48 = vld [vmem:[#allocation2 + $0xaf0] ss:$40 sps:$4 sm:$0xff]   ;;  %v11655_v51 = vld [vmem:[#allocation2 + $0xfa4] ss:$40 sps:$4 sm:$0xff]  }
  0x77   : > { %4238 = vmatprep.subr.bf16.mxu1 %v11598_v54  ;;  %v11653_v54 = vld [vmem:[#allocation2 + $0xfa0] ss:$40 sps:$4 sm:$0xff]  }
  0x79   : > { %4196 = vmatpush2.bf16.msra.mxu0 %v11600_v55  ;;  %v11658_v55 = vld [vmem:[#allocation2 + $0xa54] ss:$40 sps:$4 sm:$0xff]  }
  0x7a   : > { %4239 = vmatpush2.bf16.msra.mxu1 %v11601_v56  ;;  %4197 = vmatprep.subr.bf16.mxu0 %v11602_v58  ;;  %v11661_v56 = vld [vmem:[#allocation2 + $0xf54] ss:$40 sps:$4 sm:$0xff]   ;;  %v11659_v58 = vld [vmem:[#allocation2 + $0xf50] ss:$40 sps:$4 sm:$0xff]  }
  0x7b   : > { %4240 = vmatprep.subr.bf16.mxu1 %v11604_v63  ;;  %v11665_v63 = vld [vmem:[#allocation2 + $0xf00] ss:$40 sps:$4 sm:$0xff]  }
  0x7d   : > { %4198 = vmatpush2.bf16.msra.mxu0 %v11606_v3  ;;  %v11671_v3 = vld [vmem:[#allocation2 + $0x13b0] ss:$40 sps:$4 sm:$0xff]  }
  0x7e   : > { %4241 = vmatpush2.bf16.msra.mxu1 %v11607_v4  ;;  %4199 = vmatprep.subr.bf16.mxu0 %v11608_v6  ;;  %v11676_v4 = vld [vmem:[#allocation2 + $0xe64] ss:$40 sps:$4 sm:$0xff]   ;;  %v11674_v6 = vld [vmem:[#allocation2 + $0xe60] ss:$40 sps:$4 sm:$0xff]  }
  0x7f   : > { %4242 = vmatprep.subr.bf16.mxu1 %v11610_v9  ;;  %v11682_v9 = vld [vmem:[#allocation2 + $0xe14] ss:$40 sps:$4 sm:$0xff]  }
  0x81   : > { %4200 = vmatpush2.bf16.msra.mxu0 %v11612_v11  ;;  %v11685_v11 = vld [vmem:[#allocation2 + $0x1314] ss:$40 sps:$4 sm:$0xff]  }
  0x82   : > { %4243 = vmatpush2.bf16.msra.mxu1 %v11613_v12  ;;  %4201 = vmatprep.subr.bf16.mxu0 %v11614_v13  ;;  %v11680_v12 = vld [vmem:[#allocation2 + $0xe10] ss:$40 sps:$4 sm:$0xff]  }
  0x83   : > { %4244 = vmatprep.subr.bf16.mxu1 %v11616_v16  ;;  %v11683_v13 = vld [vmem:[#allocation2 + $0x1310] ss:$40 sps:$4 sm:$0xff]   ;;  %v11686_v16 = vld [vmem:[#allocation2 + $0xdc0] ss:$40 sps:$4 sm:$0xff]  }
  0x85   : > { %4202 = vmatpush2.bf16.msra.mxu0 %v11618_v17  ;;  %v11689_v17 = vld [vmem:[#allocation2 + $0x12c0] ss:$40 sps:$4 sm:$0xff]  }
  0x86   : > { %4245 = vmatpush2.bf16.msra.mxu1 %v11619_v18  ;;  %4257 = vmatprep.subr.bf16.mxu0 %v11622_v24  ;;  %v11694_v18 = vld [vmem:[#allocation2 + $0xd74] ss:$40 sps:$4 sm:$0xff]   ;;  %v11698_v24 = vld [vmem:[#allocation2 + $0xd20] ss:$40 sps:$4 sm:$0xff]  }
  0x87   : > { %4300 = vmatprep.subr.bf16.mxu1 %v11625_v25  ;;  %v11701_v25 = vld [vmem:[#allocation2 + $0x1220] ss:$40 sps:$4 sm:$0xff]  }
  0x88   : > { %4204 = vmatmul.mubr.bf16.vlgmr.msra.gmra.mxu0 %v12816_v26 }
  0x89   : > { %4247 = vmatmul.mubr.bf16.vlgmr.msra.gmra.mxu1 %v12818_v27  ;;  %4258 = vmatpush1.bf16.msra.mxu0 %v11620_v28  ;;  %v11706_v28 = vld [vmem:[#allocation2 + $0xcd4] ss:$40 sps:$4 sm:$0xff]  }
  0x8a   : > { %4301 = vmatpush1.bf16.msra.mxu1 %v11623_v29  ;;  %4259 = vmatprep.subr.bf16.mxu0 %v11628_v32  ;;  %v11709_v29 = vld [vmem:[#allocation2 + $0x11d4] ss:$40 sps:$4 sm:$0xff]   ;;  %v11712_v32 = vld [vmem:[#allocation2 + $0xc84] ss:$40 sps:$4 sm:$0xff]  }
  0x8b   : > { %4302 = vmatprep.subr.bf16.mxu1 %v11631_v33  ;;  %4289 = vmatprep.mubr.bf16.mxu0 %v12822_v34  ;;  %v11715_v33 = vld [vmem:[#allocation2 + $0x1184] ss:$40 sps:$4 sm:$0xff]  }
  0x8c   : > { %4332 = vmatprep.mubr.bf16.mxu1 %v12824_v35 }
  0x8d   : > { %4260 = vmatpush1.bf16.msra.mxu0 %v11626_v36  ;;  %v11710_v36 = vld [vmem:[#allocation2 + $0xc80] ss:$40 sps:$4 sm:$0xff]  }
  0x8e   : > { %4303 = vmatpush1.bf16.msra.mxu1 %v11629_v37  ;;  %4261 = vmatprep.subr.bf16.mxu0 %v11634_v38  ;;  %v11713_v37 = vld [vmem:[#allocation2 + $0x1180] ss:$40 sps:$4 sm:$0xff]   ;;  %v11718_v38 = vld [vmem:[#allocation2 + $0x23c] ss:$40 sps:$4 sm:$0xff]  }
  0x8f   : > { %4304 = vmatprep.subr.bf16.mxu1 %v11637_v39  ;;  %v11721_v39 = vld [vmem:[#allocation2 + $0x73c] ss:$40 sps:$4 sm:$0xff]  }
  0x91   : > { %4262 = vmatpush1.bf16.msra.mxu0 %v11632_v40  ;;  %v11716_v40 = vld [vmem:[#allocation2 + $0x238] ss:$40 sps:$4 sm:$0xff]  }
  0x92   : > { %4305 = vmatpush1.bf16.msra.mxu1 %v11635_v41  ;;  %4263 = vmatprep.subr.bf16.mxu0 %v11640_v42  ;;  %v11719_v41 = vld [vmem:[#allocation2 + $0x738] ss:$40 sps:$4 sm:$0xff]   ;;  %v11724_v42 = vld [vmem:[#allocation2 + $0x1ec] ss:$40 sps:$4 sm:$0xff]  }
  0x93   : > { %4306 = vmatprep.subr.bf16.mxu1 %v11643_v43  ;;  %v11727_v43 = vld [vmem:[#allocation2 + $0x6ec] ss:$40 sps:$4 sm:$0xff]  }
  0x95   : > { %4264 = vmatpush1.bf16.msra.mxu0 %v11638_v44  ;;  %v11722_v44 = vld [vmem:[#allocation2 + $0x1e8] ss:$40 sps:$4 sm:$0xff]  }
  0x96   : > { %4307 = vmatpush1.bf16.msra.mxu1 %v11641_v45  ;;  %4265 = vmatprep.subr.bf16.mxu0 %v11646_v46  ;;  %v11725_v45 = vld [vmem:[#allocation2 + $0x6e8] ss:$40 sps:$4 sm:$0xff]   ;;  %v11730_v46 = vld [vmem:[#allocation2 + $0x19c] ss:$40 sps:$4 sm:$0xff]  }
  0x97   : > { %4308 = vmatprep.subr.bf16.mxu1 %v11649_v47  ;;  %v11733_v47 = vld [vmem:[#allocation2 + $0x69c] ss:$40 sps:$4 sm:$0xff]  }
  0x99   : > { %4266 = vmatpush1.bf16.msra.mxu0 %v11644_v48  ;;  %v11728_v48 = vld [vmem:[#allocation2 + $0x198] ss:$40 sps:$4 sm:$0xff]  }
  0x9a   : > { %4309 = vmatpush1.bf16.msra.mxu1 %v11647_v49  ;;  %4267 = vmatprep.subr.bf16.mxu0 %v11652_v50  ;;  %v11731_v49 = vld [vmem:[#allocation2 + $0x698] ss:$40 sps:$4 sm:$0xff]   ;;  %v11736_v50 = vld [vmem:[#allocation2 + $0x14c] ss:$40 sps:$4 sm:$0xff]  }
  0x9b   : > { %4310 = vmatprep.subr.bf16.mxu1 %v11655_v51  ;;  %v11739_v51 = vld [vmem:[#allocation2 + $0x64c] ss:$40 sps:$4 sm:$0xff]  }
  0x9d   : > { %4268 = vmatpush1.bf16.msra.mxu0 %v11650_v53  ;;  %v11734_v53 = vld [vmem:[#allocation2 + $0x148] ss:$40 sps:$4 sm:$0xff]  }
  0x9e   : > { %4311 = vmatpush1.bf16.msra.mxu1 %v11653_v54  ;;  %4269 = vmatprep.subr.bf16.mxu0 %v11658_v55  ;;  %v11737_v54 = vld [vmem:[#allocation2 + $0x648] ss:$40 sps:$4 sm:$0xff]   ;;  %v11742_v55 = vld [vmem:[#allocation2 + $0xfc] ss:$40 sps:$4 sm:$0xff]  }
  0x9f   : > { %4312 = vmatprep.subr.bf16.mxu1 %v11661_v56  ;;  %v11745_v56 = vld [vmem:[#allocation2 + $0x5fc] ss:$40 sps:$4 sm:$0xff]  }
  0xa1   : > { %4270 = vmatpush1.bf16.msra.mxu0 %v11656_v57  ;;  %v11740_v57 = vld [vmem:[#allocation2 + $0xf8] ss:$40 sps:$4 sm:$0xff]  }
  0xa2   : > { %4313 = vmatpush1.bf16.msra.mxu1 %v11659_v58  ;;  %4271 = vmatprep.subr.bf16.mxu0 %v11664_v60  ;;  %v11743_v58 = vld [vmem:[#allocation2 + $0x5f8] ss:$40 sps:$4 sm:$0xff]   ;;  %v11748_v60 = vld [vmem:[#allocation2 + $0xac] ss:$40 sps:$4 sm:$0xff]  }
  0xa3   : > { %4314 = vmatprep.subr.bf16.mxu1 %v11667_v61  ;;  %v11751_v61 = vld [vmem:[#allocation2 + $0x5ac] ss:$40 sps:$4 sm:$0xff]  }
  0xa5   : > { %4272 = vmatpush1.bf16.msra.mxu0 %v11662_v62  ;;  %v11746_v62 = vld [vmem:[#allocation2 + $0xa8] ss:$40 sps:$4 sm:$0xff]  }
  0xa6   : > { %4315 = vmatpush1.bf16.msra.mxu1 %v11665_v63  ;;  %4273 = vmatprep.subr.bf16.mxu0 %v11670_v0  ;;  %v11749_v63 = vld [vmem:[#allocation2 + $0x5a8] ss:$40 sps:$4 sm:$0xff]   ;;  %v11754_v0 = vld [vmem:[#allocation2 + $0x5c] ss:$40 sps:$4 sm:$0xff]  }
  0xa7   : > { %4316 = vmatprep.subr.bf16.mxu1 %v11673_v1  ;;  %v11757_v1 = vld [vmem:[#allocation2 + $0x55c] ss:$40 sps:$4 sm:$0xff]  }
  0xa9   : > { %4274 = vmatpush2.bf16.msra.mxu0 %v11668_v2  ;;  %v11752_v2 = vld [vmem:[#allocation2 + $0x58] ss:$40 sps:$4 sm:$0xff]  }
  0xaa   : > { %4317 = vmatpush2.bf16.msra.mxu1 %v11671_v3  ;;  %4275 = vmatprep.subr.bf16.mxu0 %v11676_v4  ;;  %v11755_v3 = vld [vmem:[#allocation2 + $0x558] ss:$40 sps:$4 sm:$0xff]   ;;  %v11760_v4 = vld [vmem:[#allocation2 + $0xc] ss:$40 sps:$4 sm:$0xff]  }
  0xab   : > { %4318 = vmatprep.subr.bf16.mxu1 %v11679_v5  ;;  %v11763_v5 = vld [vmem:[#allocation2 + $0x50c] ss:$40 sps:$4 sm:$0xff]  }
  0xad   : > { %4276 = vmatpush2.bf16.msra.mxu0 %v11674_v6  ;;  %v11758_v6 = vld [vmem:[#allocation2 + $0x8] ss:$40 sps:$4 sm:$0xff]  }
  0xae   : > { %4319 = vmatpush2.bf16.msra.mxu1 %v11677_v8  ;;  %4277 = vmatprep.subr.bf16.mxu0 %v11682_v9  ;;  %v11761_v8 = vld [vmem:[#allocation2 + $0x508] ss:$40 sps:$4 sm:$0xff]   ;;  %v11766_v9 = vld [vmem:[#allocation2 + $0x4bc] ss:$40 sps:$4 sm:$0xff]  }
  0xaf   : > { %4320 = vmatprep.subr.bf16.mxu1 %v11685_v11  ;;  %v11769_v11 = vld [vmem:[#allocation2 + $0x9bc] ss:$40 sps:$4 sm:$0xff]  }
  0xb1   : > { %4278 = vmatpush2.bf16.msra.mxu0 %v11680_v12  ;;  %v11764_v12 = vld [vmem:[#allocation2 + $0x4b8] ss:$40 sps:$4 sm:$0xff]  }
  0xb2   : > { %4321 = vmatpush2.bf16.msra.mxu1 %v11683_v13  ;;  %4279 = vmatprep.subr.bf16.mxu0 %v11688_v14  ;;  %v11767_v13 = vld [vmem:[#allocation2 + $0x9b8] ss:$40 sps:$4 sm:$0xff]   ;;  %v11772_v14 = vld [vmem:[#allocation2 + $0x46c] ss:$40 sps:$4 sm:$0xff]  }
  0xb3   : > { %4322 = vmatprep.subr.bf16.mxu1 %v11691_v15  ;;  %v11775_v15 = vld [vmem:[#allocation2 + $0x96c] ss:$40 sps:$4 sm:$0xff]  }
  0xb5   : > { %4280 = vmatpush2.bf16.msra.mxu0 %v11686_v16  ;;  %v11770_v16 = vld [vmem:[#allocation2 + $0x468] ss:$40 sps:$4 sm:$0xff]  }
  0xb6   : > { %4323 = vmatpush2.bf16.msra.mxu1 %v11689_v17  ;;  %4281 = vmatprep.subr.bf16.mxu0 %v11694_v18  ;;  %v11773_v17 = vld [vmem:[#allocation2 + $0x968] ss:$40 sps:$4 sm:$0xff]   ;;  %v11778_v18 = vld [vmem:[#allocation2 + $0x41c] ss:$40 sps:$4 sm:$0xff]  }
  0xb7   : > { %4324 = vmatprep.subr.bf16.mxu1 %v11697_v19  ;;  %v11781_v19 = vld [vmem:[#allocation2 + $0x91c] ss:$40 sps:$4 sm:$0xff]  }
  0xb9   : > { %4282 = vmatpush2.bf16.msra.mxu0 %v11692_v20  ;;  %v11776_v20 = vld [vmem:[#allocation2 + $0x418] ss:$40 sps:$4 sm:$0xff]  }
  0xba   : > { %4325 = vmatpush2.bf16.msra.mxu1 %v11695_v21  ;;  %4283 = vmatprep.subr.bf16.mxu0 %v11700_v22  ;;  %v11779_v21 = vld [vmem:[#allocation2 + $0x918] ss:$40 sps:$4 sm:$0xff]   ;;  %v11784_v22 = vld [vmem:[#allocation2 + $0x3cc] ss:$40 sps:$4 sm:$0xff]  }
  0xbb   : > { %4326 = vmatprep.subr.bf16.mxu1 %v11703_v23  ;;  %v11787_v23 = vld [vmem:[#allocation2 + $0x8cc] ss:$40 sps:$4 sm:$0xff]  }
  0xbd   : > { %4284 = vmatpush2.bf16.msra.mxu0 %v11698_v24  ;;  %v11782_v24 = vld [vmem:[#allocation2 + $0x3c8] ss:$40 sps:$4 sm:$0xff]  }
  0xbe   : > { %4327 = vmatpush2.bf16.msra.mxu1 %v11701_v25  ;;  %4285 = vmatprep.subr.bf16.mxu0 %v11706_v28  ;;  %v11785_v25 = vld [vmem:[#allocation2 + $0x8c8] ss:$40 sps:$4 sm:$0xff]   ;;  %v11790_v28 = vld [vmem:[#allocation2 + $0x37c] ss:$40 sps:$4 sm:$0xff]  }
  0xbf   : > { %4328 = vmatprep.subr.bf16.mxu1 %v11709_v29  ;;  %v11793_v29 = vld [vmem:[#allocation2 + $0x87c] ss:$40 sps:$4 sm:$0xff]  }
  0xc1   : > { %4286 = vmatpush2.bf16.msra.mxu0 %v11704_v30  ;;  %v11788_v30 = vld [vmem:[#allocation2 + $0x378] ss:$40 sps:$4 sm:$0xff]  }
  0xc2   : > { %4329 = vmatpush2.bf16.msra.mxu1 %v11707_v31  ;;  %4287 = vmatprep.subr.bf16.mxu0 %v11712_v32  ;;  %v11791_v31 = vld [vmem:[#allocation2 + $0x878] ss:$40 sps:$4 sm:$0xff]   ;;  %v11796_v32 = vld [vmem:[#allocation2 + $0x32c] ss:$40 sps:$4 sm:$0xff]  }
  0xc3   : > { %4330 = vmatprep.subr.bf16.mxu1 %v11715_v33  ;;  %v11799_v33 = vld [vmem:[#allocation2 + $0x82c] ss:$40 sps:$4 sm:$0xff]  }
  0xc5   : > { %4288 = vmatpush2.bf16.msra.mxu0 %v11710_v36  ;;  %v11794_v36 = vld [vmem:[#allocation2 + $0x328] ss:$40 sps:$4 sm:$0xff]  }
  0xc6   : > { %4331 = vmatpush2.bf16.msra.mxu1 %v11713_v37  ;;  %4343 = vmatprep.subr.bf16.mxu0 %v11718_v38  ;;  %v11797_v37 = vld [vmem:[#allocation2 + $0x828] ss:$40 sps:$4 sm:$0xff]   ;;  %v11802_v38 = vld [vmem:[#allocation2 + $0x2dc] ss:$40 sps:$4 sm:$0xff]  }
  0xc7   : > { %4386 = vmatprep.subr.bf16.mxu1 %v11721_v39  ;;  %v11805_v39 = vld [vmem:[#allocation2 + $0x7dc] ss:$40 sps:$4 sm:$0xff]  }
  0xc8   : > { %4290 = vmatmul.mubr.bf16.vlgmr.msra.gmra.mxu0 %v12806_v7 }
  0xc9   : > { %4333 = vmatmul.mubr.bf16.vlgmr.msra.gmra.mxu1 %v12809_v10  ;;  %4344 = vmatpush1.bf16.msra.mxu0 %v11716_v40  ;;  %v11800_v40 = vld [vmem:[#allocation2 + $0x2d8] ss:$40 sps:$4 sm:$0xff]  }
  0xca   : > { %4387 = vmatpush1.bf16.msra.mxu1 %v11719_v41  ;;  %4345 = vmatprep.subr.bf16.mxu0 %v11724_v42  ;;  %v11803_v41 = vld [vmem:[#allocation2 + $0x7d8] ss:$40 sps:$4 sm:$0xff]   ;;  %v11808_v42 = vld [vmem:[#allocation2 + $0x28c] ss:$40 sps:$4 sm:$0xff]  }
  0xcb   : > { %4388 = vmatprep.subr.bf16.mxu1 %v11727_v43  ;;  %4375 = vmatprep.mubr.bf16.mxu0 %v12795_v52  ;;  %v11811_v43 = vld [vmem:[#allocation2 + $0x78c] ss:$40 sps:$4 sm:$0xff]  }
  0xcc   : > { %4418 = vmatprep.mubr.bf16.mxu1 %v12800_v59 }
  0xcd   : > { %4346 = vmatpush1.bf16.msra.mxu0 %v11722_v44  ;;  %v11806_v44 = vld [vmem:[#allocation2 + $0x288] ss:$40 sps:$4 sm:$0xff]  }
  0xce   : > { %4389 = vmatpush1.bf16.msra.mxu1 %v11725_v45  ;;  %4347 = vmatprep.subr.bf16.mxu0 %v11730_v46  ;;  %v11809_v45 = vld [vmem:[#allocation2 + $0x788] ss:$40 sps:$4 sm:$0xff]   ;;  %v11814_v46 = vld [vmem:[#allocation2 + $0xc3c] ss:$40 sps:$4 sm:$0xff]  }
  0xcf   : > { %4390 = vmatprep.subr.bf16.mxu1 %v11733_v47  ;;  %v11817_v47 = vld [vmem:[#allocation2 + $0x113c] ss:$40 sps:$4 sm:$0xff]  }
  0xd1   : > { %4348 = vmatpush1.bf16.msra.mxu0 %v11728_v48  ;;  %v11812_v48 = vld [vmem:[#allocation2 + $0xc38] ss:$40 sps:$4 sm:$0xff]  }
  0xd2   : > { %4391 = vmatpush1.bf16.msra.mxu1 %v11731_v49  ;;  %4349 = vmatprep.subr.bf16.mxu0 %v11736_v50  ;;  %v11815_v49 = vld [vmem:[#allocation2 + $0x1138] ss:$40 sps:$4 sm:$0xff]   ;;  %v11820_v50 = vld [vmem:[#allocation2 + $0xbec] ss:$40 sps:$4 sm:$0xff]  }
  0xd3   : > { %4392 = vmatprep.subr.bf16.mxu1 %v11739_v51  ;;  %v11823_v51 = vld [vmem:[#allocation2 + $0x10ec] ss:$40 sps:$4 sm:$0xff]  }
  0xd5   : > { %4350 = vmatpush1.bf16.msra.mxu0 %v11734_v53  ;;  %v11818_v53 = vld [vmem:[#allocation2 + $0xbe8] ss:$40 sps:$4 sm:$0xff]  }
  0xd6   : > { %4393 = vmatpush1.bf16.msra.mxu1 %v11737_v54  ;;  %4351 = vmatprep.subr.bf16.mxu0 %v11742_v55  ;;  %v11821_v54 = vld [vmem:[#allocation2 + $0x10e8] ss:$40 sps:$4 sm:$0xff]   ;;  %v11826_v55 = vld [vmem:[#allocation2 + $0xb9c] ss:$40 sps:$4 sm:$0xff]  }
  0xd7   : > { %4394 = vmatprep.subr.bf16.mxu1 %v11745_v56  ;;  %v11829_v56 = vld [vmem:[#allocation2 + $0x109c] ss:$40 sps:$4 sm:$0xff]  }
  0xd9   : > { %4352 = vmatpush1.bf16.msra.mxu0 %v11740_v57  ;;  %v11824_v57 = vld [vmem:[#allocation2 + $0xb98] ss:$40 sps:$4 sm:$0xff]  }
  0xda   : > { %4395 = vmatpush1.bf16.msra.mxu1 %v11743_v58  ;;  %4353 = vmatprep.subr.bf16.mxu0 %v11748_v60  ;;  %v11827_v58 = vld [vmem:[#allocation2 + $0x1098] ss:$40 sps:$4 sm:$0xff]   ;;  %v11832_v60 = vld [vmem:[#allocation2 + $0xb4c] ss:$40 sps:$4 sm:$0xff]  }
  0xdb   : > { %4396 = vmatprep.subr.bf16.mxu1 %v11751_v61  ;;  %v11835_v61 = vld [vmem:[#allocation2 + $0x104c] ss:$40 sps:$4 sm:$0xff]  }
  0xdd   : > { %4354 = vmatpush1.bf16.msra.mxu0 %v11746_v62  ;;  %v11830_v62 = vld [vmem:[#allocation2 + $0xb48] ss:$40 sps:$4 sm:$0xff]  }
  0xde   : > { %4397 = vmatpush1.bf16.msra.mxu1 %v11749_v63  ;;  %4355 = vmatprep.subr.bf16.mxu0 %v11754_v0  ;;  %v11833_v63 = vld [vmem:[#allocation2 + $0x1048] ss:$40 sps:$4 sm:$0xff]   ;;  %v11838_v0 = vld [vmem:[#allocation2 + $0xafc] ss:$40 sps:$4 sm:$0xff]  }
  0xdf   : > { %4398 = vmatprep.subr.bf16.mxu1 %v11757_v1  ;;  %v11841_v1 = vld [vmem:[#allocation2 + $0xffc] ss:$40 sps:$4 sm:$0xff]  }
  0xe1   : > { %4356 = vmatpush1.bf16.msra.mxu0 %v11752_v2  ;;  %v11836_v2 = vld [vmem:[#allocation2 + $0xaf8] ss:$40 sps:$4 sm:$0xff]  }
  0xe2   : > { %4399 = vmatpush1.bf16.msra.mxu1 %v11755_v3  ;;  %4357 = vmatprep.subr.bf16.mxu0 %v11760_v4  ;;  %v11839_v3 = vld [vmem:[#allocation2 + $0xff8] ss:$40 sps:$4 sm:$0xff]   ;;  %v11844_v4 = vld [vmem:[#allocation2 + $0xaac] ss:$40 sps:$4 sm:$0xff]  }
  0xe3   : > { %4400 = vmatprep.subr.bf16.mxu1 %v11763_v5  ;;  %v11847_v5 = vld [vmem:[#allocation2 + $0xfac] ss:$40 sps:$4 sm:$0xff]  }
  0xe5   : > { %4358 = vmatpush1.bf16.msra.mxu0 %v11758_v6  ;;  %v11842_v6 = vld [vmem:[#allocation2 + $0xaa8] ss:$40 sps:$4 sm:$0xff]  }
  0xe6   : > { %4401 = vmatpush1.bf16.msra.mxu1 %v11761_v8  ;;  %4359 = vmatprep.subr.bf16.mxu0 %v11766_v9  ;;  %v11845_v8 = vld [vmem:[#allocation2 + $0xfa8] ss:$40 sps:$4 sm:$0xff]   ;;  %v11850_v9 = vld [vmem:[#allocation2 + $0xa5c] ss:$40 sps:$4 sm:$0xff]  }
  0xe7   : > { %4402 = vmatprep.subr.bf16.mxu1 %v11769_v11  ;;  %v11853_v11 = vld [vmem:[#allocation2 + $0xf5c] ss:$40 sps:$4 sm:$0xff]  }
  0xe9   : > { %4360 = vmatpush2.bf16.msra.mxu0 %v11764_v12  ;;  %v11848_v12 = vld [vmem:[#allocation2 + $0xa58] ss:$40 sps:$4 sm:$0xff]  }
  0xea   : > { %4403 = vmatpush2.bf16.msra.mxu1 %v11767_v13  ;;  %4361 = vmatprep.subr.bf16.mxu0 %v11772_v14  ;;  %v11851_v13 = vld [vmem:[#allocation2 + $0xf58] ss:$40 sps:$4 sm:$0xff]   ;;  %v11856_v14 = vld [vmem:[#allocation2 + $0xa0c] ss:$40 sps:$4 sm:$0xff]  }
  0xeb   : > { %4404 = vmatprep.subr.bf16.mxu1 %v11775_v15  ;;  %v11859_v15 = vld [vmem:[#allocation2 + $0xf0c] ss:$40 sps:$4 sm:$0xff]  }
  0xed   : > { %4362 = vmatpush2.bf16.msra.mxu0 %v11770_v16  ;;  %v11854_v16 = vld [vmem:[#allocation2 + $0xa08] ss:$40 sps:$4 sm:$0xff]  }
  0xee   : > { %4405 = vmatpush2.bf16.msra.mxu1 %v11773_v17  ;;  %4363 = vmatprep.subr.bf16.mxu0 %v11778_v18  ;;  %v11857_v17 = vld [vmem:[#allocation2 + $0xf08] ss:$40 sps:$4 sm:$0xff]   ;;  %v11862_v18 = vld [vmem:[#allocation2 + $0xebc] ss:$40 sps:$4 sm:$0xff]  }
  0xef   : > { %4406 = vmatprep.subr.bf16.mxu1 %v11781_v19  ;;  %v11865_v19 = vld [vmem:[#allocation2 + $0x13bc] ss:$40 sps:$4 sm:$0xff]  }
  0xf1   : > { %4364 = vmatpush2.bf16.msra.mxu0 %v11776_v20  ;;  %v11860_v20 = vld [vmem:[#allocation2 + $0xeb8] ss:$40 sps:$4 sm:$0xff]  }
  0xf2   : > { %4407 = vmatpush2.bf16.msra.mxu1 %v11779_v21  ;;  %4365 = vmatprep.subr.bf16.mxu0 %v11784_v22  ;;  %v11863_v21 = vld [vmem:[#allocation2 + $0x13b8] ss:$40 sps:$4 sm:$0xff]   ;;  %v11868_v22 = vld [vmem:[#allocation2 + $0xe6c] ss:$40 sps:$4 sm:$0xff]  }
  0xf3   : > { %4408 = vmatprep.subr.bf16.mxu1 %v11787_v23  ;;  %v11871_v23 = vld [vmem:[#allocation2 + $0x136c] ss:$40 sps:$4 sm:$0xff]  }
  0xf5   : > { %4366 = vmatpush2.bf16.msra.mxu0 %v11782_v24  ;;  %v11866_v24 = vld [vmem:[#allocation2 + $0xe68] ss:$40 sps:$4 sm:$0xff]  }
  0xf6   : > { %4409 = vmatpush2.bf16.msra.mxu1 %v11785_v25  ;;  %4367 = vmatprep.subr.bf16.mxu0 %v11790_v28  ;;  %v11869_v25 = vld [vmem:[#allocation2 + $0x1368] ss:$40 sps:$4 sm:$0xff]   ;;  %v11874_v28 = vld [vmem:[#allocation2 + $0xe1c] ss:$40 sps:$4 sm:$0xff]  }
  0xf7   : > { %4410 = vmatprep.subr.bf16.mxu1 %v11793_v29  ;;  %v11877_v29 = vld [vmem:[#allocation2 + $0x131c] ss:$40 sps:$4 sm:$0xff]  }
  0xf9   : > { %4368 = vmatpush2.bf16.msra.mxu0 %v11788_v30  ;;  %v11872_v30 = vld [vmem:[#allocation2 + $0xe18] ss:$40 sps:$4 sm:$0xff]  }
  0xfa   : > { %4411 = vmatpush2.bf16.msra.mxu1 %v11791_v31  ;;  %4369 = vmatprep.subr.bf16.mxu0 %v11796_v32  ;;  %v11875_v31 = vld [vmem:[#allocation2 + $0x1318] ss:$40 sps:$4 sm:$0xff]   ;;  %v11880_v32 = vld [vmem:[#allocation2 + $0xdcc] ss:$40 sps:$4 sm:$0xff]  }
  0xfb   : > { %4412 = vmatprep.subr.bf16.mxu1 %v11799_v33  ;;  %v11883_v33 = vld [vmem:[#allocation2 + $0x12cc] ss:$40 sps:$4 sm:$0xff]  }
  0xfd   : > { %4370 = vmatpush2.bf16.msra.mxu0 %v11794_v36  ;;  %v11878_v36 = vld [vmem:[#allocation2 + $0xdc8] ss:$40 sps:$4 sm:$0xff]  }
  0xfe   : > { %4413 = vmatpush2.bf16.msra.mxu1 %v11797_v37  ;;  %4371 = vmatprep.subr.bf16.mxu0 %v11802_v38  ;;  %v11881_v37 = vld [vmem:[#allocation2 + $0x12c8] ss:$40 sps:$4 sm:$0xff]   ;;  %v11886_v38 = vld [vmem:[#allocation2 + $0xd7c] ss:$40 sps:$4 sm:$0xff]  }
  0xff   : > { %4414 = vmatprep.subr.bf16.mxu1 %v11805_v39  ;;  %v11889_v39 = vld [vmem:[#allocation2 + $0x127c] ss:$40 sps:$4 sm:$0xff]  }
 0x101   : > { %4372 = vmatpush2.bf16.msra.mxu0 %v11800_v40  ;;  %v11884_v40 = vld [vmem:[#allocation2 + $0xd78] ss:$40 sps:$4 sm:$0xff]  }
 0x102   : > { %4415 = vmatpush2.bf16.msra.mxu1 %v11803_v41  ;;  %4373 = vmatprep.subr.bf16.mxu0 %v11808_v42  ;;  %v11887_v41 = vld [vmem:[#allocation2 + $0x1278] ss:$40 sps:$4 sm:$0xff]   ;;  %v11892_v42 = vld [vmem:[#allocation2 + $0xd2c] ss:$40 sps:$4 sm:$0xff]  }
 0x103   : > { %4416 = vmatprep.subr.bf16.mxu1 %v11811_v43  ;;  %v11895_v43 = vld [vmem:[#allocation2 + $0x122c] ss:$40 sps:$4 sm:$0xff]  }
 0x105   : > { %4374 = vmatpush2.bf16.msra.mxu0 %v11806_v44  ;;  %v11890_v44 = vld [vmem:[#allocation2 + $0xd28] ss:$40 sps:$4 sm:$0xff]  }
 0x106   : > { %4417 = vmatpush2.bf16.msra.mxu1 %v11809_v45  ;;  %4429 = vmatprep.subr.bf16.mxu0 %v11814_v46  ;;  %v11893_v45 = vld [vmem:[#allocation2 + $0x1228] ss:$40 sps:$4 sm:$0xff]   ;;  %v11898_v46 = vld [vmem:[#allocation2 + $0xcdc] ss:$40 sps:$4 sm:$0xff]  }
 0x107   : > { %4472 = vmatprep.subr.bf16.mxu1 %v11817_v47  ;;  %v11901_v47 = vld [vmem:[#allocation2 + $0x11dc] ss:$40 sps:$4 sm:$0xff]  }
 0x108   : > { %4376 = vmatmul.mubr.bf16.vlgmr.msra.gmra.mxu0 %v12816_v26 }
 0x109   : > { %4419 = vmatmul.mubr.bf16.vlgmr.msra.gmra.mxu1 %v12818_v27  ;;  %4430 = vmatpush1.bf16.msra.mxu0 %v11812_v48  ;;  %v11896_v48 = vld [vmem:[#allocation2 + $0xcd8] ss:$40 sps:$4 sm:$0xff]  }
 0x10a   : > { %4473 = vmatpush1.bf16.msra.mxu1 %v11815_v49  ;;  %4431 = vmatprep.subr.bf16.mxu0 %v11820_v50  ;;  %v11899_v49 = vld [vmem:[#allocation2 + $0x11d8] ss:$40 sps:$4 sm:$0xff]   ;;  %v11904_v50 = vld [vmem:[#allocation2 + $0xc8c] ss:$40 sps:$4 sm:$0xff]  }
 0x10b   : > { %4474 = vmatprep.subr.bf16.mxu1 %v11823_v51  ;;  %4461 = vmatprep.mubr.bf16.mxu0 %v12822_v34  ;;  %v11907_v51 = vld [vmem:[#allocation2 + $0x118c] ss:$40 sps:$4 sm:$0xff]  }
 0x10c   : > { %4504 = vmatprep.mubr.bf16.mxu1 %v12824_v35 }
 0x10d   : > { %4432 = vmatpush1.bf16.msra.mxu0 %v11818_v53  ;;  %v11902_v53 = vld [vmem:[#allocation2 + $0xc88] ss:$40 sps:$4 sm:$0xff]  }
 0x10e   : > { %4475 = vmatpush1.bf16.msra.mxu1 %v11821_v54  ;;  %4433 = vmatprep.subr.bf16.mxu0 %v11826_v55  ;;  %v11905_v54 = vld [vmem:[#allocation2 + $0x1188] ss:$40 sps:$4 sm:$0xff]   ;;  %v11910_v55 = vld [vmem:[#allocation2 + $0x244] ss:$40 sps:$4 sm:$0xff]  }
 0x10f   : > { %4476 = vmatprep.subr.bf16.mxu1 %v11829_v56  ;;  %v11913_v56 = vld [vmem:[#allocation2 + $0x744] ss:$40 sps:$4 sm:$0xff]  }
 0x111   : > { %4434 = vmatpush1.bf16.msra.mxu0 %v11824_v57  ;;  %v11908_v57 = vld [vmem:[#allocation2 + $0x240] ss:$40 sps:$4 sm:$0xff]  }
 0x112   : > { %4477 = vmatpush1.bf16.msra.mxu1 %v11827_v58  ;;  %4435 = vmatprep.subr.bf16.mxu0 %v11832_v60  ;;  %v11911_v58 = vld [vmem:[#allocation2 + $0x740] ss:$40 sps:$4 sm:$0xff]   ;;  %v11916_v60 = vld [vmem:[#allocation2 + $0x1f4] ss:$40 sps:$4 sm:$0xff]  }
 0x113   : > { %4478 = vmatprep.subr.bf16.mxu1 %v11835_v61  ;;  %v11919_v61 = vld [vmem:[#allocation2 + $0x6f4] ss:$40 sps:$4 sm:$0xff]  }
 0x115   : > { %4436 = vmatpush1.bf16.msra.mxu0 %v11830_v62  ;;  %v11914_v62 = vld [vmem:[#allocation2 + $0x1f0] ss:$40 sps:$4 sm:$0xff]  }
 0x116   : > { %4479 = vmatpush1.bf16.msra.mxu1 %v11833_v63  ;;  %4437 = vmatprep.subr.bf16.mxu0 %v11838_v0  ;;  %v11917_v63 = vld [vmem:[#allocation2 + $0x6f0] ss:$40 sps:$4 sm:$0xff]   ;;  %v11922_v0 = vld [vmem:[#allocation2 + $0x1a4] ss:$40 sps:$4 sm:$0xff]  }
 0x117   : > { %4480 = vmatprep.subr.bf16.mxu1 %v11841_v1  ;;  %v11925_v1 = vld [vmem:[#allocation2 + $0x6a4] ss:$40 sps:$4 sm:$0xff]  }
 0x119   : > { %4438 = vmatpush1.bf16.msra.mxu0 %v11836_v2  ;;  %v11920_v2 = vld [vmem:[#allocation2 + $0x1a0] ss:$40 sps:$4 sm:$0xff]  }
 0x11a   : > { %4481 = vmatpush1.bf16.msra.mxu1 %v11839_v3  ;;  %4439 = vmatprep.subr.bf16.mxu0 %v11844_v4  ;;  %v11923_v3 = vld [vmem:[#allocation2 + $0x6a0] ss:$40 sps:$4 sm:$0xff]   ;;  %v11928_v4 = vld [vmem:[#allocation2 + $0x154] ss:$40 sps:$4 sm:$0xff]  }
 0x11b   : > { %4482 = vmatprep.subr.bf16.mxu1 %v11847_v5  ;;  %v11931_v5 = vld [vmem:[#allocation2 + $0x654] ss:$40 sps:$4 sm:$0xff]  }
 0x11d   : > { %4440 = vmatpush1.bf16.msra.mxu0 %v11842_v6  ;;  %v11926_v6 = vld [vmem:[#allocation2 + $0x150] ss:$40 sps:$4 sm:$0xff]  }
 0x11e   : > { %4483 = vmatpush1.bf16.msra.mxu1 %v11845_v8  ;;  %4441 = vmatprep.subr.bf16.mxu0 %v11850_v9  ;;  %v11929_v8 = vld [vmem:[#allocation2 + $0x650] ss:$40 sps:$4 sm:$0xff]   ;;  %v11934_v9 = vld [vmem:[#allocation2 + $0x104] ss:$40 sps:$4 sm:$0xff]  }
 0x11f   : > { %4484 = vmatprep.subr.bf16.mxu1 %v11853_v11  ;;  %v11937_v11 = vld [vmem:[#allocation2 + $0x604] ss:$40 sps:$4 sm:$0xff]  }
 0x121   : > { %4442 = vmatpush1.bf16.msra.mxu0 %v11848_v12  ;;  %v11932_v12 = vld [vmem:[#allocation2 + $0x100] ss:$40 sps:$4 sm:$0xff]  }
 0x122   : > { %4485 = vmatpush1.bf16.msra.mxu1 %v11851_v13  ;;  %4443 = vmatprep.subr.bf16.mxu0 %v11856_v14  ;;  %v11935_v13 = vld [vmem:[#allocation2 + $0x600] ss:$40 sps:$4 sm:$0xff]   ;;  %v11940_v14 = vld [vmem:[#allocation2 + $0xb4] ss:$40 sps:$4 sm:$0xff]  }
 0x123   : > { %4486 = vmatprep.subr.bf16.mxu1 %v11859_v15  ;;  %v11943_v15 = vld [vmem:[#allocation2 + $0x5b4] ss:$40 sps:$4 sm:$0xff]  }
 0x125   : > { %4444 = vmatpush1.bf16.msra.mxu0 %v11854_v16  ;;  %v11938_v16 = vld [vmem:[#allocation2 + $0xb0] ss:$40 sps:$4 sm:$0xff]  }
 0x126   : > { %4487 = vmatpush1.bf16.msra.mxu1 %v11857_v17  ;;  %4445 = vmatprep.subr.bf16.mxu0 %v11862_v18  ;;  %v11941_v17 = vld [vmem:[#allocation2 + $0x5b0] ss:$40 sps:$4 sm:$0xff]   ;;  %v11946_v18 = vld [vmem:[#allocation2 + $0x64] ss:$40 sps:$4 sm:$0xff]  }
 0x127   : > { %4488 = vmatprep.subr.bf16.mxu1 %v11865_v19  ;;  %v11949_v19 = vld [vmem:[#allocation2 + $0x564] ss:$40 sps:$4 sm:$0xff]  }
 0x129   : > { %4446 = vmatpush2.bf16.msra.mxu0 %v11860_v20  ;;  %v11944_v20 = vld [vmem:[#allocation2 + $0x60] ss:$40 sps:$4 sm:$0xff]  }
 0x12a   : > { %4489 = vmatpush2.bf16.msra.mxu1 %v11863_v21  ;;  %4447 = vmatprep.subr.bf16.mxu0 %v11868_v22  ;;  %v11947_v21 = vld [vmem:[#allocation2 + $0x560] ss:$40 sps:$4 sm:$0xff]   ;;  %v11952_v22 = vld [vmem:[#allocation2 + $0x14] ss:$40 sps:$4 sm:$0xff]  }
 0x12b   : > { %4490 = vmatprep.subr.bf16.mxu1 %v11871_v23  ;;  %v11955_v23 = vld [vmem:[#allocation2 + $0x514] ss:$40 sps:$4 sm:$0xff]  }
 0x12d   : > { %4448 = vmatpush2.bf16.msra.mxu0 %v11866_v24  ;;  %v11950_v24 = vld [vmem:[#allocation2 + $0x10] ss:$40 sps:$4 sm:$0xff]  }
 0x12e   : > { %4491 = vmatpush2.bf16.msra.mxu1 %v11869_v25  ;;  %4449 = vmatprep.subr.bf16.mxu0 %v11874_v28  ;;  %v11953_v25 = vld [vmem:[#allocation2 + $0x510] ss:$40 sps:$4 sm:$0xff]   ;;  %v11958_v28 = vld [vmem:[#allocation2 + $0x4c4] ss:$40 sps:$4 sm:$0xff]  }
 0x12f   : > { %4492 = vmatprep.subr.bf16.mxu1 %v11877_v29  ;;  %v11961_v29 = vld [vmem:[#allocation2 + $0x9c4] ss:$40 sps:$4 sm:$0xff]  }
 0x131   : > { %4450 = vmatpush2.bf16.msra.mxu0 %v11872_v30  ;;  %v11956_v30 = vld [vmem:[#allocation2 + $0x4c0] ss:$40 sps:$4 sm:$0xff]  }
 0x132   : > { %4493 = vmatpush2.bf16.msra.mxu1 %v11875_v31  ;;  %4451 = vmatprep.subr.bf16.mxu0 %v11880_v32  ;;  %v11959_v31 = vld [vmem:[#allocation2 + $0x9c0] ss:$40 sps:$4 sm:$0xff]   ;;  %v11964_v32 = vld [vmem:[#allocation2 + $0x474] ss:$40 sps:$4 sm:$0xff]  }
 0x133   : > { %4494 = vmatprep.subr.bf16.mxu1 %v11883_v33  ;;  %v11967_v33 = vld [vmem:[#allocation2 + $0x974] ss:$40 sps:$4 sm:$0xff]  }
 0x135   : > { %4452 = vmatpush2.bf16.msra.mxu0 %v11878_v36  ;;  %v11962_v36 = vld [vmem:[#allocation2 + $0x470] ss:$40 sps:$4 sm:$0xff]  }
 0x136   : > { %4495 = vmatpush2.bf16.msra.mxu1 %v11881_v37  ;;  %4453 = vmatprep.subr.bf16.mxu0 %v11886_v38  ;;  %v11965_v37 = vld [vmem:[#allocation2 + $0x970] ss:$40 sps:$4 sm:$0xff]   ;;  %v11970_v38 = vld [vmem:[#allocation2 + $0x424] ss:$40 sps:$4 sm:$0xff]  }
 0x137   : > { %4496 = vmatprep.subr.bf16.mxu1 %v11889_v39  ;;  %v11973_v39 = vld [vmem:[#allocation2 + $0x924] ss:$40 sps:$4 sm:$0xff]  }
 0x139   : > { %4454 = vmatpush2.bf16.msra.mxu0 %v11884_v40  ;;  %v11968_v40 = vld [vmem:[#allocation2 + $0x420] ss:$40 sps:$4 sm:$0xff]  }
 0x13a   : > { %4497 = vmatpush2.bf16.msra.mxu1 %v11887_v41  ;;  %4455 = vmatprep.subr.bf16.mxu0 %v11892_v42  ;;  %v11971_v41 = vld [vmem:[#allocation2 + $0x920] ss:$40 sps:$4 sm:$0xff]   ;;  %v11976_v42 = vld [vmem:[#allocation2 + $0x3d4] ss:$40 sps:$4 sm:$0xff]  }
 0x13b   : > { %4498 = vmatprep.subr.bf16.mxu1 %v11895_v43  ;;  %v11979_v43 = vld [vmem:[#allocation2 + $0x8d4] ss:$40 sps:$4 sm:$0xff]  }
 0x13d   : > { %4456 = vmatpush2.bf16.msra.mxu0 %v11890_v44  ;;  %v11974_v44 = vld [vmem:[#allocation2 + $0x3d0] ss:$40 sps:$4 sm:$0xff]  }
 0x13e   : > { %4499 = vmatpush2.bf16.msra.mxu1 %v11893_v45  ;;  %4457 = vmatprep.subr.bf16.mxu0 %v11898_v46  ;;  %v11977_v45 = vld [vmem:[#allocation2 + $0x8d0] ss:$40 sps:$4 sm:$0xff]   ;;  %v11982_v46 = vld [vmem:[#allocation2 + $0x384] ss:$40 sps:$4 sm:$0xff]  }
 0x13f   : > { %4500 = vmatprep.subr.bf16.mxu1 %v11901_v47  ;;  %v11985_v47 = vld [vmem:[#allocation2 + $0x884] ss:$40 sps:$4 sm:$0xff]  }
 0x141   : > { %4458 = vmatpush2.bf16.msra.mxu0 %v11896_v48  ;;  %v11980_v48 = vld [vmem:[#allocation2 + $0x380] ss:$40 sps:$4 sm:$0xff]  }
 0x142   : > { %4501 = vmatpush2.bf16.msra.mxu1 %v11899_v49  ;;  %4459 = vmatprep.subr.bf16.mxu0 %v11904_v50  ;;  %v11983_v49 = vld [vmem:[#allocation2 + $0x880] ss:$40 sps:$4 sm:$0xff]   ;;  %v11988_v50 = vld [vmem:[#allocation2 + $0x334] ss:$40 sps:$4 sm:$0xff]  }
 0x143   : > { %4502 = vmatprep.subr.bf16.mxu1 %v11907_v51  ;;  %v11991_v51 = vld [vmem:[#allocation2 + $0x834] ss:$40 sps:$4 sm:$0xff]  }
 0x145   : > { %4460 = vmatpush2.bf16.msra.mxu0 %v11902_v53  ;;  %v11986_v53 = vld [vmem:[#allocation2 + $0x330] ss:$40 sps:$4 sm:$0xff]  }
 0x146   : > { %4503 = vmatpush2.bf16.msra.mxu1 %v11905_v54  ;;  %4515 = vmatprep.subr.bf16.mxu0 %v11910_v55  ;;  %v11989_v54 = vld [vmem:[#allocation2 + $0x830] ss:$40 sps:$4 sm:$0xff]   ;;  %v11994_v55 = vld [vmem:[#allocation2 + $0x2e4] ss:$40 sps:$4 sm:$0xff]  }
 0x147   : > { %4558 = vmatprep.subr.bf16.mxu1 %v11913_v56  ;;  %v11997_v56 = vld [vmem:[#allocation2 + $0x7e4] ss:$40 sps:$4 sm:$0xff]  }
 0x148   : > { %4462 = vmatmul.mubr.bf16.vlgmr.msra.gmra.mxu0 %v12806_v7 }
 0x149   : > { %4505 = vmatmul.mubr.bf16.vlgmr.msra.gmra.mxu1 %v12809_v10  ;;  %4516 = vmatpush1.bf16.msra.mxu0 %v11908_v57  ;;  %v11992_v57 = vld [vmem:[#allocation2 + $0x2e0] ss:$40 sps:$4 sm:$0xff]  }
 0x14a   : > { %4559 = vmatpush1.bf16.msra.mxu1 %v11911_v58  ;;  %4517 = vmatprep.subr.bf16.mxu0 %v11916_v60  ;;  %v11995_v58 = vld [vmem:[#allocation2 + $0x7e0] ss:$40 sps:$4 sm:$0xff]   ;;  %v12000_v60 = vld [vmem:[#allocation2 + $0x294] ss:$40 sps:$4 sm:$0xff]  }
 0x14b   : > { %4560 = vmatprep.subr.bf16.mxu1 %v11919_v61  ;;  %4547 = vmatprep.mubr.bf16.mxu0 %v12795_v52  ;;  %v12003_v61 = vld [vmem:[#allocation2 + $0x794] ss:$40 sps:$4 sm:$0xff]  }
 0x14c   : > { %4590 = vmatprep.mubr.bf16.mxu1 %v12800_v59 }
 0x14d   : > { %4518 = vmatpush1.bf16.msra.mxu0 %v11914_v62  ;;  %v11998_v62 = vld [vmem:[#allocation2 + $0x290] ss:$40 sps:$4 sm:$0xff]  }
 0x14e   : > { %4561 = vmatpush1.bf16.msra.mxu1 %v11917_v63  ;;  %4519 = vmatprep.subr.bf16.mxu0 %v11922_v0  ;;  %v12001_v63 = vld [vmem:[#allocation2 + $0x790] ss:$40 sps:$4 sm:$0xff]   ;;  %v12006_v0 = vld [vmem:[#allocation2 + $0xc44] ss:$40 sps:$4 sm:$0xff]  }
 0x14f   : > { %4562 = vmatprep.subr.bf16.mxu1 %v11925_v1  ;;  %v12009_v1 = vld [vmem:[#allocation2 + $0x1144] ss:$40 sps:$4 sm:$0xff]  }
 0x151   : > { %4520 = vmatpush1.bf16.msra.mxu0 %v11920_v2  ;;  %v12004_v2 = vld [vmem:[#allocation2 + $0xc40] ss:$40 sps:$4 sm:$0xff]  }
 0x152   : > { %4563 = vmatpush1.bf16.msra.mxu1 %v11923_v3  ;;  %4521 = vmatprep.subr.bf16.mxu0 %v11928_v4  ;;  %v12007_v3 = vld [vmem:[#allocation2 + $0x1140] ss:$40 sps:$4 sm:$0xff]   ;;  %v12012_v4 = vld [vmem:[#allocation2 + $0xbf4] ss:$40 sps:$4 sm:$0xff]  }
 0x153   : > { %4564 = vmatprep.subr.bf16.mxu1 %v11931_v5  ;;  %v12015_v5 = vld [vmem:[#allocation2 + $0x10f4] ss:$40 sps:$4 sm:$0xff]  }
 0x155   : > { %4522 = vmatpush1.bf16.msra.mxu0 %v11926_v6  ;;  %v12010_v6 = vld [vmem:[#allocation2 + $0xbf0] ss:$40 sps:$4 sm:$0xff]  }
 0x156   : > { %4565 = vmatpush1.bf16.msra.mxu1 %v11929_v8  ;;  %4523 = vmatprep.subr.bf16.mxu0 %v11934_v9  ;;  %v12013_v8 = vld [vmem:[#allocation2 + $0x10f0] ss:$40 sps:$4 sm:$0xff]   ;;  %v12018_v9 = vld [vmem:[#allocation2 + $0xba4] ss:$40 sps:$4 sm:$0xff]  }
 0x157   : > { %4566 = vmatprep.subr.bf16.mxu1 %v11937_v11  ;;  %v12021_v11 = vld [vmem:[#allocation2 + $0x10a4] ss:$40 sps:$4 sm:$0xff]  }
 0x159   : > { %4524 = vmatpush1.bf16.msra.mxu0 %v11932_v12  ;;  %v12016_v12 = vld [vmem:[#allocation2 + $0xba0] ss:$40 sps:$4 sm:$0xff]  }
 0x15a   : > { %4567 = vmatpush1.bf16.msra.mxu1 %v11935_v13  ;;  %4525 = vmatprep.subr.bf16.mxu0 %v11940_v14  ;;  %v12019_v13 = vld [vmem:[#allocation2 + $0x10a0] ss:$40 sps:$4 sm:$0xff]   ;;  %v12024_v14 = vld [vmem:[#allocation2 + $0xb54] ss:$40 sps:$4 sm:$0xff]  }
 0x15b   : > { %4568 = vmatprep.subr.bf16.mxu1 %v11943_v15  ;;  %v12027_v15 = vld [vmem:[#allocation2 + $0x1054] ss:$40 sps:$4 sm:$0xff]  }
 0x15d   : > { %4526 = vmatpush1.bf16.msra.mxu0 %v11938_v16  ;;  %v12022_v16 = vld [vmem:[#allocation2 + $0xb50] ss:$40 sps:$4 sm:$0xff]  }
 0x15e   : > { %4569 = vmatpush1.bf16.msra.mxu1 %v11941_v17  ;;  %4527 = vmatprep.subr.bf16.mxu0 %v11946_v18  ;;  %v12025_v17 = vld [vmem:[#allocation2 + $0x1050] ss:$40 sps:$4 sm:$0xff]   ;;  %v12030_v18 = vld [vmem:[#allocation2 + $0xb04] ss:$40 sps:$4 sm:$0xff]  }
 0x15f   : > { %4570 = vmatprep.subr.bf16.mxu1 %v11949_v19  ;;  %v12033_v19 = vld [vmem:[#allocation2 + $0x1004] ss:$40 sps:$4 sm:$0xff]  }
 0x161   : > { %4528 = vmatpush1.bf16.msra.mxu0 %v11944_v20  ;;  %v12028_v20 = vld [vmem:[#allocation2 + $0xb00] ss:$40 sps:$4 sm:$0xff]  }
 0x162   : > { %4571 = vmatpush1.bf16.msra.mxu1 %v11947_v21  ;;  %4529 = vmatprep.subr.bf16.mxu0 %v11952_v22  ;;  %v12031_v21 = vld [vmem:[#allocation2 + $0x1000] ss:$40 sps:$4 sm:$0xff]   ;;  %v12036_v22 = vld [vmem:[#allocation2 + $0xab4] ss:$40 sps:$4 sm:$0xff]  }
 0x163   : > { %4572 = vmatprep.subr.bf16.mxu1 %v11955_v23  ;;  %v12039_v23 = vld [vmem:[#allocation2 + $0xfb4] ss:$40 sps:$4 sm:$0xff]  }
 0x165   : > { %4530 = vmatpush1.bf16.msra.mxu0 %v11950_v24  ;;  %v12034_v24 = vld [vmem:[#allocation2 + $0xab0] ss:$40 sps:$4 sm:$0xff]  }
 0x166   : > { %4573 = vmatpush1.bf16.msra.mxu1 %v11953_v25  ;;  %4531 = vmatprep.subr.bf16.mxu0 %v11958_v28  ;;  %v12037_v25 = vld [vmem:[#allocation2 + $0xfb0] ss:$40 sps:$4 sm:$0xff]   ;;  %v12042_v28 = vld [vmem:[#allocation2 + $0xa64] ss:$40 sps:$4 sm:$0xff]  }
 0x167   : > { %4574 = vmatprep.subr.bf16.mxu1 %v11961_v29  ;;  %v12045_v29 = vld [vmem:[#allocation2 + $0xf64] ss:$40 sps:$4 sm:$0xff]  }
 0x169   : > { %4532 = vmatpush2.bf16.msra.mxu0 %v11956_v30  ;;  %v12040_v30 = vld [vmem:[#allocation2 + $0xa60] ss:$40 sps:$4 sm:$0xff]  }
 0x16a   : > { %4575 = vmatpush2.bf16.msra.mxu1 %v11959_v31  ;;  %4533 = vmatprep.subr.bf16.mxu0 %v11964_v32  ;;  %v12043_v31 = vld [vmem:[#allocation2 + $0xf60] ss:$40 sps:$4 sm:$0xff]   ;;  %v12048_v32 = vld [vmem:[#allocation2 + $0xa14] ss:$40 sps:$4 sm:$0xff]  }
 0x16b   : > { %4576 = vmatprep.subr.bf16.mxu1 %v11967_v33  ;;  %v12051_v33 = vld [vmem:[#allocation2 + $0xf14] ss:$40 sps:$4 sm:$0xff]  }
 0x16d   : > { %4534 = vmatpush2.bf16.msra.mxu0 %v11962_v36  ;;  %v12046_v36 = vld [vmem:[#allocation2 + $0xa10] ss:$40 sps:$4 sm:$0xff]  }
 0x16e   : > { %4577 = vmatpush2.bf16.msra.mxu1 %v11965_v37  ;;  %4535 = vmatprep.subr.bf16.mxu0 %v11970_v38  ;;  %v12049_v37 = vld [vmem:[#allocation2 + $0xf10] ss:$40 sps:$4 sm:$0xff]   ;;  %v12054_v38 = vld [vmem:[#allocation2 + $0xec4] ss:$40 sps:$4 sm:$0xff]  }
 0x16f   : > { %4578 = vmatprep.subr.bf16.mxu1 %v11973_v39  ;;  %v12057_v39 = vld [vmem:[#allocation2 + $0x13c4] ss:$40 sps:$4 sm:$0xff]  }
 0x171   : > { %4536 = vmatpush2.bf16.msra.mxu0 %v11968_v40  ;;  %v12052_v40 = vld [vmem:[#allocation2 + $0xec0] ss:$40 sps:$4 sm:$0xff]  }
 0x172   : > { %4579 = vmatpush2.bf16.msra.mxu1 %v11971_v41  ;;  %4537 = vmatprep.subr.bf16.mxu0 %v11976_v42  ;;  %v12055_v41 = vld [vmem:[#allocation2 + $0x13c0] ss:$40 sps:$4 sm:$0xff]   ;;  %v12060_v42 = vld [vmem:[#allocation2 + $0xe74] ss:$40 sps:$4 sm:$0xff]  }
 0x173   : > { %4580 = vmatprep.subr.bf16.mxu1 %v11979_v43  ;;  %v12063_v43 = vld [vmem:[#allocation2 + $0x1374] ss:$40 sps:$4 sm:$0xff]  }
 0x175   : > { %4538 = vmatpush2.bf16.msra.mxu0 %v11974_v44  ;;  %v12058_v44 = vld [vmem:[#allocation2 + $0xe70] ss:$40 sps:$4 sm:$0xff]  }
 0x176   : > { %4581 = vmatpush2.bf16.msra.mxu1 %v11977_v45  ;;  %4539 = vmatprep.subr.bf16.mxu0 %v11982_v46  ;;  %v12061_v45 = vld [vmem:[#allocation2 + $0x1370] ss:$40 sps:$4 sm:$0xff]   ;;  %v12066_v46 = vld [vmem:[#allocation2 + $0xe24] ss:$40 sps:$4 sm:$0xff]  }
 0x177   : > { %4582 = vmatprep.subr.bf16.mxu1 %v11985_v47  ;;  %v12069_v47 = vld [vmem:[#allocation2 + $0x1324] ss:$40 sps:$4 sm:$0xff]  }
 0x179   : > { %4540 = vmatpush2.bf16.msra.mxu0 %v11980_v48  ;;  %v12846_v48 = vpop.f32.mrf.mxu0 }
 0x17a   : > { %4583 = vmatpush2.bf16.msra.mxu1 %v11983_v49  ;;  %4541 = vmatprep.subr.bf16.mxu0 %v11988_v50  ;;  %v12848_v49 = vpop.f32.mrf.mxu1  ;;  %v12064_v50 = vld [vmem:[#allocation2 + $0xe20] ss:$40 sps:$4 sm:$0xff]  }
 0x17b   : > { %4584 = vmatprep.subr.bf16.mxu1 %v11991_v51  ;;  %v12067_v51 = vld [vmem:[#allocation2 + $0x1320] ss:$40 sps:$4 sm:$0xff]  }
 0x17d   : > { %4542 = vmatpush2.bf16.msra.mxu0 %v11986_v53  ;;  %v12072_v53 = vld [vmem:[#allocation2 + $0xdd4] ss:$40 sps:$4 sm:$0xff]  }
 0x17e   : > { %4585 = vmatpush2.bf16.msra.mxu1 %v11989_v54  ;;  %4543 = vmatprep.subr.bf16.mxu0 %v11994_v55  ;;  %v12075_v54 = vld [vmem:[#allocation2 + $0x12d4] ss:$40 sps:$4 sm:$0xff]   ;;  %v12850_v55 = vpop.f32.mrf.mxu0 }
 0x17f   : > { %4586 = vmatprep.subr.bf16.mxu1 %v11997_v56  ;;  %v12852_v56 = vpop.f32.mrf.mxu1 }
 0x181   : > { %4544 = vmatpush2.bf16.msra.mxu0 %v11992_v57  ;;  %v12070_v57 = vld [vmem:[#allocation2 + $0xdd0] ss:$40 sps:$4 sm:$0xff]  }
 0x182   : > { %4587 = vmatpush2.bf16.msra.mxu1 %v11995_v58  ;;  %4545 = vmatprep.subr.bf16.mxu0 %v12000_v60  ;;  %v12073_v58 = vld [vmem:[#allocation2 + $0x12d0] ss:$40 sps:$4 sm:$0xff]   ;;  %v12078_v60 = vld [vmem:[#allocation2 + $0xd84] ss:$40 sps:$4 sm:$0xff]  }
 0x183   : > { %4588 = vmatprep.subr.bf16.mxu1 %v12003_v61  ;;  %v12081_v61 = vld [vmem:[#allocation2 + $0x1284] ss:$40 sps:$4 sm:$0xff]  }
 0x185   : > { %4546 = vmatpush2.bf16.msra.mxu0 %v11998_v62  ;;  %v12854_v62 = vpop.f32.mrf.mxu0 }
 0x186   : > { %4589 = vmatpush2.bf16.msra.mxu1 %v12001_v63  ;;  %4601 = vmatprep.subr.bf16.mxu0 %v12006_v0  ;;  %v12856_v63 = vpop.f32.mrf.mxu1  ;;  %v12076_v0 = vld [vmem:[#allocation2 + $0xd80] ss:$40 sps:$4 sm:$0xff]  }
 0x187   : > { %4644 = vmatprep.subr.bf16.mxu1 %v12009_v1  ;;  %v12079_v1 = vld [vmem:[#allocation2 + $0x1280] ss:$40 sps:$4 sm:$0xff]  }
 0x188   : > { %4548 = vmatmul.mubr.bf16.vlgmr.msra.gmra.mxu0 %v12816_v26 }
 0x189   : > { %4591 = vmatmul.mubr.bf16.vlgmr.msra.gmra.mxu1 %v12818_v27  ;;  %4602 = vmatpush1.bf16.msra.mxu0 %v12004_v2  ;;  %v12084_v2 = vld [vmem:[#allocation2 + $0xd34] ss:$40 sps:$4 sm:$0xff]  }
 0x18a   : > { %4645 = vmatpush1.bf16.msra.mxu1 %v12007_v3  ;;  %4603 = vmatprep.subr.bf16.mxu0 %v12012_v4  ;;  %v12087_v3 = vld [vmem:[#allocation2 + $0x1234] ss:$40 sps:$4 sm:$0xff]   ;;  %v12858_v4 = vpop.f32.mrf.mxu0 }
 0x18b   : > { %4646 = vmatprep.subr.bf16.mxu1 %v12015_v5  ;;  %4633 = vmatprep.mubr.bf16.mxu0 %v12822_v34  ;;  %v12860_v5 = vpop.f32.mrf.mxu1 }
 0x18c   : > { %4676 = vmatprep.mubr.bf16.mxu1 %v12824_v35 }
 0x18d   : > { %4604 = vmatpush1.bf16.msra.mxu0 %v12010_v6  ;;  %v12082_v6 = vld [vmem:[#allocation2 + $0xd30] ss:$40 sps:$4 sm:$0xff]  }
 0x18e   : > { %4647 = vmatpush1.bf16.msra.mxu1 %v12013_v8  ;;  %4605 = vmatprep.subr.bf16.mxu0 %v12018_v9  ;;  %v12085_v8 = vld [vmem:[#allocation2 + $0x1230] ss:$40 sps:$4 sm:$0xff]   ;;  %v12862_v9 = vpop.f32.mrf.mxu0 }
 0x18f   : > { %4648 = vmatprep.subr.bf16.mxu1 %v12021_v11  ;;  %v12864_v11 = vpop.f32.mrf.mxu1 }
 0x191   : > { %4606 = vmatpush1.bf16.msra.mxu0 %v12016_v12  ;;  %v12090_v12 = vld [vmem:[#allocation2 + $0xce4] ss:$40 sps:$4 sm:$0xff]  }
 0x192   : > { %4649 = vmatpush1.bf16.msra.mxu1 %v12019_v13  ;;  %4607 = vmatprep.subr.bf16.mxu0 %v12024_v14  ;;  %v12093_v13 = vld [vmem:[#allocation2 + $0x11e4] ss:$40 sps:$4 sm:$0xff]   ;;  %v12088_v14 = vld [vmem:[#allocation2 + $0xce0] ss:$40 sps:$4 sm:$0xff]  }
 0x193   : > { %4650 = vmatprep.subr.bf16.mxu1 %v12027_v15  ;;  %v12091_v15 = vld [vmem:[#allocation2 + $0x11e0] ss:$40 sps:$4 sm:$0xff]  }
 0x195   : > { %4608 = vmatpush1.bf16.msra.mxu0 %v12022_v16  ;;  %v12866_v16 = vpop.f32.mrf.mxu0 }
 0x196   : > { %4651 = vmatpush1.bf16.msra.mxu1 %v12025_v17  ;;  %4609 = vmatprep.subr.bf16.mxu0 %v12030_v18  ;;  %v12868_v17 = vpop.f32.mrf.mxu1  ;;  %v12096_v18 = vld [vmem:[#allocation2 + $0xc94] ss:$40 sps:$4 sm:$0xff]  }
 0x197   : > { %4652 = vmatprep.subr.bf16.mxu1 %v12033_v19  ;;  %v12099_v19 = vld [vmem:[#allocation2 + $0x1194] ss:$40 sps:$4 sm:$0xff]  }
 0x199   : > { %4610 = vmatpush1.bf16.msra.mxu0 %v12028_v20  ;;  %v12094_v20 = vld [vmem:[#allocation2 + $0xc90] ss:$40 sps:$4 sm:$0xff]  }
 0x19a   : > { %4653 = vmatpush1.bf16.msra.mxu1 %v12031_v21  ;;  %4611 = vmatprep.subr.bf16.mxu0 %v12036_v22  ;;  %v12097_v21 = vld [vmem:[#allocation2 + $0x1190] ss:$40 sps:$4 sm:$0xff]   ;;  %v12870_v22 = vpop.f32.mrf.mxu0 }
 0x19b   : > { %4654 = vmatprep.subr.bf16.mxu1 %v12039_v23  ;;  %v12872_v23 = vpop.f32.mrf.mxu1 }
 0x19d   : > { %4612 = vmatpush1.bf16.msra.mxu0 %v12034_v24  ;;  %v12102_v24 = vld [vmem:[#allocation2 + $0x24c] ss:$40 sps:$4 sm:$0xff]  }
 0x19e   : > { %4655 = vmatpush1.bf16.msra.mxu1 %v12037_v25  ;;  %4613 = vmatprep.subr.bf16.mxu0 %v12042_v28  ;;  %v12105_v25 = vld [vmem:[#allocation2 + $0x74c] ss:$40 sps:$4 sm:$0xff]   ;;  %v12100_v28 = vld [vmem:[#allocation2 + $0x248] ss:$40 sps:$4 sm:$0xff]  }
 0x19f   : > { %4656 = vmatprep.subr.bf16.mxu1 %v12045_v29  ;;  %v12103_v29 = vld [vmem:[#allocation2 + $0x748] ss:$40 sps:$4 sm:$0xff]  }
 0x1a1   : > { %4614 = vmatpush1.bf16.msra.mxu0 %v12040_v30  ;;  %v12874_v30 = vpop.f32.mrf.mxu0 }
 0x1a2   : > { %4657 = vmatpush1.bf16.msra.mxu1 %v12043_v31  ;;  %4615 = vmatprep.subr.bf16.mxu0 %v12048_v32  ;;  %v12876_v31 = vpop.f32.mrf.mxu1  ;;  %v12108_v32 = vld [vmem:[#allocation2 + $0x1fc] ss:$40 sps:$4 sm:$0xff]  }
 0x1a3   : > { %4658 = vmatprep.subr.bf16.mxu1 %v12051_v33  ;;  %v12111_v33 = vld [vmem:[#allocation2 + $0x6fc] ss:$40 sps:$4 sm:$0xff]  }
 0x1a5   : > { %4616 = vmatpush1.bf16.msra.mxu0 %v12046_v36 }
 0x1a6   : > { %4659 = vmatpush1.bf16.msra.mxu1 %v12049_v37  ;;  %4617 = vmatprep.subr.bf16.mxu0 %v12054_v38 }
 0x1a7   : > { %4660 = vmatprep.subr.bf16.mxu1 %v12057_v39  ;;  %v12106_v39 = vld [vmem:[#allocation2 + $0x1f8] ss:$40 sps:$4 sm:$0xff]  }
 0x1a9   : > { %4618 = vmatpush2.bf16.msra.mxu0 %v12052_v40  ;;  %v12109_v40 = vld [vmem:[#allocation2 + $0x6f8] ss:$40 sps:$4 sm:$0xff]  }
 0x1aa   : > { %4661 = vmatpush2.bf16.msra.mxu1 %v12055_v41  ;;  %4619 = vmatprep.subr.bf16.mxu0 %v12060_v42 }
 0x1ab   : > { %4662 = vmatprep.subr.bf16.mxu1 %v12063_v43  ;;  %v12114_v43 = vld [vmem:[#allocation2 + $0x1ac] ss:$40 sps:$4 sm:$0xff]  }
 0x1ad   : > { %4620 = vmatpush2.bf16.msra.mxu0 %v12058_v44  ;;  %v12117_v44 = vld [vmem:[#allocation2 + $0x6ac] ss:$40 sps:$4 sm:$0xff]  }
 0x1ae   : > { %4663 = vmatpush2.bf16.msra.mxu1 %v12061_v45  ;;  %4621 = vmatprep.subr.bf16.mxu0 %v12066_v46 }
 0x1af   : > { %4664 = vmatprep.subr.bf16.mxu1 %v12069_v47 }
 0x1b1   : > { %4622 = vmatpush2.bf16.msra.mxu0 %v12064_v50 }
 0x1b2   : > { %4665 = vmatpush2.bf16.msra.mxu1 %v12067_v51  ;;  %4623 = vmatprep.subr.bf16.mxu0 %v12072_v53  ;;  %v12112_v51 = vld [vmem:[#allocation2 + $0x1a8] ss:$40 sps:$4 sm:$0xff]  }
 0x1b3   : > { %4666 = vmatprep.subr.bf16.mxu1 %v12075_v54  ;;  %v12115_v53 = vld [vmem:[#allocation2 + $0x6a8] ss:$40 sps:$4 sm:$0xff]  }
 0x1b5   : > { %4624 = vmatpush2.bf16.msra.mxu0 %v12070_v57 }
 0x1b6   : > { %4667 = vmatpush2.bf16.msra.mxu1 %v12073_v58  ;;  %4625 = vmatprep.subr.bf16.mxu0 %v12078_v60  ;;  %v12120_v58 = vld [vmem:[#allocation2 + $0x15c] ss:$40 sps:$4 sm:$0xff]  }
 0x1b7   : > { %4668 = vmatprep.subr.bf16.mxu1 %v12081_v61  ;;  %v12123_v60 = vld [vmem:[#allocation2 + $0x65c] ss:$40 sps:$4 sm:$0xff]  }
 0x1b9   : > { %4626 = vmatpush2.bf16.msra.mxu0 %v12076_v0  ;;  %v12118_v0 = vld [vmem:[#allocation2 + $0x158] ss:$40 sps:$4 sm:$0xff]  }
 0x1ba   : > { %4669 = vmatpush2.bf16.msra.mxu1 %v12079_v1  ;;  %4627 = vmatprep.subr.bf16.mxu0 %v12084_v2  ;;  %v12121_v1 = vld [vmem:[#allocation2 + $0x658] ss:$40 sps:$4 sm:$0xff]   ;;  %v12126_v2 = vld [vmem:[#allocation2 + $0x10c] ss:$40 sps:$4 sm:$0xff]  }
 0x1bb   : > { %4670 = vmatprep.subr.bf16.mxu1 %v12087_v3  ;;  %v12129_v3 = vld [vmem:[#allocation2 + $0x60c] ss:$40 sps:$4 sm:$0xff]  }
 0x1bd   : > { %4628 = vmatpush2.bf16.msra.mxu0 %v12082_v6  ;;  %v12124_v6 = vld [vmem:[#allocation2 + $0x108] ss:$40 sps:$4 sm:$0xff]  }
 0x1be   : > { %4671 = vmatpush2.bf16.msra.mxu1 %v12085_v8  ;;  %4629 = vmatprep.subr.bf16.mxu0 %v12090_v12  ;;  %v12127_v8 = vld [vmem:[#allocation2 + $0x608] ss:$40 sps:$4 sm:$0xff]   ;;  %v12132_v12 = vld [vmem:[#allocation2 + $0xbc] ss:$40 sps:$4 sm:$0xff]  }
 0x1bf   : > { %4672 = vmatprep.subr.bf16.mxu1 %v12093_v13  ;;  %v12135_v13 = vld [vmem:[#allocation2 + $0x5bc] ss:$40 sps:$4 sm:$0xff]  }
 0x1c1   : > { %4630 = vmatpush2.bf16.msra.mxu0 %v12088_v14  ;;  %v12130_v14 = vld [vmem:[#allocation2 + $0xb8] ss:$40 sps:$4 sm:$0xff]  }
 0x1c2   : > { %4673 = vmatpush2.bf16.msra.mxu1 %v12091_v15  ;;  %4631 = vmatprep.subr.bf16.mxu0 %v12096_v18  ;;  %v12133_v15 = vld [vmem:[#allocation2 + $0x5b8] ss:$40 sps:$4 sm:$0xff]   ;;  %v12138_v18 = vld [vmem:[#allocation2 + $0x6c] ss:$40 sps:$4 sm:$0xff]  }
 0x1c3   : > { %4674 = vmatprep.subr.bf16.mxu1 %v12099_v19  ;;  %v12141_v19 = vld [vmem:[#allocation2 + $0x56c] ss:$40 sps:$4 sm:$0xff]  }
 0x1c5   : > { %4632 = vmatpush2.bf16.msra.mxu0 %v12094_v20  ;;  %v12136_v20 = vld [vmem:[#allocation2 + $0x68] ss:$40 sps:$4 sm:$0xff]  }
 0x1c6   : > { %4675 = vmatpush2.bf16.msra.mxu1 %v12097_v21  ;;  %4687 = vmatprep.subr.bf16.mxu0 %v12102_v24  ;;  %v12139_v21 = vld [vmem:[#allocation2 + $0x568] ss:$40 sps:$4 sm:$0xff]   ;;  %v12144_v24 = vld [vmem:[#allocation2 + $0x1c] ss:$40 sps:$4 sm:$0xff]  }
 0x1c7   : > { %4730 = vmatprep.subr.bf16.mxu1 %v12105_v25  ;;  %v12147_v25 = vld [vmem:[#allocation2 + $0x51c] ss:$40 sps:$4 sm:$0xff]  }
 0x1c8   : > { %v4377_v36 = vpop.f32.mrf.mxu0  ;;  %4634 = vmatmul.mubr.bf16.vlgmr.msra.gmra.mxu0 %v12806_v7 }
 0x1c9   : > { %v4420_v37 = vpop.f32.mrf.mxu1  ;;  %4677 = vmatmul.mubr.bf16.vlgmr.msra.gmra.mxu1 %v12809_v10  ;;  %4688 = vmatpush1.bf16.msra.mxu0 %v12100_v28  ;;  %v12142_v28 = vld [vmem:[#allocation2 + $0x18] ss:$40 sps:$4 sm:$0xff]  }
 0x1ca   : > { %v12880_v38 = vadd.f32 %v4420_v37, %v4377_v36  ;;  %4731 = vmatpush1.bf16.msra.mxu1 %v12103_v29  ;;  %v4379_v41 = vpop.f32.mrf.mxu0  ;;  %4689 = vmatprep.subr.bf16.mxu0 %v12108_v32  ;;  %v12145_v29 = vld [vmem:[#allocation2 + $0x518] ss:$40 sps:$4 sm:$0xff]   ;;  %v12150_v32 = vld [vmem:[#allocation2 + $0x4cc] ss:$40 sps:$4 sm:$0xff]   ;;  %v12148_v36 = vld [vmem:[#allocation2 + $0x4c8] ss:$40 sps:$4 sm:$0xff]  }
 0x1cb   : > { %v4422_v42 = vpop.f32.mrf.mxu1  ;;  %4732 = vmatprep.subr.bf16.mxu1 %v12111_v33  ;;  %4719 = vmatprep.mubr.bf16.mxu0 %v12795_v52  ;;  %v12153_v33 = vld [vmem:[#allocation2 + $0x9cc] ss:$40 sps:$4 sm:$0xff]   ;;  %v12151_v37 = vld [vmem:[#allocation2 + $0x9c8] ss:$40 sps:$4 sm:$0xff]  }
 0x1cc   : > { %v12882_v45 = vadd.f32 %v4422_v42, %v4379_v41  ;;  %4762 = vmatprep.mubr.bf16.mxu1 %v12800_v59  ;;  %v4381_v46 = vpop.f32.mrf.mxu0  ;;  %v12154_v41 = vld [vmem:[#allocation2 + $0x478] ss:$40 sps:$4 sm:$0xff]  }
 0x1cd   : > { %v4424_v47 = vpop.f32.mrf.mxu1  ;;  %4690 = vmatpush1.bf16.msra.mxu0 %v12106_v39  ;;  %v12156_v39 = vld [vmem:[#allocation2 + $0x47c] ss:$40 sps:$4 sm:$0xff]   ;;  %v12157_v42 = vld [vmem:[#allocation2 + $0x978] ss:$40 sps:$4 sm:$0xff]  }
 0x1ce   : > { %v12886_v50 = vadd.f32 %v4424_v47, %v4381_v46  ;;  %4733 = vmatpush1.bf16.msra.mxu1 %v12109_v40  ;;  %v4383_v54 = vpop.f32.mrf.mxu0  ;;  %4691 = vmatprep.subr.bf16.mxu0 %v12114_v43  ;;  %v12159_v40 = vld [vmem:[#allocation2 + $0x97c] ss:$40 sps:$4 sm:$0xff]   ;;  %v12162_v43 = vld [vmem:[#allocation2 + $0x42c] ss:$40 sps:$4 sm:$0xff]   ;;  %v12160_v46 = vld [vmem:[#allocation2 + $0x428] ss:$40 sps:$4 sm:$0xff]  }
 0x1cf   : > { %v4426_v57 = vpop.f32.mrf.mxu1  ;;  %4734 = vmatprep.subr.bf16.mxu1 %v12117_v44  ;;  %v12165_v44 = vld [vmem:[#allocation2 + $0x92c] ss:$40 sps:$4 sm:$0xff]   ;;  %v12163_v47 = vld [vmem:[#allocation2 + $0x928] ss:$40 sps:$4 sm:$0xff]  }
 0x1d0   : > { %v12888_v61 = vadd.f32 %v4426_v57, %v4383_v54  ;;  %v12166_v54 = vld [vmem:[#allocation2 + $0x3d8] ss:$40 sps:$4 sm:$0xff]  }
 0x1d1   : > { %4692 = vmatpush1.bf16.msra.mxu0 %v12112_v51  ;;  %v12168_v51 = vld [vmem:[#allocation2 + $0x3dc] ss:$40 sps:$4 sm:$0xff]   ;;  %v12169_v57 = vld [vmem:[#allocation2 + $0x8d8] ss:$40 sps:$4 sm:$0xff]  }
 0x1d2   : > { %4735 = vmatpush1.bf16.msra.mxu1 %v12115_v53  ;;  %4693 = vmatprep.subr.bf16.mxu0 %v12120_v58  ;;  %v12171_v53 = vld [vmem:[#allocation2 + $0x8dc] ss:$40 sps:$4 sm:$0xff]   ;;  %v12174_v58 = vld [vmem:[#allocation2 + $0x38c] ss:$40 sps:$4 sm:$0xff]  }
 0x1d3   : > { %4736 = vmatprep.subr.bf16.mxu1 %v12123_v60  ;;  %v12177_v60 = vld [vmem:[#allocation2 + $0x88c] ss:$40 sps:$4 sm:$0xff]  }
 0x1d5   : > { %4694 = vmatpush1.bf16.msra.mxu0 %v12118_v0  ;;  %v12172_v0 = vld [vmem:[#allocation2 + $0x388] ss:$40 sps:$4 sm:$0xff]  }
 0x1d6   : > { %4737 = vmatpush1.bf16.msra.mxu1 %v12121_v1  ;;  %4695 = vmatprep.subr.bf16.mxu0 %v12126_v2  ;;  %v12175_v1 = vld [vmem:[#allocation2 + $0x888] ss:$40 sps:$4 sm:$0xff]   ;;  %v12180_v2 = vld [vmem:[#allocation2 + $0x33c] ss:$40 sps:$4 sm:$0xff]  }
 0x1d7   : > { %4738 = vmatprep.subr.bf16.mxu1 %v12129_v3  ;;  %v12183_v3 = vld [vmem:[#allocation2 + $0x83c] ss:$40 sps:$4 sm:$0xff]  }
 0x1d9   : > { %4696 = vmatpush1.bf16.msra.mxu0 %v12124_v6  ;;  %v12178_v6 = vld [vmem:[#allocation2 + $0x338] ss:$40 sps:$4 sm:$0xff]  }
 0x1da   : > { %4739 = vmatpush1.bf16.msra.mxu1 %v12127_v8  ;;  %4697 = vmatprep.subr.bf16.mxu0 %v12132_v12  ;;  %v12181_v8 = vld [vmem:[#allocation2 + $0x838] ss:$40 sps:$4 sm:$0xff]   ;;  %v12186_v12 = vld [vmem:[#allocation2 + $0x2ec] ss:$40 sps:$4 sm:$0xff]  }
 0x1db   : > { %4740 = vmatprep.subr.bf16.mxu1 %v12135_v13  ;;  %v12189_v13 = vld [vmem:[#allocation2 + $0x7ec] ss:$40 sps:$4 sm:$0xff]  }
 0x1dd   : > { %4698 = vmatpush1.bf16.msra.mxu0 %v12130_v14  ;;  %v12184_v14 = vld [vmem:[#allocation2 + $0x2e8] ss:$40 sps:$4 sm:$0xff]  }
 0x1de   : > { %4741 = vmatpush1.bf16.msra.mxu1 %v12133_v15  ;;  %4699 = vmatprep.subr.bf16.mxu0 %v12138_v18  ;;  %v12187_v15 = vld [vmem:[#allocation2 + $0x7e8] ss:$40 sps:$4 sm:$0xff]   ;;  %v12192_v18 = vld [vmem:[#allocation2 + $0x29c] ss:$40 sps:$4 sm:$0xff]  }
 0x1df   : > { %4742 = vmatprep.subr.bf16.mxu1 %v12141_v19  ;;  %v12195_v19 = vld [vmem:[#allocation2 + $0x79c] ss:$40 sps:$4 sm:$0xff]  }
 0x1e1   : > { %4700 = vmatpush1.bf16.msra.mxu0 %v12136_v20  ;;  %v12190_v20 = vld [vmem:[#allocation2 + $0x298] ss:$40 sps:$4 sm:$0xff]  }
 0x1e2   : > { %4743 = vmatpush1.bf16.msra.mxu1 %v12139_v21  ;;  %4701 = vmatprep.subr.bf16.mxu0 %v12144_v24  ;;  %v12193_v21 = vld [vmem:[#allocation2 + $0x798] ss:$40 sps:$4 sm:$0xff]   ;;  %v12198_v24 = vld [vmem:[#allocation2 + $0xc4c] ss:$40 sps:$4 sm:$0xff]  }
 0x1e3   : > { %4744 = vmatprep.subr.bf16.mxu1 %v12147_v25  ;;  %v12201_v25 = vld [vmem:[#allocation2 + $0x114c] ss:$40 sps:$4 sm:$0xff]  }
 0x1e5   : > { %4702 = vmatpush1.bf16.msra.mxu0 %v12142_v28  ;;  %v12196_v28 = vld [vmem:[#allocation2 + $0xc48] ss:$40 sps:$4 sm:$0xff]  }
 0x1e6   : > { %4745 = vmatpush1.bf16.msra.mxu1 %v12145_v29  ;;  %4703 = vmatprep.subr.bf16.mxu0 %v12150_v32  ;;  %v12199_v29 = vld [vmem:[#allocation2 + $0x1148] ss:$40 sps:$4 sm:$0xff]   ;;  %v12204_v32 = vld [vmem:[#allocation2 + $0xbfc] ss:$40 sps:$4 sm:$0xff]  }
 0x1e7   : > { %4746 = vmatprep.subr.bf16.mxu1 %v12153_v33  ;;  %v12207_v33 = vld [vmem:[#allocation2 + $0x10fc] ss:$40 sps:$4 sm:$0xff]  }
 0x1e9   : > { %4704 = vmatpush2.bf16.msra.mxu0 %v12148_v36 }
 0x1ea   : > { %4747 = vmatpush2.bf16.msra.mxu1 %v12151_v37  ;;  %4705 = vmatprep.subr.bf16.mxu0 %v12156_v39 }
 0x1eb   : > { %4748 = vmatprep.subr.bf16.mxu1 %v12159_v40  ;;  %v12202_v40 = vld [vmem:[#allocation2 + $0xbf8] ss:$40 sps:$4 sm:$0xff]  }
 0x1ed   : > { %4706 = vmatpush2.bf16.msra.mxu0 %v12154_v41  ;;  %v12205_v41 = vld [vmem:[#allocation2 + $0x10f8] ss:$40 sps:$4 sm:$0xff]  }
 0x1ee   : > { %4749 = vmatpush2.bf16.msra.mxu1 %v12157_v42  ;;  %4707 = vmatprep.subr.bf16.mxu0 %v12162_v43 }
 0x1ef   : > { %4750 = vmatprep.subr.bf16.mxu1 %v12165_v44  ;;  %v12210_v44 = vld [vmem:[#allocation2 + $0xbac] ss:$40 sps:$4 sm:$0xff]  }
 0x1f1   : > { %4708 = vmatpush2.bf16.msra.mxu0 %v12160_v46  ;;  %v12213_v46 = vld [vmem:[#allocation2 + $0x10ac] ss:$40 sps:$4 sm:$0xff]  }
 0x1f2   : > { %4751 = vmatpush2.bf16.msra.mxu1 %v12163_v47  ;;  %4709 = vmatprep.subr.bf16.mxu0 %v12168_v51 }
 0x1f3   : > { %4752 = vmatprep.subr.bf16.mxu1 %v12171_v53 }
 0x1f5   : > { %4710 = vmatpush2.bf16.msra.mxu0 %v12166_v54 }
 0x1f6   : > { %4753 = vmatpush2.bf16.msra.mxu1 %v12169_v57  ;;  %4711 = vmatprep.subr.bf16.mxu0 %v12174_v58  ;;  %v12208_v58 = vld [vmem:[#allocation2 + $0xba8] ss:$40 sps:$4 sm:$0xff]  }
 0x1f7   : > { %4754 = vmatprep.subr.bf16.mxu1 %v12177_v60  ;;  %v12211_v60 = vld [vmem:[#allocation2 + $0x10a8] ss:$40 sps:$4 sm:$0xff]  }
 0x1f9   : > { %4712 = vmatpush2.bf16.msra.mxu0 %v12172_v0 }
 0x1fa   : > { %4755 = vmatpush2.bf16.msra.mxu1 %v12175_v1  ;;  %4713 = vmatprep.subr.bf16.mxu0 %v12180_v2  ;;  %v12216_v1 = vld [vmem:[#allocation2 + $0xb5c] ss:$40 sps:$4 sm:$0xff]  }
 0x1fb   : > { %4756 = vmatprep.subr.bf16.mxu1 %v12183_v3  ;;  %v12219_v2 = vld [vmem:[#allocation2 + $0x105c] ss:$40 sps:$4 sm:$0xff]  }
 0x1fd   : > { %4714 = vmatpush2.bf16.msra.mxu0 %v12178_v6 }
 0x1fe   : > { %4757 = vmatpush2.bf16.msra.mxu1 %v12181_v8  ;;  %4715 = vmatprep.subr.bf16.mxu0 %v12186_v12  ;;  %v12214_v12 = vld [vmem:[#allocation2 + $0xb58] ss:$40 sps:$4 sm:$0xff]  }
 0x1ff   : > { %4758 = vmatprep.subr.bf16.mxu1 %v12189_v13  ;;  %v12222_v13 = vld [vmem:[#allocation2 + $0xb0c] ss:$40 sps:$4 sm:$0xff]  }
 0x201   : > { %4716 = vmatpush2.bf16.msra.mxu0 %v12184_v14  ;;  %v12225_v14 = vld [vmem:[#allocation2 + $0x100c] ss:$40 sps:$4 sm:$0xff]  }
 0x202   : > { %4759 = vmatpush2.bf16.msra.mxu1 %v12187_v15  ;;  %4717 = vmatprep.subr.bf16.mxu0 %v12192_v18  ;;  %v12220_v15 = vld [vmem:[#allocation2 + $0xb08] ss:$40 sps:$4 sm:$0xff]  }
 0x203   : > { %4760 = vmatprep.subr.bf16.mxu1 %v12195_v19  ;;  %v12223_v18 = vld [vmem:[#allocation2 + $0x1008] ss:$40 sps:$4 sm:$0xff]   ;;  %v12228_v19 = vld [vmem:[#allocation2 + $0xabc] ss:$40 sps:$4 sm:$0xff]  }
 0x205   : > { %4718 = vmatpush2.bf16.msra.mxu0 %v12190_v20  ;;  %v12231_v20 = vld [vmem:[#allocation2 + $0xfbc] ss:$40 sps:$4 sm:$0xff]  }
 0x206   : > { %4761 = vmatpush2.bf16.msra.mxu1 %v12193_v21  ;;  %4773 = vmatprep.subr.bf16.mxu0 %v12198_v24  ;;  %v12229_v21 = vld [vmem:[#allocation2 + $0xfb8] ss:$40 sps:$4 sm:$0xff]   ;;  %v12234_v24 = vld [vmem:[#allocation2 + $0xa6c] ss:$40 sps:$4 sm:$0xff]  }
 0x207   : > { %4816 = vmatprep.subr.bf16.mxu1 %v12201_v25  ;;  %v12237_v25 = vld [vmem:[#allocation2 + $0xf6c] ss:$40 sps:$4 sm:$0xff]  }
 0x208   : > { %v4463_v36 = vpop.f32.mrf.mxu0  ;;  %4720 = vmatmul.mubr.bf16.vlgmr.msra.gmra.mxu0 %v12816_v26 }
 0x209   : > { %v4506_v37 = vpop.f32.mrf.mxu1  ;;  %4763 = vmatmul.mubr.bf16.vlgmr.msra.gmra.mxu1 %v12818_v27  ;;  %v4464_v39 = vadd.f32 %v4463_v36, %v12880_v38  ;;  %4774 = vmatpush1.bf16.msra.mxu0 %v12196_v28  ;;  %v12232_v28 = vld [vmem:[#allocation2 + $0xa68] ss:$40 sps:$4 sm:$0xff]   ;;  %v12238_v36 = vld [vmem:[#allocation2 + $0xa18] ss:$40 sps:$4 sm:$0xff]  }
 0x20a   : > { %4817 = vmatpush1.bf16.msra.mxu1 %v12199_v29  ;;  %v4465_v42 = vpop.f32.mrf.mxu0  ;;  %4775 = vmatprep.subr.bf16.mxu0 %v12204_v32  ;;  %v12235_v29 = vld [vmem:[#allocation2 + $0xf68] ss:$40 sps:$4 sm:$0xff]   ;;  %v12240_v32 = vld [vmem:[#allocation2 + $0xa1c] ss:$40 sps:$4 sm:$0xff]  }
 0x20b   : > { %v4508_v43 = vpop.f32.mrf.mxu1  ;;  %4818 = vmatprep.subr.bf16.mxu1 %v12207_v33  ;;  %v12893_v47 = vadd.f32 %v4506_v37, %v4464_v39  ;;  %v4466_v51 = vadd.f32 %v4465_v42, %v12882_v45  ;;  %4805 = vmatprep.mubr.bf16.mxu0 %v12822_v34  ;;  %v12243_v33 = vld [vmem:[#allocation2 + $0xf1c] ss:$40 sps:$4 sm:$0xff]   ;;  %v12241_v37 = vld [vmem:[#allocation2 + $0xf18] ss:$40 sps:$4 sm:$0xff]   ;;  %v12246_v39 = vld [vmem:[#allocation2 + $0xecc] ss:$40 sps:$4 sm:$0xff]  }
 0x20c   : > { %4848 = vmatprep.mubr.bf16.mxu1 %v12824_v35  ;;  %v4467_v53 = vpop.f32.mrf.mxu0  ;;  %v12247_v42 = vld [vmem:[#allocation2 + $0x13c8] ss:$40 sps:$4 sm:$0xff]  }
 0x20d   : > { %v4510_v38 = vpop.f32.mrf.mxu1  ;;  %v12898_v54 = vadd.f32 %v4508_v43, %v4466_v51  ;;  %v4468_v57 = vadd.f32 %v4467_v53, %v12886_v50  ;;  %4776 = vmatpush1.bf16.msra.mxu0 %v12202_v40  ;;  %v12217_v50 = vld [vmem:[#allocation2 + $0x1058] ss:$40 sps:$4 sm:$0xff]   ;;  %v12249_v40 = vld [vmem:[#allocation2 + $0x13cc] ss:$40 sps:$4 sm:$0xff]   ;;  %v12252_v43 = vld [vmem:[#allocation2 + $0xe7c] ss:$40 sps:$4 sm:$0xff]  }
 0x20e   : > { %4819 = vmatpush1.bf16.msra.mxu1 %v12205_v41  ;;  %v4469_v0 = vpop.f32.mrf.mxu0  ;;  %4777 = vmatprep.subr.bf16.mxu0 %v12210_v44  ;;  %v12244_v41 = vld [vmem:[#allocation2 + $0xec8] ss:$40 sps:$4 sm:$0xff]   ;;  %v12255_v44 = vld [vmem:[#allocation2 + $0x137c] ss:$40 sps:$4 sm:$0xff]   ;;  %v12253_v51 = vld [vmem:[#allocation2 + $0x1378] ss:$40 sps:$4 sm:$0xff]  }
 0x20f   : > { %4820 = vmatprep.subr.bf16.mxu1 %v12213_v46  ;;  %v12901_v45 = vadd.f32 %v4510_v38, %v4468_v57  ;;  %v4470_v3 = vadd.f32 %v4469_v0, %v12888_v61  ;;  %v4512_v6 = vpop.f32.mrf.mxu1  ;;  %v12226_v61 = vld [vmem:[#allocation2 + $0xab8] ss:$40 sps:$4 sm:$0xff]   ;;  %v12258_v53 = vld [vmem:[#allocation2 + $0xe2c] ss:$40 sps:$4 sm:$0xff]   ;;  %v12256_v57 = vld [vmem:[#allocation2 + $0xe28] ss:$40 sps:$4 sm:$0xff]  }
 0x210   : > { %v12250_v46 = vld [vmem:[#allocation2 + $0xe78] ss:$40 sps:$4 sm:$0xff]   ;;  %v12261_v38 = vld [vmem:[#allocation2 + $0x132c] ss:$40 sps:$4 sm:$0xff]   ;;  %v12267_v0 = vld [vmem:[#allocation2 + $0x12dc] ss:$40 sps:$4 sm:$0xff]  }
 0x211   : > { %v12904_v8 = vadd.f32 %v4512_v6, %v4470_v3  ;;  %4778 = vmatpush1.bf16.msra.mxu0 %v12208_v58  ;;  %v12259_v58 = vld [vmem:[#allocation2 + $0x1328] ss:$40 sps:$4 sm:$0xff]   ;;  %v12270_v3 = vld [vmem:[#allocation2 + $0xd8c] ss:$40 sps:$4 sm:$0xff]  }
 0x212   : > { %4821 = vmatpush1.bf16.msra.mxu1 %v12211_v60  ;;  %4779 = vmatprep.subr.bf16.mxu0 %v12216_v1  ;;  %v12264_v60 = vld [vmem:[#allocation2 + $0xddc] ss:$40 sps:$4 sm:$0xff]   ;;  %v12262_v1 = vld [vmem:[#allocation2 + $0xdd8] ss:$40 sps:$4 sm:$0xff]   ;;  %v12273_v6 = vld [vmem:[#allocation2 + $0x128c] ss:$40 sps:$4 sm:$0xff]  }
 0x213   : > { %4822 = vmatprep.subr.bf16.mxu1 %v12219_v2  ;;  %v12265_v2 = vld [vmem:[#allocation2 + $0x12d8] ss:$40 sps:$4 sm:$0xff]  }
 0x215   : > { %4780 = vmatpush1.bf16.msra.mxu0 %v12214_v12  ;;  %v12268_v12 = vld [vmem:[#allocation2 + $0xd88] ss:$40 sps:$4 sm:$0xff]  }
 0x216   : > { %4823 = vmatpush1.bf16.msra.mxu1 %v12217_v50  ;;  %4781 = vmatprep.subr.bf16.mxu0 %v12222_v13  ;;  %v12271_v50 = vld [vmem:[#allocation2 + $0x1288] ss:$40 sps:$4 sm:$0xff]   ;;  %v12276_v13 = vld [vmem:[#allocation2 + $0xd3c] ss:$40 sps:$4 sm:$0xff]  }
 0x217   : > { %4824 = vmatprep.subr.bf16.mxu1 %v12225_v14  ;;  %v12279_v14 = vld [vmem:[#allocation2 + $0x123c] ss:$40 sps:$4 sm:$0xff]  }
 0x219   : > { %4782 = vmatpush1.bf16.msra.mxu0 %v12220_v15  ;;  %v12274_v15 = vld [vmem:[#allocation2 + $0xd38] ss:$40 sps:$4 sm:$0xff]  }
 0x21a   : > { %4825 = vmatpush1.bf16.msra.mxu1 %v12223_v18  ;;  %4783 = vmatprep.subr.bf16.mxu0 %v12228_v19  ;;  %v12277_v18 = vld [vmem:[#allocation2 + $0x1238] ss:$40 sps:$4 sm:$0xff]   ;;  %v12282_v19 = vld [vmem:[#allocation2 + $0xcec] ss:$40 sps:$4 sm:$0xff]  }
 0x21b   : > { %4826 = vmatprep.subr.bf16.mxu1 %v12231_v20  ;;  %v12285_v20 = vld [vmem:[#allocation2 + $0x11ec] ss:$40 sps:$4 sm:$0xff]  }
 0x21d   : > { %4784 = vmatpush1.bf16.msra.mxu0 %v12226_v61  ;;  %v12280_v61 = vld [vmem:[#allocation2 + $0xce8] ss:$40 sps:$4 sm:$0xff]  }
 0x21e   : > { %4827 = vmatpush1.bf16.msra.mxu1 %v12229_v21  ;;  %4785 = vmatprep.subr.bf16.mxu0 %v12234_v24  ;;  %v12283_v21 = vld [vmem:[#allocation2 + $0x11e8] ss:$40 sps:$4 sm:$0xff]   ;;  %v12288_v24 = vld [vmem:[#allocation2 + $0xc9c] ss:$40 sps:$4 sm:$0xff]  }
 0x21f   : > { %4828 = vmatprep.subr.bf16.mxu1 %v12237_v25  ;;  %v12291_v25 = vld [vmem:[#allocation2 + $0x119c] ss:$40 sps:$4 sm:$0xff]  }
 0x221   : > { %4786 = vmatpush1.bf16.msra.mxu0 %v12232_v28  ;;  %v12286_v28 = vld [vmem:[#allocation2 + $0xc98] ss:$40 sps:$4 sm:$0xff]  }
 0x222   : > { %4829 = vmatpush1.bf16.msra.mxu1 %v12235_v29  ;;  %4787 = vmatprep.subr.bf16.mxu0 %v12240_v32  ;;  %v12289_v29 = vld [vmem:[#allocation2 + $0x1198] ss:$40 sps:$4 sm:$0xff]   ;;  %v12294_v32 = vld [vmem:[#allocation2 + $0x254] ss:$40 sps:$4 sm:$0xff]  }
 0x223   : > { %4830 = vmatprep.subr.bf16.mxu1 %v12243_v33  ;;  %v12297_v33 = vld [vmem:[#allocation2 + $0x754] ss:$40 sps:$4 sm:$0xff]  }
 0x225   : > { %4788 = vmatpush1.bf16.msra.mxu0 %v12238_v36  ;;  %v12292_v36 = vld [vmem:[#allocation2 + $0x250] ss:$40 sps:$4 sm:$0xff]  }
 0x226   : > { %4831 = vmatpush1.bf16.msra.mxu1 %v12241_v37  ;;  %4789 = vmatprep.subr.bf16.mxu0 %v12246_v39  ;;  %v12295_v37 = vld [vmem:[#allocation2 + $0x750] ss:$40 sps:$4 sm:$0xff]   ;;  %v12300_v39 = vld [vmem:[#allocation2 + $0x204] ss:$40 sps:$4 sm:$0xff]  }
 0x227   : > { %4832 = vmatprep.subr.bf16.mxu1 %v12249_v40  ;;  %v12303_v40 = vld [vmem:[#allocation2 + $0x704] ss:$40 sps:$4 sm:$0xff]  }
 0x229   : > { %4790 = vmatpush2.bf16.msra.mxu0 %v12244_v41 }
 0x22a   : > { %4833 = vmatpush2.bf16.msra.mxu1 %v12247_v42  ;;  %4791 = vmatprep.subr.bf16.mxu0 %v12252_v43 }
 0x22b   : > { %4834 = vmatprep.subr.bf16.mxu1 %v12255_v44  ;;  %v12298_v44 = vld [vmem:[#allocation2 + $0x200] ss:$40 sps:$4 sm:$0xff]  }
 0x22d   : > { %4792 = vmatpush2.bf16.msra.mxu0 %v12250_v46  ;;  %v12301_v46 = vld [vmem:[#allocation2 + $0x700] ss:$40 sps:$4 sm:$0xff]  }
 0x22e   : > { %4835 = vmatpush2.bf16.msra.mxu1 %v12253_v51  ;;  %4793 = vmatprep.subr.bf16.mxu0 %v12258_v53 }
 0x22f   : > { %4836 = vmatprep.subr.bf16.mxu1 %v12261_v38  ;;  %v12306_v38 = vld [vmem:[#allocation2 + $0x1b4] ss:$40 sps:$4 sm:$0xff]  }
 0x231   : > { %4794 = vmatpush2.bf16.msra.mxu0 %v12256_v57  ;;  %v12309_v57 = vld [vmem:[#allocation2 + $0x6b4] ss:$40 sps:$4 sm:$0xff]  }
 0x232   : > { %4837 = vmatpush2.bf16.msra.mxu1 %v12259_v58  ;;  %4795 = vmatprep.subr.bf16.mxu0 %v12264_v60 }
 0x233   : > { %4838 = vmatprep.subr.bf16.mxu1 %v12267_v0 }
 0x235   : > { %4796 = vmatpush2.bf16.msra.mxu0 %v12262_v1  ;;  %v12304_v1 = vld [vmem:[#allocation2 + $0x1b0] ss:$40 sps:$4 sm:$0xff]  }
 0x236   : > { %4839 = vmatpush2.bf16.msra.mxu1 %v12265_v2  ;;  %4797 = vmatprep.subr.bf16.mxu0 %v12270_v3  ;;  %v12307_v2 = vld [vmem:[#allocation2 + $0x6b0] ss:$40 sps:$4 sm:$0xff]   ;;  %v12312_v3 = vld [vmem:[#allocation2 + $0x164] ss:$40 sps:$4 sm:$0xff]  }
 0x237   : > { %4840 = vmatprep.subr.bf16.mxu1 %v12273_v6  ;;  %v12315_v6 = vld [vmem:[#allocation2 + $0x664] ss:$40 sps:$4 sm:$0xff]  }
 0x239   : > { %4798 = vmatpush2.bf16.msra.mxu0 %v12268_v12  ;;  %v12310_v12 = vld [vmem:[#allocation2 + $0x160] ss:$40 sps:$4 sm:$0xff]  }
 0x23a   : > { %4841 = vmatpush2.bf16.msra.mxu1 %v12271_v50  ;;  %4799 = vmatprep.subr.bf16.mxu0 %v12276_v13  ;;  %v12313_v50 = vld [vmem:[#allocation2 + $0x660] ss:$40 sps:$4 sm:$0xff]   ;;  %v12316_v13 = vld [vmem:[#allocation2 + $0x110] ss:$40 sps:$4 sm:$0xff]  }
 0x23b   : > { %4842 = vmatprep.subr.bf16.mxu1 %v12279_v14  ;;  %v12319_v14 = vld [vmem:[#allocation2 + $0x610] ss:$40 sps:$4 sm:$0xff]  }
 0x23d   : > { %4800 = vmatpush2.bf16.msra.mxu0 %v12274_v15  ;;  %v12324_v15 = vld [vmem:[#allocation2 + $0xc4] ss:$40 sps:$4 sm:$0xff]  }
 0x23e   : > { %4843 = vmatpush2.bf16.msra.mxu1 %v12277_v18  ;;  %4801 = vmatprep.subr.bf16.mxu0 %v12282_v19  ;;  %v12327_v18 = vld [vmem:[#allocation2 + $0x5c4] ss:$40 sps:$4 sm:$0xff]   ;;  %v12322_v19 = vld [vmem:[#allocation2 + $0xc0] ss:$40 sps:$4 sm:$0xff]  }
 0x23f   : > { %4844 = vmatprep.subr.bf16.mxu1 %v12285_v20  ;;  %v12325_v20 = vld [vmem:[#allocation2 + $0x5c0] ss:$40 sps:$4 sm:$0xff]  }
 0x241   : > { %4802 = vmatpush2.bf16.msra.mxu0 %v12280_v61  ;;  %v12330_v61 = vld [vmem:[#allocation2 + $0x74] ss:$40 sps:$4 sm:$0xff]  }
 0x242   : > { %4845 = vmatpush2.bf16.msra.mxu1 %v12283_v21  ;;  %4803 = vmatprep.subr.bf16.mxu0 %v12288_v24  ;;  %v12333_v21 = vld [vmem:[#allocation2 + $0x574] ss:$40 sps:$4 sm:$0xff]   ;;  %v12328_v24 = vld [vmem:[#allocation2 + $0x70] ss:$40 sps:$4 sm:$0xff]  }
 0x243   : > { %4846 = vmatprep.subr.bf16.mxu1 %v12291_v25  ;;  %v12331_v25 = vld [vmem:[#allocation2 + $0x570] ss:$40 sps:$4 sm:$0xff]  }
 0x245   : > { %4804 = vmatpush2.bf16.msra.mxu0 %v12286_v28  ;;  %v12336_v28 = vld [vmem:[#allocation2 + $0x24] ss:$40 sps:$4 sm:$0xff]  }
 0x246   : > { %4847 = vmatpush2.bf16.msra.mxu1 %v12289_v29  ;;  %4859 = vmatprep.subr.bf16.mxu0 %v12294_v32  ;;  %v12339_v29 = vld [vmem:[#allocation2 + $0x524] ss:$40 sps:$4 sm:$0xff]   ;;  %v12334_v32 = vld [vmem:[#allocation2 + $0x20] ss:$40 sps:$4 sm:$0xff]  }
 0x247   : > { %4902 = vmatprep.subr.bf16.mxu1 %v12297_v33  ;;  %v12337_v33 = vld [vmem:[#allocation2 + $0x520] ss:$40 sps:$4 sm:$0xff]  }
 0x248   : > { %v4549_v41 = vpop.f32.mrf.mxu0  ;;  %4806 = vmatmul.mubr.bf16.vlgmr.msra.gmra.mxu0 %v12806_v7 }
 0x249   : > { %v4592_v42 = vpop.f32.mrf.mxu1  ;;  %4849 = vmatmul.mubr.bf16.vlgmr.msra.gmra.mxu1 %v12809_v10  ;;  %4860 = vmatpush1.bf16.msra.mxu0 %v12292_v36  ;;  %v12342_v36 = vld [vmem:[#allocation2 + $0x4d4] ss:$40 sps:$4 sm:$0xff]  }
 0x24a   : > { %v12908_v43 = vadd.f32 %v4592_v42, %v4549_v41  ;;  %4903 = vmatpush1.bf16.msra.mxu1 %v12295_v37  ;;  %v12910_v51 = vpop.f32.mrf.mxu0  ;;  %4861 = vmatprep.subr.bf16.mxu0 %v12300_v39  ;;  %v12345_v37 = vld [vmem:[#allocation2 + $0x9d4] ss:$40 sps:$4 sm:$0xff]   ;;  %v12340_v39 = vld [vmem:[#allocation2 + $0x4d0] ss:$40 sps:$4 sm:$0xff]   ;;  %v12348_v41 = vld [vmem:[#allocation2 + $0x484] ss:$40 sps:$4 sm:$0xff]  }
 0x24b   : > { %v12912_v53 = vpop.f32.mrf.mxu1  ;;  %4904 = vmatprep.subr.bf16.mxu1 %v12303_v40  ;;  %4891 = vmatprep.mubr.bf16.mxu0 %v12795_v52  ;;  %v12318_v52 = vld [vmem:[#allocation2 + $0x114] ss:$40 sps:$4 sm:$0xff]   ;;  %v12343_v40 = vld [vmem:[#allocation2 + $0x9d0] ss:$40 sps:$4 sm:$0xff]   ;;  %v12351_v42 = vld [vmem:[#allocation2 + $0x984] ss:$40 sps:$4 sm:$0xff]  }
 0x24c   : > { %4934 = vmatprep.mubr.bf16.mxu1 %v12800_v59  ;;  %v4553_v58 = vpop.f32.mrf.mxu0  ;;  %v12321_v59 = vld [vmem:[#allocation2 + $0x614] ss:$40 sps:$4 sm:$0xff]  }
 0x24d   : > { %v4596_v60 = vpop.f32.mrf.mxu1  ;;  %4862 = vmatpush1.bf16.msra.mxu0 %v12298_v44  ;;  %v12346_v44 = vld [vmem:[#allocation2 + $0x480] ss:$40 sps:$4 sm:$0xff]  }
 0x24e   : > { %v12916_v0 = vadd.f32 %v4596_v60, %v4553_v58  ;;  %4905 = vmatpush1.bf16.msra.mxu1 %v12301_v46  ;;  %4863 = vmatprep.subr.bf16.mxu0 %v12306_v38  ;;  %v12349_v46 = vld [vmem:[#allocation2 + $0x980] ss:$40 sps:$4 sm:$0xff]   ;;  %v12354_v38 = vld [vmem:[#allocation2 + $0x434] ss:$40 sps:$4 sm:$0xff]   ;;  %v12352_v58 = vld [vmem:[#allocation2 + $0x430] ss:$40 sps:$4 sm:$0xff]  }
 0x24f   : > { %4906 = vmatprep.subr.bf16.mxu1 %v12309_v57  ;;  %v12357_v57 = vld [vmem:[#allocation2 + $0x934] ss:$40 sps:$4 sm:$0xff]   ;;  %v12355_v60 = vld [vmem:[#allocation2 + $0x930] ss:$40 sps:$4 sm:$0xff]  }
 0x251   : > { %4864 = vmatpush1.bf16.msra.mxu0 %v12304_v1  ;;  %v12360_v1 = vld [vmem:[#allocation2 + $0x3e4] ss:$40 sps:$4 sm:$0xff]  }
 0x252   : > { %4907 = vmatpush1.bf16.msra.mxu1 %v12307_v2  ;;  %4865 = vmatprep.subr.bf16.mxu0 %v12312_v3  ;;  %v12363_v2 = vld [vmem:[#allocation2 + $0x8e4] ss:$40 sps:$4 sm:$0xff]   ;;  %v12358_v3 = vld [vmem:[#allocation2 + $0x3e0] ss:$40 sps:$4 sm:$0xff]  }
 0x253   : > { %4908 = vmatprep.subr.bf16.mxu1 %v12315_v6  ;;  %v12361_v6 = vld [vmem:[#allocation2 + $0x8e0] ss:$40 sps:$4 sm:$0xff]  }
 0x255   : > { %4866 = vmatpush1.bf16.msra.mxu0 %v12310_v12  ;;  %v12366_v12 = vld [vmem:[#allocation2 + $0x394] ss:$40 sps:$4 sm:$0xff]  }
 0x256   : > { %4909 = vmatpush1.bf16.msra.mxu1 %v12313_v50  ;;  %4867 = vmatprep.subr.bf16.mxu0 %v12318_v52  ;;  %v12369_v50 = vld [vmem:[#allocation2 + $0x894] ss:$40 sps:$4 sm:$0xff]   ;;  %v12364_v52 = vld [vmem:[#allocation2 + $0x390] ss:$40 sps:$4 sm:$0xff]  }
 0x257   : > { %4910 = vmatprep.subr.bf16.mxu1 %v12321_v59  ;;  %v12367_v59 = vld [vmem:[#allocation2 + $0x890] ss:$40 sps:$4 sm:$0xff]  }
 0x259   : > { %4868 = vmatpush1.bf16.msra.mxu0 %v12316_v13  ;;  %v12372_v13 = vld [vmem:[#allocation2 + $0x344] ss:$40 sps:$4 sm:$0xff]  }
 0x25a   : > { %4911 = vmatpush1.bf16.msra.mxu1 %v12319_v14  ;;  %4869 = vmatprep.subr.bf16.mxu0 %v12324_v15  ;;  %v12375_v14 = vld [vmem:[#allocation2 + $0x844] ss:$40 sps:$4 sm:$0xff]   ;;  %v12370_v15 = vld [vmem:[#allocation2 + $0x340] ss:$40 sps:$4 sm:$0xff]  }
 0x25b   : > { %4912 = vmatprep.subr.bf16.mxu1 %v12327_v18  ;;  %v12373_v18 = vld [vmem:[#allocation2 + $0x840] ss:$40 sps:$4 sm:$0xff]  }
 0x25d   : > { %4870 = vmatpush1.bf16.msra.mxu0 %v12322_v19  ;;  %v12378_v19 = vld [vmem:[#allocation2 + $0x2f4] ss:$40 sps:$4 sm:$0xff]  }
 0x25e   : > { %4913 = vmatpush1.bf16.msra.mxu1 %v12325_v20  ;;  %4871 = vmatprep.subr.bf16.mxu0 %v12330_v61  ;;  %v12381_v20 = vld [vmem:[#allocation2 + $0x7f4] ss:$40 sps:$4 sm:$0xff]   ;;  %v12376_v61 = vld [vmem:[#allocation2 + $0x2f0] ss:$40 sps:$4 sm:$0xff]  }
 0x25f   : > { %4914 = vmatprep.subr.bf16.mxu1 %v12333_v21  ;;  %v12379_v21 = vld [vmem:[#allocation2 + $0x7f0] ss:$40 sps:$4 sm:$0xff]  }
 0x261   : > { %4872 = vmatpush1.bf16.msra.mxu0 %v12328_v24  ;;  %v12384_v24 = vld [vmem:[#allocation2 + $0x2a4] ss:$40 sps:$4 sm:$0xff]  }
 0x262   : > { %4915 = vmatpush1.bf16.msra.mxu1 %v12331_v25  ;;  %4873 = vmatprep.subr.bf16.mxu0 %v12336_v28  ;;  %v12387_v25 = vld [vmem:[#allocation2 + $0x7a4] ss:$40 sps:$4 sm:$0xff]   ;;  %v12382_v28 = vld [vmem:[#allocation2 + $0x2a0] ss:$40 sps:$4 sm:$0xff]  }
 0x263   : > { %4916 = vmatprep.subr.bf16.mxu1 %v12339_v29  ;;  %v12385_v29 = vld [vmem:[#allocation2 + $0x7a0] ss:$40 sps:$4 sm:$0xff]  }
 0x265   : > { %4874 = vmatpush1.bf16.msra.mxu0 %v12334_v32  ;;  %v12390_v32 = vld [vmem:[#allocation2 + $0xc54] ss:$40 sps:$4 sm:$0xff]  }
 0x266   : > { %4917 = vmatpush1.bf16.msra.mxu1 %v12337_v33  ;;  %4875 = vmatprep.subr.bf16.mxu0 %v12342_v36  ;;  %v12393_v33 = vld [vmem:[#allocation2 + $0x1154] ss:$40 sps:$4 sm:$0xff]   ;;  %v12388_v36 = vld [vmem:[#allocation2 + $0xc50] ss:$40 sps:$4 sm:$0xff]  }
 0x267   : > { %4918 = vmatprep.subr.bf16.mxu1 %v12345_v37  ;;  %v12391_v37 = vld [vmem:[#allocation2 + $0x1150] ss:$40 sps:$4 sm:$0xff]  }
 0x269   : > { %4876 = vmatpush2.bf16.msra.mxu0 %v12340_v39  ;;  %v12918_v39 = vpop.f32.mrf.mxu0 }
 0x26a   : > { %4919 = vmatpush2.bf16.msra.mxu1 %v12343_v40  ;;  %4877 = vmatprep.subr.bf16.mxu0 %v12348_v41  ;;  %v12920_v40 = vpop.f32.mrf.mxu1  ;;  %v12396_v41 = vld [vmem:[#allocation2 + $0xc04] ss:$40 sps:$4 sm:$0xff]  }
 0x26b   : > { %4920 = vmatprep.subr.bf16.mxu1 %v12351_v42  ;;  %v12399_v42 = vld [vmem:[#allocation2 + $0x1104] ss:$40 sps:$4 sm:$0xff]  }
 0x26d   : > { %4878 = vmatpush2.bf16.msra.mxu0 %v12346_v44 }
 0x26e   : > { %4921 = vmatpush2.bf16.msra.mxu1 %v12349_v46  ;;  %4879 = vmatprep.subr.bf16.mxu0 %v12354_v38 }
 0x26f   : > { %4922 = vmatprep.subr.bf16.mxu1 %v12357_v57  ;;  %v12394_v57 = vld [vmem:[#allocation2 + $0xc00] ss:$40 sps:$4 sm:$0xff]  }
 0x271   : > { %4880 = vmatpush2.bf16.msra.mxu0 %v12352_v58  ;;  %v12397_v58 = vld [vmem:[#allocation2 + $0x1100] ss:$40 sps:$4 sm:$0xff]  }
 0x272   : > { %4923 = vmatpush2.bf16.msra.mxu1 %v12355_v60  ;;  %4881 = vmatprep.subr.bf16.mxu0 %v12360_v1 }
 0x273   : > { %4924 = vmatprep.subr.bf16.mxu1 %v12363_v2  ;;  %v12402_v2 = vld [vmem:[#allocation2 + $0xbb4] ss:$40 sps:$4 sm:$0xff]  }
 0x275   : > { %4882 = vmatpush2.bf16.msra.mxu0 %v12358_v3  ;;  %v12405_v3 = vld [vmem:[#allocation2 + $0x10b4] ss:$40 sps:$4 sm:$0xff]  }
 0x276   : > { %4925 = vmatpush2.bf16.msra.mxu1 %v12361_v6  ;;  %4883 = vmatprep.subr.bf16.mxu0 %v12366_v12  ;;  %v12403_v12 = vld [vmem:[#allocation2 + $0x10b0] ss:$40 sps:$4 sm:$0xff]  }
 0x277   : > { %4926 = vmatprep.subr.bf16.mxu1 %v12369_v50 }
 0x279   : > { %4884 = vmatpush2.bf16.msra.mxu0 %v12364_v52  ;;  %v12408_v52 = vld [vmem:[#allocation2 + $0xb64] ss:$40 sps:$4 sm:$0xff]  }
 0x27a   : > { %4927 = vmatpush2.bf16.msra.mxu1 %v12367_v59  ;;  %4885 = vmatprep.subr.bf16.mxu0 %v12372_v13  ;;  %v12411_v59 = vld [vmem:[#allocation2 + $0x1064] ss:$40 sps:$4 sm:$0xff]  }
 0x27b   : > { %4928 = vmatprep.subr.bf16.mxu1 %v12375_v14  ;;  %v12406_v14 = vld [vmem:[#allocation2 + $0xb60] ss:$40 sps:$4 sm:$0xff]  }
 0x27d   : > { %4886 = vmatpush2.bf16.msra.mxu0 %v12370_v15  ;;  %v12417_v15 = vld [vmem:[#allocation2 + $0x1014] ss:$40 sps:$4 sm:$0xff]  }
 0x27e   : > { %4929 = vmatpush2.bf16.msra.mxu1 %v12373_v18  ;;  %4887 = vmatprep.subr.bf16.mxu0 %v12378_v19  ;;  %v12415_v18 = vld [vmem:[#allocation2 + $0x1010] ss:$40 sps:$4 sm:$0xff]   ;;  %v12420_v19 = vld [vmem:[#allocation2 + $0xac4] ss:$40 sps:$4 sm:$0xff]  }
 0x27f   : > { %4930 = vmatprep.subr.bf16.mxu1 %v12381_v20  ;;  %v12423_v20 = vld [vmem:[#allocation2 + $0xfc4] ss:$40 sps:$4 sm:$0xff]  }
 0x281   : > { %4888 = vmatpush2.bf16.msra.mxu0 %v12376_v61  ;;  %v12418_v61 = vld [vmem:[#allocation2 + $0xac0] ss:$40 sps:$4 sm:$0xff]  }
 0x282   : > { %4931 = vmatpush2.bf16.msra.mxu1 %v12379_v21  ;;  %4889 = vmatprep.subr.bf16.mxu0 %v12384_v24  ;;  %v12421_v21 = vld [vmem:[#allocation2 + $0xfc0] ss:$40 sps:$4 sm:$0xff]   ;;  %v12426_v24 = vld [vmem:[#allocation2 + $0xa74] ss:$40 sps:$4 sm:$0xff]  }
 0x283   : > { %4932 = vmatprep.subr.bf16.mxu1 %v12387_v25  ;;  %v12429_v25 = vld [vmem:[#allocation2 + $0xf74] ss:$40 sps:$4 sm:$0xff]  }
 0x285   : > { %4890 = vmatpush2.bf16.msra.mxu0 %v12382_v28  ;;  %v12424_v28 = vld [vmem:[#allocation2 + $0xa70] ss:$40 sps:$4 sm:$0xff]  }
 0x286   : > { %4933 = vmatpush2.bf16.msra.mxu1 %v12385_v29  ;;  %4945 = vmatprep.subr.bf16.mxu0 %v12390_v32  ;;  %v12427_v29 = vld [vmem:[#allocation2 + $0xf70] ss:$40 sps:$4 sm:$0xff]   ;;  %v12432_v32 = vld [vmem:[#allocation2 + $0xa24] ss:$40 sps:$4 sm:$0xff]  }
 0x287   : > { %4988 = vmatprep.subr.bf16.mxu1 %v12393_v33  ;;  %v12435_v33 = vld [vmem:[#allocation2 + $0xf24] ss:$40 sps:$4 sm:$0xff]  }
 0x288   : > { %v4635_v44 = vpop.f32.mrf.mxu0  ;;  %4892 = vmatmul.mubr.bf16.vlgmr.msra.gmra.mxu0 %v12816_v26 }
 0x289   : > { %v4678_v46 = vpop.f32.mrf.mxu1  ;;  %4935 = vmatmul.mubr.bf16.vlgmr.msra.gmra.mxu1 %v12818_v27  ;;  %v4636_v38 = vadd.f32 %v4635_v44, %v12908_v43  ;;  %4946 = vmatpush1.bf16.msra.mxu0 %v12388_v36  ;;  %v12400_v43 = vld [vmem:[#allocation2 + $0xbb0] ss:$40 sps:$4 sm:$0xff]   ;;  %v12430_v36 = vld [vmem:[#allocation2 + $0xa20] ss:$40 sps:$4 sm:$0xff]  }
 0x28a   : > { %4989 = vmatpush1.bf16.msra.mxu1 %v12391_v37  ;;  %v12925_v60 = vpop.f32.mrf.mxu0  ;;  %4947 = vmatprep.subr.bf16.mxu0 %v12396_v41  ;;  %v12433_v37 = vld [vmem:[#allocation2 + $0xf20] ss:$40 sps:$4 sm:$0xff]   ;;  %v12438_v41 = vld [vmem:[#allocation2 + $0xed4] ss:$40 sps:$4 sm:$0xff]   ;;  %v12436_v44 = vld [vmem:[#allocation2 + $0xed0] ss:$40 sps:$4 sm:$0xff]  }
 0x28b   : > { %v12927_v1 = vpop.f32.mrf.mxu1  ;;  %4990 = vmatprep.subr.bf16.mxu1 %v12399_v42  ;;  %v12929_v6 = vadd.f32 %v4678_v46, %v4636_v38  ;;  %4977 = vmatprep.mubr.bf16.mxu0 %v12822_v34  ;;  %v12409_v34 = vld [vmem:[#allocation2 + $0x1060] ss:$40 sps:$4 sm:$0xff]   ;;  %v12441_v42 = vld [vmem:[#allocation2 + $0x13d4] ss:$40 sps:$4 sm:$0xff]   ;;  %v12439_v46 = vld [vmem:[#allocation2 + $0x13d0] ss:$40 sps:$4 sm:$0xff]  }
 0x28c   : > { %5020 = vmatprep.mubr.bf16.mxu1 %v12824_v35  ;;  %v4639_v26 = vpop.f32.mrf.mxu0  ;;  %v12414_v35 = vld [vmem:[#allocation2 + $0xb14] ss:$40 sps:$4 sm:$0xff]   ;;  %v12444_v38 = vld [vmem:[#allocation2 + $0xe84] ss:$40 sps:$4 sm:$0xff]  }
 0x28d   : > { %v4640_v27 = vadd.f32 %v4639_v26, %v12916_v0  ;;  %4948 = vmatpush1.bf16.msra.mxu0 %v12394_v57  ;;  %v4682_v50 = vpop.f32.mrf.mxu1  ;;  %v12412_v0 = vld [vmem:[#allocation2 + $0xb10] ss:$40 sps:$4 sm:$0xff]   ;;  %v12447_v57 = vld [vmem:[#allocation2 + $0x1384] ss:$40 sps:$4 sm:$0xff]   ;;  %v12453_v26 = vld [vmem:[#allocation2 + $0x1334] ss:$40 sps:$4 sm:$0xff]  }
 0x28e   : > { %4991 = vmatpush1.bf16.msra.mxu1 %v12397_v58  ;;  %4949 = vmatprep.subr.bf16.mxu0 %v12402_v2  ;;  %v12442_v58 = vld [vmem:[#allocation2 + $0xe80] ss:$40 sps:$4 sm:$0xff]  }
 0x28f   : > { %4992 = vmatprep.subr.bf16.mxu1 %v12405_v3  ;;  %v12934_v13 = vadd.f32 %v4682_v50, %v4640_v27  ;;  %v12445_v2 = vld [vmem:[#allocation2 + $0x1380] ss:$40 sps:$4 sm:$0xff]   ;;  %v12450_v3 = vld [vmem:[#allocation2 + $0xe34] ss:$40 sps:$4 sm:$0xff]   ;;  %v12448_v27 = vld [vmem:[#allocation2 + $0xe30] ss:$40 sps:$4 sm:$0xff]  }
 0x290   : > { %v12459_v50 = vld [vmem:[#allocation2 + $0x12e4] ss:$40 sps:$4 sm:$0xff]  }
 0x291   : > { %4950 = vmatpush1.bf16.msra.mxu0 %v12400_v43  ;;  %v12451_v43 = vld [vmem:[#allocation2 + $0x1330] ss:$40 sps:$4 sm:$0xff]  }
 0x292   : > { %4993 = vmatpush1.bf16.msra.mxu1 %v12403_v12  ;;  %4951 = vmatprep.subr.bf16.mxu0 %v12408_v52  ;;  %v12456_v12 = vld [vmem:[#allocation2 + $0xde4] ss:$40 sps:$4 sm:$0xff]   ;;  %v12454_v52 = vld [vmem:[#allocation2 + $0xde0] ss:$40 sps:$4 sm:$0xff]  }
 0x293   : > { %4994 = vmatprep.subr.bf16.mxu1 %v12411_v59  ;;  %v12457_v59 = vld [vmem:[#allocation2 + $0x12e0] ss:$40 sps:$4 sm:$0xff]  }
 0x295   : > { %4952 = vmatpush1.bf16.msra.mxu0 %v12406_v14  ;;  %v12462_v14 = vld [vmem:[#allocation2 + $0xd94] ss:$40 sps:$4 sm:$0xff]  }
 0x296   : > { %4995 = vmatpush1.bf16.msra.mxu1 %v12409_v34  ;;  %4953 = vmatprep.subr.bf16.mxu0 %v12414_v35  ;;  %v12465_v34 = vld [vmem:[#allocation2 + $0x1294] ss:$40 sps:$4 sm:$0xff]   ;;  %v12460_v35 = vld [vmem:[#allocation2 + $0xd90] ss:$40 sps:$4 sm:$0xff]  }
 0x297   : > { %4996 = vmatprep.subr.bf16.mxu1 %v12417_v15  ;;  %v12463_v15 = vld [vmem:[#allocation2 + $0x1290] ss:$40 sps:$4 sm:$0xff]  }
 0x299   : > { %4954 = vmatpush1.bf16.msra.mxu0 %v12412_v0  ;;  %v12468_v0 = vld [vmem:[#allocation2 + $0xd44] ss:$40 sps:$4 sm:$0xff]  }
 0x29a   : > { %4997 = vmatpush1.bf16.msra.mxu1 %v12415_v18  ;;  %4955 = vmatprep.subr.bf16.mxu0 %v12420_v19  ;;  %v12471_v18 = vld [vmem:[#allocation2 + $0x1244] ss:$40 sps:$4 sm:$0xff]   ;;  %v12466_v19 = vld [vmem:[#allocation2 + $0xd40] ss:$40 sps:$4 sm:$0xff]  }
 0x29b   : > { %4998 = vmatprep.subr.bf16.mxu1 %v12423_v20  ;;  %v12469_v20 = vld [vmem:[#allocation2 + $0x1240] ss:$40 sps:$4 sm:$0xff]  }
 0x29d   : > { %4956 = vmatpush1.bf16.msra.mxu0 %v12418_v61  ;;  %v12474_v61 = vld [vmem:[#allocation2 + $0xcf4] ss:$40 sps:$4 sm:$0xff]  }
 0x29e   : > { %4999 = vmatpush1.bf16.msra.mxu1 %v12421_v21  ;;  %4957 = vmatprep.subr.bf16.mxu0 %v12426_v24  ;;  %v12477_v21 = vld [vmem:[#allocation2 + $0x11f4] ss:$40 sps:$4 sm:$0xff]   ;;  %v12472_v24 = vld [vmem:[#allocation2 + $0xcf0] ss:$40 sps:$4 sm:$0xff]  }
 0x29f   : > { %5000 = vmatprep.subr.bf16.mxu1 %v12429_v25  ;;  %v12475_v25 = vld [vmem:[#allocation2 + $0x11f0] ss:$40 sps:$4 sm:$0xff]  }
 0x2a1   : > { %4958 = vmatpush1.bf16.msra.mxu0 %v12424_v28  ;;  %v12480_v28 = vld [vmem:[#allocation2 + $0xca4] ss:$40 sps:$4 sm:$0xff]  }
 0x2a2   : > { %5001 = vmatpush1.bf16.msra.mxu1 %v12427_v29  ;;  %4959 = vmatprep.subr.bf16.mxu0 %v12432_v32  ;;  %v12483_v29 = vld [vmem:[#allocation2 + $0x11a4] ss:$40 sps:$4 sm:$0xff]  }
 0x2a3   : > { %5002 = vmatprep.subr.bf16.mxu1 %v12435_v33  ;;  %v5314_v32 = vld [vmem:[#allocation6 + $0x1c0] sm:$0xff] }
 0x2a4   : > { %v5318_v33 = vld [vmem:[#allocation6 + $0x1e0] sm:$0xff] }
 0x2a5   : > { %4960 = vmatpush1.bf16.msra.mxu0 %v12430_v36  ;;  %v12478_v36 = vld [vmem:[#allocation2 + $0xca0] ss:$40 sps:$4 sm:$0xff]  }
 0x2a6   : > { %5003 = vmatpush1.bf16.msra.mxu1 %v12433_v37  ;;  %4961 = vmatprep.subr.bf16.mxu0 %v12438_v41  ;;  %v12481_v37 = vld [vmem:[#allocation2 + $0x11a0] ss:$40 sps:$4 sm:$0xff]   ;;  %v10881_v41 = vcombine.high %v5314_v32, %v5318_v33 }
 0x2a7   : > { %5004 = vmatprep.subr.bf16.mxu1 %v12441_v42  ;;  %v5306_v42 = vld [vmem:[#allocation6 + $0x180] sm:$0xff] }
 0x2a9   : > { %4962 = vmatpush2.bf16.msra.mxu0 %v12436_v44  ;;  %v5310_v44 = vld [vmem:[#allocation6 + $0x1a0] sm:$0xff] }
 0x2aa   : > { %5005 = vmatpush2.bf16.msra.mxu1 %v12439_v46  ;;  %4963 = vmatprep.subr.bf16.mxu0 %v12444_v38  ;;  %v10880_v46 = vcombine.low %v5314_v32, %v5318_v33  ;;  %v12936_v38 = vpop.f32.mrf.mxu0  ;;  %v5438_v32 = vld [vmem:[#allocation6 + $0x5a0] sm:$0xff] }
 0x2ab   : > { %5006 = vmatprep.subr.bf16.mxu1 %v12447_v57  ;;  %v12938_v57 = vpop.f32.mrf.mxu1 }
 0x2ad   : > { %4964 = vmatpush2.bf16.msra.mxu0 %v12442_v58  ;;  %v10873_v58 = vcombine.high %v5306_v42, %v5310_v44 }
 0x2ae   : > { %5007 = vmatpush2.bf16.msra.mxu1 %v12445_v2  ;;  %4965 = vmatprep.subr.bf16.mxu0 %v12450_v3  ;;  %v5298_v2 = vld [vmem:[#allocation6 + $0x140] sm:$0xff] }
 0x2af   : > { %5008 = vmatprep.subr.bf16.mxu1 %v12453_v26  ;;  %v5302_v3 = vld [vmem:[#allocation6 + $0x160] sm:$0xff] }
 0x2b1   : > { %4966 = vmatpush2.bf16.msra.mxu0 %v12448_v27 }
 0x2b2   : > { %5009 = vmatpush2.bf16.msra.mxu1 %v12451_v43  ;;  %4967 = vmatprep.subr.bf16.mxu0 %v12456_v12  ;;  %v10872_v43 = vcombine.low %v5306_v42, %v5310_v44  ;;  %v5430_v42 = vld [vmem:[#allocation6 + $0x560] sm:$0xff] }
 0x2b3   : > { %5010 = vmatprep.subr.bf16.mxu1 %v12459_v50  ;;  %v5274_v44 = vld [vmem:[#allocation6 + $0x80] sm:$0xff] }
 0x2b5   : > { %4968 = vmatpush2.bf16.msra.mxu0 %v12454_v52  ;;  %v10865_v52 = vcombine.high %v5298_v2, %v5302_v3 }
 0x2b6   : > { %5011 = vmatpush2.bf16.msra.mxu1 %v12457_v59  ;;  %4969 = vmatprep.subr.bf16.mxu0 %v12462_v14  ;;  %v5290_v14 = vld [vmem:[#allocation6 + $0x100] sm:$0xff] }
 0x2b7   : > { %5012 = vmatprep.subr.bf16.mxu1 %v12465_v34  ;;  %v5294_v34 = vld [vmem:[#allocation6 + $0x120] sm:$0xff] }
 0x2b8   : > { %v10856_v33 = vcombine.low %v5290_v14, %v5294_v34 }
 0x2b9   : > { %4970 = vmatpush2.bf16.msra.mxu0 %v12460_v35 }
 0x2ba   : > { %5013 = vmatpush2.bf16.msra.mxu1 %v12463_v15  ;;  %4971 = vmatprep.subr.bf16.mxu0 %v12468_v0  ;;  %v10864_v0 = vcombine.low %v5298_v2, %v5302_v3 }
 0x2bb   : > { %5014 = vmatprep.subr.bf16.mxu1 %v12471_v18 }
 0x2bd   : > { %4972 = vmatpush2.bf16.msra.mxu0 %v12466_v19  ;;  %v5282_v19 = vld [vmem:[#allocation6 + $0xc0] sm:$0xff] }
 0x2be   : > { %5015 = vmatpush2.bf16.msra.mxu1 %v12469_v20  ;;  %4973 = vmatprep.subr.bf16.mxu0 %v12474_v61  ;;  %v5286_v61 = vld [vmem:[#allocation6 + $0xe0] sm:$0xff] }
 0x2bf   : > { %5016 = vmatprep.subr.bf16.mxu1 %v12477_v21  ;;  %v5442_v21 = vld [vmem:[#allocation6 + $0x5c0] sm:$0xff]  ;;  %v10848_v3 = vcombine.low %v5282_v19, %v5286_v61 }
 0x2c1   : > { %4974 = vmatpush2.bf16.msra.mxu0 %v12472_v24  ;;  %v5446_v24 = vld [vmem:[#allocation6 + $0x5e0] sm:$0xff] }
 0x2c2   : > { %5017 = vmatpush2.bf16.msra.mxu1 %v12475_v25  ;;  %4975 = vmatprep.subr.bf16.mxu0 %v12480_v28  ;;  %v11008_v25 = vcombine.low %v5442_v21, %v5446_v24  ;;  %v11009_v28 = vcombine.high %v5442_v21, %v5446_v24  ;;  %v5378_v21 = vld [vmem:[#allocation6 + $0x3c0] sm:$0xff] }
 0x2c3   : > { %5018 = vmatprep.subr.bf16.mxu1 %v12483_v29  ;;  %v5434_v29 = vld [vmem:[#allocation6 + $0x580] sm:$0xff] }
 0x2c5   : > { %4976 = vmatpush2.bf16.msra.mxu0 %v12478_v36  ;;  %v11001_v36 = vcombine.high %v5434_v29, %v5438_v32 }
 0x2c6   : > { %5019 = vmatpush2.bf16.msra.mxu1 %v12481_v37  ;;  %9098 = vmatprep.subr.bf16.mxu0 %v10881_v41  ;;  %v5426_v37 = vld [vmem:[#allocation6 + $0x540] sm:$0xff]  ;;  %v10849_v41 = vcombine.high %v5282_v19, %v5286_v61 }
 0x2c7   : > { %9141 = vmatprep.subr.bf16.mxu1 %v11009_v28  ;;  %v10993_v2 = vcombine.high %v5426_v37, %v5430_v42  ;;  %v5382_v19 = vld [vmem:[#allocation6 + $0x3e0] sm:$0xff] }
 0x2c8   : > { %v12940_v26 = vpop.f32.mrf.mxu0  ;;  %4978 = vmatmul.mubr.bf16.vlgmr.msra.gmra.mxu0 %v12806_v7  ;;  %v10945_v24 = vcombine.high %v5378_v21, %v5382_v19  ;;  %v5374_v28 = vld [vmem:[#allocation6 + $0x3a0] sm:$0xff] }
 0x2c9   : > { %v12942_v27 = vpop.f32.mrf.mxu1  ;;  %5021 = vmatmul.mubr.bf16.vlgmr.msra.gmra.mxu1 %v12809_v10  ;;  %9099 = vmatpush1.bf16.msra.mxu0 %v10880_v46  ;;  %v10857_v10 = vcombine.high %v5290_v14, %v5294_v34  ;;  %v5278_v46 = vld [vmem:[#allocation6 + $0xa0] sm:$0xff] }
 0x2ca   : > { %v4723_v12 = vpop.f32.mrf.mxu0  ;;  %9100 = vmatprep.subr.bf16.mxu0 %v10873_v58  ;;  %9142 = vmatpush1.bf16.msra.mxu1 %v11008_v25  ;;  %v11000_v58 = vcombine.low %v5434_v29, %v5438_v32  ;;  %v10840_v14 = vcombine.low %v5274_v44, %v5278_v46  ;;  %v5370_v25 = vld [vmem:[#allocation6 + $0x380] sm:$0xff]  ;;  %v10944_v29 = vcombine.low %v5378_v21, %v5382_v19 }
 0x2cb   : > { %v4766_v50 = vpop.f32.mrf.mxu1  ;;  %9143 = vmatprep.subr.bf16.mxu1 %v11001_v36  ;;  %v10937_v32 = vcombine.high %v5370_v25, %v5374_v28  ;;  %v5366_v36 = vld [vmem:[#allocation6 + $0x360] sm:$0xff] }
 0x2cc   : > { %v12946_v59 = vadd.f32 %v4766_v50, %v4723_v12  ;;  %v12948_v35 = vpop.f32.mrf.mxu0  ;;  %v5266_v12 = vld [vmem:[#allocation6 + $0x40] sm:$0xff] }
 0x2cd   : > { %v12950_v15 = vpop.f32.mrf.mxu1  ;;  %9101 = vmatpush1.bf16.msra.mxu0 %v10872_v43  ;;  %v10841_v43 = vcombine.high %v5274_v44, %v5278_v46  ;;  %v5270_v50 = vld [vmem:[#allocation6 + $0x60] sm:$0xff] }
 0x2ce   : > { %v4727_v18 = vpop.f32.mrf.mxu0  ;;  %9102 = vmatprep.subr.bf16.mxu0 %v10865_v52  ;;  %9144 = vmatpush1.bf16.msra.mxu1 %v11000_v58  ;;  %v10992_v52 = vcombine.low %v5426_v37, %v5430_v42  ;;  %v10833_v34 = vcombine.high %v5266_v12, %v5270_v50  ;;  %v10936_v37 = vcombine.low %v5370_v25, %v5374_v28  ;;  %v5354_v42 = vld [vmem:[#allocation6 + $0x300] sm:$0xff] }
 0x2cf   : > { %v4770_v7 = vpop.f32.mrf.mxu1  ;;  %9145 = vmatprep.subr.bf16.mxu1 %v10993_v2  ;;  %v5358_v44 = vld [vmem:[#allocation6 + $0x320] sm:$0xff]  ;;  %v4595_v2 = vadd.f32 %v12912_v53, %v12910_v51 }
 0x2d0   : > { %v12952_v20 = vadd.f32 %v4770_v7, %v4727_v18  ;;  %v5262_v18 = vld [vmem:[#allocation6 + $0x20] sm:$0xff]  ;;  %v10832_v7 = vcombine.low %v5266_v12, %v5270_v50  ;;  %v10921_v58 = vcombine.high %v5354_v42, %v5358_v44  ;;  %v4599_v12 = vadd.f32 %v12920_v40, %v12918_v39 }
 0x2d1   : > { %9103 = vmatpush1.bf16.msra.mxu0 %v10864_v0  ;;  %v5258_v0 = vld [vmem:[#allocation6] sm:$0xff]  ;;  %v4249_v50 = vadd.f32 %v12848_v49, %v12846_v48 }
 0x2d2   : > { %9104 = vmatprep.subr.bf16.mxu0 %v10857_v10  ;;  %9146 = vmatpush1.bf16.msra.mxu1 %v10992_v52  ;;  %v10825_v10 = vcombine.high %v5258_v0, %v5262_v18  ;;  %v10824_v61 = vcombine.low %v5258_v0, %v5262_v18  ;;  %v4638_v52 = vadd.f32 %v12925_v60, %v4595_v2  ;;  %v5338_v53 = vld [vmem:[#allocation6 + $0x280] sm:$0xff] }
 0x2d3   : > { %v4642_v0 = vadd.f32 %v12936_v38, %v4599_v12  ;;  %v4292_v51 = vadd.f32 %v12862_v9, %v4249_v50  ;;  %v5330_v60 = vld [vmem:[#allocation6 + $0x240] sm:$0xff]  ;;  %v4769_v50 = vadd.f32 %v12950_v15, %v12948_v35 }
 0x2d4   : > { %v12967_v40 = vadd.f32 %v12927_v1, %v4638_v52  ;;  %v5334_v38 = vld [vmem:[#allocation6 + $0x260] sm:$0xff] }
 0x2d5   : > { %9105 = vmatpush1.bf16.msra.mxu0 %v10856_v33  ;;  %v5362_v33 = vld [vmem:[#allocation6 + $0x340] sm:$0xff]  ;;  %v12970_v49 = vadd.f32 %v12938_v57, %v4642_v0  ;;  %v10897_v57 = vcombine.high %v5330_v60, %v5334_v38 }
 0x2d6   : > { %9106 = vmatprep.subr.bf16.mxu0 %v10849_v41  ;;  %v10929_v41 = vcombine.high %v5362_v33, %v5366_v36  ;;  %v10928_v46 = vcombine.low %v5362_v33, %v5366_v36  ;;  %v5326_v19 = vld [vmem:[#allocation6 + $0x220] sm:$0xff] }
 0x2d9   : > { %9107 = vmatpush1.bf16.msra.mxu0 %v10848_v3  ;;  %v5346_v3 = vld [vmem:[#allocation6 + $0x2c0] sm:$0xff] }
 0x2da   : > { %9108 = vmatprep.subr.bf16.mxu0 %v10841_v43  ;;  %v5350_v43 = vld [vmem:[#allocation6 + $0x2e0] sm:$0xff] }
 0x2db   : > { %v10913_v18 = vcombine.high %v5346_v3, %v5350_v43  ;;  %v10912_v48 = vcombine.low %v5346_v3, %v5350_v43 }
 0x2dd   : > { %9109 = vmatpush1.bf16.msra.mxu0 %v10840_v14  ;;  %v10920_v14 = vcombine.low %v5354_v42, %v5358_v44  ;;  %v4765_v42 = vadd.f32 %v12942_v27, %v12940_v26  ;;  %v4255_v44 = vadd.f32 %v12860_v5, %v12858_v4 }
 0x2de   : > { %9110 = vmatprep.subr.bf16.mxu0 %v10833_v34  ;;  %v4253_v34 = vadd.f32 %v12856_v63, %v12854_v62  ;;  %v12973_v63 = vadd.f32 %v12864_v11, %v4292_v51  ;;  %v5322_v11 = vld [vmem:[#allocation6 + $0x200] sm:$0xff] }
 0x2df   : > { %v10889_v28 = vcombine.high %v5322_v11, %v5326_v19  ;;  %v10888_v33 = vcombine.low %v5322_v11, %v5326_v19  ;;  %v4298_v43 = vadd.f32 %v12874_v30, %v4255_v44  ;;  %v5414_v51 = vld [vmem:[#allocation6 + $0x4e0] sm:$0xff]  ;;  %v5133_v44 = vlaneseq }
 0x2e0   : > { %v4296_v39 = vadd.f32 %v12870_v22, %v4253_v34  ;;  %v5041_v22 = vmul.f32 %v12967_v40, %v12967_v40  ;;  %v5031_v21 = vmul.f32 %v12973_v63, %v12973_v63  ;;  %v5406_v19 = vld [vmem:[#allocation6 + $0x4a0] sm:$0xff] }
 0x2e1   : > { %9111 = vmatpush1.bf16.msra.mxu0 %v10832_v7  ;;  %v5342_v7 = vld [vmem:[#allocation6 + $0x2a0] sm:$0xff]  ;;  %v13021_v35 = vadd.f32 %v12876_v31, %v4298_v43 }
 0x2e2   : > { %9112 = vmatprep.subr.bf16.mxu0 %v10825_v10  ;;  %v10905_v62 = vcombine.high %v5338_v53, %v5342_v7  ;;  %v12976_v9 = vadd.f32 %v12872_v23, %v4296_v39  ;;  %v10904_v1 = vcombine.low %v5338_v53, %v5342_v7  ;;  %v5046_v10 = vmul.f32 %v12970_v49, %v12970_v49 }
 0x2e3   : > { %v12986_v23 = vadd.f32 %v5041_v22, %v5031_v21 }
 0x2e5   : > { %9113 = vmatpush1.bf16.msra.mxu0 %v10824_v61  ;;  %v5036_v61 = vmul.f32 %v12976_v9, %v12976_v9  ;;  %12484 = vrsqrt.f32 %v12986_v23  ;;  %vm5063_vm3 = vcmp.eq.f32.partialorder %v12986_v23, inf  ;;  %vm5065_vm5 = vcmp.eq.f32.partialorder %v12986_v23, 0.0 }
 0x2e6   : > { %9114 = vmatprep.subr.bf16.mxu0 %v10945_v24  ;;  %v10896_v24 = vcombine.low %v5330_v60, %v5334_v38  ;;  %v5033_v60 = vmul.f32 %v12893_v47, %v12893_v47 }
 0x2e7   : > { %v12988_v25 = vadd.f32 %v5046_v10, %v5036_v61  ;;  %v5037_v61 = vmul.f32 %v13021_v35, %v13021_v35 }
 0x2e9   : > { %9115 = vmatpush2.bf16.msra.mxu0 %v10944_v29  ;;  %v12990_v29 = vld [vmem:[#allocation6 + $0x9c0] sm:$0xff]  ;;  %12486 = vrsqrt.f32 %v12988_v25  ;;  %vm5098_vm4 = vcmp.eq.f32.partialorder %v12988_v25, inf  ;;  %vm5100_vm6 = vcmp.eq.f32.partialorder %v12988_v25, 0.0  ;;  %v5101_v43 = vand.u32 2147483648, %v12988_v25 }
 0x2ea   : > { %9116 = vmatprep.subr.bf16.mxu0 %v10937_v32  ;;  %v12992_v32 = vld [vmem:[#allocation6 + $0x9e0] sm:$0xff] }
 0x2eb   : > { %v11137_v36 = vcombine.high %v12990_v29, %v12992_v32 }
 0x2ed   : > { %9117 = vmatpush2.bf16.msra.mxu0 %v10936_v37  ;;  %v4251_v37 = vadd.f32 %v12852_v56, %v12850_v55  ;;  %v5418_v56 = vld [vmem:[#allocation6 + $0x500] sm:$0xff] }
 0x2ee   : > { %9118 = vmatprep.subr.bf16.mxu0 %v10929_v41 }
 0x2ef   : > { %v4294_v41 = vadd.f32 %v12866_v16, %v4251_v37  ;;  %v5422_v16 = vld [vmem:[#allocation6 + $0x520] sm:$0xff] }
 0x2f0   : > { %v10985_v4 = vcombine.high %v5418_v56, %v5422_v16  ;;  %v10984_v27 = vcombine.low %v5418_v56, %v5422_v16 }
 0x2f1   : > { %9119 = vmatpush2.bf16.msra.mxu0 %v10928_v46  ;;  %v13006_v2 = vadd.f32 %v12868_v17, %v4294_v41  ;;  %v5038_v41 = vmul.f32 %v12901_v45, %v12901_v45 }
 0x2f2   : > { %9120 = vmatprep.subr.bf16.mxu0 %v10921_v58  ;;  %9147 = vmatprep.subr.bf16.mxu1 %v10985_v4  ;;  %v13067_v4 = vshrl.u32 %v5133_v44, 7  ;;  %v5490_v44 = vld [vmem:[#allocation6 + $0x740] sm:$0xff] }
 0x2f3   : > { %v5032_v17 = vmul.f32 %v13006_v2, %v13006_v2  ;;  %9148 = vmatpush1.bf16.msra.mxu1 %v10984_v27 }
 0x2f5   : > { %9121 = vmatpush2.bf16.msra.mxu0 %v10920_v14 }
 0x2f6   : > { %9122 = vmatprep.subr.bf16.mxu0 %v10913_v18  ;;  %v12485_v18 = vpop.eup %12484 }
 0x2f7   : > { %v12487_v53 = vpop.eup %12486  ;;  %v5062_v22 = vmul.f32 %v12485_v18, %v12986_v23 }
 0x2f8   : > { %v5097_v10 = vmul.f32 %v12487_v53, %v12988_v25 }
 0x2f9   : > { %9123 = vmatpush2.bf16.msra.mxu0 %v10912_v48 }
 0x2fa   : > { %9124 = vmatprep.subr.bf16.mxu0 %v10905_v62 }
 0x2fd   : > { %9125 = vmatpush2.bf16.msra.mxu0 %v10904_v1 }
 0x2fe   : > { %9126 = vmatprep.subr.bf16.mxu0 %v10897_v57 }
 0x301   : > { %9127 = vmatpush2.bf16.msra.mxu0 %v10896_v24 }
 0x302   : > { %9128 = vmatprep.subr.bf16.mxu0 %v10889_v28  ;;  %v5064_v28 = vsel %vm5063_vm3, %v12986_v23, %v5062_v22 }
 0x305   : > { %9129 = vmatpush2.bf16.msra.mxu0 %v10888_v33 }
 0x306   : > { %9184 = vmatprep.subr.bf16.mxu0 %v11137_v36 }
 0x308   : > { %v4807_v46 = vpop.f32.mrf.mxu0 }
 0x309   : > { %v4850_v58 = vpop.f32.mrf.mxu1  ;;  %v4808_v3 = vadd.f32 %v4807_v46, %v4765_v42  ;;  %v5066_v42 = vand.u32 2147483648, %v12986_v23  ;;  %v5099_v46 = vsel %vm5098_vm4, %v12988_v25, %v5097_v10  ;;  %v5390_v23 = vld [vmem:[#allocation6 + $0x420] sm:$0xff] }
 0x30a   : > { %v4809_v12 = vpop.f32.mrf.mxu0  ;;  %v5502_v10 = vld [vmem:[#allocation6 + $0x7a0] sm:$0xff] }
 0x30b   : > { %v4852_v55 = vpop.f32.mrf.mxu1  ;;  %v13011_v52 = vadd.f32 %v4850_v58, %v4808_v3  ;;  %v4810_v26 = vadd.f32 %v4809_v12, %v12946_v59  ;;  %v5410_v59 = vld [vmem:[#allocation6 + $0x4c0] sm:$0xff]  ;;  %v13059_v12 = vsel %vm5065_vm5, %v5066_v42, %v5064_v28 }
 0x30c   : > { %v4811_v5 = vpop.f32.mrf.mxu0  ;;  %v10976_v38 = vcombine.low %v5410_v59, %v5414_v51  ;;  %v10977_v31 = vcombine.high %v5410_v59, %v5414_v51  ;;  %v5394_v58 = vld [vmem:[#allocation6 + $0x440] sm:$0xff]  ;;  %vm5178_vm7 = vcmp.gt.f32.partialorder %v13059_v12, 0.0  ;;  %v5135_v59 = vsub.s32 0, %v13067_v4 }
 0x30d   : > { %v5042_v30 = vmul.f32 %v13011_v52, %v13011_v52  ;;  %v13018_v14 = vadd.f32 %v4852_v55, %v4810_v26  ;;  %v4812_v34 = vadd.f32 %v4811_v5, %v4769_v50  ;;  %v4854_v0 = vpop.f32.mrf.mxu1  ;;  %v5398_v3 = vld [vmem:[#allocation6 + $0x460] sm:$0xff]  ;;  %v13063_v50 = vsel %vm5100_vm6, %v5101_v43, %v5099_v46 }
 0x30e   : > { %v4813_v15 = vpop.f32.mrf.mxu0  ;;  %9149 = vmatprep.subr.bf16.mxu1 %v10977_v31  ;;  %v10960_v56 = vcombine.low %v5394_v58, %v5398_v3  ;;  %v10961_v16 = vcombine.high %v5394_v58, %v5398_v3  ;;  %v5386_v26 = vld [vmem:[#allocation6 + $0x400] sm:$0xff]  ;;  %vm5183_vm8 = vcmp.gt.f32.partialorder %v13063_v50, 0.0 }
 0x30f   : > { %v13023_v7 = vadd.f32 %v5042_v30, %v5032_v17  ;;  %v5043_v39 = vmul.f32 %v13018_v14, %v13018_v14  ;;  %v13027_v48 = vadd.f32 %v4854_v0, %v4812_v34  ;;  %v4814_v62 = vadd.f32 %v4813_v15, %v12952_v20  ;;  %v4856_v1 = vpop.f32.mrf.mxu1  ;;  %v5402_v20 = vld [vmem:[#allocation6 + $0x480] sm:$0xff]  ;;  %9150 = vmatpush1.bf16.msra.mxu1 %v10976_v38 }
 0x310   : > { %v10969_v24 = vcombine.high %v5402_v20, %v5406_v19  ;;  %v10968_v37 = vcombine.low %v5402_v20, %v5406_v19  ;;  %v10953_v25 = vcombine.high %v5386_v26, %v5390_v23  ;;  %v10952_v5 = vcombine.low %v5386_v26, %v5390_v23  ;;  %v5506_v30 = vld [vmem:[#allocation6 + $0x7c0] sm:$0xff] }
 0x311   : > { %12488 = vrsqrt.f32 %v13023_v7  ;;  %v13035_v57 = vadd.f32 %v5043_v39, %v5033_v60  ;;  %v5047_v21 = vmul.f32 %v13027_v48, %v13027_v48  ;;  %v13039_v11 = vadd.f32 %v4856_v1, %v4814_v62  ;;  %v5510_v34 = vld [vmem:[#allocation6 + $0x7e0] sm:$0xff]  ;;  %v13080_v62 = vld [vmem:[#allocation4] sm:$0x1f] }
 0x312   : > { %9151 = vmatprep.subr.bf16.mxu1 %v10969_v24  ;;  %v5188_v17 = vsel %vm5178_vm7, %v13059_v12, 1.0  ;;  %v5193_v0 = vsel %vm5183_vm8, %v13063_v50, 1.0  ;;  %v11073_v15 = vcombine.high %v5506_v30, %v5510_v34  ;;  %vm5070_vm9 = vcmp.eq.f32.partialorder %v13023_v7, inf  ;;  %v5498_v1 = vld [vmem:[#allocation6 + $0x780] sm:$0xff] }
 0x313   : > { %12490 = vrsqrt.f32 %v13035_v57  ;;  %v13047_v33 = vadd.f32 %v5047_v21, %v5037_v61  ;;  %v5048_v36 = vmul.f32 %v13039_v11, %v13039_v11  ;;  %9152 = vmatpush1.bf16.msra.mxu1 %v10968_v37  ;;  %v5073_v51 = vand.u32 2147483648, %v13023_v7  ;;  %v5494_v46 = vld [vmem:[#allocation6 + $0x760] sm:$0xff] }
 0x314   : > { %9153 = vmatprep.subr.bf16.mxu1 %v10961_v16  ;;  %v11072_v53 = vcombine.low %v5506_v30, %v5510_v34  ;;  %vm5072_vm10 = vcmp.eq.f32.partialorder %v13023_v7, 0.0  ;;  %v5139_v38 = vsub.s32 1, %v13067_v4  ;;  %vm5077_vm12 = vcmp.eq.f32.partialorder %v13035_v57, inf }
 0x315   : > { %12492 = vrsqrt.f32 %v13047_v33  ;;  %v13061_v55 = vadd.f32 %v5048_v36, %v5038_v41  ;;  %v5080_v21 = vand.u32 2147483648, %v13035_v57  ;;  %v11065_v20 = vcombine.high %v5498_v1, %v5502_v10 }
 0x316   : > { %vm5079_vm13 = vcmp.eq.f32.partialorder %v13035_v57, 0.0  ;;  %v13098_v28 = vrot.slane %v13080_v62, %v5139_v38  ;;  %vm5105_vm15 = vcmp.eq.f32.partialorder %v13047_v33, inf  ;;  %v5108_v41 = vand.u32 2147483648, %v13047_v33 }
 0x317   : > { %12494 = vrsqrt.f32 %v13061_v55  ;;  %9154 = vmatpush1.bf16.msra.mxu1 %v10960_v56  ;;  %v11064_v42 = vcombine.low %v5498_v1, %v5502_v10  ;;  %vm5107_vm0 = vcmp.eq.f32.partialorder %v13047_v33, 0.0  ;;  %vm5112_vm1 = vcmp.eq.f32.partialorder %v13061_v55, inf }
 0x318   : > { %9155 = vmatprep.subr.bf16.mxu1 %v10953_v25  ;;  %12496 = vrcp.f32 %v5188_v17  ;;  %v5115_v26 = vand.u32 2147483648, %v13061_v55  ;;  %v11056_v23 = vcombine.low %v5490_v44, %v5494_v46  ;;  %v11057_v25 = vcombine.high %v5490_v44, %v5494_v46  ;;  %v5486_v17 = vld [vmem:[#allocation6 + $0x720] sm:$0xff] }
 0x319   : > { %12498 = vrcp.f32 %v5193_v0  ;;  %vm5114_vm3 = vcmp.eq.f32.partialorder %v13061_v55, 0.0 }
 0x31b   : > { %9156 = vmatpush1.bf16.msra.mxu1 %v10952_v5 }
 0x31c   : > { %9157 = vmatprep.subr.bf16.mxu1 %v11073_v15 }
 0x31e   : > { %v12489_v27 = vpop.eup %12488 }
 0x31f   : > { %v5069_v18 = vmul.f32 %v12489_v27, %v13023_v7  ;;  %9158 = vmatpush2.bf16.msra.mxu1 %v11072_v53  ;;  %v5482_v27 = vld [vmem:[#allocation6 + $0x700] sm:$0xff] }
 0x320   : > { %v12491_v39 = vpop.eup %12490  ;;  %9159 = vmatprep.subr.bf16.mxu1 %v11065_v20  ;;  %v11049_v34 = vcombine.high %v5482_v27, %v5486_v17  ;;  %v11048_v15 = vcombine.low %v5482_v27, %v5486_v17 }
 0x321   : > { %v5071_v60 = vsel %vm5070_vm9, %v13023_v7, %v5069_v18  ;;  %v5076_v22 = vmul.f32 %v12491_v39, %v13035_v57  ;;  %v5136_v7 = vrot.slane %v13080_v62, %v5135_v59  ;;  %v5474_v39 = vld [vmem:[#allocation6 + $0x6c0] sm:$0xff] }
 0x322   : > { %v13085_v31 = vsel %vm5072_vm10, %v5073_v51, %v5071_v60  ;;  %v12493_v19 = vpop.eup %12492  ;;  %v5478_v60 = vld [vmem:[#allocation6 + $0x6e0] sm:$0xff] }
 0x323   : > { %vm5179_vm11 = vcmp.gt.f32.partialorder %v13085_v31, 0.0  ;;  %v5078_v24 = vsel %vm5077_vm12, %v13035_v57, %v5076_v22  ;;  %v5104_v37 = vmul.f32 %v12493_v19, %v13047_v33  ;;  %v5143_v57 = vsub.s32 2, %v13067_v4  ;;  %9160 = vmatpush2.bf16.msra.mxu1 %v11064_v42 }
 0x324   : > { %v5189_v61 = vsel %vm5179_vm11, %v13085_v31, 1.0  ;;  %v13100_v36 = vsel %vm5079_vm13, %v5080_v21, %v5078_v24  ;;  %v12495_v58 = vpop.eup %12494  ;;  %9161 = vmatprep.subr.bf16.mxu1 %v11057_v25  ;;  %v5163_v0 = vsub.f32 %v13063_v50, %v5136_v7  ;;  %v5158_v59 = vsub.f32 %v13059_v12, %v5136_v7  ;;  %v5466_v24 = vld [vmem:[#allocation6 + $0x680] sm:$0xff] }
 0x325   : > { %12500 = vrcp.f32 %v5189_v61  ;;  %vm5180_vm14 = vcmp.gt.f32.partialorder %v13100_v36, 0.0  ;;  %v5106_v43 = vsel %vm5105_vm15, %v13047_v33, %v5104_v37  ;;  %v5111_v16 = vmul.f32 %v12495_v58, %v13061_v55  ;;  %v12497_v53 = vpop.eup %12496  ;;  %v5470_v37 = vld [vmem:[#allocation6 + $0x6a0] sm:$0xff] }
 0x326   : > { %v5190_v3 = vsel %vm5180_vm14, %v13100_v36, 1.0  ;;  %v13112_v56 = vsel %vm5107_vm0, %v5108_v41, %v5106_v43  ;;  %v5144_v18 = vrot.slane %v13080_v62, %v5143_v57  ;;  %v12499_v38 = vpop.eup %12498  ;;  %v11041_v22 = vcombine.high %v5474_v39, %v5478_v60 }
 0x327   : > { %12502 = vrcp.f32 %v5190_v3  ;;  %vm5184_vm2 = vcmp.gt.f32.partialorder %v13112_v56, 0.0  ;;  %v5113_v33 = vsel %vm5112_vm1, %v13061_v55, %v5111_v16  ;;  %9162 = vmatpush2.bf16.msra.mxu1 %v11056_v23  ;;  %v5159_v55 = vsub.f32 %v13085_v31, %v13098_v28 }
 0x328   : > { %v5194_v5 = vsel %vm5184_vm2, %v13112_v56, 1.0  ;;  %v13123_v30 = vsel %vm5114_vm3, %v5115_v26, %v5113_v33  ;;  %9163 = vmatprep.subr.bf16.mxu1 %v11049_v34  ;;  %v5173_v1 = vmax.f32 %v5163_v0, 0.0  ;;  %v5160_v10 = vsub.f32 %v13100_v36, %v5144_v18  ;;  %v5462_v33 = vld [vmem:[#allocation6 + $0x660] sm:$0xff] }
 0x329   : > { %12504 = vrcp.f32 %v5194_v5  ;;  %vm5185_vm4 = vcmp.gt.f32.partialorder %v13123_v30, 0.0  ;;  %v11040_v21 = vcombine.low %v5474_v39, %v5478_v60  ;;  %v5168_v20 = vmax.f32 %v5158_v59, 0.0  ;;  %v5458_v5 = vld [vmem:[#allocation6 + $0x640] sm:$0xff] }
 0x32a   : > { %v5195_v51 = vsel %vm5185_vm4, %v13123_v30, 1.0  ;;  %v5169_v19 = vmax.f32 %v5159_v55, 0.0  ;;  %v5213_v61 = vmul.f32 %v12499_v38, %v5173_v1  ;;  %v5164_v44 = vsub.f32 %v13112_v56, %v13098_v28  ;;  %v5450_v55 = vld [vmem:[#allocation6 + $0x600] sm:$0xff] }
 0x32b   : > { %12506 = vrcp.f32 %v5195_v51  ;;  %9164 = vmatpush2.bf16.msra.mxu1 %v11048_v15  ;;  %v5208_v41 = vmul.f32 %v12497_v53, %v5168_v20  ;;  %v11033_v46 = vcombine.high %v5466_v24, %v5470_v37  ;;  %v5170_v58 = vmax.f32 %v5160_v10, 0.0  ;;  %v5454_v51 = vld [vmem:[#allocation6 + $0x620] sm:$0xff] }
 0x32c   : > { %9165 = vmatprep.subr.bf16.mxu1 %v11041_v22  ;;  %v11032_v57 = vcombine.low %v5466_v24, %v5470_v37  ;;  %v5223_v16 = vsel %vm5183_vm8, %v5213_v61, 0.0  ;;  %v5165_v25 = vsub.f32 %v13123_v30, %v5144_v18  ;;  %v5174_v27 = vmax.f32 %v5164_v44, 0.0  ;;  %v5562_v22 = vld [vmem:[#allocation6 + $0x980] sm:$0xff] }
 0x32d   : > { %v5218_v28 = vsel %vm5178_vm7, %v5208_v41, 0.0  ;;  %v11025_v17 = vcombine.high %v5458_v5, %v5462_v33  ;;  %v11024_v0 = vcombine.low %v5458_v5, %v5462_v33  ;;  %v5238_v50 = vmul.f32 %v5223_v16, %v12976_v9  ;;  %v5566_v1 = vld [vmem:[#allocation6 + $0x9a0] sm:$0xff] }
 0x32e   : > { %v5228_v59 = vmul.f32 %v5218_v28, %v12973_v63  ;;  %v5175_v12 = vmax.f32 %v5165_v25, 0.0  ;;  %v5243_v39 = vmul.f32 %v5223_v16, %v12970_v49  ;;  %v11017_v9 = vcombine.high %v5450_v55, %v5454_v51  ;;  %v13170_v20 = vld [vmem:[#allocation6 + $0xde0] sm:$0xff] }
 0x32f   : > { %9166 = vmatpush2.bf16.msra.mxu1 %v11040_v21  ;;  %v11016_v63 = vcombine.low %v5450_v55, %v5454_v51  ;;  %v5233_v10 = vmul.f32 %v5218_v28, %v12967_v40  ;;  %v13176_v24 = vld [vmem:[#allocation6 + $0x11c0] sm:$0xff]  ;;  %v11128_v44 = vcombine.low %v5562_v22, %v5566_v1  ;;  %vm9986_vm1 = vcmask 1040384  }
 0x330   : > { %9167 = vmatprep.subr.bf16.mxu1 %v11033_v46  ;;  %v13158_v21 = vpack.c.bf16 %v5238_v50, %v5228_v59  ;;  %v13178_v37 = vld [vmem:[#allocation6 + $0x11e0] sm:$0xff]  ;;  %vm10040_vm3 = vcmask 1042432  }
 0x331   : > { %v13180_v30 = vpack.c.bf16 %v5243_v39, %v5233_v10  ;;  %v5538_v16 = vld [vmem:[#allocation6 + $0x8c0] sm:$0xff] }
 0x332   : > { %v12501_v7 = vpop.eup %12500  ;;  %v5530_v5 = vld [vmem:[#allocation6 + $0x880] sm:$0xff] }
 0x333   : > { %v5209_v42 = vmul.f32 %v12501_v7, %v5169_v19  ;;  %9168 = vmatpush2.bf16.msra.mxu1 %v11032_v57  ;;  %v11129_v7 = vcombine.high %v5562_v22, %v5566_v1  ;;  %v5550_v57 = vld [vmem:[#allocation6 + $0x920] sm:$0xff] }
 0x334   : > { %v12503_v3 = vpop.eup %12502  ;;  %9169 = vmatprep.subr.bf16.mxu1 %v11025_v17  ;;  %v5534_v33 = vld [vmem:[#allocation6 + $0x8a0] sm:$0xff] }
 0x335   : > { %v5219_v43 = vsel %vm5179_vm11, %v5209_v42, 0.0  ;;  %v5210_v23 = vmul.f32 %v12503_v3, %v5170_v58  ;;  %v11392_v42 = vcombine.low %v13176_v24, %v13178_v37  ;;  %v5546_v58 = vld [vmem:[#allocation6 + $0x900] sm:$0xff] }
 0x336   : > { %v5234_v26 = vmul.f32 %v5219_v43, %v13011_v52  ;;  %v12505_v34 = vpop.eup %12504  ;;  %v5229_v36 = vmul.f32 %v5219_v43, %v13006_v2  ;;  %v11113_v43 = vcombine.high %v5546_v58, %v5550_v57  ;;  %v5522_v17 = vld [vmem:[#allocation6 + $0x840] sm:$0xff] }
 0x337   : > { %v5220_v31 = vsel %vm5180_vm14, %v5210_v23, 0.0  ;;  %v5214_v18 = vmul.f32 %v12505_v34, %v5174_v27  ;;  %9170 = vmatpush2.bf16.msra.mxu1 %v11024_v0  ;;  %v11112_v23 = vcombine.low %v5546_v58, %v5550_v57  ;;  %v11097_v27 = vcombine.high %v5530_v5, %v5534_v33  ;;  %v5526_v34 = vld [vmem:[#allocation6 + $0x860] sm:$0xff] }
 0x338   : > { %v5230_v52 = vmul.f32 %v5220_v31, %v12893_v47  ;;  %v5235_v15 = vmul.f32 %v5220_v31, %v13018_v14  ;;  %v12507_v53 = vpop.eup %12506  ;;  %9171 = vmatprep.subr.bf16.mxu1 %v11017_v9  ;;  %v11096_v31 = vcombine.low %v5530_v5, %v5534_v33  ;;  %v11089_v0 = vcombine.high %v5522_v17, %v5526_v34  ;;  %v5514_v50 = vld [vmem:[#allocation6 + $0x800] sm:$0xff] }
 0x339   : > { %v5224_v60 = vsel %vm5184_vm2, %v5214_v18, 0.0  ;;  %v5215_v38 = vmul.f32 %v12507_v53, %v5175_v12  ;;  %v5634_v59 = vld [vmem:[#allocation6 + $0xbc0] sm:$0xff]  ;;  %v11393_v33 = vcombine.high %v13176_v24, %v13178_v37  ;;  %vm10013_vm2 = vcmask 1041408  }
 0x33a   : > { %v5239_v47 = vmul.f32 %v5224_v60, %v13021_v35  ;;  %v5244_v14 = vmul.f32 %v5224_v60, %v13027_v48  ;;  %v11136_v35 = vcombine.low %v12990_v29, %v12992_v32  ;;  %v13168_v48 = vld [vmem:[#allocation6 + $0xdc0] sm:$0xff] }
 0x33b   : > { %v5225_v56 = vsel %vm5185_vm4, %v5215_v38, 0.0  ;;  %v11265_v61 = vcombine.high %v13168_v48, %v13170_v20  ;;  %v5554_v29 = vld [vmem:[#allocation6 + $0x940] sm:$0xff]  ;;  %9172 = vmatpush2.bf16.msra.mxu1 %v11016_v63 }
 0x33c   : > { %v13160_v49 = vpack.c.bf16 %v5239_v47, %v5229_v36  ;;  %v13162_v2 = vpack.c.bf16 %v5244_v14, %v5234_v26  ;;  %v5240_v19 = vmul.f32 %v5225_v56, %v12901_v45  ;;  %v5245_v40 = vmul.f32 %v5225_v56, %v13039_v11  ;;  %v5558_v32 = vld [vmem:[#allocation6 + $0x960] sm:$0xff] }
 0x33d   : > { %v11264_v45 = vcombine.low %v13168_v48, %v13170_v20  ;;  %9227 = vmatprep.subr.bf16.mxu1 %v11265_v61  ;;  %v11121_v46 = vcombine.high %v5554_v29, %v5558_v32  ;;  %v11120_v3 = vcombine.low %v5554_v29, %v5558_v32  ;;  %v5542_v26 = vld [vmem:[#allocation6 + $0x8e0] sm:$0xff] }
 0x33e   : > { %9130 = vmatprep.mubr.bf16.mxu0 %v13160_v49  ;;  %v13185_v41 = vpack.c.bf16 %v5240_v19, %v5230_v52  ;;  %v13187_v11 = vpack.c.bf16 %v5245_v40, %v5235_v15  ;;  %v11105_v25 = vcombine.high %v5538_v16, %v5542_v26  ;;  %v11104_v28 = vcombine.low %v5538_v16, %v5542_v26  ;;  %v5518_v52 = vld [vmem:[#allocation6 + $0x820] sm:$0xff] }
 0x33f   : > { %9131 = vmatmul.mubr.bf16.vlgmr.msra.gmra.mxu0 %v13158_v21  ;;  %v11088_v15 = vcombine.low %v5522_v17, %v5526_v34  ;;  %v11081_v18 = vcombine.high %v5514_v50, %v5518_v52  ;;  %v5638_v12 = vld [vmem:[#allocation6 + $0xbe0] sm:$0xff]  ;;  %v11080_v55 = vcombine.low %v5514_v50, %v5518_v52 }
 0x340   : > { %9216 = vmatprep.mubr.bf16.mxu0 %v13180_v30  ;;  %9185 = vmatpush1.bf16.msra.mxu0 %v11136_v35  ;;  %v11201_v51 = vcombine.high %v5634_v59, %v5638_v12  ;;  %v5626_v53 = vld [vmem:[#allocation6 + $0xb80] sm:$0xff]  ;;  %v11200_v36 = vcombine.low %v5634_v59, %v5638_v12 }
 0x341   : > { %9186 = vmatprep.subr.bf16.mxu0 %v11129_v7  ;;  %v5630_v39 = vld [vmem:[#allocation6 + $0xba0] sm:$0xff] }
 0x342   : > { %v11193_v60 = vcombine.high %v5626_v53, %v5630_v39  ;;  %v5618_v9 = vld [vmem:[#allocation6 + $0xb40] sm:$0xff]  ;;  %v11192_v14 = vcombine.low %v5626_v53, %v5630_v39 }
 0x343   : > { %v5622_v47 = vld [vmem:[#allocation6 + $0xb60] sm:$0xff] }
 0x344   : > { %9187 = vmatpush1.bf16.msra.mxu0 %v11128_v44  ;;  %v11185_v38 = vcombine.high %v5618_v9, %v5622_v47  ;;  %v5610_v22 = vld [vmem:[#allocation6 + $0xb00] sm:$0xff]  ;;  %v11184_v63 = vcombine.low %v5618_v9, %v5622_v47 }
 0x345   : > { %9188 = vmatprep.subr.bf16.mxu0 %v11121_v46  ;;  %v5614_v1 = vld [vmem:[#allocation6 + $0xb20] sm:$0xff] }
 0x346   : > { %v11177_v10 = vcombine.high %v5610_v22, %v5614_v1  ;;  %v5602_v56 = vld [vmem:[#allocation6 + $0xac0] sm:$0xff]  ;;  %v11176_v19 = vcombine.low %v5610_v22, %v5614_v1 }
 0x347   : > { %v5606_v35 = vld [vmem:[#allocation6 + $0xae0] sm:$0xff] }
 0x348   : > { %9189 = vmatpush1.bf16.msra.mxu0 %v11120_v3  ;;  %v11169_v40 = vcombine.high %v5602_v56, %v5606_v35  ;;  %v5594_v7 = vld [vmem:[#allocation6 + $0xa80] sm:$0xff]  ;;  %v11168_v29 = vcombine.low %v5602_v56, %v5606_v35 }
 0x349   : > { %9190 = vmatprep.subr.bf16.mxu0 %v11113_v43  ;;  %v5598_v61 = vld [vmem:[#allocation6 + $0xaa0] sm:$0xff] }
 0x34a   : > { %v11161_v32 = vcombine.high %v5594_v7, %v5598_v61  ;;  %v5586_v44 = vld [vmem:[#allocation6 + $0xa40] sm:$0xff]  ;;  %v11160_v58 = vcombine.low %v5594_v7, %v5598_v61 }
 0x34b   : > { %v5590_v46 = vld [vmem:[#allocation6 + $0xa60] sm:$0xff] }
 0x34c   : > { %9191 = vmatpush1.bf16.msra.mxu0 %v11112_v23  ;;  %v11153_v57 = vcombine.high %v5586_v44, %v5590_v46  ;;  %v5578_v3 = vld [vmem:[#allocation6 + $0xa00] sm:$0xff]  ;;  %v11152_v16 = vcombine.low %v5586_v44, %v5590_v46  ;;  %v4893_v23 = vpop.f32.mrf.mxu0 }
 0x34d   : > { %9192 = vmatprep.subr.bf16.mxu0 %v11105_v25  ;;  %v5582_v43 = vld [vmem:[#allocation6 + $0xa20] sm:$0xff]  ;;  %v4936_v25 = vpop.f32.mrf.mxu1 }
 0x34e   : > { %v11145_v26 = vcombine.high %v5578_v3, %v5582_v43  ;;  %v11144_v5 = vcombine.low %v5578_v3, %v5582_v43  ;;  %v4937_v50 = vadd.f32 %v4936_v25, %v4893_v23 }
 0x350   : > { %9193 = vmatpush1.bf16.msra.mxu0 %v11104_v28  ;;  %v4895_v28 = vpop.f32.mrf.mxu0 }
 0x351   : > { %9194 = vmatprep.subr.bf16.mxu0 %v11097_v27  ;;  %v4938_v27 = vpop.f32.mrf.mxu1 }
 0x352   : > { %v4897_v17 = vpop.f32.mrf.mxu0 }
 0x353   : > { %v4940_v34 = vpop.f32.mrf.mxu1 }
 0x354   : > { %9195 = vmatpush1.bf16.msra.mxu0 %v11096_v31  ;;  %v4899_v31 = vpop.f32.mrf.mxu0 }
 0x355   : > { %9196 = vmatprep.subr.bf16.mxu0 %v11089_v0  ;;  %v4942_v0 = vpop.f32.mrf.mxu1 }
 0x356   : > { %v4943_v9 = vadd.f32 %v4942_v0, %v4899_v31 }
 0x358   : > { %9197 = vmatpush1.bf16.msra.mxu0 %v11088_v15 }
 0x359   : > { %9198 = vmatprep.subr.bf16.mxu0 %v11081_v18  ;;  %v4939_v18 = vadd.f32 %v4938_v27, %v4895_v28 }
 0x35c   : > { %9199 = vmatpush1.bf16.msra.mxu0 %v11080_v55 }
 0x35d   : > { %9200 = vmatprep.subr.bf16.mxu0 %v11201_v51  ;;  %v4941_v51 = vadd.f32 %v4940_v34, %v4897_v17  ;;  %v5147_v34 = vsub.s32 3, %v13067_v4 }
 0x360   : > { %9201 = vmatpush2.bf16.msra.mxu0 %v11200_v36  ;;  %v5034_v36 = vmul.f32 %v12898_v54, %v12898_v54 }
 0x361   : > { %9202 = vmatprep.subr.bf16.mxu0 %v11193_v60 }
 0x364   : > { %9203 = vmatpush2.bf16.msra.mxu0 %v11192_v14 }
 0x365   : > { %9204 = vmatprep.subr.bf16.mxu0 %v11185_v38 }
 0x368   : > { %9205 = vmatpush2.bf16.msra.mxu0 %v11184_v63 }
 0x369   : > { %9206 = vmatprep.subr.bf16.mxu0 %v11177_v10 }
 0x36c   : > { %9207 = vmatpush2.bf16.msra.mxu0 %v11176_v19  ;;  %v5035_v19 = vmul.f32 %v12929_v6, %v12929_v6 }
 0x36d   : > { %9208 = vmatprep.subr.bf16.mxu0 %v11169_v40 }
 0x370   : > { %9209 = vmatpush2.bf16.msra.mxu0 %v11168_v29 }
 0x371   : > { %9210 = vmatprep.subr.bf16.mxu0 %v11161_v32  ;;  %v5039_v32 = vmul.f32 %v12904_v8, %v12904_v8 }
 0x374   : > { %9211 = vmatpush2.bf16.msra.mxu0 %v11160_v58  ;;  %v5040_v58 = vmul.f32 %v12934_v13, %v12934_v13 }
 0x375   : > { %9212 = vmatprep.subr.bf16.mxu0 %v11153_v57 }
 0x378   : > { %9213 = vmatpush2.bf16.msra.mxu0 %v11152_v16 }
 0x379   : > { %9214 = vmatprep.subr.bf16.mxu0 %v11145_v26 }
 0x37c   : > { %9215 = vmatpush2.bf16.msra.mxu0 %v11144_v5 }
 0x37d   : > { %9270 = vmatprep.subr.bf16.mxu0 %v11393_v33 }
 0x388   : > { %v4979_v52 = vpop.f32.mrf.mxu0 }
 0x389   : > { %v5022_v15 = vpop.f32.mrf.mxu1  ;;  %v4980_v59 = vadd.f32 %v4979_v52, %v4937_v50 }
 0x38a   : > { %v4981_v12 = vpop.f32.mrf.mxu0 }
 0x38b   : > { %v5024_v55 = vpop.f32.mrf.mxu1  ;;  %v13195_v53 = vadd.f32 %v5022_v15, %v4980_v59  ;;  %v4982_v39 = vadd.f32 %v4981_v12, %v4939_v18 }
 0x38c   : > { %v4983_v60 = vpop.f32.mrf.mxu0 }
 0x38d   : > { %v5044_v47 = vmul.f32 %v13195_v53, %v13195_v53  ;;  %v13201_v14 = vadd.f32 %v5024_v55, %v4982_v39  ;;  %v4984_v38 = vadd.f32 %v4983_v60, %v4941_v51  ;;  %v5026_v22 = vpop.f32.mrf.mxu1  ;;  %v5148_v55 = vrot.slane %v13080_v62, %v5147_v34 }
 0x38e   : > { %v4985_v1 = vpop.f32.mrf.mxu0  ;;  %v5151_v39 = vsub.s32 4, %v13067_v4 }
 0x38f   : > { %v5054_v63 = vadd.f32 %v5044_v47, %v5034_v36  ;;  %v5045_v10 = vmul.f32 %v13201_v14, %v13201_v14  ;;  %v13205_v56 = vadd.f32 %v5026_v22, %v4984_v38  ;;  %v4986_v35 = vadd.f32 %v4985_v1, %v4943_v9  ;;  %v5028_v40 = vpop.f32.mrf.mxu1 }
 0x390   : > { %v5152_v22 = vrot.slane %v13080_v62, %v5151_v39  ;;  %v5678_v39 = vld [vmem:[#allocation6 + $0xd20] sm:$0xff] }
 0x391   : > { %12508 = vrsqrt.f32 %v5054_v63  ;;  %v5055_v7 = vadd.f32 %v5045_v10, %v5035_v19  ;;  %v5049_v61 = vmul.f32 %v13205_v56, %v13205_v56  ;;  %v13211_v29 = vadd.f32 %v5028_v40, %v4986_v35 }
 0x392   : > { %vm5084_vm5 = vcmp.eq.f32.partialorder %v5054_v63, inf  ;;  %v5087_v16 = vand.u32 2147483648, %v5054_v63  ;;  %vm5086_vm6 = vcmp.eq.f32.partialorder %v5054_v63, 0.0 }
 0x393   : > { %12510 = vrsqrt.f32 %v5055_v7  ;;  %v5059_v44 = vadd.f32 %v5049_v61, %v5039_v32  ;;  %v5050_v46 = vmul.f32 %v13211_v29, %v13211_v29  ;;  %vm5091_vm8 = vcmp.eq.f32.partialorder %v5055_v7, inf }
 0x394   : > { %v5094_v33 = vand.u32 2147483648, %v5055_v7  ;;  %vm5093_vm9 = vcmp.eq.f32.partialorder %v5055_v7, 0.0 }
 0x395   : > { %12512 = vrsqrt.f32 %v5059_v44  ;;  %v5060_v57 = vadd.f32 %v5050_v46, %v5040_v58  ;;  %vm5119_vm11 = vcmp.eq.f32.partialorder %v5059_v44, inf  ;;  %v5122_v50 = vand.u32 2147483648, %v5059_v44 }
 0x396   : > { %vm5121_vm12 = vcmp.eq.f32.partialorder %v5059_v44, 0.0 }
 0x397   : > { %12514 = vrsqrt.f32 %v5060_v57  ;;  %vm5126_vm14 = vcmp.eq.f32.partialorder %v5060_v57, inf  ;;  %v5129_v51 = vand.u32 2147483648, %v5060_v57  ;;  %vm5128_vm15 = vcmp.eq.f32.partialorder %v5060_v57, 0.0 }
 0x39e   : > { %v12509_v3 = vpop.eup %12508 }
 0x39f   : > { %v5083_v43 = vmul.f32 %v12509_v3, %v5054_v63 }
 0x3a0   : > { %v12511_v26 = vpop.eup %12510 }
 0x3a1   : > { %v5085_v23 = vsel %vm5084_vm5, %v5054_v63, %v5083_v43  ;;  %v5090_v5 = vmul.f32 %v12511_v26, %v5055_v7  ;;  %v5690_v26 = vld [vmem:[#allocation6 + $0xd80] sm:$0xff] }
 0x3a2   : > { %v5088_v25 = vsel %vm5086_vm6, %v5087_v16, %v5085_v23  ;;  %v12513_v28 = vpop.eup %12512  ;;  %v5694_v23 = vld [vmem:[#allocation6 + $0xda0] sm:$0xff] }
 0x3a3   : > { %vm5181_vm7 = vcmp.gt.f32.partialorder %v5088_v25, 0.0  ;;  %v5092_v17 = vsel %vm5091_vm8, %v5055_v7, %v5090_v5  ;;  %v5118_v0 = vmul.f32 %v12513_v28, %v5059_v44  ;;  %v5161_v47 = vsub.f32 %v5088_v25, %v5148_v55 }
 0x3a4   : > { %v5191_v27 = vsel %vm5181_vm7, %v5088_v25, 1.0  ;;  %v5095_v31 = vsel %vm5093_vm9, %v5094_v33, %v5092_v17  ;;  %v12515_v52 = vpop.eup %12514  ;;  %v11257_v34 = vcombine.high %v5690_v26, %v5694_v23 }
 0x3a5   : > { %12516 = vrcp.f32 %v5191_v27  ;;  %vm5182_vm10 = vcmp.gt.f32.partialorder %v5095_v31, 0.0  ;;  %v5120_v18 = vsel %vm5119_vm11, %v5059_v44, %v5118_v0  ;;  %v5125_v12 = vmul.f32 %v12515_v52, %v5060_v57  ;;  %v5818_v0 = vld [vmem:[#allocation6 + $0x1180] sm:$0xff] }
 0x3a6   : > { %v5192_v15 = vsel %vm5182_vm10, %v5095_v31, 1.0  ;;  %v5123_v59 = vsel %vm5121_vm12, %v5122_v50, %v5120_v18  ;;  %v5171_v1 = vmax.f32 %v5161_v47, 0.0  ;;  %v5162_v10 = vsub.f32 %v5095_v31, %v5152_v22  ;;  %v5666_v47 = vld [vmem:[#allocation6 + $0xcc0] sm:$0xff] }
 0x3a7   : > { %12518 = vrcp.f32 %v5192_v15  ;;  %vm5186_vm13 = vcmp.gt.f32.partialorder %v5123_v59, 0.0  ;;  %v5127_v60 = vsel %vm5126_vm14, %v5060_v57, %v5125_v12  ;;  %v5166_v19 = vsub.f32 %v5123_v59, %v5148_v55  ;;  %v5686_v15 = vld [vmem:[#allocation6 + $0xd60] sm:$0xff] }
 0x3a8   : > { %v5196_v36 = vsel %vm5186_vm13, %v5123_v59, 1.0  ;;  %v5130_v9 = vsel %vm5128_vm15, %v5129_v51, %v5127_v60  ;;  %v5172_v61 = vmax.f32 %v5162_v10, 0.0  ;;  %v5674_v51 = vld [vmem:[#allocation6 + $0xd00] sm:$0xff] }
 0x3a9   : > { %12520 = vrcp.f32 %v5196_v36  ;;  %vm5187_vm0 = vcmp.gt.f32.partialorder %v5130_v9, 0.0  ;;  %v5167_v32 = vsub.f32 %v5130_v9, %v5152_v22  ;;  %v5176_v44 = vmax.f32 %v5166_v19, 0.0  ;;  %v5806_v36 = vld [vmem:[#allocation6 + $0x1120] sm:$0xff] }
 0x3aa   : > { %v5197_v38 = vsel %vm5187_vm0, %v5130_v9, 1.0  ;;  %v11241_v60 = vcombine.high %v5674_v51, %v5678_v39  ;;  %v11240_v37 = vcombine.low %v5674_v51, %v5678_v39  ;;  %v5798_v22 = vld [vmem:[#allocation6 + $0x10e0] sm:$0xff] }
 0x3ab   : > { %12522 = vrcp.f32 %v5197_v38  ;;  %v5177_v3 = vmax.f32 %v5167_v32, 0.0  ;;  %v5670_v38 = vld [vmem:[#allocation6 + $0xce0] sm:$0xff] }
 0x3ac   : > { %v5658_v10 = vld [vmem:[#allocation6 + $0xc80] sm:$0xff] }
 0x3b2   : > { %v12517_v63 = vpop.eup %12516 }
 0x3b3   : > { %v5211_v35 = vmul.f32 %v12517_v63, %v5171_v1  ;;  %v11233_v1 = vcombine.high %v5666_v47, %v5670_v38 }
 0x3b4   : > { %v12519_v40 = vpop.eup %12518 }
 0x3b5   : > { %v5221_v4 = vsel %vm5181_vm7, %v5211_v35, 0.0  ;;  %v5212_v58 = vmul.f32 %v12519_v40, %v5172_v61  ;;  %v5662_v35 = vld [vmem:[#allocation6 + $0xca0] sm:$0xff]  ;;  %v11232_v40 = vcombine.low %v5666_v47, %v5670_v38 }
 0x3b6   : > { %v5236_v7 = vmul.f32 %v5221_v4, %v13195_v53  ;;  %v12521_v46 = vpop.eup %12520  ;;  %v5231_v62 = vmul.f32 %v5221_v4, %v12898_v54  ;;  %v5822_v54 = vld [vmem:[#allocation6 + $0x11a0] sm:$0xff]  ;;  %v11225_v61 = vcombine.high %v5658_v10, %v5662_v35 }
 0x3b7   : > { %v5216_v57 = vmul.f32 %v12521_v46, %v5176_v44  ;;  %v5222_v5 = vsel %vm5182_vm10, %v5212_v58, 0.0  ;;  %v11385_v12 = vcombine.high %v5818_v0, %v5822_v54  ;;  %v11384_v55 = vcombine.low %v5818_v0, %v5822_v54  ;;  %v5786_v4 = vld [vmem:[#allocation6 + $0x1080] sm:$0xff] }
 0x3b8   : > { %v12523_v43 = vpop.eup %12522  ;;  %v5232_v50 = vmul.f32 %v5222_v5, %v12929_v6  ;;  %v5237_v52 = vmul.f32 %v5222_v5, %v13201_v14  ;;  %v11256_v6 = vcombine.low %v5690_v26, %v5694_v23  ;;  %v5814_v14 = vld [vmem:[#allocation6 + $0x1160] sm:$0xff] }
 0x3b9   : > { %v5226_v16 = vsel %vm5186_vm13, %v5216_v57, 0.0  ;;  %v5217_v33 = vmul.f32 %v12523_v43, %v5177_v3  ;;  %v5650_v44 = vld [vmem:[#allocation6 + $0xc40] sm:$0xff]  ;;  %v11224_v57 = vcombine.low %v5658_v10, %v5662_v35 }
 0x3ba   : > { %v5241_v25 = vmul.f32 %v5226_v16, %v12904_v8  ;;  %v5246_v53 = vmul.f32 %v5226_v16, %v13205_v56  ;;  %v5682_v56 = vld [vmem:[#allocation6 + $0xd40] sm:$0xff] }
 0x3bb   : > { %v5227_v17 = vsel %vm5187_vm0, %v5217_v33, 0.0  ;;  %v11248_v20 = vcombine.low %v5682_v56, %v5686_v15  ;;  %v5654_v46 = vld [vmem:[#allocation6 + $0xc60] sm:$0xff] }
 0x3bc   : > { %v13234_v28 = vpack.c.bf16 %v5241_v25, %v5231_v62  ;;  %v13236_v27 = vpack.c.bf16 %v5246_v53, %v5236_v7  ;;  %v5242_v31 = vmul.f32 %v5227_v17, %v12934_v13  ;;  %v5247_v8 = vmul.f32 %v5227_v17, %v13211_v29  ;;  %v5810_v13 = vld [vmem:[#allocation6 + $0x1140] sm:$0xff] }
 0x3bd   : > { %v11249_v29 = vcombine.high %v5682_v56, %v5686_v15  ;;  %v11377_v48 = vcombine.high %v5810_v13, %v5814_v14  ;;  %v11376_v9 = vcombine.low %v5810_v13, %v5814_v14  ;;  %v5790_v7 = vld [vmem:[#allocation6 + $0x10a0] sm:$0xff]  ;;  %v11217_v62 = vcombine.high %v5650_v44, %v5654_v46 }
 0x3be   : > { %9173 = vmatprep.mubr.bf16.mxu1 %v13234_v28  ;;  %v13244_v18 = vpack.c.bf16 %v5242_v31, %v5232_v50  ;;  %v13246_v59 = vpack.c.bf16 %v5247_v8, %v5237_v52  ;;  %v11353_v58 = vcombine.high %v5786_v4, %v5790_v7  ;;  %v5778_v3 = vld [vmem:[#allocation6 + $0x1040] sm:$0xff]  ;;  %v11352_v16 = vcombine.low %v5786_v4, %v5790_v7 }
 0x3bf   : > { %9174 = vmatmul.mubr.bf16.vlgmr.msra.gmra.mxu1 %v13185_v41  ;;  %v5782_v43 = vld [vmem:[#allocation6 + $0x1060] sm:$0xff]  ;;  %v11216_v25 = vcombine.low %v5650_v44, %v5654_v46 }
 0x3c0   : > { %9228 = vmatpush1.bf16.msra.mxu1 %v11264_v45  ;;  %9259 = vmatprep.mubr.bf16.mxu1 %v13187_v11  ;;  %v5802_v45 = vld [vmem:[#allocation6 + $0x1100] sm:$0xff]  ;;  %v11345_v5 = vcombine.high %v5778_v3, %v5782_v43 }
 0x3c1   : > { %9217 = vmatmul.mubr.bf16.vlgmr.msra.gmra.mxu0 %v13244_v18  ;;  %9229 = vmatprep.subr.bf16.mxu1 %v11257_v34  ;;  %v11369_v24 = vcombine.high %v5802_v45, %v5806_v36  ;;  %v11368_v63 = vcombine.low %v5802_v45, %v5806_v36  ;;  %v5642_v26 = vld [vmem:[#allocation6 + $0xc00] sm:$0xff]  ;;  %v11344_v34 = vcombine.low %v5778_v3, %v5782_v43 }
 0x3c2   : > { %9271 = vmatpush1.bf16.msra.mxu0 %v11392_v42  ;;  %9302 = vmatprep.mubr.bf16.mxu0 %v13246_v59  ;;  %v5794_v42 = vld [vmem:[#allocation6 + $0x10c0] sm:$0xff] }
 0x3c3   : > { %9272 = vmatprep.subr.bf16.mxu0 %v11385_v12  ;;  %v11361_v19 = vcombine.high %v5794_v42, %v5798_v22  ;;  %v11360_v32 = vcombine.low %v5794_v42, %v5798_v22  ;;  %v5646_v23 = vld [vmem:[#allocation6 + $0xc20] sm:$0xff] }
 0x3c4   : > { %9230 = vmatpush1.bf16.msra.mxu1 %v11256_v6  ;;  %v5770_v53 = vld [vmem:[#allocation6 + $0x1000] sm:$0xff]  ;;  %v11209_v17 = vcombine.high %v5642_v26, %v5646_v23  ;;  %v11208_v52 = vcombine.low %v5642_v26, %v5646_v23 }
 0x3c5   : > { %9231 = vmatprep.subr.bf16.mxu1 %v11249_v29  ;;  %v5774_v33 = vld [vmem:[#allocation6 + $0x1020] sm:$0xff] }
 0x3c6   : > { %9273 = vmatpush1.bf16.msra.mxu0 %v11384_v55  ;;  %v5762_v0 = vld [vmem:[#allocation6 + $0xfc0] sm:$0xff]  ;;  %v11337_v50 = vcombine.high %v5770_v53, %v5774_v33  ;;  %v11336_v15 = vcombine.low %v5770_v53, %v5774_v33 }
 0x3c7   : > { %9274 = vmatprep.subr.bf16.mxu0 %v11377_v48  ;;  %v5766_v54 = vld [vmem:[#allocation6 + $0xfe0] sm:$0xff] }
 0x3c8   : > { %9232 = vmatpush1.bf16.msra.mxu1 %v11248_v20  ;;  %v5890_v31 = vld [vmem:[#allocation6 + $0x13c0] sm:$0xff]  ;;  %v11329_v56 = vcombine.high %v5762_v0, %v5766_v54  ;;  %v11328_v14 = vcombine.low %v5762_v0, %v5766_v54 }
 0x3c9   : > { %9233 = vmatprep.subr.bf16.mxu1 %v11241_v60  ;;  %v5894_v8 = vld [vmem:[#allocation6 + $0x13e0] sm:$0xff] }
 0x3ca   : > { %9275 = vmatpush1.bf16.msra.mxu0 %v11376_v9  ;;  %v5754_v12 = vld [vmem:[#allocation6 + $0xf80] sm:$0xff]  ;;  %v11457_v13 = vcombine.high %v5890_v31, %v5894_v8  ;;  %v11456_v39 = vcombine.low %v5890_v31, %v5894_v8 }
 0x3cb   : > { %9276 = vmatprep.subr.bf16.mxu0 %v11369_v24  ;;  %v5758_v6 = vld [vmem:[#allocation6 + $0xfa0] sm:$0xff] }
 0x3cc   : > { %9234 = vmatpush1.bf16.msra.mxu1 %v11240_v37  ;;  %v5882_v29 = vld [vmem:[#allocation6 + $0x1380] sm:$0xff]  ;;  %v11321_v51 = vcombine.high %v5754_v12, %v5758_v6  ;;  %v11320_v36 = vcombine.low %v5754_v12, %v5758_v6 }
 0x3cd   : > { %9235 = vmatprep.subr.bf16.mxu1 %v11233_v1  ;;  %v5886_v55 = vld [vmem:[#allocation6 + $0x13a0] sm:$0xff] }
 0x3ce   : > { %9277 = vmatpush1.bf16.msra.mxu0 %v11368_v63  ;;  %v5746_v48 = vld [vmem:[#allocation6 + $0xf40] sm:$0xff]  ;;  %v11449_v45 = vcombine.high %v5882_v29, %v5886_v55  ;;  %v11448_v38 = vcombine.low %v5882_v29, %v5886_v55 }
 0x3cf   : > { %9278 = vmatprep.subr.bf16.mxu0 %v11361_v19  ;;  %v5750_v20 = vld [vmem:[#allocation6 + $0xf60] sm:$0xff] }
 0x3d0   : > { %9236 = vmatpush1.bf16.msra.mxu1 %v11232_v40  ;;  %v5874_v60 = vld [vmem:[#allocation6 + $0x1340] sm:$0xff]  ;;  %v11313_v47 = vcombine.high %v5746_v48, %v5750_v20  ;;  %v11312_v22 = vcombine.low %v5746_v48, %v5750_v20 }
 0x3d1   : > { %9237 = vmatprep.subr.bf16.mxu1 %v11225_v61  ;;  %v5878_v9 = vld [vmem:[#allocation6 + $0x1360] sm:$0xff] }
 0x3d2   : > { %9279 = vmatpush1.bf16.msra.mxu0 %v11360_v32  ;;  %v5738_v24 = vld [vmem:[#allocation6 + $0xf00] sm:$0xff]  ;;  %v11441_v42 = vcombine.high %v5874_v60, %v5878_v9  ;;  %v11440_v35 = vcombine.low %v5874_v60, %v5878_v9 }
 0x3d3   : > { %9280 = vmatprep.subr.bf16.mxu0 %v11353_v58  ;;  %v5742_v37 = vld [vmem:[#allocation6 + $0xf20] sm:$0xff] }
 0x3d4   : > { %9238 = vmatpush1.bf16.msra.mxu1 %v11224_v57  ;;  %v5866_v1 = vld [vmem:[#allocation6 + $0x1300] sm:$0xff]  ;;  %v11305_v10 = vcombine.high %v5738_v24, %v5742_v37  ;;  %v11304_v7 = vcombine.low %v5738_v24, %v5742_v37 }
 0x3d5   : > { %9239 = vmatprep.subr.bf16.mxu1 %v11217_v62  ;;  %v5870_v63 = vld [vmem:[#allocation6 + $0x1320] sm:$0xff] }
 0x3d6   : > { %9281 = vmatpush1.bf16.msra.mxu0 %v11352_v16  ;;  %v5730_v19 = vld [vmem:[#allocation6 + $0xec0] sm:$0xff]  ;;  %v11433_v4 = vcombine.high %v5866_v1, %v5870_v63  ;;  %v11432_v46 = vcombine.low %v5866_v1, %v5870_v63 }
 0x3d7   : > { %9282 = vmatprep.subr.bf16.mxu0 %v11345_v5  ;;  %v5734_v40 = vld [vmem:[#allocation6 + $0xee0] sm:$0xff] }
 0x3d8   : > { %9240 = vmatpush1.bf16.msra.mxu1 %v11216_v25  ;;  %v5858_v61 = vld [vmem:[#allocation6 + $0x12c0] sm:$0xff]  ;;  %v11297_v44 = vcombine.high %v5730_v19, %v5734_v40  ;;  %v11296_v43 = vcombine.low %v5730_v19, %v5734_v40 }
 0x3d9   : > { %9241 = vmatprep.subr.bf16.mxu1 %v11209_v17  ;;  %v5862_v32 = vld [vmem:[#allocation6 + $0x12e0] sm:$0xff] }
 0x3da   : > { %9283 = vmatpush1.bf16.msra.mxu0 %v11344_v34  ;;  %v5722_v58 = vld [vmem:[#allocation6 + $0xe80] sm:$0xff]  ;;  %v11425_v3 = vcombine.high %v5858_v61, %v5862_v32  ;;  %v11424_v23 = vcombine.low %v5858_v61, %v5862_v32 }
 0x3db   : > { %9284 = vmatprep.subr.bf16.mxu0 %v11337_v50  ;;  %v5726_v57 = vld [vmem:[#allocation6 + $0xea0] sm:$0xff] }
 0x3dc   : > { %9242 = vmatpush1.bf16.msra.mxu1 %v11208_v52  ;;  %v5850_v62 = vld [vmem:[#allocation6 + $0x1280] sm:$0xff]  ;;  %v11289_v26 = vcombine.high %v5722_v58, %v5726_v57  ;;  %v11288_v33 = vcombine.low %v5722_v58, %v5726_v57 }
 0x3dd   : > { %9243 = vmatprep.subr.bf16.mxu1 %v11329_v56  ;;  %v5854_v16 = vld [vmem:[#allocation6 + $0x12a0] sm:$0xff] }
 0x3de   : > { %9285 = vmatpush1.bf16.msra.mxu0 %v11336_v15  ;;  %v5714_v5 = vld [vmem:[#allocation6 + $0xe40] sm:$0xff]  ;;  %v11417_v53 = vcombine.high %v5850_v62, %v5854_v16  ;;  %v11416_v54 = vcombine.low %v5850_v62, %v5854_v16 }
 0x3df   : > { %9286 = vmatprep.subr.bf16.mxu0 %v11457_v13  ;;  %v5718_v25 = vld [vmem:[#allocation6 + $0xe60] sm:$0xff]  ;;  %v5315_v13 = vld [vmem:[#allocation6 + $0x1c8] sm:$0xff] }
 0x3e0   : > { %9244 = vmatpush2.bf16.msra.mxu1 %v11328_v14  ;;  %v5842_v17 = vld [vmem:[#allocation6 + $0x1240] sm:$0xff]  ;;  %v11281_v0 = vcombine.high %v5714_v5, %v5718_v25  ;;  %v11280_v8 = vcombine.low %v5714_v5, %v5718_v25  ;;  %v5319_v14 = vld [vmem:[#allocation6 + $0x1e8] sm:$0xff] }
 0x3e1   : > { %9245 = vmatprep.subr.bf16.mxu1 %v11321_v51  ;;  %v5846_v34 = vld [vmem:[#allocation6 + $0x1260] sm:$0xff]  ;;  %v5443_v51 = vld [vmem:[#allocation6 + $0x5c8] sm:$0xff]  ;;  %v10883_v48 = vcombine.high %v5315_v13, %v5319_v14  ;;  %v10882_v9 = vcombine.low %v5315_v13, %v5319_v14 }
 0x3e2   : > { %9287 = vmatpush2.bf16.msra.mxu0 %v11456_v39  ;;  %v5706_v50 = vld [vmem:[#allocation6 + $0xe00] sm:$0xff]  ;;  %v11409_v31 = vcombine.high %v5842_v17, %v5846_v34  ;;  %v11408_v6 = vcombine.low %v5842_v17, %v5846_v34  ;;  %v5447_v39 = vld [vmem:[#allocation6 + $0x5e8] sm:$0xff] }
 0x3e3   : > { %9288 = vmatprep.subr.bf16.mxu0 %v11449_v45  ;;  %v5710_v52 = vld [vmem:[#allocation6 + $0xe20] sm:$0xff]  ;;  %v5307_v45 = vld [vmem:[#allocation6 + $0x188] sm:$0xff]  ;;  %v11011_v60 = vcombine.high %v5443_v51, %v5447_v39  ;;  %v11010_v37 = vcombine.low %v5443_v51, %v5447_v39 }
 0x3e4   : > { %9246 = vmatpush2.bf16.msra.mxu1 %v11320_v36  ;;  %v5834_v56 = vld [vmem:[#allocation6 + $0x1200] sm:$0xff]  ;;  %v11273_v12 = vcombine.high %v5706_v50, %v5710_v52  ;;  %v11272_v55 = vcombine.low %v5706_v50, %v5710_v52  ;;  %v5311_v36 = vld [vmem:[#allocation6 + $0x1a8] sm:$0xff] }
 0x3e5   : > { %9247 = vmatprep.subr.bf16.mxu1 %v11313_v47  ;;  %v5838_v15 = vld [vmem:[#allocation6 + $0x1220] sm:$0xff]  ;;  %v5435_v47 = vld [vmem:[#allocation6 + $0x588] sm:$0xff]  ;;  %v10875_v24 = vcombine.high %v5307_v45, %v5311_v36  ;;  %v10874_v63 = vcombine.low %v5307_v45, %v5311_v36 }
 0x3e6   : > { %9289 = vmatpush2.bf16.msra.mxu0 %v11448_v38  ;;  %v11401_v29 = vcombine.high %v5834_v56, %v5838_v15  ;;  %v11400_v20 = vcombine.low %v5834_v56, %v5838_v15  ;;  %v5439_v38 = vld [vmem:[#allocation6 + $0x5a8] sm:$0xff] }
 0x3e7   : > { %9290 = vmatprep.subr.bf16.mxu0 %v11441_v42  ;;  %v5299_v42 = vld [vmem:[#allocation6 + $0x148] sm:$0xff]  ;;  %v11003_v1 = vcombine.high %v5435_v47, %v5439_v38  ;;  %v11002_v40 = vcombine.low %v5435_v47, %v5439_v38 }
 0x3e8   : > { %9248 = vmatpush2.bf16.msra.mxu1 %v11312_v22  ;;  %v5303_v22 = vld [vmem:[#allocation6 + $0x168] sm:$0xff] }
 0x3e9   : > { %9249 = vmatprep.subr.bf16.mxu1 %v11305_v10  ;;  %v5427_v10 = vld [vmem:[#allocation6 + $0x548] sm:$0xff]  ;;  %v10867_v19 = vcombine.high %v5299_v42, %v5303_v22  ;;  %v10866_v32 = vcombine.low %v5299_v42, %v5303_v22 }
 0x3ea   : > { %9291 = vmatpush2.bf16.msra.mxu0 %v11440_v35  ;;  %v5431_v35 = vld [vmem:[#allocation6 + $0x568] sm:$0xff] }
 0x3eb   : > { %9292 = vmatprep.subr.bf16.mxu0 %v11433_v4  ;;  %v5291_v4 = vld [vmem:[#allocation6 + $0x108] sm:$0xff]  ;;  %v10995_v61 = vcombine.high %v5427_v10, %v5431_v35  ;;  %v10994_v57 = vcombine.low %v5427_v10, %v5431_v35 }
 0x3ec   : > { %9250 = vmatpush2.bf16.msra.mxu1 %v11304_v7  ;;  %v5295_v7 = vld [vmem:[#allocation6 + $0x128] sm:$0xff] }
 0x3ed   : > { %9251 = vmatprep.subr.bf16.mxu1 %v11297_v44  ;;  %v5419_v44 = vld [vmem:[#allocation6 + $0x508] sm:$0xff]  ;;  %v10859_v58 = vcombine.high %v5291_v4, %v5295_v7  ;;  %v10858_v16 = vcombine.low %v5291_v4, %v5295_v7 }
 0x3ee   : > { %9293 = vmatpush2.bf16.msra.mxu0 %v11432_v46  ;;  %v5423_v46 = vld [vmem:[#allocation6 + $0x528] sm:$0xff] }
 0x3ef   : > { %9294 = vmatprep.subr.bf16.mxu0 %v11425_v3  ;;  %v5283_v3 = vld [vmem:[#allocation6 + $0xc8] sm:$0xff]  ;;  %v10987_v62 = vcombine.high %v5419_v44, %v5423_v46  ;;  %v10986_v25 = vcombine.low %v5419_v44, %v5423_v46 }
 0x3f0   : > { %9252 = vmatpush2.bf16.msra.mxu1 %v11296_v43  ;;  %v5287_v43 = vld [vmem:[#allocation6 + $0xe8] sm:$0xff] }
 0x3f1   : > { %9253 = vmatprep.subr.bf16.mxu1 %v11289_v26  ;;  %v5411_v26 = vld [vmem:[#allocation6 + $0x4c8] sm:$0xff]  ;;  %v10851_v5 = vcombine.high %v5283_v3, %v5287_v43  ;;  %v10850_v34 = vcombine.low %v5283_v3, %v5287_v43 }
 0x3f2   : > { %9295 = vmatpush2.bf16.msra.mxu0 %v11424_v23  ;;  %v5415_v23 = vld [vmem:[#allocation6 + $0x4e8] sm:$0xff] }
 0x3f3   : > { %9296 = vmatprep.subr.bf16.mxu0 %v11417_v53  ;;  %v5275_v53 = vld [vmem:[#allocation6 + $0x88] sm:$0xff]  ;;  %v10979_v17 = vcombine.high %v5411_v26, %v5415_v23  ;;  %v10978_v52 = vcombine.low %v5411_v26, %v5415_v23 }
 0x3f4   : > { %9254 = vmatpush2.bf16.msra.mxu1 %v11288_v33  ;;  %v5279_v33 = vld [vmem:[#allocation6 + $0xa8] sm:$0xff] }
 0x3f5   : > { %9255 = vmatprep.subr.bf16.mxu1 %v11281_v0  ;;  %v5403_v0 = vld [vmem:[#allocation6 + $0x488] sm:$0xff]  ;;  %v10843_v50 = vcombine.high %v5275_v53, %v5279_v33  ;;  %v10842_v15 = vcombine.low %v5275_v53, %v5279_v33 }
 0x3f6   : > { %9297 = vmatpush2.bf16.msra.mxu0 %v11416_v54  ;;  %v5407_v54 = vld [vmem:[#allocation6 + $0x4a8] sm:$0xff] }
 0x3f7   : > { %9298 = vmatprep.subr.bf16.mxu0 %v11409_v31  ;;  %v5267_v31 = vld [vmem:[#allocation6 + $0x48] sm:$0xff]  ;;  %v10971_v56 = vcombine.high %v5403_v0, %v5407_v54  ;;  %v10970_v14 = vcombine.low %v5403_v0, %v5407_v54 }
 0x3f8   : > { %9256 = vmatpush2.bf16.msra.mxu1 %v11280_v8  ;;  %v5271_v8 = vld [vmem:[#allocation6 + $0x68] sm:$0xff] }
 0x3f9   : > { %9257 = vmatprep.subr.bf16.mxu1 %v11273_v12  ;;  %v5395_v12 = vld [vmem:[#allocation6 + $0x448] sm:$0xff]  ;;  %v10835_v13 = vcombine.high %v5267_v31, %v5271_v8  ;;  %v10834_v39 = vcombine.low %v5267_v31, %v5271_v8 }
 0x3fa   : > { %9299 = vmatpush2.bf16.msra.mxu0 %v11408_v6  ;;  %v5399_v6 = vld [vmem:[#allocation6 + $0x468] sm:$0xff] }
 0x3fb   : > { %9300 = vmatprep.subr.bf16.mxu0 %v11401_v29  ;;  %v5259_v29 = vld [vmem:[#allocation6 + $0x8] sm:$0xff]  ;;  %v10963_v51 = vcombine.high %v5395_v12, %v5399_v6  ;;  %v10962_v36 = vcombine.low %v5395_v12, %v5399_v6 }
 0x3fc   : > { %9258 = vmatpush2.bf16.msra.mxu1 %v11272_v55  ;;  %v5263_v55 = vld [vmem:[#allocation6 + $0x28] sm:$0xff] }
 0x3fd   : > { %9313 = vmatprep.subr.bf16.mxu1 %v10883_v48  ;;  %v5387_v48 = vld [vmem:[#allocation6 + $0x408] sm:$0xff]  ;;  %v10827_v45 = vcombine.high %v5259_v29, %v5263_v55  ;;  %v10826_v38 = vcombine.low %v5259_v29, %v5263_v55 }
 0x3fe   : > { %9301 = vmatpush2.bf16.msra.mxu0 %v11400_v20  ;;  %v5391_v20 = vld [vmem:[#allocation6 + $0x428] sm:$0xff] }
 0x3ff   : > { %9260 = vmatmul.mubr.bf16.vlgmr.msra.gmra.mxu1 %v13162_v2  ;;  %9356 = vmatprep.subr.bf16.mxu0 %v11011_v60  ;;  %v5379_v60 = vld [vmem:[#allocation6 + $0x3c8] sm:$0xff]  ;;  %v10955_v47 = vcombine.high %v5387_v48, %v5391_v20  ;;  %v10954_v22 = vcombine.low %v5387_v48, %v5391_v20 }
 0x400   : > { %9314 = vmatpush1.bf16.msra.mxu1 %v10882_v9  ;;  %9345 = vmatprep.mubr.bf16.mxu1 %v13160_v49  ;;  %v5383_v9 = vld [vmem:[#allocation6 + $0x3e8] sm:$0xff] }
 0x401   : > { %9303 = vmatmul.mubr.bf16.vlgmr.msra.gmra.mxu0 %v13236_v27  ;;  %9315 = vmatprep.subr.bf16.mxu1 %v10875_v24  ;;  %v5507_v24 = vld [vmem:[#allocation6 + $0x7c8] sm:$0xff]  ;;  %v10947_v42 = vcombine.high %v5379_v60, %v5383_v9  ;;  %v10946_v35 = vcombine.low %v5379_v60, %v5383_v9 }
 0x402   : > { %9357 = vmatpush1.bf16.msra.mxu0 %v11010_v37  ;;  %9388 = vmatprep.mubr.bf16.mxu0 %v13234_v28  ;;  %v5511_v37 = vld [vmem:[#allocation6 + $0x7e8] sm:$0xff] }
 0x403   : > { %9358 = vmatprep.subr.bf16.mxu0 %v11003_v1  ;;  %v5371_v1 = vld [vmem:[#allocation6 + $0x388] sm:$0xff]  ;;  %v11075_v10 = vcombine.high %v5507_v24, %v5511_v37  ;;  %v11074_v7 = vcombine.low %v5507_v24, %v5511_v37 }
 0x404   : > { %9316 = vmatpush1.bf16.msra.mxu1 %v10874_v63  ;;  %v5375_v63 = vld [vmem:[#allocation6 + $0x3a8] sm:$0xff] }
 0x405   : > { %9317 = vmatprep.subr.bf16.mxu1 %v10867_v19  ;;  %v5499_v19 = vld [vmem:[#allocation6 + $0x788] sm:$0xff]  ;;  %v10939_v4 = vcombine.high %v5371_v1, %v5375_v63  ;;  %v10938_v46 = vcombine.low %v5371_v1, %v5375_v63 }
 0x406   : > { %9359 = vmatpush1.bf16.msra.mxu0 %v11002_v40  ;;  %v5503_v40 = vld [vmem:[#allocation6 + $0x7a8] sm:$0xff] }
 0x407   : > { %9360 = vmatprep.subr.bf16.mxu0 %v10995_v61  ;;  %v5363_v61 = vld [vmem:[#allocation6 + $0x348] sm:$0xff]  ;;  %v11067_v44 = vcombine.high %v5499_v19, %v5503_v40  ;;  %v11066_v43 = vcombine.low %v5499_v19, %v5503_v40 }
 0x408   : > { %9318 = vmatpush1.bf16.msra.mxu1 %v10866_v32  ;;  %v5367_v32 = vld [vmem:[#allocation6 + $0x368] sm:$0xff] }
 0x409   : > { %9319 = vmatprep.subr.bf16.mxu1 %v10859_v58  ;;  %v5491_v58 = vld [vmem:[#allocation6 + $0x748] sm:$0xff]  ;;  %v10931_v3 = vcombine.high %v5363_v61, %v5367_v32  ;;  %v10930_v23 = vcombine.low %v5363_v61, %v5367_v32 }
 0x40a   : > { %9361 = vmatpush1.bf16.msra.mxu0 %v10994_v57  ;;  %v5495_v57 = vld [vmem:[#allocation6 + $0x768] sm:$0xff] }
 0x40b   : > { %9362 = vmatprep.subr.bf16.mxu0 %v10987_v62  ;;  %v5355_v62 = vld [vmem:[#allocation6 + $0x308] sm:$0xff]  ;;  %v11059_v26 = vcombine.high %v5491_v58, %v5495_v57  ;;  %v11058_v33 = vcombine.low %v5491_v58, %v5495_v57 }
 0x40c   : > { %9320 = vmatpush1.bf16.msra.mxu1 %v10858_v16  ;;  %v5359_v16 = vld [vmem:[#allocation6 + $0x328] sm:$0xff] }
 0x40d   : > { %9321 = vmatprep.subr.bf16.mxu1 %v10851_v5  ;;  %v5483_v5 = vld [vmem:[#allocation6 + $0x708] sm:$0xff]  ;;  %v10923_v53 = vcombine.high %v5355_v62, %v5359_v16  ;;  %v10922_v54 = vcombine.low %v5355_v62, %v5359_v16 }
 0x40e   : > { %9363 = vmatpush1.bf16.msra.mxu0 %v10986_v25  ;;  %v5487_v25 = vld [vmem:[#allocation6 + $0x728] sm:$0xff] }
 0x40f   : > { %9364 = vmatprep.subr.bf16.mxu0 %v10979_v17  ;;  %v5347_v17 = vld [vmem:[#allocation6 + $0x2c8] sm:$0xff]  ;;  %v11051_v0 = vcombine.high %v5483_v5, %v5487_v25  ;;  %v11050_v8 = vcombine.low %v5483_v5, %v5487_v25 }
 0x410   : > { %9322 = vmatpush1.bf16.msra.mxu1 %v10850_v34  ;;  %v5351_v34 = vld [vmem:[#allocation6 + $0x2e8] sm:$0xff] }
 0x411   : > { %9323 = vmatprep.subr.bf16.mxu1 %v10843_v50  ;;  %v5475_v50 = vld [vmem:[#allocation6 + $0x6c8] sm:$0xff]  ;;  %v10915_v31 = vcombine.high %v5347_v17, %v5351_v34  ;;  %v10914_v6 = vcombine.low %v5347_v17, %v5351_v34  ;;  %v12658_v34 = vmov 0.0  }
 0x412   : > { %9365 = vmatpush1.bf16.msra.mxu0 %v10978_v52  ;;  %v5479_v52 = vld [vmem:[#allocation6 + $0x6e8] sm:$0xff]  ;;  %9964 = vst [vmem:[%s13267_s7 + $0x10] sm:$0xf] %v12658_v34  ;;  %9965 = vst [vmem:[%s13267_s7 + $0x18] sm:$0xf] %v12658_v34 }
 0x413   : > { %9366 = vmatprep.subr.bf16.mxu0 %v10971_v56  ;;  %v5339_v56 = vld [vmem:[#allocation6 + $0x288] sm:$0xff]  ;;  %v11043_v12 = vcombine.high %v5475_v50, %v5479_v52  ;;  %v11042_v55 = vcombine.low %v5475_v50, %v5479_v52 }
 0x414   : > { %9324 = vmatpush1.bf16.msra.mxu1 %v10842_v15  ;;  %v5343_v15 = vld [vmem:[#allocation6 + $0x2a8] sm:$0xff] }
 0x415   : > { %9325 = vmatprep.subr.bf16.mxu1 %v10835_v13  ;;  %v5467_v13 = vld [vmem:[#allocation6 + $0x688] sm:$0xff]  ;;  %v10907_v29 = vcombine.high %v5339_v56, %v5343_v15  ;;  %v10906_v20 = vcombine.low %v5339_v56, %v5343_v15 }
 0x416   : > { %9367 = vmatpush1.bf16.msra.mxu0 %v10970_v14  ;;  %v5471_v14 = vld [vmem:[#allocation6 + $0x6a8] sm:$0xff] }
 0x417   : > { %9368 = vmatprep.subr.bf16.mxu0 %v10963_v51  ;;  %v5331_v51 = vld [vmem:[#allocation6 + $0x248] sm:$0xff]  ;;  %v11035_v48 = vcombine.high %v5467_v13, %v5471_v14  ;;  %v11034_v9 = vcombine.low %v5467_v13, %v5471_v14 }
 0x418   : > { %9326 = vmatpush1.bf16.msra.mxu1 %v10834_v39  ;;  %v5335_v39 = vld [vmem:[#allocation6 + $0x268] sm:$0xff] }
 0x419   : > { %9327 = vmatprep.subr.bf16.mxu1 %v10827_v45  ;;  %v5459_v45 = vld [vmem:[#allocation6 + $0x648] sm:$0xff]  ;;  %v10899_v60 = vcombine.high %v5331_v51, %v5335_v39  ;;  %v10898_v37 = vcombine.low %v5331_v51, %v5335_v39 }
 0x41a   : > { %9369 = vmatpush1.bf16.msra.mxu0 %v10962_v36  ;;  %v5463_v36 = vld [vmem:[#allocation6 + $0x668] sm:$0xff] }
 0x41b   : > { %9370 = vmatprep.subr.bf16.mxu0 %v10955_v47  ;;  %v5323_v47 = vld [vmem:[#allocation6 + $0x208] sm:$0xff]  ;;  %v11027_v24 = vcombine.high %v5459_v45, %v5463_v36  ;;  %v11026_v63 = vcombine.low %v5459_v45, %v5463_v36 }
 0x41c   : > { %9328 = vmatpush1.bf16.msra.mxu1 %v10826_v38  ;;  %v5327_v38 = vld [vmem:[#allocation6 + $0x228] sm:$0xff] }
 0x41d   : > { %9329 = vmatprep.subr.bf16.mxu1 %v10947_v42  ;;  %v5451_v42 = vld [vmem:[#allocation6 + $0x608] sm:$0xff]  ;;  %v10891_v1 = vcombine.high %v5323_v47, %v5327_v38  ;;  %v10890_v40 = vcombine.low %v5323_v47, %v5327_v38 }
 0x41e   : > { %9371 = vmatpush1.bf16.msra.mxu0 %v10954_v22  ;;  %v5455_v22 = vld [vmem:[#allocation6 + $0x628] sm:$0xff] }
 0x41f   : > { %9372 = vmatprep.subr.bf16.mxu0 %v11075_v10  ;;  %v5571_v10 = vld [vmem:[#allocation6 + $0x9c8] sm:$0xff]  ;;  %v11019_v19 = vcombine.high %v5451_v42, %v5455_v22  ;;  %v11018_v32 = vcombine.low %v5451_v42, %v5455_v22 }
 0x420   : > { %9330 = vmatpush2.bf16.msra.mxu1 %v10946_v35  ;;  %v5575_v35 = vld [vmem:[#allocation6 + $0x9e8] sm:$0xff] }
 0x421   : > { %9331 = vmatprep.subr.bf16.mxu1 %v10939_v4  ;;  %v5699_v4 = vld [vmem:[#allocation6 + $0xdc8] sm:$0xff]  ;;  %v11139_v61 = vcombine.high %v5571_v10, %v5575_v35  ;;  %v11138_v57 = vcombine.low %v5571_v10, %v5575_v35 }
 0x422   : > { %9373 = vmatpush2.bf16.msra.mxu0 %v11074_v7  ;;  %v5703_v7 = vld [vmem:[#allocation6 + $0xde8] sm:$0xff] }
 0x423   : > { %9374 = vmatprep.subr.bf16.mxu0 %v11067_v44  ;;  %v5563_v44 = vld [vmem:[#allocation6 + $0x988] sm:$0xff]  ;;  %v11267_v58 = vcombine.high %v5699_v4, %v5703_v7  ;;  %v11266_v16 = vcombine.low %v5699_v4, %v5703_v7 }
 0x424   : > { %9332 = vmatpush2.bf16.msra.mxu1 %v10938_v46  ;;  %v5567_v46 = vld [vmem:[#allocation6 + $0x9a8] sm:$0xff] }
 0x425   : > { %9333 = vmatprep.subr.bf16.mxu1 %v10931_v3  ;;  %v5691_v3 = vld [vmem:[#allocation6 + $0xd88] sm:$0xff]  ;;  %v11131_v62 = vcombine.high %v5563_v44, %v5567_v46  ;;  %v11130_v25 = vcombine.low %v5563_v44, %v5567_v46 }
 0x426   : > { %9375 = vmatpush2.bf16.msra.mxu0 %v11066_v43  ;;  %v5695_v43 = vld [vmem:[#allocation6 + $0xda8] sm:$0xff] }
 0x427   : > { %9376 = vmatprep.subr.bf16.mxu0 %v11059_v26  ;;  %v5555_v26 = vld [vmem:[#allocation6 + $0x948] sm:$0xff]  ;;  %v11259_v5 = vcombine.high %v5691_v3, %v5695_v43 }
 0x428   : > { %9334 = vmatpush2.bf16.msra.mxu1 %v10930_v23  ;;  %v5559_v23 = vld [vmem:[#allocation6 + $0x968] sm:$0xff] }
 0x429   : > { %9335 = vmatprep.subr.bf16.mxu1 %v10923_v53  ;;  %v5683_v53 = vld [vmem:[#allocation6 + $0xd48] sm:$0xff]  ;;  %v11123_v17 = vcombine.high %v5555_v26, %v5559_v23 }
 0x42a   : > { %9377 = vmatpush2.bf16.msra.mxu0 %v11058_v33  ;;  %v5687_v33 = vld [vmem:[#allocation6 + $0xd68] sm:$0xff] }
 0x42b   : > { %9378 = vmatprep.subr.bf16.mxu0 %v11051_v0  ;;  %v11258_v0 = vcombine.low %v5691_v3, %v5695_v43  ;;  %v5551_v50 = vld [vmem:[#allocation6 + $0x928] sm:$0xff]  ;;  %v11251_v52 = vcombine.high %v5683_v53, %v5687_v33 }
 0x42c   : > { %9336 = vmatpush2.bf16.msra.mxu1 %v10922_v54  ;;  %v5547_v54 = vld [vmem:[#allocation6 + $0x908] sm:$0xff] }
 0x42d   : > { %9337 = vmatprep.subr.bf16.mxu1 %v10915_v31  ;;  %v11122_v31 = vcombine.low %v5555_v26, %v5559_v23  ;;  %v5679_v56 = vld [vmem:[#allocation6 + $0xd28] sm:$0xff]  ;;  %v11115_v15 = vcombine.high %v5547_v54, %v5551_v50 }
 0x42e   : > { %9379 = vmatpush2.bf16.msra.mxu0 %v11050_v8  ;;  %v5675_v8 = vld [vmem:[#allocation6 + $0xd08] sm:$0xff] }
 0x42f   : > { %9380 = vmatprep.subr.bf16.mxu0 %v11043_v12  ;;  %v11250_v12 = vcombine.low %v5683_v53, %v5687_v33  ;;  %v5543_v13 = vld [vmem:[#allocation6 + $0x8e8] sm:$0xff]  ;;  %v11243_v14 = vcombine.high %v5675_v8, %v5679_v56 }
 0x430   : > { %9338 = vmatpush2.bf16.msra.mxu1 %v10914_v6  ;;  %v5539_v6 = vld [vmem:[#allocation6 + $0x8c8] sm:$0xff] }
 0x431   : > { %9339 = vmatprep.subr.bf16.mxu1 %v10907_v29  ;;  %v11114_v29 = vcombine.low %v5547_v54, %v5551_v50  ;;  %v5671_v51 = vld [vmem:[#allocation6 + $0xce8] sm:$0xff]  ;;  %v11107_v39 = vcombine.high %v5539_v6, %v5543_v13 }
 0x432   : > { %9381 = vmatpush2.bf16.msra.mxu0 %v11042_v55  ;;  %v5667_v55 = vld [vmem:[#allocation6 + $0xcc8] sm:$0xff] }
 0x433   : > { %9382 = vmatprep.subr.bf16.mxu0 %v11035_v48  ;;  %v11242_v48 = vcombine.low %v5675_v8, %v5679_v56  ;;  %v5535_v45 = vld [vmem:[#allocation6 + $0x8a8] sm:$0xff]  ;;  %v11235_v36 = vcombine.high %v5667_v55, %v5671_v51 }
 0x434   : > { %9340 = vmatpush2.bf16.msra.mxu1 %v10906_v20  ;;  %v5531_v20 = vld [vmem:[#allocation6 + $0x888] sm:$0xff] }
 0x435   : > { %9341 = vmatprep.subr.bf16.mxu1 %v10899_v60  ;;  %v11106_v60 = vcombine.low %v5539_v6, %v5543_v13  ;;  %v5663_v47 = vld [vmem:[#allocation6 + $0xca8] sm:$0xff]  ;;  %v11099_v38 = vcombine.high %v5531_v20, %v5535_v45 }
 0x436   : > { %9383 = vmatpush2.bf16.msra.mxu0 %v11034_v9  ;;  %v5659_v9 = vld [vmem:[#allocation6 + $0xc88] sm:$0xff] }
 0x437   : > { %9384 = vmatprep.subr.bf16.mxu0 %v11027_v24  ;;  %v11234_v24 = vcombine.low %v5667_v55, %v5671_v51  ;;  %v5527_v42 = vld [vmem:[#allocation6 + $0x868] sm:$0xff]  ;;  %v11227_v22 = vcombine.high %v5659_v9, %v5663_v47 }
 0x438   : > { %9342 = vmatpush2.bf16.msra.mxu1 %v10898_v37  ;;  %v5523_v37 = vld [vmem:[#allocation6 + $0x848] sm:$0xff] }
 0x439   : > { %9343 = vmatprep.subr.bf16.mxu1 %v10891_v1  ;;  %v11098_v1 = vcombine.low %v5531_v20, %v5535_v45  ;;  %v5655_v10 = vld [vmem:[#allocation6 + $0xc68] sm:$0xff]  ;;  %v11091_v35 = vcombine.high %v5523_v37, %v5527_v42 }
 0x43a   : > { %9385 = vmatpush2.bf16.msra.mxu0 %v11026_v63  ;;  %v5651_v63 = vld [vmem:[#allocation6 + $0xc48] sm:$0xff] }
 0x43b   : > { %9386 = vmatprep.subr.bf16.mxu0 %v11019_v19  ;;  %v11226_v19 = vcombine.low %v5659_v9, %v5663_v47  ;;  %v5519_v4 = vld [vmem:[#allocation6 + $0x828] sm:$0xff]  ;;  %v11219_v7 = vcombine.high %v5651_v63, %v5655_v10 }
 0x43c   : > { %9344 = vmatpush2.bf16.msra.mxu1 %v10890_v40  ;;  %v5515_v40 = vld [vmem:[#allocation6 + $0x808] sm:$0xff] }
 0x43d   : > { %9399 = vmatprep.subr.bf16.mxu1 %v11139_v61  ;;  %v11090_v61 = vcombine.low %v5523_v37, %v5527_v42  ;;  %v5647_v44 = vld [vmem:[#allocation6 + $0xc28] sm:$0xff]  ;;  %v11083_v46 = vcombine.high %v5515_v40, %v5519_v4 }
 0x43e   : > { %9387 = vmatpush2.bf16.msra.mxu0 %v11018_v32  ;;  %v5643_v32 = vld [vmem:[#allocation6 + $0xc08] sm:$0xff] }
 0x43f   : > { %9346 = vmatmul.mubr.bf16.vlgmr.msra.gmra.mxu1 %v13158_v21  ;;  %9442 = vmatprep.subr.bf16.mxu0 %v11267_v58  ;;  %v11218_v58 = vcombine.low %v5651_v63, %v5655_v10  ;;  %v5639_v3 = vld [vmem:[#allocation6 + $0xbe8] sm:$0xff]  ;;  %v11211_v43 = vcombine.high %v5643_v32, %v5647_v44 }
 0x440   : > { %9400 = vmatpush1.bf16.msra.mxu1 %v11138_v57  ;;  %9431 = vmatprep.mubr.bf16.mxu1 %v13180_v30  ;;  %v5635_v57 = vld [vmem:[#allocation6 + $0xbc8] sm:$0xff] }
 0x441   : > { %9389 = vmatmul.mubr.bf16.vlgmr.msra.gmra.mxu0 %v13185_v41  ;;  %9401 = vmatprep.subr.bf16.mxu1 %v11131_v62  ;;  %v11082_v62 = vcombine.low %v5515_v40, %v5519_v4  ;;  %v5767_v26 = vld [vmem:[#allocation6 + $0xfe8] sm:$0xff]  ;;  %v11203_v23 = vcombine.high %v5635_v57, %v5639_v3 }
 0x442   : > { %9443 = vmatpush1.bf16.msra.mxu0 %v11266_v16  ;;  %9474 = vmatprep.mubr.bf16.mxu0 %v13187_v11  ;;  %v5763_v16 = vld [vmem:[#allocation6 + $0xfc8] sm:$0xff] }
 0x443   : > { %9444 = vmatprep.subr.bf16.mxu0 %v11259_v5  ;;  %v11210_v5 = vcombine.low %v5643_v32, %v5647_v44  ;;  %v5631_v53 = vld [vmem:[#allocation6 + $0xba8] sm:$0xff]  ;;  %v11331_v33 = vcombine.high %v5763_v16, %v5767_v26  ;;  %v11330_v50 = vcombine.low %v5763_v16, %v5767_v26 }
 0x444   : > { %9402 = vmatpush1.bf16.msra.mxu1 %v11130_v25  ;;  %v5627_v25 = vld [vmem:[#allocation6 + $0xb88] sm:$0xff] }
 0x445   : > { %9403 = vmatprep.subr.bf16.mxu1 %v11123_v17  ;;  %v11202_v17 = vcombine.low %v5635_v57, %v5639_v3  ;;  %v5755_v34 = vld [vmem:[#allocation6 + $0xf88] sm:$0xff]  ;;  %v11195_v54 = vcombine.high %v5627_v25, %v5631_v53  ;;  %v11194_v56 = vcombine.low %v5627_v25, %v5631_v53 }
 0x446   : > { %9445 = vmatpush1.bf16.msra.mxu0 %v11258_v0  ;;  %v5759_v0 = vld [vmem:[#allocation6 + $0xfa8] sm:$0xff] }
 0x447   : > { %9446 = vmatprep.subr.bf16.mxu0 %v11251_v52  ;;  %v5619_v52 = vld [vmem:[#allocation6 + $0xb48] sm:$0xff]  ;;  %v11323_v8 = vcombine.high %v5755_v34, %v5759_v0  ;;  %v11322_v13 = vcombine.low %v5755_v34, %v5759_v0 }
 0x448   : > { %9404 = vmatpush1.bf16.msra.mxu1 %v11122_v31  ;;  %v5623_v31 = vld [vmem:[#allocation6 + $0xb68] sm:$0xff] }
 0x449   : > { %9405 = vmatprep.subr.bf16.mxu1 %v11115_v15  ;;  %v5747_v15 = vld [vmem:[#allocation6 + $0xf48] sm:$0xff]  ;;  %v11187_v6 = vcombine.high %v5619_v52, %v5623_v31  ;;  %v11186_v51 = vcombine.low %v5619_v52, %v5623_v31 }
 0x44a   : > { %9447 = vmatpush1.bf16.msra.mxu0 %v11250_v12  ;;  %v5751_v12 = vld [vmem:[#allocation6 + $0xf68] sm:$0xff] }
 0x44b   : > { %9448 = vmatprep.subr.bf16.mxu0 %v11243_v14  ;;  %v5611_v14 = vld [vmem:[#allocation6 + $0xb08] sm:$0xff]  ;;  %v11315_v55 = vcombine.high %v5747_v15, %v5751_v12  ;;  %v11314_v45 = vcombine.low %v5747_v15, %v5751_v12 }
 0x44c   : > { %9406 = vmatpush1.bf16.msra.mxu1 %v11114_v29  ;;  %v5615_v29 = vld [vmem:[#allocation6 + $0xb28] sm:$0xff] }
 0x44d   : > { %9407 = vmatprep.subr.bf16.mxu1 %v11107_v39  ;;  %v5739_v39 = vld [vmem:[#allocation6 + $0xf08] sm:$0xff]  ;;  %v11179_v20 = vcombine.high %v5611_v14, %v5615_v29  ;;  %v11178_v47 = vcombine.low %v5611_v14, %v5615_v29 }
 0x44e   : > { %9449 = vmatpush1.bf16.msra.mxu0 %v11242_v48  ;;  %v5743_v48 = vld [vmem:[#allocation6 + $0xf28] sm:$0xff] }
 0x44f   : > { %9450 = vmatprep.subr.bf16.mxu0 %v11235_v36  ;;  %v5603_v36 = vld [vmem:[#allocation6 + $0xac8] sm:$0xff]  ;;  %v11307_v9 = vcombine.high %v5739_v39, %v5743_v48  ;;  %v11306_v42 = vcombine.low %v5739_v39, %v5743_v48 }
 0x450   : > { %9408 = vmatpush1.bf16.msra.mxu1 %v11106_v60  ;;  %v5607_v60 = vld [vmem:[#allocation6 + $0xae8] sm:$0xff] }
 0x451   : > { %9409 = vmatprep.subr.bf16.mxu1 %v11099_v38  ;;  %v5731_v38 = vld [vmem:[#allocation6 + $0xec8] sm:$0xff]  ;;  %v11171_v37 = vcombine.high %v5603_v36, %v5607_v60  ;;  %v11170_v10 = vcombine.low %v5603_v36, %v5607_v60 }
 0x452   : > { %9451 = vmatpush1.bf16.msra.mxu0 %v11234_v24  ;;  %v5735_v24 = vld [vmem:[#allocation6 + $0xee8] sm:$0xff] }
 0x453   : > { %9452 = vmatprep.subr.bf16.mxu0 %v11227_v22  ;;  %v5595_v22 = vld [vmem:[#allocation6 + $0xa88] sm:$0xff]  ;;  %v11299_v63 = vcombine.high %v5731_v38, %v5735_v24  ;;  %v11298_v4 = vcombine.low %v5731_v38, %v5735_v24 }
 0x454   : > { %9410 = vmatpush1.bf16.msra.mxu1 %v11098_v1  ;;  %v5599_v1 = vld [vmem:[#allocation6 + $0xaa8] sm:$0xff] }
 0x455   : > { %9411 = vmatprep.subr.bf16.mxu1 %v11091_v35  ;;  %v5723_v35 = vld [vmem:[#allocation6 + $0xe88] sm:$0xff]  ;;  %v11163_v40 = vcombine.high %v5595_v22, %v5599_v1  ;;  %v11162_v44 = vcombine.low %v5595_v22, %v5599_v1 }
 0x456   : > { %9453 = vmatpush1.bf16.msra.mxu0 %v11226_v19  ;;  %v5727_v19 = vld [vmem:[#allocation6 + $0xea8] sm:$0xff] }
 0x457   : > { %9454 = vmatprep.subr.bf16.mxu0 %v11219_v7  ;;  %v5587_v7 = vld [vmem:[#allocation6 + $0xa48] sm:$0xff]  ;;  %v11291_v32 = vcombine.high %v5723_v35, %v5727_v19  ;;  %v11290_v3 = vcombine.low %v5723_v35, %v5727_v19 }
 0x458   : > { %9412 = vmatpush1.bf16.msra.mxu1 %v11090_v61  ;;  %v5591_v61 = vld [vmem:[#allocation6 + $0xa68] sm:$0xff] }
 0x459   : > { %9413 = vmatprep.subr.bf16.mxu1 %v11083_v46  ;;  %v5715_v46 = vld [vmem:[#allocation6 + $0xe48] sm:$0xff]  ;;  %v11155_v57 = vcombine.high %v5587_v7, %v5591_v61  ;;  %v11154_v26 = vcombine.low %v5587_v7, %v5591_v61 }
 0x45a   : > { %9455 = vmatpush1.bf16.msra.mxu0 %v11218_v58  ;;  %v5719_v58 = vld [vmem:[#allocation6 + $0xe68] sm:$0xff] }
 0x45b   : > { %9456 = vmatprep.subr.bf16.mxu0 %v11211_v43  ;;  %v5579_v43 = vld [vmem:[#allocation6 + $0xa08] sm:$0xff]  ;;  %v11283_v16 = vcombine.high %v5715_v46, %v5719_v58  ;;  %v11282_v53 = vcombine.low %v5715_v46, %v5719_v58 }
 0x45c   : > { %9414 = vmatpush1.bf16.msra.mxu1 %v11082_v62  ;;  %v5583_v62 = vld [vmem:[#allocation6 + $0xa28] sm:$0xff] }
 0x45d   : > { %9415 = vmatprep.subr.bf16.mxu1 %v11203_v23  ;;  %v5707_v23 = vld [vmem:[#allocation6 + $0xe08] sm:$0xff]  ;;  %v11147_v25 = vcombine.high %v5579_v43, %v5583_v62  ;;  %v11146_v0 = vcombine.low %v5579_v43, %v5583_v62 }
 0x45e   : > { %9457 = vmatpush1.bf16.msra.mxu0 %v11210_v5  ;;  %v5711_v5 = vld [vmem:[#allocation6 + $0xe28] sm:$0xff] }
 0x45f   : > { %9458 = vmatprep.subr.bf16.mxu0 %v11331_v33  ;;  %v5827_v33 = vld [vmem:[#allocation6 + $0x11c8] sm:$0xff]  ;;  %v11275_v34 = vcombine.high %v5707_v23, %v5711_v5  ;;  %v11274_v31 = vcombine.low %v5707_v23, %v5711_v5 }
 0x460   : > { %9416 = vmatpush2.bf16.msra.mxu1 %v11202_v17  ;;  %v5831_v17 = vld [vmem:[#allocation6 + $0x11e8] sm:$0xff] }
 0x461   : > { %9417 = vmatprep.subr.bf16.mxu1 %v11195_v54  ;;  %v5316_v54 = vld [vmem:[#allocation6 + $0x1d0] sm:$0xff]  ;;  %v11395_v52 = vcombine.high %v5827_v33, %v5831_v17  ;;  %v11394_v12 = vcombine.low %v5827_v33, %v5831_v17 }
 0x462   : > { %9459 = vmatpush2.bf16.msra.mxu0 %v11330_v50  ;;  %v5320_v50 = vld [vmem:[#allocation6 + $0x1f0] sm:$0xff] }
 0x463   : > { %9460 = vmatprep.subr.bf16.mxu0 %v11323_v8  ;;  %v5819_v8 = vld [vmem:[#allocation6 + $0x1188] sm:$0xff]  ;;  %v10885_v15 = vcombine.high %v5316_v54, %v5320_v50  ;;  %v10884_v29 = vcombine.low %v5316_v54, %v5320_v50 }
 0x464   : > { %9418 = vmatpush2.bf16.msra.mxu1 %v11194_v56  ;;  %v5823_v56 = vld [vmem:[#allocation6 + $0x11a8] sm:$0xff] }
 0x465   : > { %9419 = vmatprep.subr.bf16.mxu1 %v11187_v6  ;;  %v5308_v6 = vld [vmem:[#allocation6 + $0x190] sm:$0xff]  ;;  %v11387_v14 = vcombine.high %v5819_v8, %v5823_v56  ;;  %v11386_v48 = vcombine.low %v5819_v8, %v5823_v56 }
 0x466   : > { %9461 = vmatpush2.bf16.msra.mxu0 %v11322_v13  ;;  %v5312_v13 = vld [vmem:[#allocation6 + $0x1b0] sm:$0xff] }
 0x467   : > { %9462 = vmatprep.subr.bf16.mxu0 %v11315_v55  ;;  %v5811_v55 = vld [vmem:[#allocation6 + $0x1148] sm:$0xff]  ;;  %v10877_v39 = vcombine.high %v5308_v6, %v5312_v13  ;;  %v10876_v60 = vcombine.low %v5308_v6, %v5312_v13 }
 0x468   : > { %9420 = vmatpush2.bf16.msra.mxu1 %v11186_v51  ;;  %v5815_v51 = vld [vmem:[#allocation6 + $0x1168] sm:$0xff] }
 0x469   : > { %9421 = vmatprep.subr.bf16.mxu1 %v11179_v20  ;;  %v5300_v20 = vld [vmem:[#allocation6 + $0x150] sm:$0xff]  ;;  %v11379_v36 = vcombine.high %v5811_v55, %v5815_v51  ;;  %v11378_v24 = vcombine.low %v5811_v55, %v5815_v51 }
 0x46a   : > { %9463 = vmatpush2.bf16.msra.mxu0 %v11314_v45  ;;  %v5304_v45 = vld [vmem:[#allocation6 + $0x170] sm:$0xff] }
 0x46b   : > { %9464 = vmatprep.subr.bf16.mxu0 %v11307_v9  ;;  %v5803_v9 = vld [vmem:[#allocation6 + $0x1108] sm:$0xff]  ;;  %v10869_v38 = vcombine.high %v5300_v20, %v5304_v45  ;;  %v10868_v1 = vcombine.low %v5300_v20, %v5304_v45 }
 0x46c   : > { %9422 = vmatpush2.bf16.msra.mxu1 %v11178_v47  ;;  %v5807_v47 = vld [vmem:[#allocation6 + $0x1128] sm:$0xff] }
 0x46d   : > { %9423 = vmatprep.subr.bf16.mxu1 %v11171_v37  ;;  %v5292_v37 = vld [vmem:[#allocation6 + $0x110] sm:$0xff]  ;;  %v11371_v22 = vcombine.high %v5803_v9, %v5807_v47  ;;  %v11370_v19 = vcombine.low %v5803_v9, %v5807_v47 }
 0x46e   : > { %9465 = vmatpush2.bf16.msra.mxu0 %v11306_v42  ;;  %v5296_v42 = vld [vmem:[#allocation6 + $0x130] sm:$0xff] }
 0x46f   : > { %9466 = vmatprep.subr.bf16.mxu0 %v11299_v63  ;;  %v5795_v63 = vld [vmem:[#allocation6 + $0x10c8] sm:$0xff]  ;;  %v10861_v35 = vcombine.high %v5292_v37, %v5296_v42  ;;  %v10860_v61 = vcombine.low %v5292_v37, %v5296_v42 }
 0x470   : > { %9424 = vmatpush2.bf16.msra.mxu1 %v11170_v10  ;;  %v5799_v10 = vld [vmem:[#allocation6 + $0x10e8] sm:$0xff] }
 0x471   : > { %9425 = vmatprep.subr.bf16.mxu1 %v11163_v40  ;;  %v5284_v40 = vld [vmem:[#allocation6 + $0xd0] sm:$0xff]  ;;  %v11363_v7 = vcombine.high %v5795_v63, %v5799_v10  ;;  %v11362_v58 = vcombine.low %v5795_v63, %v5799_v10 }
 0x472   : > { %9467 = vmatpush2.bf16.msra.mxu0 %v11298_v4  ;;  %v5288_v4 = vld [vmem:[#allocation6 + $0xf0] sm:$0xff] }
 0x473   : > { %9468 = vmatprep.subr.bf16.mxu0 %v11291_v32  ;;  %v5787_v32 = vld [vmem:[#allocation6 + $0x1088] sm:$0xff]  ;;  %v10853_v46 = vcombine.high %v5284_v40, %v5288_v4  ;;  %v10852_v62 = vcombine.low %v5284_v40, %v5288_v4 }
 0x474   : > { %9426 = vmatpush2.bf16.msra.mxu1 %v11162_v44  ;;  %v5791_v44 = vld [vmem:[#allocation6 + $0x10a8] sm:$0xff] }
 0x475   : > { %9427 = vmatprep.subr.bf16.mxu1 %v11155_v57  ;;  %v5276_v57 = vld [vmem:[#allocation6 + $0x90] sm:$0xff]  ;;  %v11355_v43 = vcombine.high %v5787_v32, %v5791_v44  ;;  %v11354_v5 = vcombine.low %v5787_v32, %v5791_v44  ;;  %v13279_v32 = vpop.f32.mrf.mxu0 }
 0x476   : > { %9469 = vmatpush2.bf16.msra.mxu0 %v11290_v3  ;;  %v5280_v3 = vld [vmem:[#allocation6 + $0xb0] sm:$0xff] }
 0x477   : > { %9470 = vmatprep.subr.bf16.mxu0 %v11283_v16  ;;  %v5779_v16 = vld [vmem:[#allocation6 + $0x1048] sm:$0xff]  ;;  %v10845_v23 = vcombine.high %v5276_v57, %v5280_v3  ;;  %v10844_v17 = vcombine.low %v5276_v57, %v5280_v3 }
 0x478   : > { %9428 = vmatpush2.bf16.msra.mxu1 %v11154_v26  ;;  %v5783_v26 = vld [vmem:[#allocation6 + $0x1068] sm:$0xff] }
 0x479   : > { %9429 = vmatprep.subr.bf16.mxu1 %v11147_v25  ;;  %v5268_v25 = vld [vmem:[#allocation6 + $0x50] sm:$0xff]  ;;  %v11347_v33 = vcombine.high %v5779_v16, %v5783_v26  ;;  %v11346_v50 = vcombine.low %v5779_v16, %v5783_v26  ;;  %v5863_v57 = vld [vmem:[#allocation6 + $0x12e8] sm:$0xff]  ;;  %v13281_v26 = vpop.f32.mrf.mxu0 }
 0x47a   : > { %9471 = vmatpush2.bf16.msra.mxu0 %v11282_v53  ;;  %v5272_v53 = vld [vmem:[#allocation6 + $0x70] sm:$0xff] }
 0x47b   : > { %9472 = vmatprep.subr.bf16.mxu0 %v11275_v34  ;;  %v5771_v34 = vld [vmem:[#allocation6 + $0x1008] sm:$0xff]  ;;  %v10837_v54 = vcombine.high %v5268_v25, %v5272_v53  ;;  %v10836_v56 = vcombine.low %v5268_v25, %v5272_v53  ;;  %v5352_v16 = vld [vmem:[#allocation6 + $0x2f0] sm:$0xff] }
 0x47c   : > { %9430 = vmatpush2.bf16.msra.mxu1 %v11146_v0  ;;  %v5775_v0 = vld [vmem:[#allocation6 + $0x1028] sm:$0xff] }
 0x47d   : > { %9485 = vmatprep.subr.bf16.mxu1 %v11395_v52  ;;  %v5260_v52 = vld [vmem:[#allocation6 + $0x10] sm:$0xff]  ;;  %v11339_v8 = vcombine.high %v5771_v34, %v5775_v0  ;;  %v11338_v13 = vcombine.low %v5771_v34, %v5775_v0  ;;  %v5851_v25 = vld [vmem:[#allocation6 + $0x1288] sm:$0xff] }
 0x47e   : > { %9473 = vmatpush2.bf16.msra.mxu0 %v11274_v31  ;;  %v5264_v31 = vld [vmem:[#allocation6 + $0x30] sm:$0xff]  ;;  %v5855_v53 = vld [vmem:[#allocation6 + $0x12a8] sm:$0xff] }
 0x47f   : > { %9432 = vmatmul.mubr.bf16.vlgmr.msra.gmra.mxu1 %v13244_v18  ;;  %9528 = vmatprep.subr.bf16.mxu0 %v10885_v15  ;;  %v5891_v15 = vld [vmem:[#allocation6 + $0x13c8] sm:$0xff]  ;;  %v10829_v6 = vcombine.high %v5260_v52, %v5264_v31  ;;  %v10828_v51 = vcombine.low %v5260_v52, %v5264_v31  ;;  %v5340_v34 = vld [vmem:[#allocation6 + $0x290] sm:$0xff] }
 0x480   : > { %9486 = vmatpush1.bf16.msra.mxu1 %v11394_v12  ;;  %9517 = vmatprep.mubr.bf16.mxu1 %v13246_v59  ;;  %v5895_v12 = vld [vmem:[#allocation6 + $0x13e8] sm:$0xff]  ;;  %v5344_v0 = vld [vmem:[#allocation6 + $0x2b0] sm:$0xff] }
 0x481   : > { %9475 = vmatmul.mubr.bf16.vlgmr.msra.gmra.mxu0 %v13162_v2  ;;  %9487 = vmatprep.subr.bf16.mxu1 %v11387_v14  ;;  %v5380_v14 = vld [vmem:[#allocation6 + $0x3d0] sm:$0xff]  ;;  %v11459_v55 = vcombine.high %v5891_v15, %v5895_v12  ;;  %v11458_v45 = vcombine.low %v5891_v15, %v5895_v12  ;;  %v5843_v31 = vld [vmem:[#allocation6 + $0x1248] sm:$0xff]  ;;  %v11418_v15 = vcombine.low %v5851_v25, %v5855_v53 }
 0x482   : > { %9529 = vmatpush1.bf16.msra.mxu0 %v10884_v29  ;;  %9560 = vmatprep.mubr.bf16.mxu0 %v13160_v49  ;;  %v5384_v29 = vld [vmem:[#allocation6 + $0x3f0] sm:$0xff] }
 0x483   : > { %9530 = vmatprep.subr.bf16.mxu0 %v10877_v39  ;;  %v5883_v39 = vld [vmem:[#allocation6 + $0x1388] sm:$0xff]  ;;  %v10949_v20 = vcombine.high %v5380_v14, %v5384_v29  ;;  %v10948_v47 = vcombine.low %v5380_v14, %v5384_v29  ;;  %v5332_v12 = vld [vmem:[#allocation6 + $0x250] sm:$0xff]  ;;  %v9175_v14 = vpop.f32.mrf.mxu1 }
 0x484   : > { %9488 = vmatpush1.bf16.msra.mxu1 %v11386_v48  ;;  %v5887_v48 = vld [vmem:[#allocation6 + $0x13a8] sm:$0xff] }
 0x485   : > { %9489 = vmatprep.subr.bf16.mxu1 %v11379_v36  ;;  %v5372_v36 = vld [vmem:[#allocation6 + $0x390] sm:$0xff]  ;;  %v11451_v9 = vcombine.high %v5883_v39, %v5887_v48  ;;  %v11450_v42 = vcombine.low %v5883_v39, %v5887_v48  ;;  %v5839_v39 = vld [vmem:[#allocation6 + $0x1228] sm:$0xff] }
 0x486   : > { %9531 = vmatpush1.bf16.msra.mxu0 %v10876_v60  ;;  %v5376_v60 = vld [vmem:[#allocation6 + $0x3b0] sm:$0xff] }
 0x487   : > { %9532 = vmatprep.subr.bf16.mxu0 %v10869_v38  ;;  %v5875_v38 = vld [vmem:[#allocation6 + $0x1348] sm:$0xff]  ;;  %v10941_v37 = vcombine.high %v5372_v36, %v5376_v60  ;;  %v10940_v10 = vcombine.low %v5372_v36, %v5376_v60  ;;  %v5324_v36 = vld [vmem:[#allocation6 + $0x210] sm:$0xff] }
 0x488   : > { %9490 = vmatpush1.bf16.msra.mxu1 %v11378_v24  ;;  %v5879_v24 = vld [vmem:[#allocation6 + $0x1368] sm:$0xff]  ;;  %v5328_v60 = vld [vmem:[#allocation6 + $0x230] sm:$0xff] }
 0x489   : > { %9491 = vmatprep.subr.bf16.mxu1 %v11371_v22  ;;  %v5364_v22 = vld [vmem:[#allocation6 + $0x350] sm:$0xff]  ;;  %v11443_v63 = vcombine.high %v5875_v38, %v5879_v24  ;;  %v11442_v4 = vcombine.low %v5875_v38, %v5879_v24 }
 0x48a   : > { %9533 = vmatpush1.bf16.msra.mxu0 %v10868_v1  ;;  %v5368_v1 = vld [vmem:[#allocation6 + $0x370] sm:$0xff] }
 0x48b   : > { %9534 = vmatprep.subr.bf16.mxu0 %v10861_v35  ;;  %v5867_v35 = vld [vmem:[#allocation6 + $0x1308] sm:$0xff]  ;;  %v10933_v40 = vcombine.high %v5364_v22, %v5368_v1  ;;  %v5444_v24 = vld [vmem:[#allocation6 + $0x5d0] sm:$0xff] }
 0x48c   : > { %9492 = vmatpush1.bf16.msra.mxu1 %v11370_v19  ;;  %v5871_v19 = vld [vmem:[#allocation6 + $0x1328] sm:$0xff] }
 0x48d   : > { %9493 = vmatprep.subr.bf16.mxu1 %v11363_v7  ;;  %v5356_v7 = vld [vmem:[#allocation6 + $0x310] sm:$0xff]  ;;  %v11435_v44 = vcombine.high %v5867_v35, %v5871_v19 }
 0x48e   : > { %9535 = vmatpush1.bf16.msra.mxu0 %v10860_v61  ;;  %v5360_v61 = vld [vmem:[#allocation6 + $0x330] sm:$0xff] }
 0x48f   : > { %9536 = vmatprep.subr.bf16.mxu0 %v10853_v46  ;;  %v10932_v46 = vcombine.low %v5364_v22, %v5368_v1  ;;  %v10925_v3 = vcombine.high %v5356_v7, %v5360_v61  ;;  %v10893_v22 = vcombine.high %v5324_v36, %v5328_v60 }
 0x490   : > { %9494 = vmatpush1.bf16.msra.mxu1 %v11362_v58  ;;  %v5859_v58 = vld [vmem:[#allocation6 + $0x12c8] sm:$0xff] }
 0x491   : > { %9495 = vmatprep.subr.bf16.mxu1 %v11355_v43  ;;  %v11434_v43 = vcombine.low %v5867_v35, %v5871_v19 }
 0x492   : > { %9537 = vmatpush1.bf16.msra.mxu0 %v10852_v62  ;;  %v5348_v62 = vld [vmem:[#allocation6 + $0x2d0] sm:$0xff] }
 0x493   : > { %9538 = vmatprep.subr.bf16.mxu0 %v10845_v23  ;;  %v11427_v23 = vcombine.high %v5859_v58, %v5863_v57  ;;  %v10916_v52 = vcombine.low %v5348_v62, %v5352_v16 }
 0x494   : > { %9496 = vmatpush1.bf16.msra.mxu1 %v11354_v5  ;;  %v10924_v5 = vcombine.low %v5356_v7, %v5360_v61  ;;  %v5436_v7 = vld [vmem:[#allocation6 + $0x590] sm:$0xff] }
 0x495   : > { %9497 = vmatprep.subr.bf16.mxu1 %v11347_v33  ;;  %v10917_v33 = vcombine.high %v5348_v62, %v5352_v16  ;;  %v5440_v61 = vld [vmem:[#allocation6 + $0x5b0] sm:$0xff] }
 0x496   : > { %9539 = vmatpush1.bf16.msra.mxu0 %v10844_v17  ;;  %v11426_v17 = vcombine.low %v5859_v58, %v5863_v57  ;;  %v11005_v16 = vcombine.high %v5436_v7, %v5440_v61 }
 0x497   : > { %9540 = vmatprep.subr.bf16.mxu0 %v10837_v54  ;;  %v9136_v54 = vpop.f32.mrf.mxu0 }
 0x498   : > { %9498 = vmatpush1.bf16.msra.mxu1 %v11346_v50  ;;  %v11419_v50 = vcombine.high %v5851_v25, %v5855_v53  ;;  %v5428_v25 = vld [vmem:[#allocation6 + $0x550] sm:$0xff] }
 0x499   : > { %9499 = vmatprep.subr.bf16.mxu1 %v11339_v8  ;;  %v5847_v8 = vld [vmem:[#allocation6 + $0x1268] sm:$0xff]  ;;  %v5432_v53 = vld [vmem:[#allocation6 + $0x570] sm:$0xff] }
 0x49a   : > { %9541 = vmatpush1.bf16.msra.mxu0 %v10836_v56  ;;  %v10909_v56 = vcombine.high %v5340_v34, %v5344_v0  ;;  %v11411_v29 = vcombine.high %v5843_v31, %v5847_v8 }
 0x49b   : > { %9542 = vmatprep.subr.bf16.mxu0 %v10829_v6  ;;  %v5336_v6 = vld [vmem:[#allocation6 + $0x270] sm:$0xff] }
 0x49c   : > { %9500 = vmatpush1.bf16.msra.mxu1 %v11338_v13  ;;  %v9138_v13 = vpop.f32.mrf.mxu0  ;;  %v10900_v38 = vcombine.low %v5332_v12, %v5336_v6 }
 0x49d   : > { %9501 = vmatprep.subr.bf16.mxu1 %v11459_v55  ;;  %v10908_v55 = vcombine.low %v5340_v34, %v5344_v0  ;;  %v11004_v34 = vcombine.low %v5436_v7, %v5440_v61 }
 0x49e   : > { %9543 = vmatpush1.bf16.msra.mxu0 %v10828_v51  ;;  %v5835_v51 = vld [vmem:[#allocation6 + $0x1208] sm:$0xff]  ;;  %v9218_v48 = vpop.f32.mrf.mxu0 }
 0x49f   : > { %9544 = vmatprep.subr.bf16.mxu0 %v10949_v20  ;;  %v10901_v20 = vcombine.high %v5332_v12, %v5336_v6  ;;  %v11402_v1 = vcombine.low %v5835_v51, %v5839_v39  ;;  %v10997_v12 = vcombine.high %v5428_v25, %v5432_v53 }
 0x4a0   : > { %9502 = vmatpush2.bf16.msra.mxu1 %v11458_v45  ;;  %v11410_v45 = vcombine.low %v5843_v31, %v5847_v8  ;;  %v5556_v31 = vld [vmem:[#allocation6 + $0x950] sm:$0xff] }
 0x4a1   : > { %9503 = vmatprep.subr.bf16.mxu1 %v11451_v9  ;;  %v9177_v9 = vpop.f32.mrf.mxu1  ;;  %v5560_v8 = vld [vmem:[#allocation6 + $0x970] sm:$0xff] }
 0x4a2   : > { %9545 = vmatpush2.bf16.msra.mxu0 %v10948_v47  ;;  %v11403_v47 = vcombine.high %v5835_v51, %v5839_v39  ;;  %v9178_v58 = vadd.f32 %v9177_v9, %v13281_v26  ;;  %v5548_v9 = vld [vmem:[#allocation6 + $0x910] sm:$0xff] }
 0x4a3   : > { %9546 = vmatprep.subr.bf16.mxu0 %v10941_v37  ;;  %v5448_v37 = vld [vmem:[#allocation6 + $0x5f0] sm:$0xff]  ;;  %v9179_v35 = vpop.f32.mrf.mxu1 }
 0x4a4   : > { %9504 = vmatpush2.bf16.msra.mxu1 %v11450_v42  ;;  %v9220_v42 = vpop.f32.mrf.mxu0  ;;  %v11013_v19 = vcombine.high %v5444_v24, %v5448_v37  ;;  %v11012_v57 = vcombine.low %v5444_v24, %v5448_v37  ;;  %v9968_v24 = vld [vmem:[%s13267_s7 + $0x10] sm:$0x1] }
 0x4a5   : > { %9505 = vmatprep.subr.bf16.mxu1 %v11443_v63  ;;  %v5572_v63 = vld [vmem:[#allocation6 + $0x9d0] sm:$0xff]  ;;  %v9181_v62 = vpop.f32.mrf.mxu1  ;;  %v9221_v0 = vadd.f32 %v9220_v42, %v9178_v58 }
 0x4a6   : > { %9547 = vmatpush2.bf16.msra.mxu0 %v10940_v10  ;;  %v5576_v10 = vld [vmem:[#allocation6 + $0x9f0] sm:$0xff] }
 0x4a7   : > { %9548 = vmatprep.subr.bf16.mxu0 %v10933_v40  ;;  %v9176_v40 = vadd.f32 %v9175_v14, %v13279_v32  ;;  %v11140_v32 = vcombine.low %v5572_v63, %v5576_v10  ;;  %v5544_v58 = vld [vmem:[#allocation6 + $0x8f0] sm:$0xff] }
 0x4a8   : > { %9506 = vmatpush2.bf16.msra.mxu1 %v11442_v4  ;;  %v10892_v4 = vcombine.low %v5324_v36, %v5328_v60 }
 0x4a9   : > { %9507 = vmatprep.subr.bf16.mxu1 %v11435_v44  ;;  %v9222_v44 = vpop.f32.mrf.mxu0 }
 0x4aa   : > { %9549 = vmatpush2.bf16.msra.mxu0 %v10932_v46  ;;  %v11141_v46 = vcombine.high %v5572_v63, %v5576_v10  ;;  %v11124_v63 = vcombine.low %v5556_v31, %v5560_v8  ;;  %v5412_v10 = vld [vmem:[#allocation6 + $0x4d0] sm:$0xff] }
 0x4ab   : > { %9550 = vmatprep.subr.bf16.mxu0 %v10925_v3  ;;  %v5564_v3 = vld [vmem:[#allocation6 + $0x990] sm:$0xff] }
 0x4ac   : > { %9508 = vmatpush2.bf16.msra.mxu1 %v11434_v43  ;;  %v5568_v43 = vld [vmem:[#allocation6 + $0x9b0] sm:$0xff] }
 0x4ad   : > { %9509 = vmatprep.subr.bf16.mxu1 %v11427_v23  ;;  %v9219_v23 = vadd.f32 %v9218_v48, %v9176_v40  ;;  %v11133_v26 = vcombine.high %v5564_v3, %v5568_v43  ;;  %v10996_v48 = vcombine.low %v5428_v25, %v5432_v53  ;;  %v9969_v40 = vld [vmem:[%s13267_s7 + $0x18] sm:$0x1] }
 0x4ae   : > { %9551 = vmatpush2.bf16.msra.mxu0 %v10924_v5  ;;  %v9180_v5 = vadd.f32 %v9179_v35, %v9136_v54  ;;  %v5416_v35 = vld [vmem:[#allocation6 + $0x4f0] sm:$0xff] }
 0x4af   : > { %9552 = vmatprep.subr.bf16.mxu0 %v10917_v33  ;;  %v9224_v33 = vpop.f32.mrf.mxu0  ;;  %v5536_v25 = vld [vmem:[#allocation6 + $0x8b0] sm:$0xff] }
 0x4b0   : > { %9510 = vmatpush2.bf16.msra.mxu1 %v11426_v17  ;;  %v9223_v6 = vadd.f32 %v9222_v44, %v9180_v5  ;;  %v10980_v5 = vcombine.low %v5412_v10, %v5416_v35 }
 0x4b1   : > { %9511 = vmatprep.subr.bf16.mxu1 %v11419_v50  ;;  %v9182_v50 = vadd.f32 %v9181_v62, %v9138_v13  ;;  %v5420_v13 = vld [vmem:[#allocation6 + $0x510] sm:$0xff] }
 0x4b2   : > { %9553 = vmatpush2.bf16.msra.mxu0 %v10916_v52  ;;  %v5404_v62 = vld [vmem:[#allocation6 + $0x490] sm:$0xff] }
 0x4b3   : > { %9554 = vmatprep.subr.bf16.mxu0 %v10909_v56 }
 0x4b4   : > { %9512 = vmatpush2.bf16.msra.mxu1 %v11418_v15  ;;  %v11132_v15 = vcombine.low %v5564_v3, %v5568_v43 }
 0x4b5   : > { %9513 = vmatprep.subr.bf16.mxu1 %v11411_v29 }
 0x4b6   : > { %9555 = vmatpush2.bf16.msra.mxu0 %v10908_v55  ;;  %v5424_v55 = vld [vmem:[#allocation6 + $0x530] sm:$0xff] }
 0x4b7   : > { %9556 = vmatprep.subr.bf16.mxu0 %v10901_v20  ;;  %v11125_v20 = vcombine.high %v5556_v31, %v5560_v8  ;;  %v10989_v42 = vcombine.high %v5420_v13, %v5424_v55  ;;  %v10988_v44 = vcombine.low %v5420_v13, %v5424_v55  ;;  %v5508_v55 = vld [vmem:[#allocation6 + $0x7d0] sm:$0xff] }
 0x4b8   : > { %9514 = vmatpush2.bf16.msra.mxu1 %v11410_v45  ;;  %v9225_v45 = vadd.f32 %v9224_v33, %v9182_v50  ;;  %v5524_v50 = vld [vmem:[#allocation6 + $0x850] sm:$0xff] }
 0x4b9   : > { %9515 = vmatprep.subr.bf16.mxu1 %v11403_v47  ;;  %v5552_v47 = vld [vmem:[#allocation6 + $0x930] sm:$0xff] }
 0x4ba   : > { %9557 = vmatpush2.bf16.msra.mxu0 %v10900_v38  ;;  %v11116_v43 = vcombine.low %v5548_v9, %v5552_v47 }
 0x4bb   : > { %9558 = vmatprep.subr.bf16.mxu0 %v10893_v22 }
 0x4bc   : > { %9516 = vmatpush2.bf16.msra.mxu1 %v11402_v1 }
 0x4bd   : > { %9571 = vmatprep.subr.bf16.mxu1 %v11013_v19 }
 0x4be   : > { %9559 = vmatpush2.bf16.msra.mxu0 %v10892_v4  ;;  %v11117_v4 = vcombine.high %v5548_v9, %v5552_v47  ;;  %v5500_v9 = vld [vmem:[#allocation6 + $0x790] sm:$0xff] }
 0x4bf   : > { %v9261_v17 = vpop.f32.mrf.mxu1  ;;  %9518 = vmatmul.mubr.bf16.vlgmr.msra.gmra.mxu1 %v13236_v27  ;;  %9614 = vmatprep.subr.bf16.mxu0 %v11141_v46  ;;  %v5540_v46 = vld [vmem:[#allocation6 + $0x8d0] sm:$0xff] }
 0x4c0   : > { %v9262_v52 = vadd.f32 %v9261_v17, %v9219_v23  ;;  %9572 = vmatpush1.bf16.msra.mxu1 %v11012_v57  ;;  %9603 = vmatprep.mubr.bf16.mxu1 %v13234_v28  ;;  %v10981_v57 = vcombine.high %v5412_v10, %v5416_v35  ;;  %v11109_v23 = vcombine.high %v5540_v46, %v5544_v58  ;;  %v5396_v17 = vld [vmem:[#allocation6 + $0x450] sm:$0xff] }
 0x4c1   : > { %v9304_v54 = vpop.f32.mrf.mxu0  ;;  %9561 = vmatmul.mubr.bf16.vlgmr.msra.gmra.mxu0 %v13158_v21  ;;  %v9263_v56 = vpop.f32.mrf.mxu1  ;;  %9573 = vmatprep.subr.bf16.mxu1 %v11005_v16  ;;  %v5408_v16 = vld [vmem:[#allocation6 + $0x4b0] sm:$0xff]  ;;  %v11108_v33 = vcombine.low %v5540_v46, %v5544_v58 }
 0x4c2   : > { %v9305_v14 = vadd.f32 %v9304_v54, %v9262_v52  ;;  %v9264_v29 = vadd.f32 %v9263_v56, %v9221_v0  ;;  %9615 = vmatpush1.bf16.msra.mxu0 %v11140_v32  ;;  %9646 = vmatprep.mubr.bf16.mxu0 %v13180_v30  ;;  %v5532_v32 = vld [vmem:[#allocation6 + $0x890] sm:$0xff]  ;;  %v10973_v53 = vcombine.high %v5404_v62, %v5408_v16 }
 0x4c3   : > { %v9306_v51 = vpop.f32.mrf.mxu0  ;;  %v9265_v39 = vpop.f32.mrf.mxu1  ;;  %9616 = vmatprep.subr.bf16.mxu0 %v11133_v26  ;;  %v11101_v26 = vcombine.high %v5532_v32, %v5536_v25  ;;  %v10972_v0 = vcombine.low %v5404_v62, %v5408_v16  ;;  %v5528_v52 = vld [vmem:[#allocation6 + $0x870] sm:$0xff]  ;;  %v11100_v8 = vcombine.low %v5532_v32, %v5536_v25 }
 0x4c4   : > { %v9307_v36 = vadd.f32 %v9306_v51, %v9264_v29  ;;  %v9266_v60 = vadd.f32 %v9265_v39, %v9223_v6  ;;  %9574 = vmatpush1.bf16.msra.mxu1 %v11004_v34  ;;  %9974 = vst [vmem:[%s13267_s7] sm:$0xff] %v9305_v14  ;;  %v5400_v34 = vld [vmem:[#allocation6 + $0x470] sm:$0xff]  ;;  %v11092_v13 = vcombine.low %v5524_v50, %v5528_v52 }
 0x4c5   : > { %v9308_v38 = vpop.f32.mrf.mxu0  ;;  %v9267_v37 = vpop.f32.mrf.mxu1  ;;  %9575 = vmatprep.subr.bf16.mxu1 %v10997_v12  ;;  %v10965_v31 = vcombine.high %v5396_v17, %v5400_v34  ;;  %v5388_v54 = vld [vmem:[#allocation6 + $0x410] sm:$0xff]  ;;  %v10964_v12 = vcombine.low %v5396_v17, %v5400_v34 }
 0x4c6   : > { %v9309_v22 = vadd.f32 %v9308_v38, %v9266_v60  ;;  %v9268_v1 = vadd.f32 %v9267_v37, %v9225_v45  ;;  %9617 = vmatpush1.bf16.msra.mxu0 %v11132_v15  ;;  %9975 = vst [vmem:[%s13267_s7 + $0x8] sm:$0xff] %v9307_v36  ;;  %v5392_v56 = vld [vmem:[#allocation6 + $0x430] sm:$0xff]  ;;  %v11093_v15 = vcombine.high %v5524_v50, %v5528_v52 }
 0x4c7   : > { %v9310_v19 = vpop.f32.mrf.mxu0  ;;  %9618 = vmatprep.subr.bf16.mxu0 %v11125_v20  ;;  %v5516_v6 = vld [vmem:[#allocation6 + $0x810] sm:$0xff]  ;;  %v10957_v29 = vcombine.high %v5388_v54, %v5392_v56 }
 0x4c8   : > { %v9972_v7 = vadd.f32 %v9968_v24, %v9309_v22  ;;  %v9311_v61 = vadd.f32 %v9310_v19, %v9268_v1  ;;  %9576 = vmatpush1.bf16.msra.mxu1 %v10996_v48  ;;  %v5520_v14 = vld [vmem:[#allocation6 + $0x830] sm:$0xff]  ;;  %v10956_v48 = vcombine.low %v5388_v54, %v5392_v56 }
 0x4c9   : > { %9577 = vmatprep.subr.bf16.mxu1 %v10989_v42  ;;  %v5512_v51 = vld [vmem:[#allocation6 + $0x7f0] sm:$0xff]  ;;  %v11085_v39 = vcombine.high %v5516_v6, %v5520_v14  ;;  %v11084_v60 = vcombine.low %v5516_v6, %v5520_v14 }
 0x4ca   : > { %9976 = vst [vmem:[%s13267_s7 + $0x10] sm:$0x1] %v9972_v7  ;;  %v9973_v3 = vadd.f32 %v9969_v40, %v9311_v61  ;;  %9619 = vmatpush1.bf16.msra.mxu0 %v11124_v63  ;;  %v5636_v20 = vld [vmem:[#allocation6 + $0xbd0] sm:$0xff]  ;;  %v11077_v36 = vcombine.high %v5508_v55, %v5512_v51  ;;  %v11076_v24 = vcombine.low %v5508_v55, %v5512_v51 }
 0x4cb   : > { %9620 = vmatprep.subr.bf16.mxu0 %v11117_v4  ;;  %v5640_v45 = vld [vmem:[#allocation6 + $0xbf0] sm:$0xff] }
 0x4cc   : > { %9977 = vst [vmem:[%s13267_s7 + $0x18] sm:$0x1] %v9973_v3  ;;  %9578 = vmatpush1.bf16.msra.mxu1 %v10988_v44  ;;  %v5504_v47 = vld [vmem:[#allocation6 + $0x7b0] sm:$0xff]  ;;  %v11205_v38 = vcombine.high %v5636_v20, %v5640_v45  ;;  %v11204_v1 = vcombine.low %v5636_v20, %v5640_v45 }
 0x4cd   : > { %9579 = vmatprep.subr.bf16.mxu1 %v10981_v57  ;;  %v5628_v37 = vld [vmem:[#allocation6 + $0xb90] sm:$0xff]  ;;  %v11069_v22 = vcombine.high %v5500_v9, %v5504_v47  ;;  %v11068_v19 = vcombine.low %v5500_v9, %v5504_v47 }
 0x4ce   : > { %9621 = vmatpush1.bf16.msra.mxu0 %v11116_v43  ;;  %v5632_v42 = vld [vmem:[#allocation6 + $0xbb0] sm:$0xff] }
 0x4cf   : > { %9622 = vmatprep.subr.bf16.mxu0 %v11109_v23  ;;  %v5492_v63 = vld [vmem:[#allocation6 + $0x750] sm:$0xff]  ;;  %v11197_v35 = vcombine.high %v5628_v37, %v5632_v42  ;;  %v11196_v61 = vcombine.low %v5628_v37, %v5632_v42 }
 0x4d0   : > { %9580 = vmatpush1.bf16.msra.mxu1 %v10980_v5  ;;  %v5496_v10 = vld [vmem:[#allocation6 + $0x770] sm:$0xff] }
 0x4d1   : > { %9581 = vmatprep.subr.bf16.mxu1 %v10973_v53  ;;  %v5620_v40 = vld [vmem:[#allocation6 + $0xb50] sm:$0xff]  ;;  %v11061_v7 = vcombine.high %v5492_v63, %v5496_v10  ;;  %v11060_v57 = vcombine.low %v5492_v63, %v5496_v10 }
 0x4d2   : > { %9623 = vmatpush1.bf16.msra.mxu0 %v11108_v33  ;;  %v5624_v4 = vld [vmem:[#allocation6 + $0xb70] sm:$0xff] }
 0x4d3   : > { %9624 = vmatprep.subr.bf16.mxu0 %v11101_v26  ;;  %v5484_v44 = vld [vmem:[#allocation6 + $0x710] sm:$0xff]  ;;  %v11189_v58 = vcombine.high %v5620_v40, %v5624_v4  ;;  %v11188_v16 = vcombine.low %v5620_v40, %v5624_v4 }
 0x4d4   : > { %9582 = vmatpush1.bf16.msra.mxu1 %v10972_v0  ;;  %v5488_v46 = vld [vmem:[#allocation6 + $0x730] sm:$0xff] }
 0x4d5   : > { %9583 = vmatprep.subr.bf16.mxu1 %v10965_v31  ;;  %v5612_v3 = vld [vmem:[#allocation6 + $0xb10] sm:$0xff]  ;;  %v11053_v62 = vcombine.high %v5484_v44, %v5488_v46  ;;  %v11052_v25 = vcombine.low %v5484_v44, %v5488_v46 }
 0x4d6   : > { %9625 = vmatpush1.bf16.msra.mxu0 %v11100_v8  ;;  %v5616_v43 = vld [vmem:[#allocation6 + $0xb30] sm:$0xff] }
 0x4d7   : > { %9626 = vmatprep.subr.bf16.mxu0 %v11093_v15  ;;  %v5476_v23 = vld [vmem:[#allocation6 + $0x6d0] sm:$0xff]  ;;  %v11181_v32 = vcombine.high %v5612_v3, %v5616_v43  ;;  %v11180_v34 = vcombine.low %v5612_v3, %v5616_v43 }
 0x4d8   : > { %9584 = vmatpush1.bf16.msra.mxu1 %v10964_v12  ;;  %v5480_v5 = vld [vmem:[#allocation6 + $0x6f0] sm:$0xff] }
 0x4d9   : > { %9585 = vmatprep.subr.bf16.mxu1 %v10957_v29  ;;  %v5604_v53 = vld [vmem:[#allocation6 + $0xad0] sm:$0xff]  ;;  %v11045_v17 = vcombine.high %v5476_v23, %v5480_v5  ;;  %v11044_v52 = vcombine.low %v5476_v23, %v5480_v5 }
 0x4da   : > { %9627 = vmatpush1.bf16.msra.mxu0 %v11092_v13  ;;  %v5608_v33 = vld [vmem:[#allocation6 + $0xaf0] sm:$0xff] }
 0x4db   : > { %9628 = vmatprep.subr.bf16.mxu0 %v11085_v39  ;;  %v5468_v26 = vld [vmem:[#allocation6 + $0x690] sm:$0xff]  ;;  %v11173_v50 = vcombine.high %v5604_v53, %v5608_v33  ;;  %v11172_v56 = vcombine.low %v5604_v53, %v5608_v33 }
 0x4dc   : > { %9586 = vmatpush1.bf16.msra.mxu1 %v10956_v48  ;;  %v5472_v0 = vld [vmem:[#allocation6 + $0x6b0] sm:$0xff] }
 0x4dd   : > { %9587 = vmatprep.subr.bf16.mxu1 %v11077_v36  ;;  %v5596_v31 = vld [vmem:[#allocation6 + $0xa90] sm:$0xff]  ;;  %v11037_v54 = vcombine.high %v5468_v26, %v5472_v0  ;;  %v11036_v14 = vcombine.low %v5468_v26, %v5472_v0 }
 0x4de   : > { %9629 = vmatpush1.bf16.msra.mxu0 %v11084_v60  ;;  %v5600_v8 = vld [vmem:[#allocation6 + $0xab0] sm:$0xff] }
 0x4df   : > { %9630 = vmatprep.subr.bf16.mxu0 %v11205_v38  ;;  %v5460_v15 = vld [vmem:[#allocation6 + $0x650] sm:$0xff]  ;;  %v11165_v6 = vcombine.high %v5596_v31, %v5600_v8  ;;  %v11164_v51 = vcombine.low %v5596_v31, %v5600_v8 }
 0x4e0   : > { %9588 = vmatpush2.bf16.msra.mxu1 %v11076_v24  ;;  %v5464_v12 = vld [vmem:[#allocation6 + $0x670] sm:$0xff] }
 0x4e1   : > { %9589 = vmatprep.subr.bf16.mxu1 %v11069_v22  ;;  %v5588_v29 = vld [vmem:[#allocation6 + $0xa50] sm:$0xff]  ;;  %v11029_v55 = vcombine.high %v5460_v15, %v5464_v12  ;;  %v11028_v45 = vcombine.low %v5460_v15, %v5464_v12 }
 0x4e2   : > { %9631 = vmatpush2.bf16.msra.mxu0 %v11204_v1  ;;  %v5592_v13 = vld [vmem:[#allocation6 + $0xa70] sm:$0xff] }
 0x4e3   : > { %9632 = vmatprep.subr.bf16.mxu0 %v11197_v35  ;;  %v5452_v39 = vld [vmem:[#allocation6 + $0x610] sm:$0xff]  ;;  %v11157_v20 = vcombine.high %v5588_v29, %v5592_v13  ;;  %v11156_v47 = vcombine.low %v5588_v29, %v5592_v13 }
 0x4e4   : > { %9590 = vmatpush2.bf16.msra.mxu1 %v11068_v19  ;;  %v5456_v48 = vld [vmem:[#allocation6 + $0x630] sm:$0xff] }
 0x4e5   : > { %9591 = vmatprep.subr.bf16.mxu1 %v11061_v7  ;;  %v5580_v36 = vld [vmem:[#allocation6 + $0xa10] sm:$0xff]  ;;  %v11021_v9 = vcombine.high %v5452_v39, %v5456_v48  ;;  %v11020_v42 = vcombine.low %v5452_v39, %v5456_v48 }
 0x4e6   : > { %9633 = vmatpush2.bf16.msra.mxu0 %v11196_v61  ;;  %v5584_v60 = vld [vmem:[#allocation6 + $0xa30] sm:$0xff] }
 0x4e7   : > { %9634 = vmatprep.subr.bf16.mxu0 %v11189_v58  ;;  %v5700_v38 = vld [vmem:[#allocation6 + $0xdd0] sm:$0xff]  ;;  %v11149_v37 = vcombine.high %v5580_v36, %v5584_v60  ;;  %v11148_v10 = vcombine.low %v5580_v36, %v5584_v60 }
 0x4e8   : > { %9592 = vmatpush2.bf16.msra.mxu1 %v11060_v57  ;;  %v5704_v24 = vld [vmem:[#allocation6 + $0xdf0] sm:$0xff] }
 0x4e9   : > { %9593 = vmatprep.subr.bf16.mxu1 %v11053_v62  ;;  %v5828_v22 = vld [vmem:[#allocation6 + $0x11d0] sm:$0xff]  ;;  %v11269_v63 = vcombine.high %v5700_v38, %v5704_v24  ;;  %v11268_v4 = vcombine.low %v5700_v38, %v5704_v24 }
 0x4ea   : > { %9635 = vmatpush2.bf16.msra.mxu0 %v11188_v16  ;;  %v5832_v1 = vld [vmem:[#allocation6 + $0x11f0] sm:$0xff] }
 0x4eb   : > { %9636 = vmatprep.subr.bf16.mxu0 %v11181_v32  ;;  %v5692_v35 = vld [vmem:[#allocation6 + $0xd90] sm:$0xff]  ;;  %v11397_v40 = vcombine.high %v5828_v22, %v5832_v1  ;;  %v11396_v46 = vcombine.low %v5828_v22, %v5832_v1 }
 0x4ec   : > { %9594 = vmatpush2.bf16.msra.mxu1 %v11052_v25  ;;  %v5696_v19 = vld [vmem:[#allocation6 + $0xdb0] sm:$0xff] }
 0x4ed   : > { %9595 = vmatprep.subr.bf16.mxu1 %v11045_v17  ;;  %v5820_v7 = vld [vmem:[#allocation6 + $0x1190] sm:$0xff]  ;;  %v11261_v44 = vcombine.high %v5692_v35, %v5696_v19  ;;  %v11260_v43 = vcombine.low %v5692_v35, %v5696_v19 }
 0x4ee   : > { %9637 = vmatpush2.bf16.msra.mxu0 %v11180_v34  ;;  %v5824_v61 = vld [vmem:[#allocation6 + $0x11b0] sm:$0xff] }
 0x4ef   : > { %9638 = vmatprep.subr.bf16.mxu0 %v11173_v50  ;;  %v5684_v58 = vld [vmem:[#allocation6 + $0xd50] sm:$0xff]  ;;  %v11389_v3 = vcombine.high %v5820_v7, %v5824_v61  ;;  %v11388_v5 = vcombine.low %v5820_v7, %v5824_v61 }
 0x4f0   : > { %9596 = vmatpush2.bf16.msra.mxu1 %v11044_v52  ;;  %v5688_v57 = vld [vmem:[#allocation6 + $0xd70] sm:$0xff] }
 0x4f1   : > { %9597 = vmatprep.subr.bf16.mxu1 %v11037_v54  ;;  %v5812_v62 = vld [vmem:[#allocation6 + $0x1150] sm:$0xff]  ;;  %v11253_v23 = vcombine.high %v5684_v58, %v5688_v57  ;;  %v11252_v33 = vcombine.low %v5684_v58, %v5688_v57 }
 0x4f2   : > { %9639 = vmatpush2.bf16.msra.mxu0 %v11172_v56  ;;  %v5816_v16 = vld [vmem:[#allocation6 + $0x1170] sm:$0xff] }
 0x4f3   : > { %9640 = vmatprep.subr.bf16.mxu0 %v11165_v6  ;;  %v5676_v32 = vld [vmem:[#allocation6 + $0xd10] sm:$0xff]  ;;  %v11381_v53 = vcombine.high %v5812_v62, %v5816_v16  ;;  %v11380_v0 = vcombine.low %v5812_v62, %v5816_v16 }
 0x4f4   : > { %9598 = vmatpush2.bf16.msra.mxu1 %v11036_v14  ;;  %v5680_v25 = vld [vmem:[#allocation6 + $0xd30] sm:$0xff] }
 0x4f5   : > { %9599 = vmatprep.subr.bf16.mxu1 %v11029_v55  ;;  %v5804_v17 = vld [vmem:[#allocation6 + $0x1110] sm:$0xff]  ;;  %v11245_v26 = vcombine.high %v5676_v32, %v5680_v25  ;;  %v11244_v8 = vcombine.low %v5676_v32, %v5680_v25 }
 0x4f6   : > { %9641 = vmatpush2.bf16.msra.mxu0 %v11164_v51  ;;  %v5808_v34 = vld [vmem:[#allocation6 + $0x1130] sm:$0xff] }
 0x4f7   : > { %9642 = vmatprep.subr.bf16.mxu0 %v11157_v20  ;;  %v5668_v50 = vld [vmem:[#allocation6 + $0xcd0] sm:$0xff]  ;;  %v11373_v31 = vcombine.high %v5804_v17, %v5808_v34  ;;  %v11372_v12 = vcombine.low %v5804_v17, %v5808_v34 }
 0x4f8   : > { %9600 = vmatpush2.bf16.msra.mxu1 %v11028_v45  ;;  %v5672_v52 = vld [vmem:[#allocation6 + $0xcf0] sm:$0xff] }
 0x4f9   : > { %9601 = vmatprep.subr.bf16.mxu1 %v11021_v9  ;;  %v5796_v54 = vld [vmem:[#allocation6 + $0x10d0] sm:$0xff]  ;;  %v11237_v15 = vcombine.high %v5668_v50, %v5672_v52  ;;  %v11236_v13 = vcombine.low %v5668_v50, %v5672_v52 }
 0x4fa   : > { %9643 = vmatpush2.bf16.msra.mxu0 %v11156_v47  ;;  %v5800_v56 = vld [vmem:[#allocation6 + $0x10f0] sm:$0xff] }
 0x4fb   : > { %9644 = vmatprep.subr.bf16.mxu0 %v11149_v37  ;;  %v5660_v6 = vld [vmem:[#allocation6 + $0xc90] sm:$0xff]  ;;  %v11365_v29 = vcombine.high %v5796_v54, %v5800_v56  ;;  %v11364_v48 = vcombine.low %v5796_v54, %v5800_v56 }
 0x4fc   : > { %9602 = vmatpush2.bf16.msra.mxu1 %v11020_v42  ;;  %v5664_v14 = vld [vmem:[#allocation6 + $0xcb0] sm:$0xff] }
 0x4fd   : > { %9657 = vmatprep.subr.bf16.mxu1 %v11269_v63  ;;  %v5788_v55 = vld [vmem:[#allocation6 + $0x1090] sm:$0xff]  ;;  %v11229_v39 = vcombine.high %v5660_v6, %v5664_v14  ;;  %v11228_v60 = vcombine.low %v5660_v6, %v5664_v14 }
 0x4fe   : > { %9645 = vmatpush2.bf16.msra.mxu0 %v11148_v10  ;;  %v5792_v51 = vld [vmem:[#allocation6 + $0x10b0] sm:$0xff] }
 0x4ff   : > { %9604 = vmatmul.mubr.bf16.vlgmr.msra.gmra.mxu1 %v13185_v41  ;;  %9700 = vmatprep.subr.bf16.mxu0 %v11397_v40  ;;  %v5652_v20 = vld [vmem:[#allocation6 + $0xc50] sm:$0xff]  ;;  %v11357_v36 = vcombine.high %v5788_v55, %v5792_v51  ;;  %v11356_v24 = vcombine.low %v5788_v55, %v5792_v51 }
 0x500   : > { %9658 = vmatpush1.bf16.msra.mxu1 %v11268_v4  ;;  %9689 = vmatprep.mubr.bf16.mxu1 %v13187_v11  ;;  %v5656_v45 = vld [vmem:[#allocation6 + $0xc70] sm:$0xff] }
 0x501   : > { %9647 = vmatmul.mubr.bf16.vlgmr.msra.gmra.mxu0 %v13244_v18  ;;  %9659 = vmatprep.subr.bf16.mxu1 %v11261_v44  ;;  %v5780_v9 = vld [vmem:[#allocation6 + $0x1050] sm:$0xff]  ;;  %v11221_v38 = vcombine.high %v5652_v20, %v5656_v45  ;;  %v11220_v1 = vcombine.low %v5652_v20, %v5656_v45 }
 0x502   : > { %9701 = vmatpush1.bf16.msra.mxu0 %v11396_v46  ;;  %9732 = vmatprep.mubr.bf16.mxu0 %v13246_v59  ;;  %v5784_v47 = vld [vmem:[#allocation6 + $0x1070] sm:$0xff] }
 0x503   : > { %9702 = vmatprep.subr.bf16.mxu0 %v11389_v3  ;;  %v5644_v37 = vld [vmem:[#allocation6 + $0xc10] sm:$0xff]  ;;  %v11349_v22 = vcombine.high %v5780_v9, %v5784_v47  ;;  %v11348_v19 = vcombine.low %v5780_v9, %v5784_v47 }
 0x504   : > { %9660 = vmatpush1.bf16.msra.mxu1 %v11260_v43  ;;  %v5648_v42 = vld [vmem:[#allocation6 + $0xc30] sm:$0xff] }
 0x505   : > { %9661 = vmatprep.subr.bf16.mxu1 %v11253_v23  ;;  %v5772_v63 = vld [vmem:[#allocation6 + $0x1010] sm:$0xff]  ;;  %v11213_v35 = vcombine.high %v5644_v37, %v5648_v42  ;;  %v11212_v61 = vcombine.low %v5644_v37, %v5648_v42 }
 0x506   : > { %9703 = vmatpush1.bf16.msra.mxu0 %v11388_v5  ;;  %v5776_v10 = vld [vmem:[#allocation6 + $0x1030] sm:$0xff] }
 0x507   : > { %9704 = vmatprep.subr.bf16.mxu0 %v11381_v53  ;;  %v5764_v40 = vld [vmem:[#allocation6 + $0xfd0] sm:$0xff]  ;;  %v11341_v7 = vcombine.high %v5772_v63, %v5776_v10  ;;  %v11340_v57 = vcombine.low %v5772_v63, %v5776_v10 }
 0x508   : > { %9662 = vmatpush1.bf16.msra.mxu1 %v11252_v33  ;;  %v5768_v4 = vld [vmem:[#allocation6 + $0xff0] sm:$0xff] }
 0x509   : > { %9663 = vmatprep.subr.bf16.mxu1 %v11245_v26  ;;  %v5892_v44 = vld [vmem:[#allocation6 + $0x13d0] sm:$0xff]  ;;  %v11333_v58 = vcombine.high %v5764_v40, %v5768_v4  ;;  %v11332_v16 = vcombine.low %v5764_v40, %v5768_v4 }
 0x50a   : > { %9705 = vmatpush1.bf16.msra.mxu0 %v11380_v0  ;;  %v5896_v46 = vld [vmem:[#allocation6 + $0x13f0] sm:$0xff] }
 0x50b   : > { %9706 = vmatprep.subr.bf16.mxu0 %v11373_v31  ;;  %v5756_v3 = vld [vmem:[#allocation6 + $0xf90] sm:$0xff]  ;;  %v11461_v62 = vcombine.high %v5892_v44, %v5896_v46  ;;  %v11460_v25 = vcombine.low %v5892_v44, %v5896_v46 }
 0x50c   : > { %9664 = vmatpush1.bf16.msra.mxu1 %v11244_v8  ;;  %v5760_v43 = vld [vmem:[#allocation6 + $0xfb0] sm:$0xff] }
 0x50d   : > { %9665 = vmatprep.subr.bf16.mxu1 %v11237_v15  ;;  %v5884_v23 = vld [vmem:[#allocation6 + $0x1390] sm:$0xff]  ;;  %v11325_v32 = vcombine.high %v5756_v3, %v5760_v43  ;;  %v11324_v34 = vcombine.low %v5756_v3, %v5760_v43 }
 0x50e   : > { %9707 = vmatpush1.bf16.msra.mxu0 %v11372_v12  ;;  %v5888_v5 = vld [vmem:[#allocation6 + $0x13b0] sm:$0xff] }
 0x50f   : > { %9708 = vmatprep.subr.bf16.mxu0 %v11365_v29  ;;  %v5748_v53 = vld [vmem:[#allocation6 + $0xf50] sm:$0xff]  ;;  %v11453_v17 = vcombine.high %v5884_v23, %v5888_v5  ;;  %v11452_v52 = vcombine.low %v5884_v23, %v5888_v5 }
 0x510   : > { %9666 = vmatpush1.bf16.msra.mxu1 %v11236_v13  ;;  %v5752_v33 = vld [vmem:[#allocation6 + $0xf70] sm:$0xff] }
 0x511   : > { %9667 = vmatprep.subr.bf16.mxu1 %v11229_v39  ;;  %v5876_v26 = vld [vmem:[#allocation6 + $0x1350] sm:$0xff]  ;;  %v11317_v50 = vcombine.high %v5748_v53, %v5752_v33  ;;  %v11316_v56 = vcombine.low %v5748_v53, %v5752_v33 }
 0x512   : > { %9709 = vmatpush1.bf16.msra.mxu0 %v11364_v48  ;;  %v5880_v0 = vld [vmem:[#allocation6 + $0x1370] sm:$0xff] }
 0x513   : > { %9710 = vmatprep.subr.bf16.mxu0 %v11357_v36  ;;  %v5740_v31 = vld [vmem:[#allocation6 + $0xf10] sm:$0xff]  ;;  %v11445_v54 = vcombine.high %v5876_v26, %v5880_v0  ;;  %v11444_v14 = vcombine.low %v5876_v26, %v5880_v0 }
 0x514   : > { %9668 = vmatpush1.bf16.msra.mxu1 %v11228_v60  ;;  %v5744_v8 = vld [vmem:[#allocation6 + $0xf30] sm:$0xff] }
 0x515   : > { %9669 = vmatprep.subr.bf16.mxu1 %v11221_v38  ;;  %v5868_v15 = vld [vmem:[#allocation6 + $0x1310] sm:$0xff]  ;;  %v11309_v6 = vcombine.high %v5740_v31, %v5744_v8  ;;  %v11308_v51 = vcombine.low %v5740_v31, %v5744_v8 }
 0x516   : > { %9711 = vmatpush1.bf16.msra.mxu0 %v11356_v24  ;;  %v5872_v12 = vld [vmem:[#allocation6 + $0x1330] sm:$0xff] }
 0x517   : > { %9712 = vmatprep.subr.bf16.mxu0 %v11349_v22  ;;  %v5732_v29 = vld [vmem:[#allocation6 + $0xed0] sm:$0xff]  ;;  %v11437_v55 = vcombine.high %v5868_v15, %v5872_v12  ;;  %v11436_v45 = vcombine.low %v5868_v15, %v5872_v12 }
 0x518   : > { %9670 = vmatpush1.bf16.msra.mxu1 %v11220_v1  ;;  %v5736_v13 = vld [vmem:[#allocation6 + $0xef0] sm:$0xff] }
 0x519   : > { %9671 = vmatprep.subr.bf16.mxu1 %v11213_v35  ;;  %v5860_v39 = vld [vmem:[#allocation6 + $0x12d0] sm:$0xff]  ;;  %v11301_v20 = vcombine.high %v5732_v29, %v5736_v13  ;;  %v11300_v47 = vcombine.low %v5732_v29, %v5736_v13 }
 0x51a   : > { %9713 = vmatpush1.bf16.msra.mxu0 %v11348_v19  ;;  %v5864_v48 = vld [vmem:[#allocation6 + $0x12f0] sm:$0xff] }
 0x51b   : > { %9714 = vmatprep.subr.bf16.mxu0 %v11341_v7  ;;  %v5724_v36 = vld [vmem:[#allocation6 + $0xe90] sm:$0xff]  ;;  %v11429_v9 = vcombine.high %v5860_v39, %v5864_v48  ;;  %v11428_v42 = vcombine.low %v5860_v39, %v5864_v48 }
 0x51c   : > { %9672 = vmatpush1.bf16.msra.mxu1 %v11212_v61  ;;  %v5728_v60 = vld [vmem:[#allocation6 + $0xeb0] sm:$0xff] }
 0x51d   : > { %9673 = vmatprep.subr.bf16.mxu1 %v11333_v58  ;;  %v5852_v38 = vld [vmem:[#allocation6 + $0x1290] sm:$0xff]  ;;  %v11293_v37 = vcombine.high %v5724_v36, %v5728_v60  ;;  %v11292_v10 = vcombine.low %v5724_v36, %v5728_v60  ;;  %v5285_v60 = vld [vmem:[#allocation6 + $0xd8] sm:$0xff] }
 0x51e   : > { %9715 = vmatpush1.bf16.msra.mxu0 %v11340_v57  ;;  %v5856_v24 = vld [vmem:[#allocation6 + $0x12b0] sm:$0xff] }
 0x51f   : > { %9716 = vmatprep.subr.bf16.mxu0 %v11461_v62  ;;  %v5716_v22 = vld [vmem:[#allocation6 + $0xe50] sm:$0xff]  ;;  %v11421_v63 = vcombine.high %v5852_v38, %v5856_v24  ;;  %v11420_v4 = vcombine.low %v5852_v38, %v5856_v24  ;;  %v5317_v62 = vld [vmem:[#allocation6 + $0x1d8] sm:$0xff] }
 0x520   : > { %9674 = vmatpush2.bf16.msra.mxu1 %v11332_v16  ;;  %v5720_v1 = vld [vmem:[#allocation6 + $0xe70] sm:$0xff]  ;;  %v5321_v16 = vld [vmem:[#allocation6 + $0x1f8] sm:$0xff] }
 0x521   : > { %9675 = vmatprep.subr.bf16.mxu1 %v11325_v32  ;;  %v5844_v35 = vld [vmem:[#allocation6 + $0x1250] sm:$0xff]  ;;  %v11285_v40 = vcombine.high %v5716_v22, %v5720_v1  ;;  %v11284_v46 = vcombine.low %v5716_v22, %v5720_v1  ;;  %v5445_v32 = vld [vmem:[#allocation6 + $0x5d8] sm:$0xff]  ;;  %v10887_v53 = vcombine.high %v5317_v62, %v5321_v16  ;;  %v10886_v0 = vcombine.low %v5317_v62, %v5321_v16 }
 0x522   : > { %9717 = vmatpush2.bf16.msra.mxu0 %v11460_v25  ;;  %v5848_v19 = vld [vmem:[#allocation6 + $0x1270] sm:$0xff]  ;;  %v5449_v25 = vld [vmem:[#allocation6 + $0x5f8] sm:$0xff] }
 0x523   : > { %9718 = vmatprep.subr.bf16.mxu0 %v11453_v17  ;;  %v5708_v7 = vld [vmem:[#allocation6 + $0xe10] sm:$0xff]  ;;  %v11413_v44 = vcombine.high %v5844_v35, %v5848_v19  ;;  %v11412_v43 = vcombine.low %v5844_v35, %v5848_v19  ;;  %v5309_v17 = vld [vmem:[#allocation6 + $0x198] sm:$0xff]  ;;  %v11015_v26 = vcombine.high %v5445_v32, %v5449_v25  ;;  %v11014_v8 = vcombine.low %v5445_v32, %v5449_v25 }
 0x524   : > { %9676 = vmatpush2.bf16.msra.mxu1 %v11324_v34  ;;  %v5712_v61 = vld [vmem:[#allocation6 + $0xe30] sm:$0xff]  ;;  %v5313_v34 = vld [vmem:[#allocation6 + $0x1b8] sm:$0xff] }
 0x525   : > { %9677 = vmatprep.subr.bf16.mxu1 %v11317_v50  ;;  %v5836_v58 = vld [vmem:[#allocation6 + $0x1210] sm:$0xff]  ;;  %v11277_v3 = vcombine.high %v5708_v7, %v5712_v61  ;;  %v11276_v5 = vcombine.low %v5708_v7, %v5712_v61  ;;  %v5437_v50 = vld [vmem:[#allocation6 + $0x598] sm:$0xff]  ;;  %v10879_v31 = vcombine.high %v5309_v17, %v5313_v34  ;;  %v10878_v12 = vcombine.low %v5309_v17, %v5313_v34 }
 0x526   : > { %9719 = vmatpush2.bf16.msra.mxu0 %v11452_v52  ;;  %v5840_v57 = vld [vmem:[#allocation6 + $0x1230] sm:$0xff]  ;;  %v5441_v52 = vld [vmem:[#allocation6 + $0x5b8] sm:$0xff] }
 0x527   : > { %9720 = vmatprep.subr.bf16.mxu0 %v11445_v54  ;;  %v11405_v23 = vcombine.high %v5836_v58, %v5840_v57  ;;  %v11404_v33 = vcombine.low %v5836_v58, %v5840_v57  ;;  %v5301_v54 = vld [vmem:[#allocation6 + $0x158] sm:$0xff]  ;;  %v11007_v15 = vcombine.high %v5437_v50, %v5441_v52  ;;  %v11006_v13 = vcombine.low %v5437_v50, %v5441_v52 }
 0x528   : > { %9678 = vmatpush2.bf16.msra.mxu1 %v11316_v56  ;;  %v5305_v56 = vld [vmem:[#allocation6 + $0x178] sm:$0xff] }
 0x529   : > { %9679 = vmatprep.subr.bf16.mxu1 %v11309_v6  ;;  %v5429_v6 = vld [vmem:[#allocation6 + $0x558] sm:$0xff]  ;;  %v10871_v29 = vcombine.high %v5301_v54, %v5305_v56  ;;  %v10870_v48 = vcombine.low %v5301_v54, %v5305_v56 }
 0x52a   : > { %9721 = vmatpush2.bf16.msra.mxu0 %v11444_v14  ;;  %v5433_v14 = vld [vmem:[#allocation6 + $0x578] sm:$0xff] }
 0x52b   : > { %9722 = vmatprep.subr.bf16.mxu0 %v11437_v55  ;;  %v5293_v55 = vld [vmem:[#allocation6 + $0x118] sm:$0xff]  ;;  %v10999_v39 = vcombine.high %v5429_v6, %v5433_v14  ;;  %v10998_v36 = vcombine.low %v5429_v6, %v5433_v14 }
 0x52c   : > { %9680 = vmatpush2.bf16.msra.mxu1 %v11308_v51  ;;  %v5297_v51 = vld [vmem:[#allocation6 + $0x138] sm:$0xff] }
 0x52d   : > { %9681 = vmatprep.subr.bf16.mxu1 %v11301_v20  ;;  %v5421_v20 = vld [vmem:[#allocation6 + $0x518] sm:$0xff]  ;;  %v10862_v38 = vcombine.low %v5293_v55, %v5297_v51 }
 0x52e   : > { %9723 = vmatpush2.bf16.msra.mxu0 %v11436_v45  ;;  %v5425_v45 = vld [vmem:[#allocation6 + $0x538] sm:$0xff] }
 0x52f   : > { %9724 = vmatprep.subr.bf16.mxu0 %v11429_v9  ;;  %v5289_v9 = vld [vmem:[#allocation6 + $0xf8] sm:$0xff] }
 0x530   : > { %9682 = vmatpush2.bf16.msra.mxu1 %v11300_v47  ;;  %v10991_v47 = vcombine.high %v5421_v20, %v5425_v45  ;;  %v5417_v24 = vld [vmem:[#allocation6 + $0x4f8] sm:$0xff] }
 0x531   : > { %9683 = vmatprep.subr.bf16.mxu1 %v11293_v37  ;;  %v10855_v37 = vcombine.high %v5285_v60, %v5289_v9  ;;  %v5277_v22 = vld [vmem:[#allocation6 + $0x98] sm:$0xff] }
 0x532   : > { %9725 = vmatpush2.bf16.msra.mxu0 %v11428_v42  ;;  %v10990_v42 = vcombine.low %v5421_v20, %v5425_v45  ;;  %v5281_v1 = vld [vmem:[#allocation6 + $0xb8] sm:$0xff] }
 0x533   : > { %9726 = vmatprep.subr.bf16.mxu0 %v11421_v63  ;;  %v5405_v35 = vld [vmem:[#allocation6 + $0x498] sm:$0xff] }
 0x534   : > { %9684 = vmatpush2.bf16.msra.mxu1 %v11292_v10  ;;  %v10854_v10 = vcombine.low %v5285_v60, %v5289_v9  ;;  %v5409_v19 = vld [vmem:[#allocation6 + $0x4b8] sm:$0xff] }
 0x535   : > { %9685 = vmatprep.subr.bf16.mxu1 %v11285_v40  ;;  %v10847_v40 = vcombine.high %v5277_v22, %v5281_v1  ;;  %v5269_v7 = vld [vmem:[#allocation6 + $0x58] sm:$0xff] }
 0x536   : > { %9727 = vmatpush2.bf16.msra.mxu0 %v11420_v4  ;;  %v5273_v61 = vld [vmem:[#allocation6 + $0x78] sm:$0xff] }
 0x537   : > { %9728 = vmatprep.subr.bf16.mxu0 %v11413_v44  ;;  %v10975_v44 = vcombine.high %v5405_v35, %v5409_v19  ;;  %v5397_v58 = vld [vmem:[#allocation6 + $0x458] sm:$0xff] }
 0x538   : > { %9686 = vmatpush2.bf16.msra.mxu1 %v11284_v46  ;;  %v10846_v46 = vcombine.low %v5277_v22, %v5281_v1  ;;  %v5401_v57 = vld [vmem:[#allocation6 + $0x478] sm:$0xff] }
 0x539   : > { %9687 = vmatprep.subr.bf16.mxu1 %v11277_v3  ;;  %v10839_v3 = vcombine.high %v5269_v7, %v5273_v61  ;;  %v5261_v62 = vld [vmem:[#allocation6 + $0x18] sm:$0xff] }
 0x53a   : > { %9729 = vmatpush2.bf16.msra.mxu0 %v11412_v43  ;;  %v10974_v43 = vcombine.low %v5405_v35, %v5409_v19  ;;  %v5265_v16 = vld [vmem:[#allocation6 + $0x38] sm:$0xff] }
 0x53b   : > { %9730 = vmatprep.subr.bf16.mxu0 %v11405_v23  ;;  %v10967_v23 = vcombine.high %v5397_v58, %v5401_v57  ;;  %v5389_v32 = vld [vmem:[#allocation6 + $0x418] sm:$0xff] }
 0x53c   : > { %9688 = vmatpush2.bf16.msra.mxu1 %v11276_v5  ;;  %v10838_v5 = vcombine.low %v5269_v7, %v5273_v61  ;;  %v5393_v25 = vld [vmem:[#allocation6 + $0x438] sm:$0xff] }
 0x53d   : > { %9743 = vmatprep.subr.bf16.mxu1 %v10887_v53  ;;  %v10831_v53 = vcombine.high %v5261_v62, %v5265_v16  ;;  %v5381_v17 = vld [vmem:[#allocation6 + $0x3d8] sm:$0xff] }
 0x53e   : > { %9731 = vmatpush2.bf16.msra.mxu0 %v11404_v33  ;;  %v10966_v33 = vcombine.low %v5397_v58, %v5401_v57  ;;  %v5385_v34 = vld [vmem:[#allocation6 + $0x3f8] sm:$0xff] }
 0x53f   : > { %9690 = vmatmul.mubr.bf16.vlgmr.msra.gmra.mxu1 %v13162_v2  ;;  %9786 = vmatprep.subr.bf16.mxu0 %v11015_v26  ;;  %v10959_v26 = vcombine.high %v5389_v32, %v5393_v25  ;;  %v5509_v50 = vld [vmem:[#allocation6 + $0x7d8] sm:$0xff] }
 0x540   : > { %9744 = vmatpush1.bf16.msra.mxu1 %v10886_v0  ;;  %9775 = vmatprep.mubr.bf16.mxu1 %v13160_v49  ;;  %v10863_v49 = vcombine.high %v5293_v55, %v5297_v51  ;;  %v10830_v0 = vcombine.low %v5261_v62, %v5265_v16  ;;  %v5513_v52 = vld [vmem:[#allocation6 + $0x7f8] sm:$0xff] }
 0x541   : > { %9733 = vmatmul.mubr.bf16.vlgmr.msra.gmra.mxu0 %v13236_v27  ;;  %9745 = vmatprep.subr.bf16.mxu1 %v10879_v31  ;;  %v10951_v31 = vcombine.high %v5381_v17, %v5385_v34  ;;  %v5373_v54 = vld [vmem:[#allocation6 + $0x398] sm:$0xff] }
 0x542   : > { %9787 = vmatpush1.bf16.msra.mxu0 %v11014_v8  ;;  %9818 = vmatprep.mubr.bf16.mxu0 %v13234_v28  ;;  %v5413_v28 = vld [vmem:[#allocation6 + $0x4d8] sm:$0xff]  ;;  %v10958_v8 = vcombine.low %v5389_v32, %v5393_v25 }
 0x543   : > { %9788 = vmatprep.subr.bf16.mxu0 %v11007_v15  ;;  %v10983_v63 = vcombine.high %v5413_v28, %v5417_v24  ;;  %v10982_v4 = vcombine.low %v5413_v28, %v5417_v24  ;;  %v5377_v56 = vld [vmem:[#allocation6 + $0x3b8] sm:$0xff]  ;;  %v11079_v15 = vcombine.high %v5509_v50, %v5513_v52 }
 0x544   : > { %9746 = vmatpush1.bf16.msra.mxu1 %v10878_v12  ;;  %v10950_v12 = vcombine.low %v5381_v17, %v5385_v34  ;;  %v5501_v6 = vld [vmem:[#allocation6 + $0x798] sm:$0xff] }
 0x545   : > { %9747 = vmatprep.subr.bf16.mxu1 %v10871_v29  ;;  %v5505_v14 = vld [vmem:[#allocation6 + $0x7b8] sm:$0xff]  ;;  %v10943_v29 = vcombine.high %v5373_v54, %v5377_v56 }
 0x546   : > { %9789 = vmatpush1.bf16.msra.mxu0 %v11006_v13  ;;  %v11078_v13 = vcombine.low %v5509_v50, %v5513_v52  ;;  %v5365_v55 = vld [vmem:[#allocation6 + $0x358] sm:$0xff] }
 0x547   : > { %9790 = vmatprep.subr.bf16.mxu0 %v10999_v39  ;;  %v5369_v51 = vld [vmem:[#allocation6 + $0x378] sm:$0xff]  ;;  %v11071_v39 = vcombine.high %v5501_v6, %v5505_v14 }
 0x548   : > { %9748 = vmatpush1.bf16.msra.mxu1 %v10870_v48  ;;  %v10942_v48 = vcombine.low %v5373_v54, %v5377_v56  ;;  %v5493_v20 = vld [vmem:[#allocation6 + $0x758] sm:$0xff]  ;;  %v10934_v28 = vcombine.low %v5365_v55, %v5369_v51 }
 0x549   : > { %9749 = vmatprep.subr.bf16.mxu1 %v10863_v49  ;;  %v5497_v45 = vld [vmem:[#allocation6 + $0x778] sm:$0xff]  ;;  %v10935_v49 = vcombine.high %v5365_v55, %v5369_v51 }
 0x54a   : > { %9791 = vmatpush1.bf16.msra.mxu0 %v10998_v36  ;;  %v11070_v36 = vcombine.low %v5501_v6, %v5505_v14  ;;  %v5357_v60 = vld [vmem:[#allocation6 + $0x318] sm:$0xff]  ;;  %v11062_v22 = vcombine.low %v5493_v20, %v5497_v45 }
 0x54b   : > { %9792 = vmatprep.subr.bf16.mxu0 %v10991_v47  ;;  %v5361_v9 = vld [vmem:[#allocation6 + $0x338] sm:$0xff]  ;;  %v13303_v47 = vpop.f32.mrf.mxu1 }
 0x54c   : > { %9750 = vmatpush1.bf16.msra.mxu1 %v10862_v38  ;;  %v11063_v38 = vcombine.high %v5493_v20, %v5497_v45  ;;  %v5485_v24 = vld [vmem:[#allocation6 + $0x718] sm:$0xff] }
 0x54d   : > { %9751 = vmatprep.subr.bf16.mxu1 %v10855_v37  ;;  %v5489_v37 = vld [vmem:[#allocation6 + $0x738] sm:$0xff]  ;;  %v13305_v35 = vpop.f32.mrf.mxu1 }
 0x54e   : > { %9793 = vmatpush1.bf16.msra.mxu0 %v10990_v42  ;;  %v10927_v42 = vcombine.high %v5357_v60, %v5361_v9  ;;  %v5349_v1 = vld [vmem:[#allocation6 + $0x2d8] sm:$0xff]  ;;  %v11055_v19 = vcombine.high %v5485_v24, %v5489_v37 }
 0x54f   : > { %9794 = vmatprep.subr.bf16.mxu0 %v10983_v63  ;;  %v5353_v63 = vld [vmem:[#allocation6 + $0x2f8] sm:$0xff] }
 0x550   : > { %9752 = vmatpush1.bf16.msra.mxu1 %v10854_v10  ;;  %v9390_v10 = vpop.f32.mrf.mxu0  ;;  %v5481_v7 = vld [vmem:[#allocation6 + $0x6f8] sm:$0xff]  ;;  %v10919_v61 = vcombine.high %v5349_v1, %v5353_v63  ;;  %v10918_v62 = vcombine.low %v5349_v1, %v5353_v63 }
 0x551   : > { %9753 = vmatprep.subr.bf16.mxu1 %v10847_v40  ;;  %v10926_v40 = vcombine.low %v5357_v60, %v5361_v9  ;;  %v5345_v58 = vld [vmem:[#allocation6 + $0x2b8] sm:$0xff] }
 0x552   : > { %9795 = vmatpush1.bf16.msra.mxu0 %v10982_v4  ;;  %v5477_v4 = vld [vmem:[#allocation6 + $0x6d8] sm:$0xff]  ;;  %v9392_v57 = vpop.f32.mrf.mxu0 }
 0x553   : > { %9796 = vmatprep.subr.bf16.mxu0 %v10975_v44  ;;  %v11054_v44 = vcombine.low %v5485_v24, %v5489_v37  ;;  %v5469_v16 = vld [vmem:[#allocation6 + $0x698] sm:$0xff]  ;;  %v11046_v32 = vcombine.low %v5477_v4, %v5481_v7  ;;  %v9393_v37 = vadd.f32 %v9392_v57, %v13305_v35 }
 0x554   : > { %9754 = vmatpush1.bf16.msra.mxu1 %v10846_v46  ;;  %v5341_v46 = vld [vmem:[#allocation6 + $0x298] sm:$0xff] }
 0x555   : > { %9755 = vmatprep.subr.bf16.mxu1 %v10839_v3  ;;  %v9351_v3 = vpop.f32.mrf.mxu1  ;;  %v5333_v25 = vld [vmem:[#allocation6 + $0x258] sm:$0xff] }
 0x556   : > { %9797 = vmatpush1.bf16.msra.mxu0 %v10974_v43  ;;  %v11047_v43 = vcombine.high %v5477_v4, %v5481_v7  ;;  %v5465_v50 = vld [vmem:[#allocation6 + $0x678] sm:$0xff] }
 0x557   : > { %9798 = vmatprep.subr.bf16.mxu0 %v10967_v23  ;;  %v5473_v23 = vld [vmem:[#allocation6 + $0x6b8] sm:$0xff]  ;;  %v9353_v17 = vpop.f32.mrf.mxu1 }
 0x558   : > { %9756 = vmatpush1.bf16.msra.mxu1 %v10838_v5  ;;  %v10911_v5 = vcombine.high %v5341_v46, %v5345_v58  ;;  %v11039_v34 = vcombine.high %v5469_v16, %v5473_v23  ;;  %v5325_v54 = vld [vmem:[#allocation6 + $0x218] sm:$0xff] }
 0x559   : > { %9757 = vmatprep.subr.bf16.mxu1 %v10831_v53  ;;  %v5337_v53 = vld [vmem:[#allocation6 + $0x278] sm:$0xff]  ;;  %v9433_v52 = vpop.f32.mrf.mxu1 }
 0x55a   : > { %9799 = vmatpush1.bf16.msra.mxu0 %v10966_v33  ;;  %v9394_v33 = vpop.f32.mrf.mxu0  ;;  %v5329_v56 = vld [vmem:[#allocation6 + $0x238] sm:$0xff]  ;;  %v10902_v6 = vcombine.low %v5333_v25, %v5337_v53 }
 0x55b   : > { %9800 = vmatprep.subr.bf16.mxu0 %v10959_v26  ;;  %v10910_v26 = vcombine.low %v5341_v46, %v5345_v58  ;;  %v5453_v14 = vld [vmem:[#allocation6 + $0x618] sm:$0xff]  ;;  %v9435_v55 = vpop.f32.mrf.mxu1  ;;  %v10895_v51 = vcombine.high %v5325_v54, %v5329_v56 }
 0x55c   : > { %9758 = vmatpush1.bf16.msra.mxu1 %v10830_v0  ;;  %v5461_v0 = vld [vmem:[#allocation6 + $0x658] sm:$0xff]  ;;  %v9436_v4 = vadd.f32 %v9435_v55, %v9393_v37 }
 0x55d   : > { %9759 = vmatprep.subr.bf16.mxu1 %v10951_v31  ;;  %v10903_v31 = vcombine.high %v5333_v25, %v5337_v53  ;;  %v5577_v20 = vld [vmem:[#allocation6 + $0x9f8] sm:$0xff] }
 0x55e   : > { %9801 = vmatpush1.bf16.msra.mxu0 %v10958_v8  ;;  %v11038_v8 = vcombine.low %v5469_v16, %v5473_v23  ;;  %v5701_v60 = vld [vmem:[#allocation6 + $0xdd8] sm:$0xff] }
 0x55f   : > { %9802 = vmatprep.subr.bf16.mxu0 %v11079_v15  ;;  %v9396_v15 = vpop.f32.mrf.mxu0  ;;  %v5705_v9 = vld [vmem:[#allocation6 + $0xdf8] sm:$0xff] }
 0x560   : > { %9760 = vmatpush2.bf16.msra.mxu1 %v10950_v12  ;;  %v11031_v12 = vcombine.high %v5461_v0, %v5465_v50  ;;  %v5565_v1 = vld [vmem:[#allocation6 + $0x998] sm:$0xff]  ;;  %v9397_v58 = vadd.f32 %v9396_v15, %v9353_v17  ;;  %v11270_v57 = vcombine.low %v5701_v60, %v5705_v9 }
 0x561   : > { %9761 = vmatprep.subr.bf16.mxu1 %v10943_v29  ;;  %v5457_v29 = vld [vmem:[#allocation6 + $0x638] sm:$0xff] }
 0x562   : > { %9803 = vmatpush2.bf16.msra.mxu0 %v11078_v13  ;;  %v9476_v13 = vpop.f32.mrf.mxu0  ;;  %v11023_v45 = vcombine.high %v5453_v14, %v5457_v29  ;;  %v5569_v63 = vld [vmem:[#allocation6 + $0x9b8] sm:$0xff] }
 0x563   : > { %9804 = vmatprep.subr.bf16.mxu0 %v11071_v39  ;;  %v11030_v39 = vcombine.low %v5461_v0, %v5465_v50  ;;  %v5697_v7 = vld [vmem:[#allocation6 + $0xdb8] sm:$0xff]  ;;  %v11135_v46 = vcombine.high %v5565_v1, %v5569_v63 }
 0x564   : > { %9762 = vmatpush2.bf16.msra.mxu1 %v10942_v48  ;;  %v5573_v48 = vld [vmem:[#allocation6 + $0x9d8] sm:$0xff] }
 0x565   : > { %9763 = vmatprep.subr.bf16.mxu1 %v10935_v49  ;;  %v9391_v49 = vadd.f32 %v9390_v10, %v13303_v47  ;;  %v11143_v24 = vcombine.high %v5573_v48, %v5577_v20  ;;  %v11142_v47 = vcombine.low %v5573_v48, %v5577_v20  ;;  %v5693_v10 = vld [vmem:[#allocation6 + $0xd98] sm:$0xff] }
 0x566   : > { %9805 = vmatpush2.bf16.msra.mxu0 %v11070_v36  ;;  %v10894_v36 = vcombine.low %v5325_v54, %v5329_v56  ;;  %v5561_v16 = vld [vmem:[#allocation6 + $0x978] sm:$0xff] }
 0x567   : > { %9806 = vmatprep.subr.bf16.mxu0 %v11063_v38  ;;  %v9478_v38 = vpop.f32.mrf.mxu0  ;;  %v5689_v17 = vld [vmem:[#allocation6 + $0xd78] sm:$0xff] }
 0x568   : > { %9764 = vmatpush2.bf16.msra.mxu1 %v10934_v28  ;;  %v9437_v28 = vpop.f32.mrf.mxu1  ;;  %v5553_v54 = vld [vmem:[#allocation6 + $0x938] sm:$0xff] }
 0x569   : > { %9765 = vmatprep.subr.bf16.mxu1 %v10927_v42  ;;  %v9434_v42 = vadd.f32 %v9433_v52, %v9391_v49  ;;  %v5681_v55 = vld [vmem:[#allocation6 + $0xd38] sm:$0xff] }
 0x56a   : > { %9807 = vmatpush2.bf16.msra.mxu0 %v11062_v22  ;;  %v11022_v22 = vcombine.low %v5453_v14, %v5457_v29 }
 0x56b   : > { %9808 = vmatprep.subr.bf16.mxu0 %v11055_v19  ;;  %v11271_v19 = vcombine.high %v5701_v60, %v5705_v9  ;;  %v5545_v60 = vld [vmem:[#allocation6 + $0x8f8] sm:$0xff] }
 0x56c   : > { %9766 = vmatpush2.bf16.msra.mxu1 %v10926_v40  ;;  %v9395_v40 = vadd.f32 %v9394_v33, %v9351_v3  ;;  %v11134_v3 = vcombine.low %v5565_v1, %v5569_v63  ;;  %v5685_v33 = vld [vmem:[#allocation6 + $0xd58] sm:$0xff] }
 0x56d   : > { %9767 = vmatprep.subr.bf16.mxu1 %v10919_v61  ;;  %v9480_v61 = vpop.f32.mrf.mxu0  ;;  %v11254_v49 = vcombine.low %v5685_v33, %v5689_v17 }
 0x56e   : > { %9809 = vmatpush2.bf16.msra.mxu0 %v11054_v44  ;;  %v9439_v44 = vpop.f32.mrf.mxu1  ;;  %v9438_v35 = vadd.f32 %v9437_v28, %v9395_v40 }
 0x56f   : > { %9810 = vmatprep.subr.bf16.mxu0 %v11047_v43  ;;  %v9477_v43 = vadd.f32 %v9476_v13, %v9434_v42  ;;  %v9440_v25 = vadd.f32 %v9439_v44, %v9397_v58  ;;  %v5677_v13 = vld [vmem:[#allocation6 + $0xd18] sm:$0xff] }
 0x570   : > { %9768 = vmatpush2.bf16.msra.mxu1 %v10918_v62  ;;  %v5557_v62 = vld [vmem:[#allocation6 + $0x958] sm:$0xff]  ;;  %v9481_v50 = vadd.f32 %v9480_v61, %v9438_v35  ;;  %v11247_v9 = vcombine.high %v5677_v13, %v5681_v55 }
 0x571   : > { %9769 = vmatprep.subr.bf16.mxu1 %v10911_v5  ;;  %v11263_v5 = vcombine.high %v5693_v10, %v5697_v7  ;;  %v11127_v0 = vcombine.high %v5557_v62, %v5561_v16  ;;  %v11126_v15 = vcombine.low %v5557_v62, %v5561_v16  ;;  %v5669_v42 = vld [vmem:[#allocation6 + $0xcd8] sm:$0xff] }
 0x572   : > { %9811 = vmatpush2.bf16.msra.mxu0 %v11046_v32  ;;  %v9479_v32 = vadd.f32 %v9478_v38, %v9436_v4  ;;  %v9980_v38 = vld [vmem:[%s13267_s7 + $0x10] sm:$0x3]  ;;  %v11246_v4 = vcombine.low %v5677_v13, %v5681_v55  ;;  %v5665_v58 = vld [vmem:[#allocation6 + $0xcb8] sm:$0xff] }
 0x573   : > { %9812 = vmatprep.subr.bf16.mxu0 %v11039_v34  ;;  %v9482_v34 = vpop.f32.mrf.mxu0  ;;  %v5529_v62 = vld [vmem:[#allocation6 + $0x878] sm:$0xff] }
 0x574   : > { %9770 = vmatpush2.bf16.msra.mxu1 %v10910_v26  ;;  %v5757_v13 = vld [vmem:[#allocation6 + $0xf98] sm:$0xff] }
 0x575   : > { %9771 = vmatprep.subr.bf16.mxu1 %v10903_v31  ;;  %v11262_v31 = vcombine.low %v5693_v10, %v5697_v7  ;;  %v5537_v10 = vld [vmem:[#allocation6 + $0x8b8] sm:$0xff] }
 0x576   : > { %9813 = vmatpush2.bf16.msra.mxu0 %v11038_v8  ;;  %v5549_v8 = vld [vmem:[#allocation6 + $0x918] sm:$0xff] }
 0x577   : > { %9814 = vmatprep.subr.bf16.mxu0 %v11031_v12  ;;  %v11255_v12 = vcombine.high %v5685_v33, %v5689_v17  ;;  %v11118_v37 = vcombine.low %v5549_v8, %v5553_v54  ;;  %v5521_v33 = vld [vmem:[#allocation6 + $0x838] sm:$0xff] }
 0x578   : > { %9772 = vmatpush2.bf16.msra.mxu1 %v10902_v6  ;;  %v5761_v55 = vld [vmem:[#allocation6 + $0xfb8] sm:$0xff] }
 0x579   : > { %9773 = vmatprep.subr.bf16.mxu1 %v10895_v51  ;;  %v9979_v51 = vld [vmem:[%s13267_s7 + $0x8] sm:$0xfe] }
 0x57a   : > { %9815 = vmatpush2.bf16.msra.mxu0 %v11030_v39  ;;  %v11119_v39 = vcombine.high %v5549_v8, %v5553_v54 }
 0x57b   : > { %9816 = vmatprep.subr.bf16.mxu0 %v11023_v45 }
 0x57c   : > { %9774 = vmatpush2.bf16.msra.mxu1 %v10894_v36  ;;  %v5541_v36 = vld [vmem:[#allocation6 + $0x8d8] sm:$0xff] }
 0x57d   : > { %9829 = vmatprep.subr.bf16.mxu1 %v11143_v24  ;;  %v11111_v63 = vcombine.high %v5541_v36, %v5545_v60  ;;  %v11110_v44 = vcombine.low %v5541_v36, %v5545_v60  ;;  %v5753_v36 = vld [vmem:[#allocation6 + $0xf78] sm:$0xff] }
 0x57e   : > { %9817 = vmatpush2.bf16.msra.mxu0 %v11022_v22  ;;  %v5673_v22 = vld [vmem:[#allocation6 + $0xcf8] sm:$0xff] }
 0x57f   : > { %v9519_v23 = vpop.f32.mrf.mxu1  ;;  %9776 = vmatmul.mubr.bf16.vlgmr.msra.gmra.mxu1 %v13158_v21  ;;  %9872 = vmatprep.subr.bf16.mxu0 %v11271_v19  ;;  %v9981_v19 = vld [vmem:[%s13267_s7 + $0x18] sm:$0x3]  ;;  %v11239_v61 = vcombine.high %v5669_v42, %v5673_v22  ;;  %v11238_v35 = vcombine.low %v5669_v42, %v5673_v22  ;;  %v5741_v42 = vld [vmem:[#allocation6 + $0xf18] sm:$0xff] }
 0x580   : > { %v9520_v53 = vadd.f32 %v9519_v23, %v9477_v43  ;;  %9830 = vmatpush1.bf16.msra.mxu1 %v11142_v47  ;;  %9861 = vmatprep.mubr.bf16.mxu1 %v13180_v30  ;;  %v9978_v30 = vld [vmem:[%s13267_s7] sm:$0xfe] }
 0x581   : > { %9819 = vmatmul.mubr.bf16.vlgmr.msra.gmra.mxu0 %v13185_v41  ;;  %v9521_v26 = vpop.f32.mrf.mxu1  ;;  %9831 = vmatprep.subr.bf16.mxu1 %v11135_v46  ;;  %v9483_v41 = vadd.f32 %v9482_v34, %v9440_v25  ;;  %v5533_v47 = vld [vmem:[#allocation6 + $0x898] sm:$0xff] }
 0x582   : > { %v9987_v21 = vrot.slane %v9520_v53, 7  ;;  %v9522_v52 = vadd.f32 %v9521_v26, %v9479_v32  ;;  %9873 = vmatpush1.bf16.msra.mxu0 %v11270_v57  ;;  %9904 = vmatprep.mubr.bf16.mxu0 %v13187_v11  ;;  %v5661_v46 = vld [vmem:[#allocation6 + $0xc98] sm:$0xff]  ;;  %v11103_v43 = vcombine.high %v5533_v47, %v5537_v10  ;;  %v11102_v23 = vcombine.low %v5533_v47, %v5537_v10 }
 0x583   : > { %v9523_v56 = vpop.f32.mrf.mxu1  ;;  %9874 = vmatprep.subr.bf16.mxu0 %v11263_v5  ;;  %v5525_v57 = vld [vmem:[#allocation6 + $0x858] sm:$0xff]  ;;  %v11231_v16 = vcombine.high %v5661_v46, %v5665_v58  ;;  %v11230_v25 = vcombine.low %v5661_v46, %v5665_v58 }
 0x584   : > { %v9997_v6 = vadd.f32 %v9987_v21, %v9978_v30  ;;  %v9988_v14 = vrot.slane %v9522_v52, 7  ;;  %v9524_v29 = vadd.f32 %v9523_v56, %v9481_v50  ;;  %9832 = vmatpush1.bf16.msra.mxu1 %v11134_v3  ;;  %v5653_v3 = vld [vmem:[#allocation6 + $0xc58] sm:$0xff]  ;;  %v11095_v32 = vcombine.high %v5525_v57, %v5529_v62 }
 0x585   : > { %v9525_v11 = vpop.f32.mrf.mxu1  ;;  %9833 = vmatprep.subr.bf16.mxu1 %v11127_v0  ;;  %v5657_v5 = vld [vmem:[#allocation6 + $0xc78] sm:$0xff]  ;;  %v11094_v34 = vcombine.low %v5525_v57, %v5529_v62 }
 0x586   : > { %10001 = vst [vmem:[%s13267_s7] sm:$0xfe] %v9997_v6  ;;  %v9998_v48 = vadd.f32 %v9988_v14, %v9979_v51  ;;  %v9989_v20 = vrot.slane %v9524_v29, 7  ;;  %v9526_v45 = vadd.f32 %v9525_v11, %v9483_v41  ;;  %9875 = vmatpush1.bf16.msra.mxu0 %v11262_v31  ;;  %v5517_v53 = vld [vmem:[#allocation6 + $0x818] sm:$0xff]  ;;  %v11223_v17 = vcombine.high %v5653_v3, %v5657_v5 }
 0x587   : > { %9876 = vmatprep.subr.bf16.mxu0 %v11255_v12  ;;  %v5645_v26 = vld [vmem:[#allocation6 + $0xc18] sm:$0xff]  ;;  %v11087_v50 = vcombine.high %v5517_v53, %v5521_v33  ;;  %v11086_v54 = vcombine.low %v5517_v53, %v5521_v33 }
 0x588   : > { %10002 = vst [vmem:[%s13267_s7 + $0x8] sm:$0xfe] %v9998_v48  ;;  %v9990_v28 = vsel %vm9986_vm1, %v9987_v21, %v9989_v20  ;;  %v9991_v24 = vrot.slane %v9526_v45, 7  ;;  %9834 = vmatpush1.bf16.msra.mxu1 %v11126_v15  ;;  %v5649_v0 = vld [vmem:[#allocation6 + $0xc38] sm:$0xff]  ;;  %v11222_v21 = vcombine.low %v5653_v3, %v5657_v5  ;;  %v11327_v20 = vcombine.high %v5757_v13, %v5761_v55 }
 0x589   : > { %v9999_v1 = vadd.f32 %v9990_v28, %v9980_v38  ;;  %9835 = vmatprep.subr.bf16.mxu1 %v11119_v39  ;;  %v5637_v52 = vld [vmem:[#allocation6 + $0xbd8] sm:$0xff]  ;;  %v11215_v8 = vcombine.high %v5645_v26, %v5649_v0  ;;  %v11214_v12 = vcombine.low %v5645_v26, %v5649_v0 }
 0x58a   : > { %v9992_v40 = vsel %vm9986_vm1, %v9988_v14, %v9991_v24  ;;  %9877 = vmatpush1.bf16.msra.mxu0 %v11254_v49  ;;  %v5641_v31 = vld [vmem:[#allocation6 + $0xbf8] sm:$0xff] }
 0x58b   : > { %10003 = vst [vmem:[%s13267_s7 + $0x10] sm:$0x3] %v9999_v1  ;;  %v10000_v7 = vadd.f32 %v9992_v40, %v9981_v19  ;;  %9878 = vmatprep.subr.bf16.mxu0 %v11247_v9  ;;  %v5765_v30 = vld [vmem:[#allocation6 + $0xfd8] sm:$0xff]  ;;  %v11207_v15 = vcombine.high %v5637_v52, %v5641_v31  ;;  %v11206_v29 = vcombine.low %v5637_v52, %v5641_v31 }
 0x58c   : > { %9836 = vmatpush1.bf16.msra.mxu1 %v11118_v37  ;;  %v5769_v56 = vld [vmem:[#allocation6 + $0xff8] sm:$0xff]  ;;  %v11326_v9 = vcombine.low %v5757_v13, %v5761_v55 }
 0x58d   : > { %10004 = vst [vmem:[%s13267_s7 + $0x18] sm:$0x3] %v10000_v7  ;;  %9837 = vmatprep.subr.bf16.mxu1 %v11111_v63  ;;  %v5629_v41 = vld [vmem:[#allocation6 + $0xb98] sm:$0xff]  ;;  %v11335_v14 = vcombine.high %v5765_v30, %v5769_v56  ;;  %v11334_v11 = vcombine.low %v5765_v30, %v5769_v56 }
 0x58e   : > { %9879 = vmatpush1.bf16.msra.mxu0 %v11246_v4  ;;  %v5633_v6 = vld [vmem:[#allocation6 + $0xbb8] sm:$0xff] }
 0x58f   : > { %9880 = vmatprep.subr.bf16.mxu0 %v11239_v61  ;;  %v11199_v51 = vcombine.high %v5629_v41, %v5633_v6  ;;  %v5621_v39 = vld [vmem:[#allocation6 + $0xb58] sm:$0xff]  ;;  %v11198_v45 = vcombine.low %v5629_v41, %v5633_v6 }
 0x590   : > { %9838 = vmatpush1.bf16.msra.mxu1 %v11110_v44  ;;  %v5625_v48 = vld [vmem:[#allocation6 + $0xb78] sm:$0xff] }
 0x591   : > { %9839 = vmatprep.subr.bf16.mxu1 %v11103_v43  ;;  %v5749_v49 = vld [vmem:[#allocation6 + $0xf58] sm:$0xff]  ;;  %v11191_v60 = vcombine.high %v5621_v39, %v5625_v48  ;;  %v11190_v37 = vcombine.low %v5621_v39, %v5625_v48 }
 0x592   : > { %9881 = vmatpush1.bf16.msra.mxu0 %v11238_v35  ;;  %v5613_v38 = vld [vmem:[#allocation6 + $0xb18] sm:$0xff]  ;;  %v11319_v24 = vcombine.high %v5749_v49, %v5753_v36  ;;  %v11318_v63 = vcombine.low %v5749_v49, %v5753_v36 }
 0x593   : > { %9882 = vmatprep.subr.bf16.mxu0 %v11231_v16  ;;  %v5617_v28 = vld [vmem:[#allocation6 + $0xb38] sm:$0xff] }
 0x594   : > { %9840 = vmatpush1.bf16.msra.mxu1 %v11102_v23  ;;  %v5745_v22 = vld [vmem:[#allocation6 + $0xf38] sm:$0xff]  ;;  %v11183_v1 = vcombine.high %v5613_v38, %v5617_v28  ;;  %v11182_v47 = vcombine.low %v5613_v38, %v5617_v28 }
 0x595   : > { %9841 = vmatprep.subr.bf16.mxu1 %v11095_v32  ;;  %v5605_v19 = vld [vmem:[#allocation6 + $0xad8] sm:$0xff]  ;;  %v11311_v4 = vcombine.high %v5741_v42, %v5745_v22  ;;  %v11310_v44 = vcombine.low %v5741_v42, %v5745_v22 }
 0x596   : > { %9883 = vmatpush1.bf16.msra.mxu0 %v11230_v25  ;;  %v5609_v40 = vld [vmem:[#allocation6 + $0xaf8] sm:$0xff] }
 0x597   : > { %9884 = vmatprep.subr.bf16.mxu0 %v11223_v17  ;;  %v5733_v10 = vld [vmem:[#allocation6 + $0xed8] sm:$0xff]  ;;  %v11175_v61 = vcombine.high %v5605_v19, %v5609_v40  ;;  %v11174_v35 = vcombine.low %v5605_v19, %v5609_v40 }
 0x598   : > { %9842 = vmatpush1.bf16.msra.mxu1 %v11094_v34  ;;  %v5737_v7 = vld [vmem:[#allocation6 + $0xef8] sm:$0xff] }
 0x599   : > { %9843 = vmatprep.subr.bf16.mxu1 %v11087_v50  ;;  %v5597_v46 = vld [vmem:[#allocation6 + $0xa98] sm:$0xff]  ;;  %v11303_v43 = vcombine.high %v5733_v10, %v5737_v7  ;;  %v11302_v23 = vcombine.low %v5733_v10, %v5737_v7 }
 0x59a   : > { %9885 = vmatpush1.bf16.msra.mxu0 %v11222_v21  ;;  %v5601_v58 = vld [vmem:[#allocation6 + $0xab8] sm:$0xff] }
 0x59b   : > { %9886 = vmatprep.subr.bf16.mxu0 %v11215_v8  ;;  %v5725_v57 = vld [vmem:[#allocation6 + $0xe98] sm:$0xff]  ;;  %v11167_v16 = vcombine.high %v5597_v46, %v5601_v58  ;;  %v11166_v25 = vcombine.low %v5597_v46, %v5601_v58 }
 0x59c   : > { %9844 = vmatpush1.bf16.msra.mxu1 %v11086_v54  ;;  %v5729_v62 = vld [vmem:[#allocation6 + $0xeb8] sm:$0xff] }
 0x59d   : > { %9845 = vmatprep.subr.bf16.mxu1 %v11207_v15  ;;  %v5589_v3 = vld [vmem:[#allocation6 + $0xa58] sm:$0xff]  ;;  %v11295_v32 = vcombine.high %v5725_v57, %v5729_v62  ;;  %v11294_v34 = vcombine.low %v5725_v57, %v5729_v62 }
 0x59e   : > { %9887 = vmatpush1.bf16.msra.mxu0 %v11214_v12  ;;  %v5593_v5 = vld [vmem:[#allocation6 + $0xa78] sm:$0xff] }
 0x59f   : > { %9888 = vmatprep.subr.bf16.mxu0 %v11335_v14  ;;  %v5717_v53 = vld [vmem:[#allocation6 + $0xe58] sm:$0xff]  ;;  %v11159_v17 = vcombine.high %v5589_v3, %v5593_v5  ;;  %v11158_v21 = vcombine.low %v5589_v3, %v5593_v5 }
 0x5a0   : > { %9846 = vmatpush2.bf16.msra.mxu1 %v11206_v29  ;;  %v5721_v33 = vld [vmem:[#allocation6 + $0xe78] sm:$0xff] }
 0x5a1   : > { %9847 = vmatprep.subr.bf16.mxu1 %v11199_v51  ;;  %v5581_v26 = vld [vmem:[#allocation6 + $0xa18] sm:$0xff]  ;;  %v11287_v50 = vcombine.high %v5717_v53, %v5721_v33  ;;  %v11286_v54 = vcombine.low %v5717_v53, %v5721_v33 }
 0x5a2   : > { %9889 = vmatpush2.bf16.msra.mxu0 %v11334_v11  ;;  %v5585_v0 = vld [vmem:[#allocation6 + $0xa38] sm:$0xff] }
 0x5a3   : > { %9890 = vmatprep.subr.bf16.mxu0 %v11327_v20  ;;  %v5709_v52 = vld [vmem:[#allocation6 + $0xe18] sm:$0xff]  ;;  %v11151_v8 = vcombine.high %v5581_v26, %v5585_v0  ;;  %v11150_v12 = vcombine.low %v5581_v26, %v5585_v0 }
 0x5a4   : > { %9848 = vmatpush2.bf16.msra.mxu1 %v11198_v45  ;;  %v5713_v31 = vld [vmem:[#allocation6 + $0xe38] sm:$0xff] }
 0x5a5   : > { %9849 = vmatprep.subr.bf16.mxu1 %v11191_v60  ;;  %v5829_v30 = vld [vmem:[#allocation6 + $0x11d8] sm:$0xff]  ;;  %v11279_v15 = vcombine.high %v5709_v52, %v5713_v31  ;;  %v11278_v6 = vcombine.low %v5709_v52, %v5713_v31 }
 0x5a6   : > { %9891 = vmatpush2.bf16.msra.mxu0 %v11326_v9  ;;  %v5833_v56 = vld [vmem:[#allocation6 + $0x11f8] sm:$0xff] }
 0x5a7   : > { %9892 = vmatprep.subr.bf16.mxu0 %v11319_v24  ;;  %v11399_v41 = vcombine.high %v5829_v30, %v5833_v56  ;;  %v5821_v14 = vld [vmem:[#allocation6 + $0x1198] sm:$0xff]  ;;  %v11398_v13 = vcombine.low %v5829_v30, %v5833_v56 }
 0x5a8   : > { %9850 = vmatpush2.bf16.msra.mxu1 %v11190_v37  ;;  %v5825_v29 = vld [vmem:[#allocation6 + $0x11b8] sm:$0xff] }
 0x5a9   : > { %9851 = vmatprep.subr.bf16.mxu1 %v11183_v1  ;;  %v11391_v55 = vcombine.high %v5821_v14, %v5825_v29  ;;  %v5813_v51 = vld [vmem:[#allocation6 + $0x1158] sm:$0xff]  ;;  %v11390_v39 = vcombine.low %v5821_v14, %v5825_v29 }
 0x5aa   : > { %9893 = vmatpush2.bf16.msra.mxu0 %v11318_v63  ;;  %v5817_v11 = vld [vmem:[#allocation6 + $0x1178] sm:$0xff] }
 0x5ab   : > { %9894 = vmatprep.subr.bf16.mxu0 %v11311_v4  ;;  %v11383_v48 = vcombine.high %v5813_v51, %v5817_v11  ;;  %v5805_v20 = vld [vmem:[#allocation6 + $0x1118] sm:$0xff]  ;;  %v11382_v49 = vcombine.low %v5813_v51, %v5817_v11 }
 0x5ac   : > { %9852 = vmatpush2.bf16.msra.mxu1 %v11182_v47  ;;  %v5809_v45 = vld [vmem:[#allocation6 + $0x1138] sm:$0xff] }
 0x5ad   : > { %9853 = vmatprep.subr.bf16.mxu1 %v11175_v61  ;;  %v11375_v36 = vcombine.high %v5805_v20, %v5809_v45  ;;  %v5797_v60 = vld [vmem:[#allocation6 + $0x10d8] sm:$0xff]  ;;  %v11374_v38 = vcombine.low %v5805_v20, %v5809_v45 }
 0x5ae   : > { %9895 = vmatpush2.bf16.msra.mxu0 %v11310_v44  ;;  %v5801_v9 = vld [vmem:[#allocation6 + $0x10f8] sm:$0xff] }
 0x5af   : > { %9896 = vmatprep.subr.bf16.mxu0 %v11303_v43  ;;  %v5789_v28 = vld [vmem:[#allocation6 + $0x1098] sm:$0xff] }
 0x5b0   : > { %9854 = vmatpush2.bf16.msra.mxu1 %v11174_v35  ;;  %v5793_v24 = vld [vmem:[#allocation6 + $0x10b8] sm:$0xff] }
 0x5b1   : > { %9855 = vmatprep.subr.bf16.mxu1 %v11167_v16  ;;  %v5781_v37 = vld [vmem:[#allocation6 + $0x1058] sm:$0xff]  ;;  %v11358_v22 = vcombine.low %v5789_v28, %v5793_v24 }
 0x5b2   : > { %9897 = vmatpush2.bf16.msra.mxu0 %v11302_v23  ;;  %v5785_v42 = vld [vmem:[#allocation6 + $0x1078] sm:$0xff] }
 0x5b3   : > { %9898 = vmatprep.subr.bf16.mxu0 %v11295_v32  ;;  %v11351_v1 = vcombine.high %v5781_v37, %v5785_v42  ;;  %v5773_v63 = vld [vmem:[#allocation6 + $0x1018] sm:$0xff]  ;;  %v11350_v40 = vcombine.low %v5781_v37, %v5785_v42  ;;  %v9562_v32 = vpop.f32.mrf.mxu0 }
 0x5b4   : > { %9856 = vmatpush2.bf16.msra.mxu1 %v11166_v25  ;;  %v5777_v19 = vld [vmem:[#allocation6 + $0x1038] sm:$0xff] }
 0x5b5   : > { %9857 = vmatprep.subr.bf16.mxu1 %v11159_v17  ;;  %v11343_v4 = vcombine.high %v5773_v63, %v5777_v19  ;;  %v5893_v47 = vld [vmem:[#allocation6 + $0x13d8] sm:$0xff]  ;;  %v11342_v7 = vcombine.low %v5773_v63, %v5777_v19 }
 0x5b6   : > { %9899 = vmatpush2.bf16.msra.mxu0 %v11294_v34  ;;  %v5897_v10 = vld [vmem:[#allocation6 + $0x13f8] sm:$0xff]  ;;  %v9564_v34 = vpop.f32.mrf.mxu0 }
 0x5b7   : > { %9900 = vmatprep.subr.bf16.mxu0 %v11287_v50  ;;  %v11463_v61 = vcombine.high %v5893_v47, %v5897_v10  ;;  %v5885_v44 = vld [vmem:[#allocation6 + $0x1398] sm:$0xff]  ;;  %v11462_v58 = vcombine.low %v5893_v47, %v5897_v10 }
 0x5b8   : > { %9858 = vmatpush2.bf16.msra.mxu1 %v11158_v21  ;;  %v5889_v46 = vld [vmem:[#allocation6 + $0x13b8] sm:$0xff]  ;;  %v9566_v52 = vpop.f32.mrf.mxu0 }
 0x5b9   : > { %9859 = vmatprep.subr.bf16.mxu1 %v11151_v8  ;;  %v11455_v43 = vcombine.high %v5885_v44, %v5889_v46  ;;  %v5877_v35 = vld [vmem:[#allocation6 + $0x1358] sm:$0xff]  ;;  %v11454_v62 = vcombine.low %v5885_v44, %v5889_v46 }
 0x5ba   : > { %9901 = vmatpush2.bf16.msra.mxu0 %v11286_v54  ;;  %v5881_v57 = vld [vmem:[#allocation6 + $0x1378] sm:$0xff]  ;;  %v9568_v56 = vpop.f32.mrf.mxu0 }
 0x5bb   : > { %9902 = vmatprep.subr.bf16.mxu0 %v11279_v15  ;;  %v11447_v16 = vcombine.high %v5877_v35, %v5881_v57  ;;  %v5869_v23 = vld [vmem:[#allocation6 + $0x1318] sm:$0xff]  ;;  %v11446_v5 = vcombine.low %v5877_v35, %v5881_v57 }
 0x5bc   : > { %9860 = vmatpush2.bf16.msra.mxu1 %v11150_v12  ;;  %v5873_v3 = vld [vmem:[#allocation6 + $0x1338] sm:$0xff] }
 0x5bd   : > { %9915 = vmatprep.subr.bf16.mxu1 %v11399_v41  ;;  %v11439_v25 = vcombine.high %v5869_v23, %v5873_v3  ;;  %v5861_v53 = vld [vmem:[#allocation6 + $0x12d8] sm:$0xff]  ;;  %v11438_v17 = vcombine.low %v5869_v23, %v5873_v3  ;;  %v10007_v23 = vld [vmem:[%s13267_s7 + $0x10] sm:$0x7] }
 0x5be   : > { %9903 = vmatpush2.bf16.msra.mxu0 %v11278_v6  ;;  %v5865_v33 = vld [vmem:[#allocation6 + $0x12f8] sm:$0xff] }
 0x5bf   : > { %9862 = vmatmul.mubr.bf16.vlgmr.msra.gmra.mxu1 %v13244_v18  ;;  %v11367_v18 = vcombine.high %v5797_v60, %v5801_v9  ;;  %v11431_v26 = vcombine.high %v5861_v53, %v5865_v33  ;;  %v5853_v0 = vld [vmem:[#allocation6 + $0x1298] sm:$0xff]  ;;  %v11430_v21 = vcombine.low %v5861_v53, %v5865_v33  ;;  %v9605_v15 = vpop.f32.mrf.mxu1 }
 0x5c0   : > { %9916 = vmatpush1.bf16.msra.mxu1 %v11398_v13  ;;  %9947 = vmatprep.mubr.bf16.mxu1 %v13246_v59  ;;  %v11366_v59 = vcombine.low %v5797_v60, %v5801_v9  ;;  %v5857_v50 = vld [vmem:[#allocation6 + $0x12b8] sm:$0xff] }
 0x5c1   : > { %9905 = vmatmul.mubr.bf16.vlgmr.msra.gmra.mxu0 %v13162_v2  ;;  %9917 = vmatprep.subr.bf16.mxu1 %v11391_v55  ;;  %v11359_v2 = vcombine.high %v5789_v28, %v5793_v24  ;;  %v11423_v31 = vcombine.high %v5853_v0, %v5857_v50  ;;  %v5845_v8 = vld [vmem:[#allocation6 + $0x1258] sm:$0xff]  ;;  %v11422_v30 = vcombine.low %v5853_v0, %v5857_v50  ;;  %v9648_v14 = vpop.f32.mrf.mxu0  ;;  %v9607_v13 = vpop.f32.mrf.mxu1 }
 0x5c2   : > { %v5849_v54 = vld [vmem:[#allocation6 + $0x1278] sm:$0xff]  ;;  %v9608_v45 = vadd.f32 %v9607_v13, %v9564_v34 }
 0x5c3   : > { %v11415_v12 = vcombine.high %v5845_v8, %v5849_v54  ;;  %v5837_v41 = vld [vmem:[#allocation6 + $0x1218] sm:$0xff]  ;;  %v11414_v29 = vcombine.low %v5845_v8, %v5849_v54  ;;  %v9650_v51 = vpop.f32.mrf.mxu0 }
 0x5c4   : > { %9918 = vmatpush1.bf16.msra.mxu1 %v11390_v39  ;;  %v5841_v6 = vld [vmem:[#allocation6 + $0x1238] sm:$0xff]  ;;  %v9609_v39 = vpop.f32.mrf.mxu1 }
 0x5c5   : > { %9919 = vmatprep.subr.bf16.mxu1 %v11383_v48  ;;  %v11407_v55 = vcombine.high %v5837_v41, %v5841_v6  ;;  %v11406_v11 = vcombine.low %v5837_v41, %v5841_v6  ;;  %v9606_v48 = vadd.f32 %v9605_v15, %v9562_v32  ;;  %v9652_v20 = vpop.f32.mrf.mxu0  ;;  %v9610_v60 = vadd.f32 %v9609_v39, %v9566_v52  ;;  %v10005_v10 = vld [vmem:[%s13267_s7] sm:$0xfc] }
 0x5c7   : > { %v9654_v9 = vpop.f32.mrf.mxu0  ;;  %v9653_v37 = vadd.f32 %v9652_v20, %v9610_v60 }
 0x5c8   : > { %9920 = vmatpush1.bf16.msra.mxu1 %v11382_v49  ;;  %v9611_v49 = vpop.f32.mrf.mxu1 }
 0x5c9   : > { %9921 = vmatprep.subr.bf16.mxu1 %v11375_v36  ;;  %v9649_v36 = vadd.f32 %v9648_v14, %v9606_v48  ;;  %v9612_v28 = vadd.f32 %v9611_v49, %v9568_v56 }
 0x5cb   : > { %v9655_v19 = vadd.f32 %v9654_v9, %v9612_v28 }
 0x5cc   : > { %9922 = vmatpush1.bf16.msra.mxu1 %v11374_v38 }
 0x5cd   : > { %9923 = vmatprep.subr.bf16.mxu1 %v11367_v18  ;;  %v9651_v18 = vadd.f32 %v9650_v51, %v9608_v45 }
 0x5d0   : > { %9924 = vmatpush1.bf16.msra.mxu1 %v11366_v59 }
 0x5d1   : > { %9925 = vmatprep.subr.bf16.mxu1 %v11359_v2 }
 0x5d4   : > { %9926 = vmatpush1.bf16.msra.mxu1 %v11358_v22 }
 0x5d5   : > { %9927 = vmatprep.subr.bf16.mxu1 %v11351_v1 }
 0x5d8   : > { %9928 = vmatpush1.bf16.msra.mxu1 %v11350_v40 }
 0x5d9   : > { %9929 = vmatprep.subr.bf16.mxu1 %v11343_v4 }
 0x5dc   : > { %9930 = vmatpush1.bf16.msra.mxu1 %v11342_v7 }
 0x5dd   : > { %9931 = vmatprep.subr.bf16.mxu1 %v11463_v61 }
 0x5e0   : > { %9932 = vmatpush2.bf16.msra.mxu1 %v11462_v58 }
 0x5e1   : > { %9933 = vmatprep.subr.bf16.mxu1 %v11455_v43  ;;  %v10006_v43 = vld [vmem:[%s13267_s7 + $0x8] sm:$0xfc] }
 0x5e4   : > { %9934 = vmatpush2.bf16.msra.mxu1 %v11454_v62 }
 0x5e5   : > { %9935 = vmatprep.subr.bf16.mxu1 %v11447_v16 }
 0x5e8   : > { %9936 = vmatpush2.bf16.msra.mxu1 %v11446_v5 }
 0x5e9   : > { %9937 = vmatprep.subr.bf16.mxu1 %v11439_v25  ;;  %v10008_v25 = vld [vmem:[%s13267_s7 + $0x18] sm:$0x7] }
 0x5ec   : > { %9938 = vmatpush2.bf16.msra.mxu1 %v11438_v17 }
 0x5ed   : > { %9939 = vmatprep.subr.bf16.mxu1 %v11431_v26 }
 0x5f0   : > { %9940 = vmatpush2.bf16.msra.mxu1 %v11430_v21 }
 0x5f1   : > { %9941 = vmatprep.subr.bf16.mxu1 %v11423_v31 }
 0x5f4   : > { %9942 = vmatpush2.bf16.msra.mxu1 %v11422_v30 }
 0x5f5   : > { %9943 = vmatprep.subr.bf16.mxu1 %v11415_v12 }
 0x5f8   : > { %9944 = vmatpush2.bf16.msra.mxu1 %v11414_v29 }
 0x5f9   : > { %9945 = vmatprep.subr.bf16.mxu1 %v11407_v55 }
 0x5fc   : > { %9946 = vmatpush2.bf16.msra.mxu1 %v11406_v11 }
 0x5ff   : > { %v9691_v38 = vpop.f32.mrf.mxu1  ;;  %9948 = vmatmul.mubr.bf16.vlgmr.msra.gmra.mxu1 %v13236_v27 }
 0x600   : > { %v9692_v24 = vadd.f32 %v9691_v38, %v9649_v36 }
 0x601   : > { %v9734_v59 = vpop.f32.mrf.mxu0  ;;  %v9693_v2 = vpop.f32.mrf.mxu1 }
 0x602   : > { %v9735_v42 = vadd.f32 %v9734_v59, %v9692_v24  ;;  %v9694_v22 = vadd.f32 %v9693_v2, %v9651_v18 }
 0x603   : > { %v9736_v1 = vpop.f32.mrf.mxu0  ;;  %v9695_v63 = vpop.f32.mrf.mxu1 }
 0x604   : > { %v10014_v40 = vrot.slane %v9735_v42, 6  ;;  %v9737_v4 = vadd.f32 %v9736_v1, %v9694_v22  ;;  %v9696_v47 = vadd.f32 %v9695_v63, %v9653_v37 }
 0x605   : > { %v9738_v27 = vpop.f32.mrf.mxu0  ;;  %v9697_v7 = vpop.f32.mrf.mxu1 }
 0x606   : > { %v10024_v61 = vadd.f32 %v10014_v40, %v10005_v10  ;;  %v10015_v44 = vrot.slane %v9737_v4, 6  ;;  %v9739_v46 = vadd.f32 %v9738_v27, %v9696_v47  ;;  %v9698_v58 = vadd.f32 %v9697_v7, %v9655_v19 }
 0x607   : > { %v9740_v35 = vpop.f32.mrf.mxu0 }
 0x608   : > { %10028 = vst [vmem:[%s13267_s7] sm:$0xfc] %v10024_v61  ;;  %v10025_v57 = vadd.f32 %v10015_v44, %v10006_v43  ;;  %v10016_v62 = vrot.slane %v9739_v46, 6  ;;  %v9741_v16 = vadd.f32 %v9740_v35, %v9698_v58  ;;  %v9959_v43 = vld [vmem:[#allocation7 + $0x8] sm:$0xff] }
 0x60a   : > { %10029 = vst [vmem:[%s13267_s7 + $0x8] sm:$0xfc] %v10025_v57  ;;  %v10017_v3 = vsel %vm10013_vm2, %v10014_v40, %v10016_v62  ;;  %v10018_v5 = vrot.slane %v9741_v16, 6  ;;  %v9960_v16 = vld [vmem:[#allocation7 + $0x10] sm:$0xf] }
 0x60b   : > { %v10026_v32 = vadd.f32 %v10017_v3, %v10007_v23  ;;  %v9961_v3 = vld [vmem:[#allocation7 + $0x18] sm:$0xf] }
 0x60c   : > { %v10019_v53 = vsel %vm10013_vm2, %v10015_v44, %v10018_v5  ;;  %v9958_v44 = vld [vmem:[#allocation7] sm:$0xff] }
 0x60d   : > { %10030 = vst [vmem:[%s13267_s7 + $0x10] sm:$0x7] %v10026_v32  ;;  %v10027_v33 = vadd.f32 %v10019_v53, %v10008_v25 }
 0x60f   : > { %10031 = vst [vmem:[%s13267_s7 + $0x18] sm:$0x7] %v10027_v33  ;;  %v10032_v28 = vld [vmem:[%s13267_s7] sm:$0xf8] }
 0x611   : > { %v10033_v22 = vld [vmem:[%s13267_s7 + $0x8] sm:$0xf8] }
 0x614   : > { %v10034_v4 = vld [vmem:[%s13267_s7 + $0x10] sm:$0xf] }
 0x616   : > { %v10035_v7 = vld [vmem:[%s13267_s7 + $0x18] sm:$0xf] }
 0x63f   : > { %v9777_v17 = vpop.f32.mrf.mxu1 }
 0x641   : > { %v9820_v34 = vpop.f32.mrf.mxu0  ;;  %v9779_v26 = vpop.f32.mrf.mxu1 }
 0x642   : > { %v9821_v56 = vadd.f32 %v9820_v34, %v9777_v17 }
 0x643   : > { %v9822_v0 = vpop.f32.mrf.mxu0  ;;  %v9781_v50 = vpop.f32.mrf.mxu1 }
 0x644   : > { %v9823_v41 = vadd.f32 %v9822_v0, %v9779_v26 }
 0x645   : > { %v9824_v21 = vpop.f32.mrf.mxu0  ;;  %v9783_v52 = vpop.f32.mrf.mxu1 }
 0x646   : > { %v9825_v14 = vadd.f32 %v9824_v21, %v9781_v50 }
 0x647   : > { %v9826_v8 = vpop.f32.mrf.mxu0 }
 0x648   : > { %v9827_v51 = vadd.f32 %v9826_v8, %v9783_v52 }
 0x67f   : > { %v9863_v31 = vpop.f32.mrf.mxu1 }
 0x680   : > { %v9864_v6 = vadd.f32 %v9863_v31, %v9821_v56 }
 0x681   : > { %v9906_v54 = vpop.f32.mrf.mxu0  ;;  %v9865_v30 = vpop.f32.mrf.mxu1 }
 0x682   : > { %v9866_v29 = vadd.f32 %v9865_v30, %v9823_v41  ;;  %v9907_v11 = vadd.f32 %v9906_v54, %v9864_v6 }
 0x683   : > { %v9908_v15 = vpop.f32.mrf.mxu0  ;;  %v9867_v12 = vpop.f32.mrf.mxu1 }
 0x684   : > { %v9868_v39 = vadd.f32 %v9867_v12, %v9825_v14  ;;  %v9909_v20 = vadd.f32 %v9908_v15, %v9866_v29 }
 0x685   : > { %v9910_v13 = vpop.f32.mrf.mxu0  ;;  %v9869_v55 = vpop.f32.mrf.mxu1 }
 0x686   : > { %v9870_v45 = vadd.f32 %v9869_v55, %v9827_v51  ;;  %v9911_v9 = vadd.f32 %v9910_v13, %v9868_v39 }
 0x687   : > { %v9912_v36 = vpop.f32.mrf.mxu0 }
 0x688   : > { %v9913_v59 = vadd.f32 %v9912_v36, %v9870_v45 }
 0x6bf   : > { %v9949_v48 = vpop.f32.mrf.mxu1 }
 0x6c0   : > { %v9950_v49 = vadd.f32 %v9949_v48, %v9907_v11 }
 0x6c1   : > { %v9951_v60 = vpop.f32.mrf.mxu1 }
 0x6c2   : > { %v10041_v38 = vrot.slane %v9950_v49, 5  ;;  %v9952_v18 = vadd.f32 %v9951_v60, %v9909_v20 }
 0x6c3   : > { %v9953_v24 = vpop.f32.mrf.mxu1 }
 0x6c4   : > { %v10051_v2 = vadd.f32 %v10041_v38, %v10032_v28  ;;  %v10042_v37 = vrot.slane %v9952_v18, 5  ;;  %v9954_v42 = vadd.f32 %v9953_v24, %v9911_v9 }
 0x6c5   : > { %v9955_v1 = vpop.f32.mrf.mxu1 }
 0x6c6   : > { %10055 = vst [vmem:[%s13267_s7] sm:$0xf8] %v10051_v2  ;;  %v10052_v63 = vadd.f32 %v10042_v37, %v10033_v22  ;;  %v10043_v19 = vrot.slane %v9954_v42, 5  ;;  %v9956_v40 = vadd.f32 %v9955_v1, %v9913_v59 }
 0x6c8   : > { %10056 = vst [vmem:[%s13267_s7 + $0x8] sm:$0xf8] %v10052_v63  ;;  %v10044_v47 = vsel %vm10040_vm3, %v10041_v38, %v10043_v19  ;;  %v10045_v10 = vrot.slane %v9956_v40, 5 }
 0x6c9   : > { %v10053_v27 = vadd.f32 %v10044_v47, %v10034_v4 }
 0x6ca   : > { %v10046_v61 = vsel %vm10040_vm3, %v10042_v37, %v10045_v10 }
 0x6cb   : > { %10057 = vst [vmem:[%s13267_s7 + $0x10] sm:$0xf] %v10053_v27  ;;  %v10054_v46 = vadd.f32 %v10046_v61, %v10035_v7 }
 0x6cd   : > { %v10059_v58 = vld [vmem:[%s13267_s7] sm:$0xff]  ;;  %10058 = vst [vmem:[%s13267_s7 + $0x18] sm:$0xf] %v10054_v46 }
 0x6ce   : > { %v10063_v35 = vmul.f32 %v10059_v58, %v9958_v44 }
 0x6cf   : > { %v10060_v57 = vld [vmem:[%s13267_s7 + $0x8] sm:$0xff] }
 0x6d0   : > { %10067 = vst [vmem:[%s13267_s7] sm:$0xff] %v10063_v35  ;;  %v10064_v62 = vmul.f32 %v10060_v57, %v9959_v43 }
 0x6d2   : > { %10068 = vst [vmem:[%s13267_s7 + $0x8] sm:$0xff] %v10064_v62  ;;  %v10061_v23 = vld [vmem:[%s13267_s7 + $0x10] sm:$0xf] }
 0x6d3   : > { %v10065_v5 = vmul.f32 %v10061_v23, %v9960_v16 }
 0x6d4   : > { %v10062_v32 = vld [vmem:[%s13267_s7 + $0x18] sm:$0xf] }
 0x6d5   : > { %10069 = vst [vmem:[%s13267_s7 + $0x10] sm:$0xf] %v10065_v5  ;;  %v10066_v25 = vmul.f32 %v10062_v32, %v9961_v3 }
 0x6d7   : > { %10070 = vst [vmem:[%s13267_s7 + $0x18] sm:$0xf] %v10066_v25 }
 0x6d8 PF: > { %s18_s18 = sadd.s32 1, %s12646_s18  }
 0x6d9   : > { %p15_p3 = scmp.ge.s32.totalorder %s18_s18, 4  }
 0x6db   :  { %17 = sbr.rel (!%p15_p3) target bundleno = 3 (0x3), region = 87 }
 0x6e0   :  { %10092 = vsyncpa [#allocation3], 1 }
 0x6e1   :  { %10094 = vsyncpa [#allocation3 + $0x1], 1 }
 0x6e2   :  { %10095 = vsyncpa [#allocation5], 1 }
 0x6e3   :  { %10096 = vsyncpa [#allocation8], 1 }

</bundles_post_ra>
